<compile_context>
chip_gen: v5e
topology: v5e:2x2
jax: 0.10.0
libtpu: 0.0.40
codegen_flags: <defaults>
</compile_context>

<pallas_src>
import functools

import jax
import jax.numpy as jnp
from jax.experimental import pallas as pl
from jax.experimental.pallas import tpu as pltpu

EPS = 1e-5
LANE = 128
COMPUTE_DTYPE = jnp.bfloat16      # MXU-native input dtype on v5e/v6e/v7x
STORE_DTYPE = jnp.bfloat16        # conv / activation intermediates in HBM
VMEM_LIMIT = 48 * 1024 * 1024     # <= v7x 64 MiB physical VMEM; fine on v5e/v6e


def _round_up(x, m):
    return (x + m - 1) // m * m


# ----------------------------- Pallas kernels -------------------------------
def conv3x3_stats_kernel(xflat_ref, w_ref, conv_ref, psum_ref, psq_ref, acc_ref,
                         *, wp, w_valid, n_rows):
    """Fused 3x3 conv (9 shifted-slice tap matmuls) + BN partial stats.

    One grid step == one batch image (fully independent -> 'parallel' grid).

    xflat_ref: (L, Cin)        spatially zero-padded image, flattened to Hp*Wp rows
                               (padded up to L), bf16
    w_ref    : (9, Cin, Cpad)  conv taps (HWIO flattened, Cout zero-padded), bf16
    conv_ref : (n_rows, Cpad)  pre-BN conv rows; n_rows = H*Wp, i.e. includes the
                               (Wp - W) junk columns that are masked from the stats
                               and sliced off outside, bf16
    psum_ref : (1, Cpad)       partial per-channel sum over VALID rows, f32
    psq_ref  : (1, Cpad)       partial per-channel sum of squares, f32
    acc_ref  : (n_rows, Cpad)  f32 VMEM accumulator scratch
    """
    acc_ref[...] = jnp.zeros_like(acc_ref)
    # Tap (dy, dx) contributes xflat[r0 + dy*Wp + dx] @ w[dy, dx] to output row r0,
    # so each tap is a contiguous 2-D slice -> pure 2-D MXU matmul, no reshape.
    for dy in range(3):
        for dx in range(3):
            off = dy * wp + dx
            acc_ref[...] += jnp.dot(
                xflat_ref[off:off + n_rows, :], w_ref[dy * 3 + dx],
                preferred_element_type=jnp.float32)

    acc = acc_ref[...]
    conv_ref[...] = acc.astype(conv_ref.dtype)          # bf16 writeback (half bytes)

    # Mask out the (Wp - W) junk columns so BN statistics only see valid pixels.
    col = jax.lax.broadcasted_iota(jnp.int32, (n_rows, 1), 0) % wp
    valid = (col < w_valid).astype(jnp.float32)
    psum_ref[...] = jnp.sum(acc * valid, axis=0, keepdims=True)
    psq_ref[...] = jnp.sum(acc * acc * valid, axis=0, keepdims=True)


def bn_finalize_kernel(psum_ref, psq_ref, g_ref, b_ref, scale_ref, shift_ref, *, inv_m):
    """Fold per-image partial sums + gamma/beta into per-channel scale/shift.

    Batch-stat BN (training-mode forward, biased variance, eps=1e-5) matching
    nn.BatchNorm2d.  E[x^2]-mean^2 in f32 is adequate at these magnitudes; switch to
    a shifted / two-pass accumulation if activations ever have |mean| >> std.
    (Eval-mode parity would instead take scale/shift from running stats.)
    """
    s = jnp.sum(psum_ref[...], axis=0)        # (1, Cpad)
    sq = jnp.sum(psq_ref[...], axis=0)        # (1, Cpad)
    mean = s * inv_m
    var = jnp.maximum(sq * inv_m - mean * mean, 0.0)
    scale = g_ref[...] * jax.lax.rsqrt(var + EPS)
    scale_ref[...] = scale
    shift_ref[...] = b_ref[...] - mean * scale


def bn_apply_relu_kernel(conv_ref, scale_ref, shift_ref, o_ref):
    """y = relu(conv * scale + shift); FMA in f32 (v5e VPU has no bf16 path)."""
    x = conv_ref[...].astype(jnp.float32)
    y = jnp.maximum(x * scale_ref[...] + shift_ref[...], 0.0)
    o_ref[...] = y.astype(o_ref.dtype)


# ------------------------------- stage wrapper -------------------------------
def conv3x3_bn_relu(x_nhwc, w_oihw, gamma, beta):
    """conv3x3 (stride 1, pad 1, no bias) + BatchNorm(batch stats) + ReLU.

    x_nhwc: (N, H, W, Cin); returns (N, H, W, Cout) bf16.
    """
    n, h, width, cin = x_nhwc.shape
    cout = w_oihw.shape[0]
    cpad = _round_up(cout, LANE)               # lane-dense (unmasked vst) outputs
    wp = width + 2
    n_rows = h * wp                            # conv rows per image (incl. junk cols)
    l_rows = _round_up((h + 2) * wp + 2, 8)    # flattened padded rows (+2 keeps the
                                               # last tap's shifted slice in bounds)
    m_valid = n * h * width

    # --- thin XLA glue (once per stage): pad, flatten, cast, weight/param prep ---
    xpad = jnp.pad(x_nhwc, ((0, 0), (1, 1), (1, 1), (0, 0)))       # (N, Hp, Wp, Cin)
    xflat = xpad.reshape(n, (h + 2) * wp, cin)
    xflat = jnp.pad(xflat, ((0, 0), (0, l_rows - (h + 2) * wp), (0, 0)))
    xflat = xflat.astype(COMPUTE_DTYPE)

    w_taps = jnp.transpose(w_oihw, (2, 3, 1, 0)).reshape(9, cin, cout)   # HWIO taps
    w_taps = jnp.pad(w_taps, ((0, 0), (0, 0), (0, cpad - cout))).astype(COMPUTE_DTYPE)
    g = jnp.pad(gamma, (0, cpad - cout)).reshape(1, cpad).astype(jnp.float32)
    b = jnp.pad(beta, (0, cpad - cout)).reshape(1, cpad).astype(jnp.float32)

    # --- pass 1: fused-patch conv + per-image BN partial stats (parallel grid) ---
    conv_full, psum, psq = pl.pallas_call(
        functools.partial(conv3x3_stats_kernel, wp=wp, w_valid=width, n_rows=n_rows),
        out_shape=(
            jax.ShapeDtypeStruct((n, n_rows, cpad), STORE_DTYPE),
            jax.ShapeDtypeStruct((n, 1, cpad), jnp.float32),
            jax.ShapeDtypeStruct((n, 1, cpad), jnp.float32),
        ),
        grid_spec=pltpu.PrefetchScalarGridSpec(
            num_scalar_prefetch=0,
            grid=(n,),
            in_specs=[
                pl.BlockSpec((None, l_rows, cin), lambda i: (i, 0, 0)),
                # TODO(synk): pipeline_mode=pl.Buffered(1) -- grid-invariant weights.
                pl.BlockSpec((9, cin, cpad), lambda i: (0, 0, 0)),
            ],
            out_specs=[
                pl.BlockSpec((None, n_rows, cpad), lambda i: (i, 0, 0)),
                pl.BlockSpec((None, 1, cpad), lambda i: (i, 0, 0)),
                pl.BlockSpec((None, 1, cpad), lambda i: (i, 0, 0)),
            ],
            scratch_shapes=[pltpu.VMEM((n_rows, cpad), jnp.float32)],
        ),
        compiler_params=pltpu.CompilerParams(
            dimension_semantics=("parallel",),     # partial stats -> both v7x TCs
            vmem_limit_bytes=VMEM_LIMIT,
        ),
    )(xflat, w_taps)

    # --- finalize: partial sums + gamma/beta -> per-channel scale/shift ---
    scale, shift = pl.pallas_call(
        functools.partial(bn_finalize_kernel, inv_m=1.0 / m_valid),
        out_shape=(
            jax.ShapeDtypeStruct((1, cpad), jnp.float32),
            jax.ShapeDtypeStruct((1, cpad), jnp.float32),
        ),
        grid_spec=pltpu.PrefetchScalarGridSpec(
            num_scalar_prefetch=0,
            grid=(1,),
            in_specs=[
                pl.BlockSpec((n, 1, cpad), lambda i: (0, 0, 0)),
                pl.BlockSpec((n, 1, cpad), lambda i: (0, 0, 0)),
                pl.BlockSpec((1, cpad), lambda i: (0, 0)),
                pl.BlockSpec((1, cpad), lambda i: (0, 0)),
            ],
            out_specs=[
                pl.BlockSpec((1, cpad), lambda i: (0, 0)),
                pl.BlockSpec((1, cpad), lambda i: (0, 0)),
            ],
        ),
        compiler_params=pltpu.CompilerParams(
            dimension_semantics=("arbitrary",),
            vmem_limit_bytes=VMEM_LIMIT,
        ),
    )(psum, psq, g, b)

    # --- pass 2: y = relu(conv * scale + shift), lane-dense bf16 (parallel grid) ---
    y = pl.pallas_call(
        bn_apply_relu_kernel,
        out_shape=jax.ShapeDtypeStruct((n, n_rows, cpad), STORE_DTYPE),
        grid_spec=pltpu.PrefetchScalarGridSpec(
            num_scalar_prefetch=0,
            grid=(n,),
            in_specs=[
                pl.BlockSpec((None, n_rows, cpad), lambda i: (i, 0, 0)),
                pl.BlockSpec((1, cpad), lambda i: (0, 0)),
                pl.BlockSpec((1, cpad), lambda i: (0, 0)),
            ],
            out_specs=pl.BlockSpec((None, n_rows, cpad), lambda i: (i, 0, 0)),
        ),
        compiler_params=pltpu.CompilerParams(
            dimension_semantics=("parallel",),
            vmem_limit_bytes=VMEM_LIMIT,
        ),
    )(conv_full, scale, shift)

    # Drop junk columns + padded output channels (thin XLA glue).
    # TODO(synk): fuse this output directly into the next stage's tap matmuls so the
    #             intermediate never round-trips HBM a second time.
    return y.reshape(n, h, wp, cpad)[:, :, :width, :cout]


# ------------------------------- forward pass --------------------------------
@jax.jit
def basic_block_forward(x_nchw, w1, g1, b1, w2, g2, b2):
    """Forward of the spec's BasicBlock (conv-bn-relu x2, no residual), NCHW in/out."""
    x = jnp.transpose(x_nchw, (0, 2, 3, 1))              # NHWC once
    h1 = conv3x3_bn_relu(x, w1, g1, b1)                  # (N, H, W, Cout) bf16
    h2 = conv3x3_bn_relu(h1, w2, g2, b2)
    return jnp.transpose(h2, (0, 3, 1, 2)).astype(jnp.float32)


# ---------------------------- pure-JAX reference -----------------------------
def reference_forward(x_nchw, w1, g1, b1, w2, g2, b2):
    def conv(x, w):
        return jax.lax.conv_general_dilated(
            x, w, window_strides=(1, 1), padding=((1, 1), (1, 1)),
            dimension_numbers=("NCHW", "OIHW", "NCHW"))

    def bn_relu(x, g, b):
        mean = x.mean(axis=(0, 2, 3), keepdims=True)
        var = ((x - mean) ** 2).mean(axis=(0, 2, 3), keepdims=True)
        y = (x - mean) * jax.lax.rsqrt(var + EPS)
        y = y * g.reshape(1, -1, 1, 1) + b.reshape(1, -1, 1, 1)
        return jnp.maximum(y, 0.0)

    out = bn_relu(conv(x_nchw, w1), g1, b1)
    out = bn_relu(conv(out, w2), g2, b2)
    return out


# --------------------------------- main ---------------------------------------
if __name__ == "__main__":
    key = jax.random.PRNGKey(0)
    k_x, k_w1, k_w2, k_g1, k_b1, k_g2, k_b2 = jax.random.split(key, 7)

    N, C_IN, C_OUT, H, W = 2, 4, 8, 16, 16

    x = jax.random.normal(k_x, (N, C_IN, H, W), dtype=jnp.float32)

    # Deterministic synthetic parameters (shapes from BasicBlock.__init__).
    w1 = jax.random.normal(k_w1, (C_OUT, C_IN, 3, 3), dtype=jnp.float32) * 0.1
    w2 = jax.random.normal(k_w2, (C_OUT, C_OUT, 3, 3), dtype=jnp.float32) * 0.1
    g1 = 1.0 + 0.1 * jax.random.normal(k_g1, (C_OUT,), dtype=jnp.float32)
    b1 = 0.1 * jax.random.normal(k_b1, (C_OUT,), dtype=jnp.float32)
    g2 = 1.0 + 0.1 * jax.random.normal(k_g2, (C_OUT,), dtype=jnp.float32)
    b2 = 0.1 * jax.random.normal(k_b2, (C_OUT,), dtype=jnp.float32)

    out = jax.block_until_ready(basic_block_forward(x, w1, g1, b1, w2, g2, b2))
    ref = reference_forward(x, w1, g1, b1, w2, g2, b2)

    assert out.shape == (N, C_OUT, H, W), out.shape
    # bf16 MXU inputs + bf16 intermediates over two normalized stages: tolerance set
    # for bf16 (~1% relative).  A structural bug (wrong tap offset, bad stats, bad
    # masking) produces O(1) errors and still fails these checks.
    max_err = float(jnp.max(jnp.abs(out - ref)))
    rel_rms = float(jnp.sqrt(jnp.mean((out - ref) ** 2) /
                             (jnp.mean(ref ** 2) + 1e-12)))
    assert max_err < 0.15, max_err
    assert rel_rms < 0.03, rel_rms

    print("KERNEL_OK")
</pallas_src>

<mosaic_0001>
module attributes {stable_mosaic.version = 11 : i64} {
  func.func @bn_finalize_kernel(%arg0: i32, %arg1: memref<2x1x128xf32, #tpu.memory_space<vmem>>, %arg2: memref<2x1x128xf32, #tpu.memory_space<vmem>>, %arg3: memref<1x128xf32, #tpu.memory_space<vmem>>, %arg4: memref<1x128xf32, #tpu.memory_space<vmem>>, %arg5: memref<1x128xf32, #tpu.memory_space<vmem>>, %arg6: memref<1x128xf32, #tpu.memory_space<vmem>>) attributes {dimension_semantics = [#tpu.dimension_semantics<arbitrary>], iteration_bounds = array<i64: 1>, scalar_prefetch = 0 : i64, scratch_operands = 0 : i64, tpu.core_type = #tpu.core_type<tc>, window_params = [{pipeline_mode = #tpu.pipeline_mode<synchronous>, transform_indices = @transform_0, window_bounds = array<i64: 2, 1, 128>}, {pipeline_mode = #tpu.pipeline_mode<synchronous>, transform_indices = @transform_1, window_bounds = array<i64: 2, 1, 128>}, {pipeline_mode = #tpu.pipeline_mode<synchronous>, transform_indices = @transform_2, window_bounds = array<i64: 1, 128>}, {pipeline_mode = #tpu.pipeline_mode<synchronous>, transform_indices = @transform_3, window_bounds = array<i64: 1, 128>}, {pipeline_mode = #tpu.pipeline_mode<synchronous>, transform_indices = @transform_4, window_bounds = array<i64: 1, 128>}, {pipeline_mode = #tpu.pipeline_mode<synchronous>, transform_indices = @transform_5, window_bounds = array<i64: 1, 128>}]} {
    %c0 = arith.constant 0 : index
    %c0_0 = arith.constant 0 : index
    %c0_1 = arith.constant 0 : index
    %0 = vector.load %arg1[%c0, %c0_0, %c0_1] : memref<2x1x128xf32, #tpu.memory_space<vmem>>, vector<2x1x128xf32>
    %cst = arith.constant dense<0.000000e+00> : vector<1x128xf32>
    %1 = vector.multi_reduction <add>, %0, %cst [0] : vector<2x1x128xf32> to vector<1x128xf32>
    %c0_2 = arith.constant 0 : index
    %c0_3 = arith.constant 0 : index
    %c0_4 = arith.constant 0 : index
    %2 = vector.load %arg2[%c0_2, %c0_3, %c0_4] : memref<2x1x128xf32, #tpu.memory_space<vmem>>, vector<2x1x128xf32>
    %cst_5 = arith.constant dense<0.000000e+00> : vector<1x128xf32>
    %3 = vector.multi_reduction <add>, %2, %cst_5 [0] : vector<2x1x128xf32> to vector<1x128xf32>
    %cst_6 = arith.constant 0.001953125 : f32
    %4 = vector.broadcast %cst_6 : f32 to vector<1x128xf32>
    %5 = arith.mulf %1, %4 : vector<1x128xf32>
    %cst_7 = arith.constant 0.001953125 : f32
    %6 = vector.broadcast %cst_7 : f32 to vector<1x128xf32>
    %7 = arith.mulf %3, %6 : vector<1x128xf32>
    %8 = arith.mulf %5, %5 : vector<1x128xf32>
    %9 = arith.subf %7, %8 : vector<1x128xf32>
    %cst_8 = arith.constant 0.000000e+00 : f32
    %10 = vector.broadcast %cst_8 : f32 to vector<1x128xf32>
    %11 = arith.maximumf %9, %10 : vector<1x128xf32>
    %c0_9 = arith.constant 0 : index
    %c0_10 = arith.constant 0 : index
    %12 = vector.load %arg3[%c0_9, %c0_10] : memref<1x128xf32, #tpu.memory_space<vmem>>, vector<1x128xf32>
    %cst_11 = arith.constant 9.99999974E-6 : f32
    %13 = vector.broadcast %cst_11 : f32 to vector<1x128xf32>
    %14 = arith.addf %11, %13 : vector<1x128xf32>
    %15 = math.rsqrt %14 : vector<1x128xf32>
    %16 = arith.mulf %12, %15 : vector<1x128xf32>
    %c0_12 = arith.constant 0 : index
    %c0_13 = arith.constant 0 : index
    %17 = vector.load %arg5[%c0_12, %c0_13] : memref<1x128xf32, #tpu.memory_space<vmem>>, vector<1x128xf32>
    tpu.vector_store %arg5[%c0_12, %c0_13], %16 {strides = array<i32>} : memref<1x128xf32, #tpu.memory_space<vmem>>, vector<1x128xf32>,
    %c0_14 = arith.constant 0 : index
    %c0_15 = arith.constant 0 : index
    %18 = vector.load %arg4[%c0_14, %c0_15] : memref<1x128xf32, #tpu.memory_space<vmem>>, vector<1x128xf32>
    %19 = arith.mulf %5, %16 : vector<1x128xf32>
    %20 = arith.subf %18, %19 : vector<1x128xf32>
    %c0_16 = arith.constant 0 : index
    %c0_17 = arith.constant 0 : index
    %21 = vector.load %arg6[%c0_16, %c0_17] : memref<1x128xf32, #tpu.memory_space<vmem>>, vector<1x128xf32>
    tpu.vector_store %arg6[%c0_16, %c0_17], %20 {strides = array<i32>} : memref<1x128xf32, #tpu.memory_space<vmem>>, vector<1x128xf32>,
    return
  }
  func.func @transform_0(%arg0: i32) -> (i32, i32, i32) {
    %c0_i32 = arith.constant 0 : i32
    %c0_i32_0 = arith.constant 0 : i32
    %c0_i32_1 = arith.constant 0 : i32
    %c0_i32_2 = arith.constant 0 : i32
    return %c0_i32, %c0_i32_0, %c0_i32_1 : i32, i32, i32
  }
  func.func @transform_1(%arg0: i32) -> (i32, i32, i32) {
    %c0_i32 = arith.constant 0 : i32
    %c0_i32_0 = arith.constant 0 : i32
    %c0_i32_1 = arith.constant 0 : i32
    %c0_i32_2 = arith.constant 0 : i32
    return %c0_i32, %c0_i32_0, %c0_i32_1 : i32, i32, i32
  }
  func.func @transform_2(%arg0: i32) -> (i32, i32) {
    %c0_i32 = arith.constant 0 : i32
    %c0_i32_0 = arith.constant 0 : i32
    %c0_i32_1 = arith.constant 0 : i32
    return %c0_i32, %c0_i32_0 : i32, i32
  }
  func.func @transform_3(%arg0: i32) -> (i32, i32) {
    %c0_i32 = arith.constant 0 : i32
    %c0_i32_0 = arith.constant 0 : i32
    %c0_i32_1 = arith.constant 0 : i32
    return %c0_i32, %c0_i32_0 : i32, i32
  }
  func.func @transform_4(%arg0: i32) -> (i32, i32) {
    %c0_i32 = arith.constant 0 : i32
    %c0_i32_0 = arith.constant 0 : i32
    %c0_i32_1 = arith.constant 0 : i32
    return %c0_i32, %c0_i32_0 : i32, i32
  }
  func.func @transform_5(%arg0: i32) -> (i32, i32) {
    %c0_i32 = arith.constant 0 : i32
    %c0_i32_0 = arith.constant 0 : i32
    %c0_i32_1 = arith.constant 0 : i32
    return %c0_i32, %c0_i32_0 : i32, i32
  }
}

module attributes {stable_mosaic.version = 11 : i64} {
  func.func @conv3x3_stats_kernel(%arg0: i32, %arg1: memref<1x328x4xbf16, #tpu.memory_space<vmem>>, %arg2: memref<9x4x128xbf16, #tpu.memory_space<vmem>>, %arg3: memref<1x288x128xbf16, #tpu.memory_space<vmem>>, %arg4: memref<1x1x128xf32, #tpu.memory_space<vmem>>, %arg5: memref<1x1x128xf32, #tpu.memory_space<vmem>>, %arg6: memref<288x128xf32, #tpu.memory_space<vmem>>) attributes {dimension_semantics = [#tpu.dimension_semantics<parallel>], iteration_bounds = array<i64: 2>, scalar_prefetch = 0 : i64, scratch_operands = 1 : i64, tpu.core_type = #tpu.core_type<tc>, window_params = [{transform_indices = @transform_0, window_bounds = array<i64: 1, 328, 4>}, {pipeline_mode = #tpu.pipeline_mode<synchronous>, transform_indices = @transform_1, window_bounds = array<i64: 9, 4, 128>}, {transform_indices = @transform_2, window_bounds = array<i64: 1, 288, 128>}, {transform_indices = @transform_3, window_bounds = array<i64: 1, 1, 128>}, {transform_indices = @transform_4, window_bounds = array<i64: 1, 1, 128>}]} {
    %cst = arith.constant 0.000000e+00 : f32
    %0 = vector.broadcast %cst : f32 to vector<288x128xf32>
    %c0 = arith.constant 0 : index
    %c0_0 = arith.constant 0 : index
    %1 = vector.load %arg6[%c0, %c0_0] : memref<288x128xf32, #tpu.memory_space<vmem>>, vector<288x128xf32>
    tpu.vector_store %arg6[%c0, %c0_0], %0 {strides = array<i32>} : memref<288x128xf32, #tpu.memory_space<vmem>>, vector<288x128xf32>,
    %c0_1 = arith.constant 0 : index
    %c0_2 = arith.constant 0 : index
    %2 = vector.load %arg6[%c0_1, %c0_2] : memref<288x128xf32, #tpu.memory_space<vmem>>, vector<288x128xf32>
    %c0_3 = arith.constant 0 : index
    %c0_4 = arith.constant 0 : index
    %c0_5 = arith.constant 0 : index
    %3 = vector.load %arg1[%c0_3, %c0_4, %c0_5] : memref<1x328x4xbf16, #tpu.memory_space<vmem>>, vector<1x288x4xbf16>
    %4 = vector.shape_cast %3 : vector<1x288x4xbf16> to vector<288x4xbf16>
    %c0_6 = arith.constant 0 : index
    %c0_7 = arith.constant 0 : index
    %c0_8 = arith.constant 0 : index
    %5 = vector.load %arg2[%c0_6, %c0_7, %c0_8] : memref<9x4x128xbf16, #tpu.memory_space<vmem>>, vector<1x4x128xbf16>
    %6 = vector.shape_cast %5 : vector<1x4x128xbf16> to vector<4x128xbf16>
    %cst_9 = arith.constant dense<0.000000e+00> : vector<288x128xf32>
    %7 = tpu.matmul %4, %6, %cst_9 {dimension_numbers = #tpu.dot_dimension_numbers<[1], [0], [0], [1], [0, 0, 1, 1], [], []>} : vector<288x4xbf16>, vector<4x128xbf16>, vector<288x128xf32> -> vector<288x128xf32>
    %8 = arith.addf %2, %7 : vector<288x128xf32>
    %c0_10 = arith.constant 0 : index
    %c0_11 = arith.constant 0 : index
    %9 = vector.load %arg6[%c0_10, %c0_11] : memref<288x128xf32, #tpu.memory_space<vmem>>, vector<288x128xf32>
    tpu.vector_store %arg6[%c0_10, %c0_11], %8 {strides = array<i32>} : memref<288x128xf32, #tpu.memory_space<vmem>>, vector<288x128xf32>,
    %c0_12 = arith.constant 0 : index
    %c0_13 = arith.constant 0 : index
    %10 = vector.load %arg6[%c0_12, %c0_13] : memref<288x128xf32, #tpu.memory_space<vmem>>, vector<288x128xf32>
    %c0_14 = arith.constant 0 : index
    %c1 = arith.constant 1 : index
    %c0_15 = arith.constant 0 : index
    %11 = vector.load %arg1[%c0_14, %c1, %c0_15] : memref<1x328x4xbf16, #tpu.memory_space<vmem>>, vector<1x288x4xbf16>
    %12 = vector.shape_cast %11 : vector<1x288x4xbf16> to vector<288x4xbf16>
    %c1_16 = arith.constant 1 : index
    %c0_17 = arith.constant 0 : index
    %c0_18 = arith.constant 0 : index
    %13 = vector.load %arg2[%c1_16, %c0_17, %c0_18] : memref<9x4x128xbf16, #tpu.memory_space<vmem>>, vector<1x4x128xbf16>
    %14 = vector.shape_cast %13 : vector<1x4x128xbf16> to vector<4x128xbf16>
    %cst_19 = arith.constant dense<0.000000e+00> : vector<288x128xf32>
    %15 = tpu.matmul %12, %14, %cst_19 {dimension_numbers = #tpu.dot_dimension_numbers<[1], [0], [0], [1], [0, 0, 1, 1], [], []>} : vector<288x4xbf16>, vector<4x128xbf16>, vector<288x128xf32> -> vector<288x128xf32>
    %16 = arith.addf %10, %15 : vector<288x128xf32>
    %c0_20 = arith.constant 0 : index
    %c0_21 = arith.constant 0 : index
    %17 = vector.load %arg6[%c0_20, %c0_21] : memref<288x128xf32, #tpu.memory_space<vmem>>, vector<288x128xf32>
    tpu.vector_store %arg6[%c0_20, %c0_21], %16 {strides = array<i32>} : memref<288x128xf32, #tpu.memory_space<vmem>>, vector<288x128xf32>,
    %c0_22 = arith.constant 0 : index
    %c0_23 = arith.constant 0 : index
    %18 = vector.load %arg6[%c0_22, %c0_23] : memref<288x128xf32, #tpu.memory_space<vmem>>, vector<288x128xf32>
    %c0_24 = arith.constant 0 : index
    %c2 = arith.constant 2 : index
    %c0_25 = arith.constant 0 : index
    %19 = vector.load %arg1[%c0_24, %c2, %c0_25] : memref<1x328x4xbf16, #tpu.memory_space<vmem>>, vector<1x288x4xbf16>
    %20 = vector.shape_cast %19 : vector<1x288x4xbf16> to vector<288x4xbf16>
    %c2_26 = arith.constant 2 : index
    %c0_27 = arith.constant 0 : index
    %c0_28 = arith.constant 0 : index
    %21 = vector.load %arg2[%c2_26, %c0_27, %c0_28] : memref<9x4x128xbf16, #tpu.memory_space<vmem>>, vector<1x4x128xbf16>
    %22 = vector.shape_cast %21 : vector<1x4x128xbf16> to vector<4x128xbf16>
    %cst_29 = arith.constant dense<0.000000e+00> : vector<288x128xf32>
    %23 = tpu.matmul %20, %22, %cst_29 {dimension_numbers = #tpu.dot_dimension_numbers<[1], [0], [0], [1], [0, 0, 1, 1], [], []>} : vector<288x4xbf16>, vector<4x128xbf16>, vector<288x128xf32> -> vector<288x128xf32>
    %24 = arith.addf %18, %23 : vector<288x128xf32>
    %c0_30 = arith.constant 0 : index
    %c0_31 = arith.constant 0 : index
    %25 = vector.load %arg6[%c0_30, %c0_31] : memref<288x128xf32, #tpu.memory_space<vmem>>, vector<288x128xf32>
    tpu.vector_store %arg6[%c0_30, %c0_31], %24 {strides = array<i32>} : memref<288x128xf32, #tpu.memory_space<vmem>>, vector<288x128xf32>,
    %c0_32 = arith.constant 0 : index
    %c0_33 = arith.constant 0 : index
    %26 = vector.load %arg6[%c0_32, %c0_33] : memref<288x128xf32, #tpu.memory_space<vmem>>, vector<288x128xf32>
    %c0_34 = arith.constant 0 : index
    %c18 = arith.constant 18 : index
    %c0_35 = arith.constant 0 : index
    %27 = vector.load %arg1[%c0_34, %c18, %c0_35] : memref<1x328x4xbf16, #tpu.memory_space<vmem>>, vector<1x288x4xbf16>
    %28 = vector.shape_cast %27 : vector<1x288x4xbf16> to vector<288x4xbf16>
    %c3 = arith.constant 3 : index
    %c0_36 = arith.constant 0 : index
    %c0_37 = arith.constant 0 : index
    %29 = vector.load %arg2[%c3, %c0_36, %c0_37] : memref<9x4x128xbf16, #tpu.memory_space<vmem>>, vector<1x4x128xbf16>
    %30 = vector.shape_cast %29 : vector<1x4x128xbf16> to vector<4x128xbf16>
    %cst_38 = arith.constant dense<0.000000e+00> : vector<288x128xf32>
    %31 = tpu.matmul %28, %30, %cst_38 {dimension_numbers = #tpu.dot_dimension_numbers<[1], [0], [0], [1], [0, 0, 1, 1], [], []>} : vector<288x4xbf16>, vector<4x128xbf16>, vector<288x128xf32> -> vector<288x128xf32>
    %32 = arith.addf %26, %31 : vector<288x128xf32>
    %c0_39 = arith.constant 0 : index
    %c0_40 = arith.constant 0 : index
    %33 = vector.load %arg6[%c0_39, %c0_40] : memref<288x128xf32, #tpu.memory_space<vmem>>, vector<288x128xf32>
    tpu.vector_store %arg6[%c0_39, %c0_40], %32 {strides = array<i32>} : memref<288x128xf32, #tpu.memory_space<vmem>>, vector<288x128xf32>,
    %c0_41 = arith.constant 0 : index
    %c0_42 = arith.constant 0 : index
    %34 = vector.load %arg6[%c0_41, %c0_42] : memref<288x128xf32, #tpu.memory_space<vmem>>, vector<288x128xf32>
    %c0_43 = arith.constant 0 : index
    %c19 = arith.constant 19 : index
    %c0_44 = arith.constant 0 : index
    %35 = vector.load %arg1[%c0_43, %c19, %c0_44] : memref<1x328x4xbf16, #tpu.memory_space<vmem>>, vector<1x288x4xbf16>
    %36 = vector.shape_cast %35 : vector<1x288x4xbf16> to vector<288x4xbf16>
    %c4 = arith.constant 4 : index
    %c0_45 = arith.constant 0 : index
    %c0_46 = arith.constant 0 : index
    %37 = vector.load %arg2[%c4, %c0_45, %c0_46] : memref<9x4x128xbf16, #tpu.memory_space<vmem>>, vector<1x4x128xbf16>
    %38 = vector.shape_cast %37 : vector<1x4x128xbf16> to vector<4x128xbf16>
    %cst_47 = arith.constant dense<0.000000e+00> : vector<288x128xf32>
    %39 = tpu.matmul %36, %38, %cst_47 {dimension_numbers = #tpu.dot_dimension_numbers<[1], [0], [0], [1], [0, 0, 1, 1], [], []>} : vector<288x4xbf16>, vector<4x128xbf16>, vector<288x128xf32> -> vector<288x128xf32>
    %40 = arith.addf %34, %39 : vector<288x128xf32>
    %c0_48 = arith.constant 0 : index
    %c0_49 = arith.constant 0 : index
    %41 = vector.load %arg6[%c0_48, %c0_49] : memref<288x128xf32, #tpu.memory_space<vmem>>, vector<288x128xf32>
    tpu.vector_store %arg6[%c0_48, %c0_49], %40 {strides = array<i32>} : memref<288x128xf32, #tpu.memory_space<vmem>>, vector<288x128xf32>,
    %c0_50 = arith.constant 0 : index
    %c0_51 = arith.constant 0 : index
    %42 = vector.load %arg6[%c0_50, %c0_51] : memref<288x128xf32, #tpu.memory_space<vmem>>, vector<288x128xf32>
    %c0_52 = arith.constant 0 : index
    %c20 = arith.constant 20 : index
    %c0_53 = arith.constant 0 : index
    %43 = vector.load %arg1[%c0_52, %c20, %c0_53] : memref<1x328x4xbf16, #tpu.memory_space<vmem>>, vector<1x288x4xbf16>
    %44 = vector.shape_cast %43 : vector<1x288x4xbf16> to vector<288x4xbf16>
    %c5 = arith.constant 5 : index
    %c0_54 = arith.constant 0 : index
    %c0_55 = arith.constant 0 : index
    %45 = vector.load %arg2[%c5, %c0_54, %c0_55] : memref<9x4x128xbf16, #tpu.memory_space<vmem>>, vector<1x4x128xbf16>
    %46 = vector.shape_cast %45 : vector<1x4x128xbf16> to vector<4x128xbf16>
    %cst_56 = arith.constant dense<0.000000e+00> : vector<288x128xf32>
    %47 = tpu.matmul %44, %46, %cst_56 {dimension_numbers = #tpu.dot_dimension_numbers<[1], [0], [0], [1], [0, 0, 1, 1], [], []>} : vector<288x4xbf16>, vector<4x128xbf16>, vector<288x128xf32> -> vector<288x128xf32>
    %48 = arith.addf %42, %47 : vector<288x128xf32>
    %c0_57 = arith.constant 0 : index
    %c0_58 = arith.constant 0 : index
    %49 = vector.load %arg6[%c0_57, %c0_58] : memref<288x128xf32, #tpu.memory_space<vmem>>, vector<288x128xf32>
    tpu.vector_store %arg6[%c0_57, %c0_58], %48 {strides = array<i32>} : memref<288x128xf32, #tpu.memory_space<vmem>>, vector<288x128xf32>,
    %c0_59 = arith.constant 0 : index
    %c0_60 = arith.constant 0 : index
    %50 = vector.load %arg6[%c0_59, %c0_60] : memref<288x128xf32, #tpu.memory_space<vmem>>, vector<288x128xf32>
    %c0_61 = arith.constant 0 : index
    %c36 = arith.constant 36 : index
    %c0_62 = arith.constant 0 : index
    %51 = vector.load %arg1[%c0_61, %c36, %c0_62] : memref<1x328x4xbf16, #tpu.memory_space<vmem>>, vector<1x288x4xbf16>
    %52 = vector.shape_cast %51 : vector<1x288x4xbf16> to vector<288x4xbf16>
    %c6 = arith.constant 6 : index
    %c0_63 = arith.constant 0 : index
    %c0_64 = arith.constant 0 : index
    %53 = vector.load %arg2[%c6, %c0_63, %c0_64] : memref<9x4x128xbf16, #tpu.memory_space<vmem>>, vector<1x4x128xbf16>
    %54 = vector.shape_cast %53 : vector<1x4x128xbf16> to vector<4x128xbf16>
    %cst_65 = arith.constant dense<0.000000e+00> : vector<288x128xf32>
    %55 = tpu.matmul %52, %54, %cst_65 {dimension_numbers = #tpu.dot_dimension_numbers<[1], [0], [0], [1], [0, 0, 1, 1], [], []>} : vector<288x4xbf16>, vector<4x128xbf16>, vector<288x128xf32> -> vector<288x128xf32>
    %56 = arith.addf %50, %55 : vector<288x128xf32>
    %c0_66 = arith.constant 0 : index
    %c0_67 = arith.constant 0 : index
    %57 = vector.load %arg6[%c0_66, %c0_67] : memref<288x128xf32, #tpu.memory_space<vmem>>, vector<288x128xf32>
    tpu.vector_store %arg6[%c0_66, %c0_67], %56 {strides = array<i32>} : memref<288x128xf32, #tpu.memory_space<vmem>>, vector<288x128xf32>,
    %c0_68 = arith.constant 0 : index
    %c0_69 = arith.constant 0 : index
    %58 = vector.load %arg6[%c0_68, %c0_69] : memref<288x128xf32, #tpu.memory_space<vmem>>, vector<288x128xf32>
    %c0_70 = arith.constant 0 : index
    %c37 = arith.constant 37 : index
    %c0_71 = arith.constant 0 : index
    %59 = vector.load %arg1[%c0_70, %c37, %c0_71] : memref<1x328x4xbf16, #tpu.memory_space<vmem>>, vector<1x288x4xbf16>
    %60 = vector.shape_cast %59 : vector<1x288x4xbf16> to vector<288x4xbf16>
    %c7 = arith.constant 7 : index
    %c0_72 = arith.constant 0 : index
    %c0_73 = arith.constant 0 : index
    %61 = vector.load %arg2[%c7, %c0_72, %c0_73] : memref<9x4x128xbf16, #tpu.memory_space<vmem>>, vector<1x4x128xbf16>
    %62 = vector.shape_cast %61 : vector<1x4x128xbf16> to vector<4x128xbf16>
    %cst_74 = arith.constant dense<0.000000e+00> : vector<288x128xf32>
    %63 = tpu.matmul %60, %62, %cst_74 {dimension_numbers = #tpu.dot_dimension_numbers<[1], [0], [0], [1], [0, 0, 1, 1], [], []>} : vector<288x4xbf16>, vector<4x128xbf16>, vector<288x128xf32> -> vector<288x128xf32>
    %64 = arith.addf %58, %63 : vector<288x128xf32>
    %c0_75 = arith.constant 0 : index
    %c0_76 = arith.constant 0 : index
    %65 = vector.load %arg6[%c0_75, %c0_76] : memref<288x128xf32, #tpu.memory_space<vmem>>, vector<288x128xf32>
    tpu.vector_store %arg6[%c0_75, %c0_76], %64 {strides = array<i32>} : memref<288x128xf32, #tpu.memory_space<vmem>>, vector<288x128xf32>,
    %c0_77 = arith.constant 0 : index
    %c0_78 = arith.constant 0 : index
    %66 = vector.load %arg6[%c0_77, %c0_78] : memref<288x128xf32, #tpu.memory_space<vmem>>, vector<288x128xf32>
    %c0_79 = arith.constant 0 : index
    %c38 = arith.constant 38 : index
    %c0_80 = arith.constant 0 : index
    %67 = vector.load %arg1[%c0_79, %c38, %c0_80] : memref<1x328x4xbf16, #tpu.memory_space<vmem>>, vector<1x288x4xbf16>
    %68 = vector.shape_cast %67 : vector<1x288x4xbf16> to vector<288x4xbf16>
    %c8 = arith.constant 8 : index
    %c0_81 = arith.constant 0 : index
    %c0_82 = arith.constant 0 : index
    %69 = vector.load %arg2[%c8, %c0_81, %c0_82] : memref<9x4x128xbf16, #tpu.memory_space<vmem>>, vector<1x4x128xbf16>
    %70 = vector.shape_cast %69 : vector<1x4x128xbf16> to vector<4x128xbf16>
    %cst_83 = arith.constant dense<0.000000e+00> : vector<288x128xf32>
    %71 = tpu.matmul %68, %70, %cst_83 {dimension_numbers = #tpu.dot_dimension_numbers<[1], [0], [0], [1], [0, 0, 1, 1], [], []>} : vector<288x4xbf16>, vector<4x128xbf16>, vector<288x128xf32> -> vector<288x128xf32>
    %72 = arith.addf %66, %71 : vector<288x128xf32>
    %c0_84 = arith.constant 0 : index
    %c0_85 = arith.constant 0 : index
    %73 = vector.load %arg6[%c0_84, %c0_85] : memref<288x128xf32, #tpu.memory_space<vmem>>, vector<288x128xf32>
    tpu.vector_store %arg6[%c0_84, %c0_85], %72 {strides = array<i32>} : memref<288x128xf32, #tpu.memory_space<vmem>>, vector<288x128xf32>,
    %c0_86 = arith.constant 0 : index
    %c0_87 = arith.constant 0 : index
    %74 = vector.load %arg6[%c0_86, %c0_87] : memref<288x128xf32, #tpu.memory_space<vmem>>, vector<288x128xf32>
    %75 = arith.truncf %74 : vector<288x128xf32> to vector<288x128xbf16>
    %c0_88 = arith.constant 0 : index
    %c0_89 = arith.constant 0 : index
    %c0_90 = arith.constant 0 : index
    %76 = vector.load %arg3[%c0_88, %c0_89, %c0_90] : memref<1x288x128xbf16, #tpu.memory_space<vmem>>, vector<1x288x128xbf16>
    %77 = vector.shape_cast %76 : vector<1x288x128xbf16> to vector<288x128xbf16>
    %78 = vector.shape_cast %75 : vector<288x128xbf16> to vector<1x288x128xbf16>
    tpu.vector_store %arg3[%c0_88, %c0_89, %c0_90], %78 {strides = array<i32>} : memref<1x288x128xbf16, #tpu.memory_space<vmem>>, vector<1x288x128xbf16>,
    %79 = tpu.iota {dimensions = array<i32: 0>} : vector<288x1xi32>
    %c18_i32 = arith.constant 18 : i32
    %c0_i32 = arith.constant 0 : i32
    %80 = arith.cmpi eq, %c18_i32, %c0_i32 : i32
    %c1_i32 = arith.constant 1 : i32
    %81 = arith.select %80, %c1_i32, %c18_i32 : i32
    %82 = vector.broadcast %81 : i32 to vector<288x1xi32>
    %83 = arith.remsi %79, %82 : vector<288x1xi32>
    %c0_i32_91 = arith.constant 0 : i32
    %84 = vector.broadcast %c0_i32_91 : i32 to vector<288x1xi32>
    %85 = arith.cmpi ne, %83, %84 : vector<288x1xi32>
    %c0_i32_92 = arith.constant 0 : i32
    %86 = vector.broadcast %c0_i32_92 : i32 to vector<288x1xi32>
    %87 = arith.cmpi slt, %83, %86 : vector<288x1xi32>
    %c0_i32_93 = arith.constant 0 : i32
    %88 = arith.cmpi slt, %81, %c0_i32_93 : i32
    %89 = vector.broadcast %88 : i1 to vector<288x1xi1>
    %90 = vector.broadcast %89 : vector<288x1xi1> to vector<288x1xi1>
    %91 = arith.xori %87, %90 : vector<288x1xi1>
    %92 = arith.andi %91, %85 : vector<288x1xi1>
    %93 = vector.broadcast %81 : i32 to vector<288x1xi32>
    %94 = arith.addi %83, %93 : vector<288x1xi32>
    %95 = arith.select %92, %94, %83 : vector<288x1xi1>, vector<288x1xi32>
    %c16_i32 = arith.constant 16 : i32
    %96 = vector.broadcast %c16_i32 : i32 to vector<288x1xi32>
    %97 = arith.cmpi slt, %95, %96 : vector<288x1xi32>
    %98 = arith.extui %97 : vector<288x1xi1> to vector<288x1xi32>
    %99 = arith.sitofp %98 : vector<288x1xi32> to vector<288x1xf32>
    %100 = vector.broadcast %99 : vector<288x1xf32> to vector<288x128xf32>
    %101 = arith.mulf %74, %100 : vector<288x128xf32>
    %cst_94 = arith.constant dense<0.000000e+00> : vector<128xf32>
    %102 = vector.multi_reduction <add>, %101, %cst_94 [0] : vector<288x128xf32> to vector<128xf32>
    %103 = vector.shape_cast %102 : vector<128xf32> to vector<1x128xf32>
    %c0_95 = arith.constant 0 : index
    %c0_96 = arith.constant 0 : index
    %c0_97 = arith.constant 0 : index
    %104 = vector.load %arg4[%c0_95, %c0_96, %c0_97] : memref<1x1x128xf32, #tpu.memory_space<vmem>>, vector<1x1x128xf32>
    %105 = vector.shape_cast %104 : vector<1x1x128xf32> to vector<1x128xf32>
    %106 = vector.shape_cast %103 : vector<1x128xf32> to vector<1x1x128xf32>
    tpu.vector_store %arg4[%c0_95, %c0_96, %c0_97], %106 {strides = array<i32>} : memref<1x1x128xf32, #tpu.memory_space<vmem>>, vector<1x1x128xf32>,
    %107 = arith.mulf %74, %74 : vector<288x128xf32>
    %108 = vector.broadcast %99 : vector<288x1xf32> to vector<288x128xf32>
    %109 = arith.mulf %107, %108 : vector<288x128xf32>
    %cst_98 = arith.constant dense<0.000000e+00> : vector<128xf32>
    %110 = vector.multi_reduction <add>, %109, %cst_98 [0] : vector<288x128xf32> to vector<128xf32>
    %111 = vector.shape_cast %110 : vector<128xf32> to vector<1x128xf32>
    %c0_99 = arith.constant 0 : index
    %c0_100 = arith.constant 0 : index
    %c0_101 = arith.constant 0 : index
    %112 = vector.load %arg5[%c0_99, %c0_100, %c0_101] : memref<1x1x128xf32, #tpu.memory_space<vmem>>, vector<1x1x128xf32>
    %113 = vector.shape_cast %112 : vector<1x1x128xf32> to vector<1x128xf32>
    %114 = vector.shape_cast %111 : vector<1x128xf32> to vector<1x1x128xf32>
    tpu.vector_store %arg5[%c0_99, %c0_100, %c0_101], %114 {strides = array<i32>} : memref<1x1x128xf32, #tpu.memory_space<vmem>>, vector<1x1x128xf32>,
    return
  }
  func.func @transform_0(%arg0: i32) -> (i32, i32, i32) {
    %c0_i32 = arith.constant 0 : i32
    %c0_i32_0 = arith.constant 0 : i32
    %c0_i32_1 = arith.constant 0 : i32
    return %arg0, %c0_i32, %c0_i32_0 : i32, i32, i32
  }
  func.func @transform_1(%arg0: i32) -> (i32, i32, i32) {
    %c0_i32 = arith.constant 0 : i32
    %c0_i32_0 = arith.constant 0 : i32
    %c0_i32_1 = arith.constant 0 : i32
    %c0_i32_2 = arith.constant 0 : i32
    return %c0_i32, %c0_i32_0, %c0_i32_1 : i32, i32, i32
  }
  func.func @transform_2(%arg0: i32) -> (i32, i32, i32) {
    %c0_i32 = arith.constant 0 : i32
    %c0_i32_0 = arith.constant 0 : i32
    %c0_i32_1 = arith.constant 0 : i32
    return %arg0, %c0_i32, %c0_i32_0 : i32, i32, i32
  }
  func.func @transform_3(%arg0: i32) -> (i32, i32, i32) {
    %c0_i32 = arith.constant 0 : i32
    %c0_i32_0 = arith.constant 0 : i32
    %c0_i32_1 = arith.constant 0 : i32
    return %arg0, %c0_i32, %c0_i32_0 : i32, i32, i32
  }
  func.func @transform_4(%arg0: i32) -> (i32, i32, i32) {
    %c0_i32 = arith.constant 0 : i32
    %c0_i32_0 = arith.constant 0 : i32
    %c0_i32_1 = arith.constant 0 : i32
    return %arg0, %c0_i32, %c0_i32_0 : i32, i32, i32
  }
}

module attributes {stable_mosaic.version = 11 : i64} {
  func.func @bn_apply_relu_kernel(%arg0: i32, %arg1: memref<1x288x128xbf16, #tpu.memory_space<vmem>>, %arg2: memref<1x128xf32, #tpu.memory_space<vmem>>, %arg3: memref<1x128xf32, #tpu.memory_space<vmem>>, %arg4: memref<1x288x128xbf16, #tpu.memory_space<vmem>>) attributes {dimension_semantics = [#tpu.dimension_semantics<parallel>], iteration_bounds = array<i64: 2>, scalar_prefetch = 0 : i64, scratch_operands = 0 : i64, tpu.core_type = #tpu.core_type<tc>, window_params = [{transform_indices = @transform_0, window_bounds = array<i64: 1, 288, 128>}, {pipeline_mode = #tpu.pipeline_mode<synchronous>, transform_indices = @transform_1, window_bounds = array<i64: 1, 128>}, {pipeline_mode = #tpu.pipeline_mode<synchronous>, transform_indices = @transform_2, window_bounds = array<i64: 1, 128>}, {transform_indices = @transform_3, window_bounds = array<i64: 1, 288, 128>}]} {
    %c0 = arith.constant 0 : index
    %c0_0 = arith.constant 0 : index
    %c0_1 = arith.constant 0 : index
    %0 = vector.load %arg1[%c0, %c0_0, %c0_1] : memref<1x288x128xbf16, #tpu.memory_space<vmem>>, vector<1x288x128xbf16>
    %1 = vector.shape_cast %0 : vector<1x288x128xbf16> to vector<288x128xbf16>
    %2 = arith.extf %1 : vector<288x128xbf16> to vector<288x128xf32>
    %c0_2 = arith.constant 0 : index
    %c0_3 = arith.constant 0 : index
    %3 = vector.load %arg2[%c0_2, %c0_3] : memref<1x128xf32, #tpu.memory_space<vmem>>, vector<1x128xf32>
    %4 = vector.broadcast %3 : vector<1x128xf32> to vector<288x128xf32>
    %5 = arith.mulf %2, %4 : vector<288x128xf32>
    %c0_4 = arith.constant 0 : index
    %c0_5 = arith.constant 0 : index
    %6 = vector.load %arg3[%c0_4, %c0_5] : memref<1x128xf32, #tpu.memory_space<vmem>>, vector<1x128xf32>
    %7 = vector.broadcast %6 : vector<1x128xf32> to vector<288x128xf32>
    %8 = arith.addf %5, %7 : vector<288x128xf32>
    %cst = arith.constant 0.000000e+00 : f32
    %9 = vector.broadcast %cst : f32 to vector<288x128xf32>
    %10 = arith.maximumf %8, %9 : vector<288x128xf32>
    %11 = arith.truncf %10 : vector<288x128xf32> to vector<288x128xbf16>
    %c0_6 = arith.constant 0 : index
    %c0_7 = arith.constant 0 : index
    %c0_8 = arith.constant 0 : index
    %12 = vector.load %arg4[%c0_6, %c0_7, %c0_8] : memref<1x288x128xbf16, #tpu.memory_space<vmem>>, vector<1x288x128xbf16>
    %13 = vector.shape_cast %12 : vector<1x288x128xbf16> to vector<288x128xbf16>
    %14 = vector.shape_cast %11 : vector<288x128xbf16> to vector<1x288x128xbf16>
    tpu.vector_store %arg4[%c0_6, %c0_7, %c0_8], %14 {strides = array<i32>} : memref<1x288x128xbf16, #tpu.memory_space<vmem>>, vector<1x288x128xbf16>,
    return
  }
  func.func @transform_0(%arg0: i32) -> (i32, i32, i32) {
    %c0_i32 = arith.constant 0 : i32
    %c0_i32_0 = arith.constant 0 : i32
    %c0_i32_1 = arith.constant 0 : i32
    return %arg0, %c0_i32, %c0_i32_0 : i32, i32, i32
  }
  func.func @transform_1(%arg0: i32) -> (i32, i32) {
    %c0_i32 = arith.constant 0 : i32
    %c0_i32_0 = arith.constant 0 : i32
    %c0_i32_1 = arith.constant 0 : i32
    return %c0_i32, %c0_i32_0 : i32, i32
  }
  func.func @transform_2(%arg0: i32) -> (i32, i32) {
    %c0_i32 = arith.constant 0 : i32
    %c0_i32_0 = arith.constant 0 : i32
    %c0_i32_1 = arith.constant 0 : i32
    return %c0_i32, %c0_i32_0 : i32, i32
  }
  func.func @transform_3(%arg0: i32) -> (i32, i32, i32) {
    %c0_i32 = arith.constant 0 : i32
    %c0_i32_0 = arith.constant 0 : i32
    %c0_i32_1 = arith.constant 0 : i32
    return %arg0, %c0_i32, %c0_i32_0 : i32, i32, i32
  }
}

module attributes {stable_mosaic.version = 11 : i64} {
  func.func @conv3x3_stats_kernel(%arg0: i32, %arg1: memref<1x328x8xbf16, #tpu.memory_space<vmem>>, %arg2: memref<9x8x128xbf16, #tpu.memory_space<vmem>>, %arg3: memref<1x288x128xbf16, #tpu.memory_space<vmem>>, %arg4: memref<1x1x128xf32, #tpu.memory_space<vmem>>, %arg5: memref<1x1x128xf32, #tpu.memory_space<vmem>>, %arg6: memref<288x128xf32, #tpu.memory_space<vmem>>) attributes {dimension_semantics = [#tpu.dimension_semantics<parallel>], iteration_bounds = array<i64: 2>, scalar_prefetch = 0 : i64, scratch_operands = 1 : i64, tpu.core_type = #tpu.core_type<tc>, window_params = [{transform_indices = @transform_0, window_bounds = array<i64: 1, 328, 8>}, {pipeline_mode = #tpu.pipeline_mode<synchronous>, transform_indices = @transform_1, window_bounds = array<i64: 9, 8, 128>}, {transform_indices = @transform_2, window_bounds = array<i64: 1, 288, 128>}, {transform_indices = @transform_3, window_bounds = array<i64: 1, 1, 128>}, {transform_indices = @transform_4, window_bounds = array<i64: 1, 1, 128>}]} {
    %cst = arith.constant 0.000000e+00 : f32
    %0 = vector.broadcast %cst : f32 to vector<288x128xf32>
    %c0 = arith.constant 0 : index
    %c0_0 = arith.constant 0 : index
    %1 = vector.load %arg6[%c0, %c0_0] : memref<288x128xf32, #tpu.memory_space<vmem>>, vector<288x128xf32>
    tpu.vector_store %arg6[%c0, %c0_0], %0 {strides = array<i32>} : memref<288x128xf32, #tpu.memory_space<vmem>>, vector<288x128xf32>,
    %c0_1 = arith.constant 0 : index
    %c0_2 = arith.constant 0 : index
    %2 = vector.load %arg6[%c0_1, %c0_2] : memref<288x128xf32, #tpu.memory_space<vmem>>, vector<288x128xf32>
    %c0_3 = arith.constant 0 : index
    %c0_4 = arith.constant 0 : index
    %c0_5 = arith.constant 0 : index
    %3 = vector.load %arg1[%c0_3, %c0_4, %c0_5] : memref<1x328x8xbf16, #tpu.memory_space<vmem>>, vector<1x288x8xbf16>
    %4 = vector.shape_cast %3 : vector<1x288x8xbf16> to vector<288x8xbf16>
    %c0_6 = arith.constant 0 : index
    %c0_7 = arith.constant 0 : index
    %c0_8 = arith.constant 0 : index
    %5 = vector.load %arg2[%c0_6, %c0_7, %c0_8] : memref<9x8x128xbf16, #tpu.memory_space<vmem>>, vector<1x8x128xbf16>
    %6 = vector.shape_cast %5 : vector<1x8x128xbf16> to vector<8x128xbf16>
    %cst_9 = arith.constant dense<0.000000e+00> : vector<288x128xf32>
    %7 = tpu.matmul %4, %6, %cst_9 {dimension_numbers = #tpu.dot_dimension_numbers<[1], [0], [0], [1], [0, 0, 1, 1], [], []>} : vector<288x8xbf16>, vector<8x128xbf16>, vector<288x128xf32> -> vector<288x128xf32>
    %8 = arith.addf %2, %7 : vector<288x128xf32>
    %c0_10 = arith.constant 0 : index
    %c0_11 = arith.constant 0 : index
    %9 = vector.load %arg6[%c0_10, %c0_11] : memref<288x128xf32, #tpu.memory_space<vmem>>, vector<288x128xf32>
    tpu.vector_store %arg6[%c0_10, %c0_11], %8 {strides = array<i32>} : memref<288x128xf32, #tpu.memory_space<vmem>>, vector<288x128xf32>,
    %c0_12 = arith.constant 0 : index
    %c0_13 = arith.constant 0 : index
    %10 = vector.load %arg6[%c0_12, %c0_13] : memref<288x128xf32, #tpu.memory_space<vmem>>, vector<288x128xf32>
    %c0_14 = arith.constant 0 : index
    %c1 = arith.constant 1 : index
    %c0_15 = arith.constant 0 : index
    %11 = vector.load %arg1[%c0_14, %c1, %c0_15] : memref<1x328x8xbf16, #tpu.memory_space<vmem>>, vector<1x288x8xbf16>
    %12 = vector.shape_cast %11 : vector<1x288x8xbf16> to vector<288x8xbf16>
    %c1_16 = arith.constant 1 : index
    %c0_17 = arith.constant 0 : index
    %c0_18 = arith.constant 0 : index
    %13 = vector.load %arg2[%c1_16, %c0_17, %c0_18] : memref<9x8x128xbf16, #tpu.memory_space<vmem>>, vector<1x8x128xbf16>
    %14 = vector.shape_cast %13 : vector<1x8x128xbf16> to vector<8x128xbf16>
    %cst_19 = arith.constant dense<0.000000e+00> : vector<288x128xf32>
    %15 = tpu.matmul %12, %14, %cst_19 {dimension_numbers = #tpu.dot_dimension_numbers<[1], [0], [0], [1], [0, 0, 1, 1], [], []>} : vector<288x8xbf16>, vector<8x128xbf16>, vector<288x128xf32> -> vector<288x128xf32>
    %16 = arith.addf %10, %15 : vector<288x128xf32>
    %c0_20 = arith.constant 0 : index
    %c0_21 = arith.constant 0 : index
    %17 = vector.load %arg6[%c0_20, %c0_21] : memref<288x128xf32, #tpu.memory_space<vmem>>, vector<288x128xf32>
    tpu.vector_store %arg6[%c0_20, %c0_21], %16 {strides = array<i32>} : memref<288x128xf32, #tpu.memory_space<vmem>>, vector<288x128xf32>,
    %c0_22 = arith.constant 0 : index
    %c0_23 = arith.constant 0 : index
    %18 = vector.load %arg6[%c0_22, %c0_23] : memref<288x128xf32, #tpu.memory_space<vmem>>, vector<288x128xf32>
    %c0_24 = arith.constant 0 : index
    %c2 = arith.constant 2 : index
    %c0_25 = arith.constant 0 : index
    %19 = vector.load %arg1[%c0_24, %c2, %c0_25] : memref<1x328x8xbf16, #tpu.memory_space<vmem>>, vector<1x288x8xbf16>
    %20 = vector.shape_cast %19 : vector<1x288x8xbf16> to vector<288x8xbf16>
    %c2_26 = arith.constant 2 : index
    %c0_27 = arith.constant 0 : index
    %c0_28 = arith.constant 0 : index
    %21 = vector.load %arg2[%c2_26, %c0_27, %c0_28] : memref<9x8x128xbf16, #tpu.memory_space<vmem>>, vector<1x8x128xbf16>
    %22 = vector.shape_cast %21 : vector<1x8x128xbf16> to vector<8x128xbf16>
    %cst_29 = arith.constant dense<0.000000e+00> : vector<288x128xf32>
    %23 = tpu.matmul %20, %22, %cst_29 {dimension_numbers = #tpu.dot_dimension_numbers<[1], [0], [0], [1], [0, 0, 1, 1], [], []>} : vector<288x8xbf16>, vector<8x128xbf16>, vector<288x128xf32> -> vector<288x128xf32>
    %24 = arith.addf %18, %23 : vector<288x128xf32>
    %c0_30 = arith.constant 0 : index
    %c0_31 = arith.constant 0 : index
    %25 = vector.load %arg6[%c0_30, %c0_31] : memref<288x128xf32, #tpu.memory_space<vmem>>, vector<288x128xf32>
    tpu.vector_store %arg6[%c0_30, %c0_31], %24 {strides = array<i32>} : memref<288x128xf32, #tpu.memory_space<vmem>>, vector<288x128xf32>,
    %c0_32 = arith.constant 0 : index
    %c0_33 = arith.constant 0 : index
    %26 = vector.load %arg6[%c0_32, %c0_33] : memref<288x128xf32, #tpu.memory_space<vmem>>, vector<288x128xf32>
    %c0_34 = arith.constant 0 : index
    %c18 = arith.constant 18 : index
    %c0_35 = arith.constant 0 : index
    %27 = vector.load %arg1[%c0_34, %c18, %c0_35] : memref<1x328x8xbf16, #tpu.memory_space<vmem>>, vector<1x288x8xbf16>
    %28 = vector.shape_cast %27 : vector<1x288x8xbf16> to vector<288x8xbf16>
    %c3 = arith.constant 3 : index
    %c0_36 = arith.constant 0 : index
    %c0_37 = arith.constant 0 : index
    %29 = vector.load %arg2[%c3, %c0_36, %c0_37] : memref<9x8x128xbf16, #tpu.memory_space<vmem>>, vector<1x8x128xbf16>
    %30 = vector.shape_cast %29 : vector<1x8x128xbf16> to vector<8x128xbf16>
    %cst_38 = arith.constant dense<0.000000e+00> : vector<288x128xf32>
    %31 = tpu.matmul %28, %30, %cst_38 {dimension_numbers = #tpu.dot_dimension_numbers<[1], [0], [0], [1], [0, 0, 1, 1], [], []>} : vector<288x8xbf16>, vector<8x128xbf16>, vector<288x128xf32> -> vector<288x128xf32>
    %32 = arith.addf %26, %31 : vector<288x128xf32>
    %c0_39 = arith.constant 0 : index
    %c0_40 = arith.constant 0 : index
    %33 = vector.load %arg6[%c0_39, %c0_40] : memref<288x128xf32, #tpu.memory_space<vmem>>, vector<288x128xf32>
    tpu.vector_store %arg6[%c0_39, %c0_40], %32 {strides = array<i32>} : memref<288x128xf32, #tpu.memory_space<vmem>>, vector<288x128xf32>,
    %c0_41 = arith.constant 0 : index
    %c0_42 = arith.constant 0 : index
    %34 = vector.load %arg6[%c0_41, %c0_42] : memref<288x128xf32, #tpu.memory_space<vmem>>, vector<288x128xf32>
    %c0_43 = arith.constant 0 : index
    %c19 = arith.constant 19 : index
    %c0_44 = arith.constant 0 : index
    %35 = vector.load %arg1[%c0_43, %c19, %c0_44] : memref<1x328x8xbf16, #tpu.memory_space<vmem>>, vector<1x288x8xbf16>
    %36 = vector.shape_cast %35 : vector<1x288x8xbf16> to vector<288x8xbf16>
    %c4 = arith.constant 4 : index
    %c0_45 = arith.constant 0 : index
    %c0_46 = arith.constant 0 : index
    %37 = vector.load %arg2[%c4, %c0_45, %c0_46] : memref<9x8x128xbf16, #tpu.memory_space<vmem>>, vector<1x8x128xbf16>
    %38 = vector.shape_cast %37 : vector<1x8x128xbf16> to vector<8x128xbf16>
    %cst_47 = arith.constant dense<0.000000e+00> : vector<288x128xf32>
    %39 = tpu.matmul %36, %38, %cst_47 {dimension_numbers = #tpu.dot_dimension_numbers<[1], [0], [0], [1], [0, 0, 1, 1], [], []>} : vector<288x8xbf16>, vector<8x128xbf16>, vector<288x128xf32> -> vector<288x128xf32>
    %40 = arith.addf %34, %39 : vector<288x128xf32>
    %c0_48 = arith.constant 0 : index
    %c0_49 = arith.constant 0 : index
    %41 = vector.load %arg6[%c0_48, %c0_49] : memref<288x128xf32, #tpu.memory_space<vmem>>, vector<288x128xf32>
    tpu.vector_store %arg6[%c0_48, %c0_49], %40 {strides = array<i32>} : memref<288x128xf32, #tpu.memory_space<vmem>>, vector<288x128xf32>,
    %c0_50 = arith.constant 0 : index
    %c0_51 = arith.constant 0 : index
    %42 = vector.load %arg6[%c0_50, %c0_51] : memref<288x128xf32, #tpu.memory_space<vmem>>, vector<288x128xf32>
    %c0_52 = arith.constant 0 : index
    %c20 = arith.constant 20 : index
    %c0_53 = arith.constant 0 : index
    %43 = vector.load %arg1[%c0_52, %c20, %c0_53] : memref<1x328x8xbf16, #tpu.memory_space<vmem>>, vector<1x288x8xbf16>
    %44 = vector.shape_cast %43 : vector<1x288x8xbf16> to vector<288x8xbf16>
    %c5 = arith.constant 5 : index
    %c0_54 = arith.constant 0 : index
    %c0_55 = arith.constant 0 : index
    %45 = vector.load %arg2[%c5, %c0_54, %c0_55] : memref<9x8x128xbf16, #tpu.memory_space<vmem>>, vector<1x8x128xbf16>
    %46 = vector.shape_cast %45 : vector<1x8x128xbf16> to vector<8x128xbf16>
    %cst_56 = arith.constant dense<0.000000e+00> : vector<288x128xf32>
    %47 = tpu.matmul %44, %46, %cst_56 {dimension_numbers = #tpu.dot_dimension_numbers<[1], [0], [0], [1], [0, 0, 1, 1], [], []>} : vector<288x8xbf16>, vector<8x128xbf16>, vector<288x128xf32> -> vector<288x128xf32>
    %48 = arith.addf %42, %47 : vector<288x128xf32>
    %c0_57 = arith.constant 0 : index
    %c0_58 = arith.constant 0 : index
    %49 = vector.load %arg6[%c0_57, %c0_58] : memref<288x128xf32, #tpu.memory_space<vmem>>, vector<288x128xf32>
    tpu.vector_store %arg6[%c0_57, %c0_58], %48 {strides = array<i32>} : memref<288x128xf32, #tpu.memory_space<vmem>>, vector<288x128xf32>,
    %c0_59 = arith.constant 0 : index
    %c0_60 = arith.constant 0 : index
    %50 = vector.load %arg6[%c0_59, %c0_60] : memref<288x128xf32, #tpu.memory_space<vmem>>, vector<288x128xf32>
    %c0_61 = arith.constant 0 : index
    %c36 = arith.constant 36 : index
    %c0_62 = arith.constant 0 : index
    %51 = vector.load %arg1[%c0_61, %c36, %c0_62] : memref<1x328x8xbf16, #tpu.memory_space<vmem>>, vector<1x288x8xbf16>
    %52 = vector.shape_cast %51 : vector<1x288x8xbf16> to vector<288x8xbf16>
    %c6 = arith.constant 6 : index
    %c0_63 = arith.constant 0 : index
    %c0_64 = arith.constant 0 : index
    %53 = vector.load %arg2[%c6, %c0_63, %c0_64] : memref<9x8x128xbf16, #tpu.memory_space<vmem>>, vector<1x8x128xbf16>
    %54 = vector.shape_cast %53 : vector<1x8x128xbf16> to vector<8x128xbf16>
    %cst_65 = arith.constant dense<0.000000e+00> : vector<288x128xf32>
    %55 = tpu.matmul %52, %54, %cst_65 {dimension_numbers = #tpu.dot_dimension_numbers<[1], [0], [0], [1], [0, 0, 1, 1], [], []>} : vector<288x8xbf16>, vector<8x128xbf16>, vector<288x128xf32> -> vector<288x128xf32>
    %56 = arith.addf %50, %55 : vector<288x128xf32>
    %c0_66 = arith.constant 0 : index
    %c0_67 = arith.constant 0 : index
    %57 = vector.load %arg6[%c0_66, %c0_67] : memref<288x128xf32, #tpu.memory_space<vmem>>, vector<288x128xf32>
    tpu.vector_store %arg6[%c0_66, %c0_67], %56 {strides = array<i32>} : memref<288x128xf32, #tpu.memory_space<vmem>>, vector<288x128xf32>,
    %c0_68 = arith.constant 0 : index
    %c0_69 = arith.constant 0 : index
    %58 = vector.load %arg6[%c0_68, %c0_69] : memref<288x128xf32, #tpu.memory_space<vmem>>, vector<288x128xf32>
    %c0_70 = arith.constant 0 : index
    %c37 = arith.constant 37 : index
    %c0_71 = arith.constant 0 : index
    %59 = vector.load %arg1[%c0_70, %c37, %c0_71] : memref<1x328x8xbf16, #tpu.memory_space<vmem>>, vector<1x288x8xbf16>
    %60 = vector.shape_cast %59 : vector<1x288x8xbf16> to vector<288x8xbf16>
    %c7 = arith.constant 7 : index
    %c0_72 = arith.constant 0 : index
    %c0_73 = arith.constant 0 : index
    %61 = vector.load %arg2[%c7, %c0_72, %c0_73] : memref<9x8x128xbf16, #tpu.memory_space<vmem>>, vector<1x8x128xbf16>
    %62 = vector.shape_cast %61 : vector<1x8x128xbf16> to vector<8x128xbf16>
    %cst_74 = arith.constant dense<0.000000e+00> : vector<288x128xf32>
    %63 = tpu.matmul %60, %62, %cst_74 {dimension_numbers = #tpu.dot_dimension_numbers<[1], [0], [0], [1], [0, 0, 1, 1], [], []>} : vector<288x8xbf16>, vector<8x128xbf16>, vector<288x128xf32> -> vector<288x128xf32>
    %64 = arith.addf %58, %63 : vector<288x128xf32>
    %c0_75 = arith.constant 0 : index
    %c0_76 = arith.constant 0 : index
    %65 = vector.load %arg6[%c0_75, %c0_76] : memref<288x128xf32, #tpu.memory_space<vmem>>, vector<288x128xf32>
    tpu.vector_store %arg6[%c0_75, %c0_76], %64 {strides = array<i32>} : memref<288x128xf32, #tpu.memory_space<vmem>>, vector<288x128xf32>,
    %c0_77 = arith.constant 0 : index
    %c0_78 = arith.constant 0 : index
    %66 = vector.load %arg6[%c0_77, %c0_78] : memref<288x128xf32, #tpu.memory_space<vmem>>, vector<288x128xf32>
    %c0_79 = arith.constant 0 : index
    %c38 = arith.constant 38 : index
    %c0_80 = arith.constant 0 : index
    %67 = vector.load %arg1[%c0_79, %c38, %c0_80] : memref<1x328x8xbf16, #tpu.memory_space<vmem>>, vector<1x288x8xbf16>
    %68 = vector.shape_cast %67 : vector<1x288x8xbf16> to vector<288x8xbf16>
    %c8 = arith.constant 8 : index
    %c0_81 = arith.constant 0 : index
    %c0_82 = arith.constant 0 : index
    %69 = vector.load %arg2[%c8, %c0_81, %c0_82] : memref<9x8x128xbf16, #tpu.memory_space<vmem>>, vector<1x8x128xbf16>
    %70 = vector.shape_cast %69 : vector<1x8x128xbf16> to vector<8x128xbf16>
    %cst_83 = arith.constant dense<0.000000e+00> : vector<288x128xf32>
    %71 = tpu.matmul %68, %70, %cst_83 {dimension_numbers = #tpu.dot_dimension_numbers<[1], [0], [0], [1], [0, 0, 1, 1], [], []>} : vector<288x8xbf16>, vector<8x128xbf16>, vector<288x128xf32> -> vector<288x128xf32>
    %72 = arith.addf %66, %71 : vector<288x128xf32>
    %c0_84 = arith.constant 0 : index
    %c0_85 = arith.constant 0 : index
    %73 = vector.load %arg6[%c0_84, %c0_85] : memref<288x128xf32, #tpu.memory_space<vmem>>, vector<288x128xf32>
    tpu.vector_store %arg6[%c0_84, %c0_85], %72 {strides = array<i32>} : memref<288x128xf32, #tpu.memory_space<vmem>>, vector<288x128xf32>,
    %c0_86 = arith.constant 0 : index
    %c0_87 = arith.constant 0 : index
    %74 = vector.load %arg6[%c0_86, %c0_87] : memref<288x128xf32, #tpu.memory_space<vmem>>, vector<288x128xf32>
    %75 = arith.truncf %74 : vector<288x128xf32> to vector<288x128xbf16>
    %c0_88 = arith.constant 0 : index
    %c0_89 = arith.constant 0 : index
    %c0_90 = arith.constant 0 : index
    %76 = vector.load %arg3[%c0_88, %c0_89, %c0_90] : memref<1x288x128xbf16, #tpu.memory_space<vmem>>, vector<1x288x128xbf16>
    %77 = vector.shape_cast %76 : vector<1x288x128xbf16> to vector<288x128xbf16>
    %78 = vector.shape_cast %75 : vector<288x128xbf16> to vector<1x288x128xbf16>
    tpu.vector_store %arg3[%c0_88, %c0_89, %c0_90], %78 {strides = array<i32>} : memref<1x288x128xbf16, #tpu.memory_space<vmem>>, vector<1x288x128xbf16>,
    %79 = tpu.iota {dimensions = array<i32: 0>} : vector<288x1xi32>
    %c18_i32 = arith.constant 18 : i32
    %c0_i32 = arith.constant 0 : i32
    %80 = arith.cmpi eq, %c18_i32, %c0_i32 : i32
    %c1_i32 = arith.constant 1 : i32
    %81 = arith.select %80, %c1_i32, %c18_i32 : i32
    %82 = vector.broadcast %81 : i32 to vector<288x1xi32>
    %83 = arith.remsi %79, %82 : vector<288x1xi32>
    %c0_i32_91 = arith.constant 0 : i32
    %84 = vector.broadcast %c0_i32_91 : i32 to vector<288x1xi32>
    %85 = arith.cmpi ne, %83, %84 : vector<288x1xi32>
    %c0_i32_92 = arith.constant 0 : i32
    %86 = vector.broadcast %c0_i32_92 : i32 to vector<288x1xi32>
    %87 = arith.cmpi slt, %83, %86 : vector<288x1xi32>
    %c0_i32_93 = arith.constant 0 : i32
    %88 = arith.cmpi slt, %81, %c0_i32_93 : i32
    %89 = vector.broadcast %88 : i1 to vector<288x1xi1>
    %90 = vector.broadcast %89 : vector<288x1xi1> to vector<288x1xi1>
    %91 = arith.xori %87, %90 : vector<288x1xi1>
    %92 = arith.andi %91, %85 : vector<288x1xi1>
    %93 = vector.broadcast %81 : i32 to vector<288x1xi32>
    %94 = arith.addi %83, %93 : vector<288x1xi32>
    %95 = arith.select %92, %94, %83 : vector<288x1xi1>, vector<288x1xi32>
    %c16_i32 = arith.constant 16 : i32
    %96 = vector.broadcast %c16_i32 : i32 to vector<288x1xi32>
    %97 = arith.cmpi slt, %95, %96 : vector<288x1xi32>
    %98 = arith.extui %97 : vector<288x1xi1> to vector<288x1xi32>
    %99 = arith.sitofp %98 : vector<288x1xi32> to vector<288x1xf32>
    %100 = vector.broadcast %99 : vector<288x1xf32> to vector<288x128xf32>
    %101 = arith.mulf %74, %100 : vector<288x128xf32>
    %cst_94 = arith.constant dense<0.000000e+00> : vector<128xf32>
    %102 = vector.multi_reduction <add>, %101, %cst_94 [0] : vector<288x128xf32> to vector<128xf32>
    %103 = vector.shape_cast %102 : vector<128xf32> to vector<1x128xf32>
    %c0_95 = arith.constant 0 : index
    %c0_96 = arith.constant 0 : index
    %c0_97 = arith.constant 0 : index
    %104 = vector.load %arg4[%c0_95, %c0_96, %c0_97] : memref<1x1x128xf32, #tpu.memory_space<vmem>>, vector<1x1x128xf32>
    %105 = vector.shape_cast %104 : vector<1x1x128xf32> to vector<1x128xf32>
    %106 = vector.shape_cast %103 : vector<1x128xf32> to vector<1x1x128xf32>
    tpu.vector_store %arg4[%c0_95, %c0_96, %c0_97], %106 {strides = array<i32>} : memref<1x1x128xf32, #tpu.memory_space<vmem>>, vector<1x1x128xf32>,
    %107 = arith.mulf %74, %74 : vector<288x128xf32>
    %108 = vector.broadcast %99 : vector<288x1xf32> to vector<288x128xf32>
    %109 = arith.mulf %107, %108 : vector<288x128xf32>
    %cst_98 = arith.constant dense<0.000000e+00> : vector<128xf32>
    %110 = vector.multi_reduction <add>, %109, %cst_98 [0] : vector<288x128xf32> to vector<128xf32>
    %111 = vector.shape_cast %110 : vector<128xf32> to vector<1x128xf32>
    %c0_99 = arith.constant 0 : index
    %c0_100 = arith.constant 0 : index
    %c0_101 = arith.constant 0 : index
    %112 = vector.load %arg5[%c0_99, %c0_100, %c0_101] : memref<1x1x128xf32, #tpu.memory_space<vmem>>, vector<1x1x128xf32>
    %113 = vector.shape_cast %112 : vector<1x1x128xf32> to vector<1x128xf32>
    %114 = vector.shape_cast %111 : vector<1x128xf32> to vector<1x1x128xf32>
    tpu.vector_store %arg5[%c0_99, %c0_100, %c0_101], %114 {strides = array<i32>} : memref<1x1x128xf32, #tpu.memory_space<vmem>>, vector<1x1x128xf32>,
    return
  }
  func.func @transform_0(%arg0: i32) -> (i32, i32, i32) {
    %c0_i32 = arith.constant 0 : i32
    %c0_i32_0 = arith.constant 0 : i32
    %c0_i32_1 = arith.constant 0 : i32
    return %arg0, %c0_i32, %c0_i32_0 : i32, i32, i32
  }
  func.func @transform_1(%arg0: i32) -> (i32, i32, i32) {
    %c0_i32 = arith.constant 0 : i32
    %c0_i32_0 = arith.constant 0 : i32
    %c0_i32_1 = arith.constant 0 : i32
    %c0_i32_2 = arith.constant 0 : i32
    return %c0_i32, %c0_i32_0, %c0_i32_1 : i32, i32, i32
  }
  func.func @transform_2(%arg0: i32) -> (i32, i32, i32) {
    %c0_i32 = arith.constant 0 : i32
    %c0_i32_0 = arith.constant 0 : i32
    %c0_i32_1 = arith.constant 0 : i32
    return %arg0, %c0_i32, %c0_i32_0 : i32, i32, i32
  }
  func.func @transform_3(%arg0: i32) -> (i32, i32, i32) {
    %c0_i32 = arith.constant 0 : i32
    %c0_i32_0 = arith.constant 0 : i32
    %c0_i32_1 = arith.constant 0 : i32
    return %arg0, %c0_i32, %c0_i32_0 : i32, i32, i32
  }
  func.func @transform_4(%arg0: i32) -> (i32, i32, i32) {
    %c0_i32 = arith.constant 0 : i32
    %c0_i32_0 = arith.constant 0 : i32
    %c0_i32_1 = arith.constant 0 : i32
    return %arg0, %c0_i32, %c0_i32_0 : i32, i32, i32
  }
}

</mosaic_0001>

<bundles_post_ra>
// kernel: basic_block_forward.7
= control target key start
LH: loop header
LB: loop body
LE: loop exit
PB: predicated region body
PF: predicated region fallthrough
CT: control target
= control target key end

     0   :  { %vm21_vm0 = vcmask 1040384   ;;  %s117_s0 = inlined_call_operand.vmem [shape: f32[2,1,128], index: 0, kind: input, shape index: {}]   ;;  %s118_s1 = inlined_call_operand.vmem [shape: f32[2,1,128], index: 1, kind: input, shape index: {}]   ;;  %s119_s2 = inlined_call_operand.vmem [shape: f32[1,128], index: 2, kind: input, shape index: {}]   ;;  %s120_s3 = inlined_call_operand.vmem [shape: f32[1,128], index: 3, kind: input, shape index: {}]   ;;  %s121_s4 = inlined_call_operand.vmem [shape: f32[1,128], index: 4, kind: output, shape index: {0}]   ;;  %s122_s5 = inlined_call_operand.vmem [shape: f32[1,128], index: 5, kind: output, shape index: {1}]  }
   0x1   :  { %v19_v0 = vld [vmem:[%s117_s0] sm:$0x1]  ;;  %v20_v1 = vld [vmem:[%s117_s0 + $0x1] sm:$0x1] }
   0x2   :  { %v25_v2 = vld [vmem:[%s118_s1] sm:$0x1]  ;;  %v22_v3 = vsel %vm21_vm0, %v19_v0, 0.0  ;;  %v23_v4 = vsel %vm21_vm0, %v20_v1, 0.0  ;;  %v26_v5 = vld [vmem:[%s118_s1 + $0x1] sm:$0x1] }
   0x3   :  { %v27_v6 = vsel %vm21_vm0, %v25_v2, 0.0  ;;  %v24_v7 = vadd.f32 %v23_v4, %v22_v3  ;;  %v28_v8 = vsel %vm21_vm0, %v26_v5, 0.0  ;;  %v35_v21 = vld [vmem:[%s119_s2] sm:$0x1] }
   0x4   :  { %v29_v9 = vadd.f32 %v28_v8, %v27_v6  ;;  %v49_v25 = vld [vmem:[%s120_s3] sm:$0x1] }
   0x5   :  { %v30_v10 = vmul.f32 0.001953125, %v24_v7 }
   0x6   :  { %v31_v11 = vmul.f32 0.001953125, %v29_v9 }
   0x7   :  { %v32_v12 = vmul.f32 %v30_v10, %v30_v10 }
   0x9   :  { %v33_v13 = vsub.f32 %v31_v11, %v32_v12 }
   0xb   :  { %v34_v14 = vmax.f32 %v33_v13, 0.0 }
   0xd   :  { %v36_v15 = vadd.f32 1e-05, %v34_v14 }
   0xf   :  { %61 = vrsqrt.f32 %v36_v15  ;;  %vm43_vm1 = vweird.f32 %v36_v15 }
  0x15   :  { %v62_v16 = vpop.eup %61 }
  0x16   :  { %v38_v17 = vmul.f32 %v62_v16, %v36_v15  ;;  %vm44_vm2 = vweird.f32 %v62_v16 }
  0x17   :  { %vm45_vm3 = vmor %vm43_vm1, %vm44_vm2 }
  0x18   :  { %v39_v18 = vmul.f32 %v62_v16, %v38_v17 }
  0x1a   :  { %v40_v19 = vmul.f32 0.5, %v39_v18 }
  0x1c   :  { %v41_v20 = vsub.f32 1.5, %v40_v19 }
  0x1e   :  { %v42_v22 = vmul.f32 %v62_v16, %v41_v20 }
  0x20   :  { %v46_v23 = vsel %vm45_vm3, %v62_v16, %v42_v22 }
  0x21   :  { %v47_v24 = vmul.f32 %v46_v23, %v35_v21 }
  0x23   :  { %48 = vst [vmem:[%s121_s4] sm:$0x1] %v47_v24  ;;  %v50_v26 = vmul.f32 %v47_v24, %v30_v10 }
  0x25   :  { %v51_v27 = vsub.f32 %v49_v25, %v50_v26 }
  0x27   :  { %52 = vst [vmem:[%s122_s5] sm:$0x1] %v51_v27 }

// kernel: basic_block_forward.8
= control target key start
LH: loop header
LB: loop body
LE: loop exit
PB: predicated region body
PF: predicated region fallthrough
CT: control target
= control target key end

     0   :  { %s730_s12 = smov 0   ;;  %s876_s0 = inlined_call_operand.vmem [shape: bf16[2,288,128], index: 0, kind: input, shape index: {}]   ;;  %s877_s1 = inlined_call_operand.vmem [shape: f32[1,128], index: 1, kind: input, shape index: {}]   ;;  %s878_s2 = inlined_call_operand.vmem [shape: f32[1,128], index: 2, kind: input, shape index: {}]   ;;  %s879_s3 = inlined_call_operand.vmem [shape: bf16[2,288,128], index: 3, kind: output, shape index: {}]  }
   0x1 LB: > { %s486_s13 = sadd.s32 4294967295, %s708_s12   ;;  %p490_p0 = scmp.ge.s32.totalorder %s708_s12, 1  ;;  %s708_s12 = sphi %s730_s12, %s13_s12  }
   0x2   : > { %p137_p1 = scmp.lt.s32.totalorder %s708_s12, 3 }
   0x4   : > { %p138_p2 = pnand %p490_p0, %p137_p1 }
   0x5   : > { %p161_p3 = scmp.lt.s32.totalorder (!%p138_p2), %s486_s13, 1 }
   0x6   : > { %141 = sbr.rel (%p138_p2) target bundleno = 63 (0x3f), region = 32 }
   0xb   : > { %s881_s13 = smov (!%p161_p3, %s486_s13), 1  ;;  %v751_v0 = vld [vmem:[%s877_s1] ss:$0 sm:$0xff] }
   0xc   : > { %s691_s14 = smul.u32 144, %s881_s13  ;;  %v759_v6 = vld [vmem:[%s878_s2] ss:$0 sm:$0xff] }
   0xe   : > { %s746_s17 = scalar_lea.vmem %s876_s0, %s691_s14  ;;  %s785_s24 = scalar_lea.vmem %s879_s3, %s691_s14 }
   0xf   : > { %v496_v1 = vld [vmem:[%s746_s17] sm:$0xff]   ;;  %v657_v2 = vld [vmem:[%s746_s17 + $0x8] sm:$0xff]   ;;  %v658_v3 = vld [vmem:[%s746_s17 + $0x10] sm:$0xff]  }
  0x10   : > { %v497_v4 = vunpack.c.l.bf16 %v496_v1  ;;  %v498_v5 = vunpack.c.h.bf16 %v496_v1  ;;  %v501_v7 = vunpack.c.l.bf16 %v657_v2  ;;  %v502_v8 = vunpack.c.h.bf16 %v657_v2  ;;  %v659_v9 = vld [vmem:[%s746_s17 + $0x18] sm:$0xff]   ;;  %v660_v30 = vld [vmem:[%s746_s17 + $0x20] sm:$0xff]   ;;  %v661_v35 = vld [vmem:[%s746_s17 + $0x28] sm:$0xff]  }
  0x11   : > { %v505_v10 = vunpack.c.l.bf16 %v658_v3  ;;  %v506_v11 = vunpack.c.h.bf16 %v658_v3  ;;  %v509_v12 = vunpack.c.l.bf16 %v659_v9  ;;  %v510_v13 = vunpack.c.h.bf16 %v659_v9  ;;  %v662_v40 = vld [vmem:[%s746_s17 + $0x30] sm:$0xff]   ;;  %v663_v45 = vld [vmem:[%s746_s17 + $0x38] sm:$0xff]   ;;  %v664_v3 = vld [vmem:[%s746_s17 + $0x40] sm:$0xff]  }
  0x12   : > { %v247_v14 = vmul.f32 %v751_v0, %v497_v4  ;;  %v248_v15 = vmul.f32 %v751_v0, %v498_v5  ;;  %v249_v16 = vmul.f32 %v751_v0, %v501_v7  ;;  %v250_v17 = vmul.f32 %v751_v0, %v502_v8 }
  0x13   : > { %v251_v18 = vmul.f32 %v751_v0, %v505_v10  ;;  %v252_v19 = vmul.f32 %v751_v0, %v506_v11  ;;  %v253_v20 = vmul.f32 %v751_v0, %v509_v12  ;;  %v254_v21 = vmul.f32 %v751_v0, %v510_v13  ;;  %v665_v13 = vld [vmem:[%s746_s17 + $0x48] sm:$0xff]  }
  0x14   : > { %v287_v22 = vadd.f32 %v759_v6, %v247_v14  ;;  %v288_v23 = vadd.f32 %v759_v6, %v248_v15  ;;  %v289_v24 = vadd.f32 %v759_v6, %v249_v16  ;;  %v290_v25 = vadd.f32 %v759_v6, %v250_v17 }
  0x15   : > { %v291_v26 = vadd.f32 %v759_v6, %v251_v18  ;;  %v292_v27 = vadd.f32 %v759_v6, %v252_v19  ;;  %v293_v28 = vadd.f32 %v759_v6, %v253_v20  ;;  %v294_v29 = vadd.f32 %v759_v6, %v254_v21  ;;  %v666_v18 = vld [vmem:[%s746_s17 + $0x50] sm:$0xff]  }
  0x16   : > { %v323_v31 = vmax.f32 %v287_v22, 0.0  ;;  %v324_v32 = vmax.f32 %v288_v23, 0.0  ;;  %v325_v33 = vmax.f32 %v289_v24, 0.0  ;;  %v326_v34 = vmax.f32 %v290_v25, 0.0  ;;  %v667_v23 = vld [vmem:[%s746_s17 + $0x58] sm:$0xff]  }
  0x17   : > { %v327_v36 = vmax.f32 %v291_v26, 0.0  ;;  %v328_v37 = vmax.f32 %v292_v27, 0.0  ;;  %v329_v38 = vmax.f32 %v293_v28, 0.0  ;;  %v330_v39 = vmax.f32 %v294_v29, 0.0 }
  0x18   : > { %v570_v41 = vpack.c.bf16 %v324_v32, %v323_v31  ;;  %v575_v42 = vpack.c.bf16 %v326_v34, %v325_v33  ;;  %v513_v43 = vunpack.c.l.bf16 %v660_v30  ;;  %v514_v44 = vunpack.c.h.bf16 %v660_v30 }
  0x19   : > { %v580_v46 = vpack.c.bf16 %v328_v37, %v327_v36  ;;  %v585_v47 = vpack.c.bf16 %v330_v39, %v329_v38  ;;  %v517_v48 = vunpack.c.l.bf16 %v661_v35  ;;  %v518_v49 = vunpack.c.h.bf16 %v661_v35 }
  0x1a   : > { %571 = vst [vmem:[%s785_s24] sm:$0xff] %v570_v41   ;;  %v255_v50 = vmul.f32 %v751_v0, %v513_v43  ;;  %v256_v51 = vmul.f32 %v751_v0, %v514_v44  ;;  %v521_v52 = vunpack.c.l.bf16 %v662_v40  ;;  %v522_v53 = vunpack.c.h.bf16 %v662_v40  ;;  %v668_v40 = vld [vmem:[%s746_s17 + $0x60] sm:$0xff]  }
  0x1b   : > { %674 = vst [vmem:[%s785_s24 + $0x8] sm:$0xff] %v575_v42   ;;  %v257_v54 = vmul.f32 %v751_v0, %v517_v48  ;;  %v258_v55 = vmul.f32 %v751_v0, %v518_v49  ;;  %v525_v56 = vunpack.c.l.bf16 %v663_v45  ;;  %v526_v57 = vunpack.c.h.bf16 %v663_v45 }
  0x1c   : > { %675 = vst [vmem:[%s785_s24 + $0x10] sm:$0xff] %v580_v46   ;;  %v295_v58 = vadd.f32 %v759_v6, %v255_v50  ;;  %v296_v59 = vadd.f32 %v759_v6, %v256_v51  ;;  %v259_v60 = vmul.f32 %v751_v0, %v521_v52  ;;  %v260_v61 = vmul.f32 %v751_v0, %v522_v53  ;;  %v669_v53 = vld [vmem:[%s746_s17 + $0x68] sm:$0xff]  }
  0x1d   : > { %676 = vst [vmem:[%s785_s24 + $0x18] sm:$0xff] %v585_v47   ;;  %v297_v62 = vadd.f32 %v759_v6, %v257_v54  ;;  %v298_v63 = vadd.f32 %v759_v6, %v258_v55  ;;  %v261_v1 = vmul.f32 %v751_v0, %v525_v56  ;;  %v262_v2 = vmul.f32 %v751_v0, %v526_v57 }
  0x1e   : > { %v331_v4 = vmax.f32 %v295_v58, 0.0  ;;  %v332_v5 = vmax.f32 %v296_v59, 0.0  ;;  %v299_v7 = vadd.f32 %v759_v6, %v259_v60  ;;  %v300_v8 = vadd.f32 %v759_v6, %v260_v61  ;;  %v670_v58 = vld [vmem:[%s746_s17 + $0x70] sm:$0xff]  }
  0x1f   : > { %v333_v9 = vmax.f32 %v297_v62, 0.0  ;;  %v334_v10 = vmax.f32 %v298_v63, 0.0  ;;  %v301_v11 = vadd.f32 %v759_v6, %v261_v1  ;;  %v302_v12 = vadd.f32 %v759_v6, %v262_v2  ;;  %v671_v63 = vld [vmem:[%s746_s17 + $0x78] sm:$0xff]  }
  0x20   : > { %v590_v14 = vpack.c.bf16 %v332_v5, %v331_v4  ;;  %v335_v15 = vmax.f32 %v299_v7, 0.0  ;;  %v336_v16 = vmax.f32 %v300_v8, 0.0  ;;  %v529_v17 = vunpack.c.l.bf16 %v664_v3 }
  0x21   : > { %v595_v19 = vpack.c.bf16 %v334_v10, %v333_v9  ;;  %v337_v20 = vmax.f32 %v301_v11, 0.0  ;;  %v338_v21 = vmax.f32 %v302_v12, 0.0  ;;  %v530_v22 = vunpack.c.h.bf16 %v664_v3 }
  0x22   : > { %677 = vst [vmem:[%s785_s24 + $0x20] sm:$0xff] %v590_v14   ;;  %v600_v24 = vpack.c.bf16 %v336_v16, %v335_v15  ;;  %v263_v25 = vmul.f32 %v751_v0, %v529_v17  ;;  %v533_v26 = vunpack.c.l.bf16 %v665_v13  ;;  %v534_v27 = vunpack.c.h.bf16 %v665_v13  ;;  %v672_v14 = vld [vmem:[%s746_s17 + $0x80] sm:$0xff]  }
  0x23   : > { %678 = vst [vmem:[%s785_s24 + $0x28] sm:$0xff] %v595_v19   ;;  %v605_v28 = vpack.c.bf16 %v338_v21, %v337_v20  ;;  %v264_v29 = vmul.f32 %v751_v0, %v530_v22  ;;  %v537_v30 = vunpack.c.l.bf16 %v666_v18  ;;  %v538_v31 = vunpack.c.h.bf16 %v666_v18 }
  0x24   : > { %679 = vst [vmem:[%s785_s24 + $0x30] sm:$0xff] %v600_v24   ;;  %v303_v32 = vadd.f32 %v759_v6, %v263_v25  ;;  %v265_v33 = vmul.f32 %v751_v0, %v533_v26  ;;  %v266_v34 = vmul.f32 %v751_v0, %v534_v27  ;;  %v541_v35 = vunpack.c.l.bf16 %v667_v23 }
  0x25   : > { %680 = vst [vmem:[%s785_s24 + $0x38] sm:$0xff] %v605_v28   ;;  %v304_v36 = vadd.f32 %v759_v6, %v264_v29  ;;  %v267_v37 = vmul.f32 %v751_v0, %v537_v30  ;;  %v268_v38 = vmul.f32 %v751_v0, %v538_v31  ;;  %v542_v39 = vunpack.c.h.bf16 %v667_v23  ;;  %v673_v31 = vld [vmem:[%s746_s17 + $0x88] sm:$0xff]  }
  0x26   : > { %v339_v41 = vmax.f32 %v303_v32, 0.0  ;;  %v305_v42 = vadd.f32 %v759_v6, %v265_v33  ;;  %v306_v43 = vadd.f32 %v759_v6, %v266_v34  ;;  %v269_v44 = vmul.f32 %v751_v0, %v541_v35 }
  0x27   : > { %v340_v45 = vmax.f32 %v304_v36, 0.0  ;;  %v307_v46 = vadd.f32 %v759_v6, %v267_v37  ;;  %v308_v47 = vadd.f32 %v759_v6, %v268_v38  ;;  %v270_v48 = vmul.f32 %v751_v0, %v542_v39 }
  0x28   : > { %v341_v49 = vmax.f32 %v305_v42, 0.0  ;;  %v342_v50 = vmax.f32 %v306_v43, 0.0  ;;  %v309_v51 = vadd.f32 %v759_v6, %v269_v44  ;;  %v545_v52 = vunpack.c.l.bf16 %v668_v40 }
  0x29   : > { %v610_v54 = vpack.c.bf16 %v340_v45, %v339_v41  ;;  %v343_v55 = vmax.f32 %v307_v46, 0.0  ;;  %v344_v56 = vmax.f32 %v308_v47, 0.0  ;;  %v310_v57 = vadd.f32 %v759_v6, %v270_v48 }
  0x2a   : > { %v615_v59 = vpack.c.bf16 %v342_v50, %v341_v49  ;;  %v345_v60 = vmax.f32 %v309_v51, 0.0  ;;  %v546_v61 = vunpack.c.h.bf16 %v668_v40  ;;  %v271_v62 = vmul.f32 %v751_v0, %v545_v52 }
  0x2b   : > { %681 = vst [vmem:[%s785_s24 + $0x40] sm:$0xff] %v610_v54   ;;  %v620_v1 = vpack.c.bf16 %v344_v56, %v343_v55  ;;  %v346_v2 = vmax.f32 %v310_v57, 0.0  ;;  %v549_v3 = vunpack.c.l.bf16 %v669_v53  ;;  %v550_v4 = vunpack.c.h.bf16 %v669_v53 }
  0x2c   : > { %682 = vst [vmem:[%s785_s24 + $0x48] sm:$0xff] %v615_v59   ;;  %v272_v5 = vmul.f32 %v751_v0, %v546_v61  ;;  %v311_v7 = vadd.f32 %v759_v6, %v271_v62  ;;  %v553_v8 = vunpack.c.l.bf16 %v670_v58  ;;  %v554_v9 = vunpack.c.h.bf16 %v670_v58 }
  0x2d   : > { %683 = vst [vmem:[%s785_s24 + $0x50] sm:$0xff] %v620_v1   ;;  %v625_v10 = vpack.c.bf16 %v346_v2, %v345_v60  ;;  %v273_v11 = vmul.f32 %v751_v0, %v549_v3  ;;  %v274_v12 = vmul.f32 %v751_v0, %v550_v4  ;;  %v557_v13 = vunpack.c.l.bf16 %v671_v63 }
  0x2e   : > { %v312_v15 = vadd.f32 %v759_v6, %v272_v5  ;;  %v347_v16 = vmax.f32 %v311_v7, 0.0  ;;  %v275_v17 = vmul.f32 %v751_v0, %v553_v8  ;;  %v276_v18 = vmul.f32 %v751_v0, %v554_v9 }
  0x2f   : > { %684 = vst [vmem:[%s785_s24 + $0x58] sm:$0xff] %v625_v10   ;;  %v313_v19 = vadd.f32 %v759_v6, %v273_v11  ;;  %v314_v20 = vadd.f32 %v759_v6, %v274_v12  ;;  %v558_v21 = vunpack.c.h.bf16 %v671_v63  ;;  %v277_v22 = vmul.f32 %v751_v0, %v557_v13 }
  0x30   : > { %v348_v23 = vmax.f32 %v312_v15, 0.0  ;;  %v315_v24 = vadd.f32 %v759_v6, %v275_v17  ;;  %v316_v25 = vadd.f32 %v759_v6, %v276_v18  ;;  %v561_v26 = vunpack.c.l.bf16 %v672_v14 }
  0x31   : > { %v349_v27 = vmax.f32 %v313_v19, 0.0  ;;  %v350_v28 = vmax.f32 %v314_v20, 0.0  ;;  %v278_v29 = vmul.f32 %v751_v0, %v558_v21  ;;  %v317_v30 = vadd.f32 %v759_v6, %v277_v22 }
  0x32   : > { %v630_v32 = vpack.c.bf16 %v348_v23, %v347_v16  ;;  %v351_v33 = vmax.f32 %v315_v24, 0.0  ;;  %v352_v34 = vmax.f32 %v316_v25, 0.0  ;;  %v562_v35 = vunpack.c.h.bf16 %v672_v14 }
  0x33   : > { %v635_v36 = vpack.c.bf16 %v350_v28, %v349_v27  ;;  %v318_v37 = vadd.f32 %v759_v6, %v278_v29  ;;  %v353_v38 = vmax.f32 %v317_v30, 0.0  ;;  %v279_v39 = vmul.f32 %v751_v0, %v561_v26 }
  0x34   : > { %685 = vst [vmem:[%s785_s24 + $0x60] sm:$0xff] %v630_v32   ;;  %v640_v40 = vpack.c.bf16 %v352_v34, %v351_v33  ;;  %v280_v41 = vmul.f32 %v751_v0, %v562_v35  ;;  %v565_v42 = vunpack.c.l.bf16 %v673_v31  ;;  %v566_v43 = vunpack.c.h.bf16 %v673_v31 }
  0x35   : > { %686 = vst [vmem:[%s785_s24 + $0x68] sm:$0xff] %v635_v36   ;;  %v354_v44 = vmax.f32 %v318_v37, 0.0  ;;  %v319_v45 = vadd.f32 %v759_v6, %v279_v39 }
  0x36   : > { %687 = vst [vmem:[%s785_s24 + $0x70] sm:$0xff] %v640_v40   ;;  %v320_v46 = vadd.f32 %v759_v6, %v280_v41  ;;  %v281_v47 = vmul.f32 %v751_v0, %v565_v42  ;;  %v282_v48 = vmul.f32 %v751_v0, %v566_v43 }
  0x37   : > { %v645_v49 = vpack.c.bf16 %v354_v44, %v353_v38  ;;  %v355_v50 = vmax.f32 %v319_v45, 0.0 }
  0x38   : > { %v356_v51 = vmax.f32 %v320_v46, 0.0  ;;  %v321_v52 = vadd.f32 %v759_v6, %v281_v47  ;;  %v322_v53 = vadd.f32 %v759_v6, %v282_v48 }
  0x39   : > { %688 = vst [vmem:[%s785_s24 + $0x78] sm:$0xff] %v645_v49  }
  0x3a   : > { %v650_v54 = vpack.c.bf16 %v356_v51, %v355_v50  ;;  %v357_v55 = vmax.f32 %v321_v52, 0.0  ;;  %v358_v56 = vmax.f32 %v322_v53, 0.0 }
  0x3c   : > { %689 = vst [vmem:[%s785_s24 + $0x80] sm:$0xff] %v650_v54   ;;  %v655_v57 = vpack.c.bf16 %v358_v56, %v357_v55 }
  0x3e   : > { %690 = vst [vmem:[%s785_s24 + $0x88] sm:$0xff] %v655_v57  }
  0x3f PF: > { %s13_s12 = sadd.s32 1, %s708_s12  }
  0x40   : > { %p10_p4 = scmp.ge.s32.totalorder %s13_s12, 4  }
  0x42   :  { %12 = sbr.rel (!%p10_p4) target bundleno = 1 (0x1), region = 62 }

// kernel: basic_block_forward.6
= control target key start
LH: loop header
LB: loop body
LE: loop exit
PB: predicated region body
PF: predicated region fallthrough
CT: control target
= control target key end

     0   :  { %s7448_s15 = smov 0   ;;  %s9343_s0 = inlined_call_operand.vmem [shape: bf16[2,328,4], index: 0, kind: input, shape index: {}]   ;;  %s9344_s1 = inlined_call_operand.vmem [shape: bf16[9,4,128], index: 1, kind: input, shape index: {}]   ;;  %s9345_s2 = inlined_call_operand.vmem [shape: bf16[2,288,128], index: 2, kind: output, shape index: {0}]   ;;  %s9346_s3 = inlined_call_operand.vmem [shape: f32[2,1,128], index: 3, kind: output, shape index: {1}]   ;;  %s9347_s4 = inlined_call_operand.vmem [shape: f32[2,1,128], index: 4, kind: output, shape index: {2}]  }
   0x1 LB: > { %s6266_s16 = sadd.s32 4294967295, %s7419_s15   ;;  %p6270_p0 = scmp.ge.s32.totalorder %s7419_s15, 1  ;;  %s7419_s15 = sphi %s7448_s15, %s15_s15  }
   0x2   : > { %p167_p1 = scmp.lt.s32.totalorder %s7419_s15, 3 }
   0x4   : > { %p168_p2 = pnand %p6270_p0, %p167_p1 }
   0x6   : > { %171 = sbr.rel (%p168_p2) target bundleno = 885 (0x375), region = 28 }
   0xb   : > { %v324_v0 = vld [vmem:[%s9344_s1] sm:$0x3]  ;;  %vm470_vm0 = vcmask 1041408   ;;  %p199_p3 = scmp.lt.s32.totalorder %s6266_s16, 1  ;;  %v6454_v2 = vld [vmem:[%s9344_s1 + $0x4] sm:$0x3] }
   0xc   : > { %v472_v1 = vsel %vm470_vm0, %v324_v0, 0  ;;  %v6363_v3 = vld [vmem:[%s9344_s1 + $0x2] sm:$0x3]  ;;  %v1451_v4 = vsel %vm470_vm0, %v6454_v2, 0  ;;  %v6636_v6 = vld [vmem:[%s9344_s1 + $0x8] sm:$0x3] }
   0xd   : > { %7398 = vmatpush.bf16.msra.mxu1 %v472_v1  ;;  %7399 = vmatpush.bf16.msra.mxu2 %v472_v1  ;;  %s9439_s16 = smov (!%p199_p3, %s6266_s16), 1  ;;  %v1017_v5 = vsel %vm470_vm0, %v6363_v3, 0  ;;  %v2451_v7 = vsel %vm470_vm0, %v6636_v6, 0  ;;  %vm415_vm1 = vcmask 31744   ;;  %v6545_v12 = vld [vmem:[%s9344_s1 + $0x6] sm:$0x3] }
   0xe   : > { %481 = vmatpush.bf16.msra.mxu0 %v472_v1  ;;  %s7401_s25 = smul.u32 164, %s9439_s16  ;;  %7400 = vmatpush.bf16.msra.mxu3 %v472_v1  ;;  %v1884_v13 = vsel %vm470_vm0, %v6545_v12, 0  ;;  %vm1358_vm2 = vcmask 1046528   ;;  %v6818_v32 = vld [vmem:[%s9344_s1 + $0xc] sm:$0x3]  ;;  %vm2792_vm6 = vcmask 1045504   ;;  %s211_s21 = scalar_lea.vmem %s9346_s3, %s9439_s16 }
   0xf   : > { %v3318_v33 = vsel %vm470_vm0, %v6818_v32, 0  ;;  %v6909_v34 = vld [vmem:[%s9344_s1 + $0xe] sm:$0x3]  ;;  %v6727_v35 = vld [vmem:[%s9344_s1 + $0xa] sm:$0x3]  ;;  %vm4226_vm7 = vcmask 1044480   ;;  %s214_s24 = scalar_lea.vmem %s9347_s4, %s9439_s16 }
  0x10   : > { %s7478_s28 = scalar_lea.vmem %s9343_s0, %s7401_s25  ;;  %v3885_v36 = vsel %vm470_vm0, %v6909_v34, 0  ;;  %v2885_v37 = vsel %vm470_vm0, %v6727_v35, 0  ;;  %v7000_v38 = vld [vmem:[%s9344_s1 + $0x10] sm:$0x3]  ;;  %vm813_vm3 = vsmask.f32 7424 }
  0x11   : > { %1460 = vmatpush.bf16.msrb.mxu2 %v1451_v4  ;;  %1026 = vmatpush.bf16.msrb.mxu1 %v1017_v5  ;;  %v7134_v8 = vld [vmem:[%s7478_s28 + $0x28] sm:$0xff]  ;;  %v7139_v9 = vld [vmem:[%s7478_s28 + $0x50] sm:$0xff]  ;;  %v7129_v10 = vld [vmem:[%s7478_s28] sm:$0xff]  ;;  %v4319_v39 = vsel %vm470_vm0, %v7000_v38, 0  ;;  %vm2225_vm4 = vsmask.f32 6400 }
  0x12   : > { %2460 = vmatpush.bf16.msrb.mxu0 %v2451_v7  ;;  %6350 = vmatmul.msk.bf16.vlgmr.msra.gmra.mxu1 %vm415_vm1, %v7134_v8  ;;  %v7144_v11 = vld [vmem:[%s7478_s28 + $0x78] sm:$0xff]  ;;  %v7135_v14 = vld [vmem:[%s7478_s28 + $0x30] sm:$0xff]  ;;  %v7130_v16 = vld [vmem:[%s7478_s28 + $0x8] sm:$0xff]  ;;  %vm3659_vm5 = vsmask.f32 5376  ;;  %s7402_s13 = smul.u32 144, %s9439_s16 }
  0x13   : > { %6355 = vmatmul.msk.bf16.vlgmr.msra.gmra.mxu2 %vm415_vm1, %v7139_v9  ;;  %6345 = vmatmul.msk.bf16.vlgmr.msra.gmra.mxu0 %vm415_vm1, %v7129_v10  ;;  %v7140_v15 = vld [vmem:[%s7478_s28 + $0x58] sm:$0xff]  ;;  %v7145_v17 = vld [vmem:[%s7478_s28 + $0x80] sm:$0xff]  ;;  %v7131_v20 = vld [vmem:[%s7478_s28 + $0x10] sm:$0xff] }
  0x14   : > { %6360 = vmatmul.msk.bf16.vlgmr.msra.gmra.mxu3 %vm415_vm1, %v7144_v11  ;;  %v7136_v18 = vld [vmem:[%s7478_s28 + $0x38] sm:$0xff]  ;;  %v7141_v19 = vld [vmem:[%s7478_s28 + $0x60] sm:$0xff]  ;;  %v7146_v21 = vld [vmem:[%s7478_s28 + $0x88] sm:$0xff]  ;;  %s8516_s18 = scalar_lea.vmem %s9345_s2, %s7402_s13 }
  0x15   : > { %1893 = vmatpush.bf16.msrb.mxu3 %v1884_v13  ;;  %v6548_v22 = vld [vmem:[%s7478_s28 + $0x8] sm:$0xe]  ;;  %v7183_v23 = vld [vmem:[%s7478_s28 + $0x8] sm:$0xf0]  ;;  %v7184_v24 = vld [vmem:[%s7478_s28 + $0x10] sm:$0xff]  ;;  %3327 = vmatpush.bf16.msra.mxu2 %v3318_v33 }
  0x16   : > { %v6549_v25 = vor.u32 %v7183_v23, %v6548_v22  ;;  %v1793_v27 = vrot.slane %v7184_v24, 1  ;;  %v7137_v28 = vld [vmem:[%s7478_s28 + $0x40] sm:$0xff]  ;;  %v7142_v29 = vld [vmem:[%s7478_s28 + $0x68] sm:$0xff]  ;;  %v7132_v30 = vld [vmem:[%s7478_s28 + $0x18] sm:$0xff]  ;;  %2894 = vmatpush.bf16.msra.mxu1 %v2885_v37  ;;  %4328 = vmatpush.bf16.msra.mxu0 %v4319_v39 }
  0x17   : > { %v7185_v40 = vld [vmem:[%s7478_s28 + $0x18] sm:$0xff]  ;;  %v6639_v41 = vld [vmem:[%s7478_s28 + $0x8] sm:$0xe]  ;;  %v7201_v42 = vld [vmem:[%s7478_s28 + $0x8] sm:$0xf0] }
  0x18   : > { %v1792_v26 = vrot.slane %v6549_v25, 1  ;;  %v1795_v43 = vrot.slane %v7185_v40, 1  ;;  %v7138_v44 = vld [vmem:[%s7478_s28 + $0x48] sm:$0xff]  ;;  %v7143_v45 = vld [vmem:[%s7478_s28 + $0x70] sm:$0xff]  ;;  %v7133_v46 = vld [vmem:[%s7478_s28 + $0x20] sm:$0xff]  ;;  %v6640_v49 = vor.u32 %v7201_v42, %v6639_v41 }
  0x19   : > { %3894 = vmatpush.bf16.msra.mxu3 %v3885_v36  ;;  %v7147_v47 = vld [vmem:[%s7478_s28] sm:$0xff]  ;;  %v7202_v48 = vld [vmem:[%s7478_s28 + $0x10] sm:$0xff]  ;;  %v7148_v51 = vld [vmem:[%s7478_s28 + $0x8] sm:$0xff] }
  0x1a   : > { %v1794_v31 = vsel %vm1358_vm2, %v1792_v26, %v1793_v27  ;;  %v1796_v50 = vsel %vm1358_vm2, %v1793_v27, %v1795_v43  ;;  %v817_v52 = vshll.u32 %v7147_v47, 16  ;;  %v6457_v53 = vld [vmem:[%s7478_s28] sm:$0xe]  ;;  %v7165_v54 = vld [vmem:[%s7478_s28] sm:$0xf0]  ;;  %v2227_v55 = vshrl.u32 %v6640_v49, 16 }
  0x1b   : > { %v2230_v56 = vshll.u32 %v6640_v49, 16  ;;  %v2235_v57 = vshrl.u32 %v7202_v48, 16  ;;  %v2238_v58 = vshll.u32 %v7202_v48, 16  ;;  %v815_v59 = vshrl.u32 %v7147_v47, 16  ;;  %v7166_v62 = vld [vmem:[%s7478_s28 + $0x8] sm:$0xff]  ;;  %v7186_v4 = vld [vmem:[%s7478_s28 + $0x20] sm:$0xff] }
  0x1c   : > { %v819_v60 = vrot.slane %v817_v52, 1  ;;  %v822_v61 = vshll.u32 %v7148_v51, 16  ;;  %v6458_v63 = vor.u32 %v7165_v54, %v6457_v53  ;;  %v2229_v0 = vrot.slane %v2227_v55, 1  ;;  %v7167_v22 = vld [vmem:[%s7478_s28 + $0x10] sm:$0xff]  ;;  %v7187_v25 = vld [vmem:[%s7478_s28 + $0x28] sm:$0xff]  ;;  %v7204_v34 = vld [vmem:[%s7478_s28 + $0x20] sm:$0xff] }
  0x1d   : > { %v2232_v1 = vrot.slane %v2230_v56, 2  ;;  %v2237_v2 = vrot.slane %v2235_v57, 1  ;;  %v2240_v3 = vrot.slane %v2238_v58, 2  ;;  %v1360_v8 = vrot.slane %v7166_v62, 1  ;;  %v7150_v36 = vld [vmem:[%s7478_s28 + $0x18] sm:$0xff]  ;;  %v7205_v53 = vld [vmem:[%s7478_s28 + $0x28] sm:$0xff] }
  0x1e   : > { %v820_v5 = vor.u32 %v819_v60, %v815_v59  ;;  %v824_v6 = vrot.slane %v822_v61, 1  ;;  %v1359_v7 = vrot.slane %v6458_v63, 1  ;;  %v1797_v11 = vrot.slane %v7186_v4, 1  ;;  %v7168_v41 = vld [vmem:[%s7478_s28 + $0x18] sm:$0xff]  ;;  %v7151_v55 = vld [vmem:[%s7478_s28 + $0x20] sm:$0xff] }
  0x1f   : > { %v2233_v9 = vor.u32 %v2232_v1, %v2229_v0  ;;  %v2241_v10 = vor.u32 %v2240_v3, %v2237_v2  ;;  %v2253_v37 = vshrl.u32 %v7204_v34, 16  ;;  %v2256_v38 = vshll.u32 %v7204_v34, 16  ;;  %v7169_v60 = vld [vmem:[%s7478_s28 + $0x20] sm:$0xff]  ;;  %v7189_v63 = vld [vmem:[%s7478_s28 + $0x38] sm:$0xff] }
  0x20   : > { %v825_v12 = vsel %vm813_vm3, %v820_v5, %v824_v6  ;;  %v1361_v13 = vsel %vm1358_vm2, %v1359_v7, %v1360_v8  ;;  %v838_v40 = vshll.u32 %v7150_v36, 16  ;;  %v1364_v47 = vrot.slane %v7168_v41, 1 }
  0x21   : > { %v2255_v42 = vrot.slane %v2253_v37, 1  ;;  %v2262_v56 = vshrl.u32 %v7205_v53, 16  ;;  %v2265_v57 = vshll.u32 %v7205_v53, 16  ;;  %v842_v58 = vshrl.u32 %v7150_v36, 16  ;;  %v7207_v37 = vld [vmem:[%s7478_s28 + $0x38] sm:$0xff] }
  0x22   : > { %6351 = vmatmul.msk.bf16.gmra.mxu1 %vm415_vm1, %v7135_v14  ;;  %v2242_v14 = vsel %vm2225_vm4, %v2233_v9, %v2241_v10  ;;  %v846_v59 = vshll.u32 %v7151_v55, 16  ;;  %v1366_v2 = vrot.slane %v7169_v60, 1  ;;  %v1803_v4 = vrot.slane %v7189_v63, 1 }
  0x23   : > { %6356 = vmatmul.msk.bf16.gmra.mxu2 %vm415_vm1, %v7140_v15  ;;  %6346 = vmatmul.msk.bf16.gmra.mxu0 %vm415_vm1, %v7130_v16  ;;  %v7203_v15 = vld [vmem:[%s7478_s28 + $0x18] sm:$0xff]  ;;  %v1798_v16 = vsel %vm1358_vm2, %v1795_v43, %v1797_v11  ;;  %v2258_v43 = vrot.slane %v2256_v38, 2  ;;  %v2264_v61 = vrot.slane %v2262_v56, 1  ;;  %v2267_v62 = vrot.slane %v2265_v57, 2 }
  0x24   : > { %6361 = vmatmul.msk.bf16.gmra.mxu3 %vm415_vm1, %v7145_v17  ;;  %v7149_v17 = vld [vmem:[%s7478_s28 + $0x10] sm:$0xff]  ;;  %v848_v1 = vrot.slane %v846_v59, 1  ;;  %v1367_v7 = vsel %vm1358_vm2, %v1364_v47, %v1366_v2  ;;  %v2283_v41 = vshll.u32 %v7207_v37, 16 }
  0x25   : > { %v834_v39 = vshrl.u32 %v7149_v17, 16  ;;  %v2259_v48 = vor.u32 %v2258_v43, %v2255_v42  ;;  %v2268_v3 = vor.u32 %v2267_v62, %v2264_v61 }
  0x27   : > { %v2269_v9 = vsel %vm2225_vm4, %v2259_v48, %v2268_v3 }
  0x32   : > { %6352 = vmatmul.msk.bf16.gmra.mxu1 %vm415_vm1, %v7136_v18  ;;  %v2244_v18 = vshrl.u32 %v7203_v15, 16 }
  0x33   : > { %6357 = vmatmul.msk.bf16.gmra.mxu2 %vm415_vm1, %v7141_v19  ;;  %6347 = vmatmul.msk.bf16.gmra.mxu0 %vm415_vm1, %v7131_v20  ;;  %v2247_v19 = vshll.u32 %v7203_v15, 16  ;;  %v826_v20 = vshrl.u32 %v7148_v51, 16 }
  0x34   : > { %6362 = vmatmul.msk.bf16.gmra.mxu3 %vm415_vm1, %v7146_v21  ;;  %v830_v21 = vshll.u32 %v7149_v17, 16  ;;  %v2246_v23 = vrot.slane %v2244_v18, 1  ;;  %v850_v17 = vshrl.u32 %v7151_v55, 16 }
  0x35   : > { %v2249_v24 = vrot.slane %v2247_v19, 2  ;;  %v828_v26 = vor.u32 %v826_v20, %v824_v6  ;;  %v7170_v19 = vld [vmem:[%s7478_s28 + $0x28] sm:$0xff] }
  0x36   : > { %v832_v27 = vrot.slane %v830_v21, 1 }
  0x42   : > { %6353 = vmatmul.msk.bf16.gmra.mxu1 %vm415_vm1, %v7137_v28  ;;  %v1362_v28 = vrot.slane %v7167_v22, 1 }
  0x43   : > { %6358 = vmatmul.msk.bf16.gmra.mxu2 %vm415_vm1, %v7142_v29  ;;  %6348 = vmatmul.msk.bf16.gmra.mxu0 %vm415_vm1, %v7132_v30  ;;  %v2250_v29 = vor.u32 %v2249_v24, %v2246_v23  ;;  %v1799_v30 = vrot.slane %v7187_v25, 1  ;;  %v7190_v24 = vld [vmem:[%s7478_s28 + $0x40] sm:$0xff]  ;;  %v852_v25 = vor.u32 %v850_v17, %v848_v1 }
  0x44   : > { %6618 = vmatmul.msk.bf16.vlgmr.msrb.gmra.mxu3 %vm415_vm1, %v1794_v31  ;;  %v833_v31 = vsel %vm813_vm3, %v828_v26, %v832_v27  ;;  %v1363_v32 = vsel %vm1358_vm2, %v1360_v8, %v1362_v28  ;;  %v1365_v51 = vsel %vm1358_vm2, %v1362_v28, %v1364_v47 }
  0x45   : > { %v2251_v33 = vsel %vm2225_vm4, %v2241_v10, %v2250_v29  ;;  %v1800_v35 = vsel %vm1358_vm2, %v1797_v11, %v1799_v30  ;;  %v2260_v52 = vsel %vm2225_vm4, %v2250_v29, %v2259_v48  ;;  %v7206_v10 = vld [vmem:[%s7478_s28 + $0x30] sm:$0xff] }
  0x52   : > { %6354 = vmatmul.msk.bf16.gmra.mxu1 %vm415_vm1, %v7138_v44  ;;  %v7188_v44 = vld [vmem:[%s7478_s28 + $0x30] sm:$0xff] }
  0x53   : > { %6359 = vmatmul.msk.bf16.gmra.mxu2 %vm415_vm1, %v7143_v45  ;;  %6349 = vmatmul.msk.bf16.gmra.mxu0 %vm415_vm1, %v7133_v46  ;;  %v836_v45 = vor.u32 %v834_v39, %v832_v27  ;;  %v840_v46 = vrot.slane %v838_v40, 1  ;;  %v1801_v49 = vrot.slane %v7188_v44, 1  ;;  %v1368_v27 = vrot.slane %v7170_v19, 1  ;;  %v7153_v39 = vld [vmem:[%s7478_s28 + $0x30] sm:$0xff] }
  0x54   : > { %6619 = vmatmul.msk.bf16.gmra.mxu3 %vm415_vm1, %v1796_v50  ;;  %v2280_v40 = vshrl.u32 %v7207_v37, 16  ;;  %v7209_v37 = vld [vmem:[%s7478_s28 + $0x48] sm:$0xff] }
  0x55   : > { %v841_v50 = vsel %vm813_vm3, %v836_v45, %v840_v46  ;;  %v1802_v54 = vsel %vm1358_vm2, %v1799_v30, %v1801_v49  ;;  %v844_v0 = vor.u32 %v842_v58, %v840_v46  ;;  %v1804_v11 = vsel %vm1358_vm2, %v1801_v49, %v1803_v4  ;;  %v7171_v46 = vld [vmem:[%s7478_s28 + $0x30] sm:$0xff] }
  0x56   : > { %v1805_v30 = vrot.slane %v7190_v24, 1  ;;  %v862_v45 = vshll.u32 %v7153_v39, 16  ;;  %v2282_v49 = vrot.slane %v2280_v40, 1  ;;  %v2298_v40 = vshrl.u32 %v7209_v37, 16 }
  0x57   : > { %v849_v6 = vsel %vm813_vm3, %v844_v0, %v848_v1  ;;  %v7208_v0 = vld [vmem:[%s7478_s28 + $0x40] sm:$0xff] }
  0x58   : > { %v1806_v38 = vsel %vm1358_vm2, %v1803_v4, %v1805_v30  ;;  %v864_v53 = vrot.slane %v862_v45, 1  ;;  %v2292_v4 = vshll.u32 %v7208_v0, 16 }
  0x5a   : > { %v2294_v17 = vrot.slane %v2292_v4, 2 }
  0x62   : > { %6436 = vmatmul.msk.bf16.vlgmr.msrb.gmra.mxu1 %vm415_vm1, %v825_v12  ;;  %v7152_v12 = vld [vmem:[%s7478_s28 + $0x28] sm:$0xff] }
  0x63   : > { %6527 = vmatmul.msk.bf16.vlgmr.msrb.gmra.mxu2 %vm415_vm1, %v1361_v13  ;;  %6709 = vmatmul.msk.bf16.vlgmr.msrb.gmra.mxu0 %vm415_vm1, %v2242_v14  ;;  %v2271_v13 = vshrl.u32 %v7206_v10, 16  ;;  %v2274_v14 = vshll.u32 %v7206_v10, 16  ;;  %v854_v18 = vshll.u32 %v7152_v12, 16  ;;  %v858_v44 = vshrl.u32 %v7152_v12, 16 }
  0x64   : > { %6620 = vmatmul.msk.bf16.gmra.mxu3 %vm415_vm1, %v1798_v16 }
  0x65   : > { %v2273_v22 = vrot.slane %v2271_v13, 1  ;;  %v2276_v23 = vrot.slane %v2274_v14, 2  ;;  %v856_v26 = vrot.slane %v854_v18, 1  ;;  %v7192_v18 = vld [vmem:[%s7478_s28 + $0x50] sm:$0xff] }
  0x67   : > { %v2277_v28 = vor.u32 %v2276_v23, %v2273_v22 }
  0x69   : > { %v2278_v36 = vsel %vm2225_vm4, %v2268_v3, %v2277_v28  ;;  %v2289_v3 = vshrl.u32 %v7208_v0, 16 }
  0x6b   : > { %v2291_v14 = vrot.slane %v2289_v3, 1 }
  0x6d   : > { %v2295_v24 = vor.u32 %v2294_v17, %v2291_v14  ;;  %v7210_v14 = vld [vmem:[%s7478_s28 + $0x50] sm:$0xff] }
  0x72   : > { %6437 = vmatmul.msk.bf16.gmra.mxu1 %vm415_vm1, %v833_v31 }
  0x73   : > { %6528 = vmatmul.msk.bf16.gmra.mxu2 %vm415_vm1, %v1363_v32  ;;  %6710 = vmatmul.msk.bf16.gmra.mxu0 %vm415_vm1, %v2251_v33  ;;  %v857_v32 = vsel %vm813_vm3, %v852_v25, %v856_v26  ;;  %v1369_v33 = vsel %vm1358_vm2, %v1366_v2, %v1368_v27  ;;  %v7154_v2 = vld [vmem:[%s7478_s28 + $0x38] sm:$0xff] }
  0x74   : > { %6621 = vmatmul.msk.bf16.gmra.mxu3 %vm415_vm1, %v1800_v35  ;;  %v870_v10 = vshll.u32 %v7154_v2, 16 }
  0x76   : > { %v872_v22 = vrot.slane %v870_v10, 1 }
  0x82   : > { %6438 = vmatmul.msk.bf16.gmra.mxu1 %vm415_vm1, %v841_v50  ;;  %v2285_v50 = vrot.slane %v2283_v41, 2  ;;  %v2301_v41 = vshll.u32 %v7209_v37, 16 }
  0x83   : > { %6529 = vmatmul.msk.bf16.gmra.mxu2 %vm415_vm1, %v1365_v51  ;;  %6711 = vmatmul.msk.bf16.gmra.mxu0 %vm415_vm1, %v2260_v52  ;;  %v7191_v51 = vld [vmem:[%s7478_s28 + $0x48] sm:$0xff]  ;;  %v860_v52 = vor.u32 %v858_v44, %v856_v26  ;;  %v1809_v26 = vrot.slane %v7192_v18, 1 }
  0x84   : > { %6622 = vmatmul.msk.bf16.gmra.mxu3 %vm415_vm1, %v1802_v54  ;;  %v1370_v54 = vrot.slane %v7171_v46, 1  ;;  %v2286_v55 = vor.u32 %v2285_v50, %v2282_v49  ;;  %v1807_v57 = vrot.slane %v7191_v51, 1  ;;  %v874_v46 = vshrl.u32 %v7154_v2, 16  ;;  %v7173_v50 = vld [vmem:[%s7478_s28 + $0x40] sm:$0xff]  ;;  %v7156_v18 = vld [vmem:[%s7478_s28 + $0x48] sm:$0xff] }
  0x85   : > { %v865_v59 = vsel %vm813_vm3, %v860_v52, %v864_v53 }
  0x86   : > { %v1371_v60 = vsel %vm1358_vm2, %v1368_v27, %v1370_v54  ;;  %v2287_v63 = vsel %vm2225_vm4, %v2277_v28, %v2286_v55  ;;  %v1808_v1 = vsel %vm1358_vm2, %v1805_v30, %v1807_v57 }
  0x8f   : > { %v7589_v5 = vpop.f32.mrf.mxu1 }
  0x90   : > { %v7593_v8 = vpop.f32.mrf.mxu0 }
  0x92   : > { %6439 = vmatmul.msk.bf16.gmra.mxu1 %vm415_vm1, %v849_v6 }
  0x93   : > { %6530 = vmatmul.msk.bf16.gmra.mxu2 %vm415_vm1, %v1367_v7  ;;  %6712 = vmatmul.msk.bf16.gmra.mxu0 %vm415_vm1, %v2269_v9  ;;  %v866_v9 = vshrl.u32 %v7153_v39, 16  ;;  %v7155_v39 = vld [vmem:[%s7478_s28 + $0x40] sm:$0xff] }
  0x94   : > { %6623 = vmatmul.msk.bf16.gmra.mxu3 %vm415_vm1, %v1804_v11  ;;  %v7172_v11 = vld [vmem:[%s7478_s28 + $0x38] sm:$0xff]  ;;  %v878_v49 = vshll.u32 %v7155_v39, 16 }
  0x95   : > { %v868_v19 = vor.u32 %v866_v9, %v864_v53  ;;  %v1372_v23 = vrot.slane %v7172_v11, 1  ;;  %v2300_v53 = vrot.slane %v2298_v40, 1 }
  0x96   : > { %v7603_v15 = vpop.f32.mrf.mxu2 }
  0x97   : > { %v7605_v16 = vpop.f32.mrf.mxu1  ;;  %v7608_v20 = vpop.f32.mrf.mxu3  ;;  %v873_v28 = vsel %vm813_vm3, %v868_v19, %v872_v22  ;;  %v1373_v30 = vsel %vm1358_vm2, %v1370_v54, %v1372_v23  ;;  %v2303_v54 = vrot.slane %v2301_v41, 2  ;;  %v2307_v19 = vshrl.u32 %v7210_v14, 16  ;;  %v7194_v41 = vld [vmem:[%s7478_s28 + $0x60] sm:$0xff] }
  0x98   : > { %v7610_v21 = vpop.f32.mrf.mxu0 }
  0x9e   : > { %v7613_v29 = vpop.f32.mrf.mxu2 }
  0x9f   : > { %v7615_v31 = vpop.f32.mrf.mxu1  ;;  %v7619_v34 = vpop.f32.mrf.mxu3 }
  0xa0   : > { %v7621_v35 = vpop.f32.mrf.mxu0 }
  0xa2   : > { %6440 = vmatmul.msk.bf16.gmra.mxu1 %vm415_vm1, %v857_v32 }
  0xa3   : > { %6531 = vmatmul.msk.bf16.gmra.mxu2 %vm415_vm1, %v1369_v33  ;;  %6713 = vmatmul.msk.bf16.gmra.mxu0 %vm415_vm1, %v2278_v36  ;;  %v2296_v36 = vsel %vm2225_vm4, %v2286_v55, %v2295_v24  ;;  %v7193_v55 = vld [vmem:[%s7478_s28 + $0x58] sm:$0xff] }
  0xa4   : > { %6624 = vmatmul.msk.bf16.gmra.mxu3 %vm415_vm1, %v1806_v38  ;;  %v1810_v38 = vsel %vm1358_vm2, %v1807_v57, %v1809_v26  ;;  %v876_v57 = vor.u32 %v874_v46, %v872_v22  ;;  %v2310_v22 = vshll.u32 %v7210_v14, 16 }
  0xa6   : > { %v7631_v42 = vpop.f32.mrf.mxu2  ;;  %v2312_v40 = vrot.slane %v2310_v22, 2 }
  0xa7   : > { %v7633_v43 = vpop.f32.mrf.mxu1  ;;  %v7636_v47 = vpop.f32.mrf.mxu3 }
  0xa8   : > { %9361 = vst [vmem:[#allocation3_spill] sm:$0xff] %v7636_v47  ;;  %v7638_v48 = vpop.f32.mrf.mxu0 }
  0xae   : > { %v7641_v56 = vpop.f32.mrf.mxu2 }
  0xaf   : > { %v7643_v58 = vpop.f32.mrf.mxu1  ;;  %v7647_v61 = vpop.f32.mrf.mxu3 }
  0xb0   : > { %9362 = vst [vmem:[#allocation4_spill] sm:$0xff] %v7647_v61  ;;  %v7649_v62 = vpop.f32.mrf.mxu0 }
  0xb2   : > { %6441 = vmatmul.msk.bf16.gmra.mxu1 %vm415_vm1, %v865_v59  ;;  %v880_v59 = vrot.slane %v878_v49, 1 }
  0xb3   : > { %6532 = vmatmul.msk.bf16.gmra.mxu2 %vm415_vm1, %v1371_v60  ;;  %6714 = vmatmul.msk.bf16.gmra.mxu0 %vm415_vm1, %v2287_v63  ;;  %v1374_v60 = vrot.slane %v7173_v50, 1  ;;  %v2304_v63 = vor.u32 %v2303_v54, %v2300_v53 }
  0xb4   : > { %6625 = vmatmul.msk.bf16.gmra.mxu3 %vm415_vm1, %v1808_v1  ;;  %v1811_v1 = vrot.slane %v7193_v55, 1  ;;  %v881_v2 = vsel %vm813_vm3, %v876_v57, %v880_v59  ;;  %v1813_v55 = vrot.slane %v7194_v41, 1 }
  0xb5   : > { %v1375_v4 = vsel %vm1358_vm2, %v1372_v23, %v1374_v60  ;;  %v2305_v11 = vsel %vm2225_vm4, %v2295_v24, %v2304_v63  ;;  %v882_v24 = vshrl.u32 %v7155_v39, 16 }
  0xb6   : > { %v7659_v6 = vpop.f32.mrf.mxu2  ;;  %v1812_v17 = vsel %vm1358_vm2, %v1809_v26, %v1811_v1 }
  0xb7   : > { %v7661_v7 = vpop.f32.mrf.mxu1  ;;  %v7664_v12 = vpop.f32.mrf.mxu3  ;;  %v884_v46 = vor.u32 %v882_v24, %v880_v59  ;;  %v1814_v59 = vsel %vm1358_vm2, %v1811_v1, %v1813_v55  ;;  %v7175_v1 = vld [vmem:[%s7478_s28 + $0x50] sm:$0xff] }
  0xb8   : > { %9363 = vst [vmem:[#allocation5_spill] sm:$0xff] %v7664_v12  ;;  %v7666_v13 = vpop.f32.mrf.mxu0 }
  0xbe   : > { %v7669_v25 = vpop.f32.mrf.mxu2 }
  0xbf   : > { %v7671_v27 = vpop.f32.mrf.mxu1  ;;  %v7675_v32 = vpop.f32.mrf.mxu3 }
  0xc0   : > { %9364 = vst [vmem:[#allocation6_spill] sm:$0xff] %v7675_v32  ;;  %v7677_v33 = vpop.f32.mrf.mxu0  ;;  %v7195_v32 = vld [vmem:[%s7478_s28 + $0x68] sm:$0xff] }
  0xc2   : > { %6442 = vmatmul.msk.bf16.gmra.mxu1 %vm415_vm1, %v873_v28 }
  0xc3   : > { %6533 = vmatmul.msk.bf16.gmra.mxu2 %vm415_vm1, %v1373_v30  ;;  %6715 = vmatmul.msk.bf16.gmra.mxu0 %vm415_vm1, %v2296_v36  ;;  %v886_v30 = vshll.u32 %v7156_v18, 16  ;;  %v7174_v36 = vld [vmem:[%s7478_s28 + $0x48] sm:$0xff] }
  0xc4   : > { %6626 = vmatmul.msk.bf16.gmra.mxu3 %vm415_vm1, %v1810_v38  ;;  %v2309_v38 = vrot.slane %v2307_v19, 1  ;;  %v1376_v50 = vrot.slane %v7174_v36, 1  ;;  %v7157_v19 = vld [vmem:[%s7478_s28 + $0x50] sm:$0xff] }
  0xc5   : > { %v888_v49 = vrot.slane %v886_v30, 1 }
  0xc6   : > { %v7687_v44 = vpop.f32.mrf.mxu2  ;;  %v2313_v53 = vor.u32 %v2312_v40, %v2309_v38  ;;  %v890_v38 = vshrl.u32 %v7156_v18, 16  ;;  %v894_v40 = vshll.u32 %v7157_v19, 16 }
  0xc7   : > { %v7689_v45 = vpop.f32.mrf.mxu1  ;;  %v7692_v51 = vpop.f32.mrf.mxu3  ;;  %v889_v39 = vsel %vm813_vm3, %v884_v46, %v888_v49 }
  0xc8   : > { %v7694_v52 = vpop.f32.mrf.mxu0  ;;  %v2314_v14 = vsel %vm2225_vm4, %v2304_v63, %v2313_v53 }
  0xce   : > { %v7697_v0 = vpop.f32.mrf.mxu2 }
  0xcf   : > { %v7699_v3 = vpop.f32.mrf.mxu1  ;;  %v7703_v9 = vpop.f32.mrf.mxu3 }
  0xd0   : > { %v7705_v10 = vpop.f32.mrf.mxu0 }
  0xd2   : > { %6443 = vmatmul.msk.bf16.gmra.mxu1 %vm415_vm1, %v881_v2  ;;  %v1377_v2 = vsel %vm1358_vm2, %v1374_v60, %v1376_v50 }
  0xd3   : > { %6534 = vmatmul.msk.bf16.gmra.mxu2 %vm415_vm1, %v1375_v4  ;;  %6716 = vmatmul.msk.bf16.gmra.mxu0 %vm415_vm1, %v2305_v11 }
  0xd4   : > { %6627 = vmatmul.msk.bf16.gmra.mxu3 %vm415_vm1, %v1812_v17  ;;  %v7211_v17 = vld [vmem:[%s7478_s28 + $0x58] sm:$0xff] }
  0xd5   : > { %v2316_v60 = vshrl.u32 %v7211_v17, 16  ;;  %v2319_v24 = vshll.u32 %v7211_v17, 16  ;;  %v1378_v17 = vrot.slane %v7175_v1, 1 }
  0xd6   : > { %v7715_v23 = vpop.f32.mrf.mxu2 }
  0xd7   : > { %v7717_v28 = vpop.f32.mrf.mxu1  ;;  %v7720_v26 = vpop.f32.mrf.mxu3 }
  0xd8   : > { %v7722_v37 = vpop.f32.mrf.mxu0 }
  0xde   : > { %v7725_v54 = vpop.f32.mrf.mxu2 }
  0xdf   : > { %v1028_v57 = vpop.f32.mrf.mxu1  ;;  %v7729_v4 = vpop.f32.mrf.mxu3 }
  0xe0   : > { %v2462_v11 = vpop.f32.mrf.mxu0  ;;  %v1118_v22 = vadd.f32 %v1028_v57, %v7593_v8  ;;  %v892_v8 = vor.u32 %v890_v38, %v888_v49  ;;  %v896_v57 = vrot.slane %v894_v40, 1  ;;  %v7212_v38 = vld [vmem:[%s7478_s28 + $0x60] sm:$0xff] }
  0xe2   : > { %6444 = vmatmul.msk.bf16.gmra.mxu1 %vm415_vm1, %v889_v39 }
  0xe3   : > { %6535 = vmatmul.msk.bf16.gmra.mxu2 %vm415_vm1, %v1377_v2  ;;  %6717 = vmatmul.msk.bf16.gmra.mxu0 %vm415_vm1, %v2314_v14  ;;  %v2318_v2 = vrot.slane %v2316_v60, 1  ;;  %v2321_v14 = vrot.slane %v2319_v24, 2  ;;  %v1379_v60 = vsel %vm1358_vm2, %v1376_v50, %v1378_v17  ;;  %v7158_v50 = vld [vmem:[%s7478_s28 + $0x58] sm:$0xff] }
  0xe4   : > { %6628 = vmatmul.msk.bf16.gmra.mxu3 %vm415_vm1, %v1814_v59 }
  0xe6   : > { %v1462_v30 = vpop.f32.mrf.mxu2 }
  0xe7   : > { %v1552_v63 = vadd.f32 %v1462_v30, %v1118_v22  ;;  %v1030_v36 = vpop.f32.mrf.mxu1  ;;  %v7741_v41 = vpop.f32.mrf.mxu3  ;;  %v2322_v22 = vor.u32 %v2321_v14, %v2318_v2  ;;  %v1815_v30 = vrot.slane %v7195_v32, 1  ;;  %v7176_v2 = vld [vmem:[%s7478_s28 + $0x58] sm:$0xff] }
  0xe8   : > { %v2464_v39 = vpop.f32.mrf.mxu0  ;;  %v1119_v59 = vadd.f32 %v1030_v36, %v7610_v21 }
  0xe9   : > { %v1985_v46 = vadd.f32 %v7692_v51, %v1552_v63  ;;  %v897_v51 = vsel %vm813_vm3, %v892_v8, %v896_v57  ;;  %v2323_v49 = vsel %vm2225_vm4, %v2313_v53, %v2322_v22  ;;  %v1816_v21 = vsel %vm1358_vm2, %v1813_v55, %v1815_v30 }
  0xea   : > { %v898_v55 = vshrl.u32 %v7157_v19, 16 }
  0xeb   : > { %v7745_v12 = vadd.f32 %v2462_v11, %v1985_v46  ;;  %v902_v46 = vshll.u32 %v7158_v50, 16 }
  0xee   : > { %v1464_v18 = vpop.f32.mrf.mxu2 }
  0xef   : > { %v1553_v61 = vadd.f32 %v1464_v18, %v1119_v59  ;;  %v1033_v47 = vpop.f32.mrf.mxu1  ;;  %v7750_v24 = vpop.f32.mrf.mxu3 }
  0xf0   : > { %v2467_v63 = vpop.f32.mrf.mxu0  ;;  %v1120_v36 = vadd.f32 %v1033_v47, %v7621_v35  ;;  %v900_v35 = vor.u32 %v898_v55, %v896_v57  ;;  %v904_v47 = vrot.slane %v902_v46, 1  ;;  %v7213_v55 = vld [vmem:[%s7478_s28 + $0x68] sm:$0xff] }
  0xf1   : > { %v1986_v11 = vadd.f32 %v7703_v9, %v1553_v61  ;;  %v2325_v61 = vshrl.u32 %v7212_v38, 16  ;;  %v2328_v9 = vshll.u32 %v7212_v38, 16 }
  0xf2   : > { %6445 = vmatmul.msk.bf16.gmra.mxu1 %vm415_vm1, %v897_v51  ;;  %v7196_v51 = vld [vmem:[%s7478_s28 + $0x70] sm:$0xff] }
  0xf3   : > { %6536 = vmatmul.msk.bf16.gmra.mxu2 %vm415_vm1, %v1379_v60  ;;  %v7758_v32 = vadd.f32 %v2464_v39, %v1986_v11  ;;  %6718 = vmatmul.msk.bf16.gmra.mxu0 %vm415_vm1, %v2323_v49  ;;  %v2327_v59 = vrot.slane %v2325_v61, 1  ;;  %v2330_v18 = vrot.slane %v2328_v9, 2  ;;  %v1380_v11 = vrot.slane %v7176_v2, 1 }
  0xf4   : > { %6629 = vmatmul.msk.bf16.gmra.mxu3 %vm415_vm1, %v1816_v21  ;;  %v1817_v21 = vrot.slane %v7196_v51, 1  ;;  %v2337_v2 = vshll.u32 %v7213_v55, 16  ;;  %v7177_v51 = vld [vmem:[%s7478_s28 + $0x60] sm:$0xff] }
  0xf5   : > { %v2331_v38 = vor.u32 %v2330_v18, %v2327_v59  ;;  %v1381_v61 = vsel %vm1358_vm2, %v1378_v17, %v1380_v11  ;;  %v7159_v17 = vld [vmem:[%s7478_s28 + $0x60] sm:$0xff] }
  0xf6   : > { %v1467_v53 = vpop.f32.mrf.mxu2  ;;  %v910_v18 = vshll.u32 %v7159_v17, 16 }
  0xf7   : > { %v1554_v40 = vadd.f32 %v1467_v53, %v1120_v36  ;;  %v1035_v1 = vpop.f32.mrf.mxu1  ;;  %v7765_v14 = vpop.f32.mrf.mxu3  ;;  %v2332_v57 = vsel %vm2225_vm4, %v2322_v22, %v2331_v38 }
  0xf8   : > { %v2469_v8 = vpop.f32.mrf.mxu0  ;;  %v1121_v49 = vadd.f32 %v1035_v1, %v7638_v48  ;;  %v1818_v48 = vsel %vm1358_vm2, %v1815_v30, %v1817_v21  ;;  %v906_v30 = vshrl.u32 %v7158_v50, 16 }
  0xf9   : > { %v1987_v39 = vadd.f32 %v7720_v26, %v1554_v40  ;;  %v905_v26 = vsel %vm813_vm3, %v900_v35, %v904_v47 }
  0xfb   : > { %v7769_v60 = vadd.f32 %v2467_v63, %v1987_v39 }
  0xfe   : > { %v1469_v19 = vpop.f32.mrf.mxu2 }
  0xff   : > { %v1555_v36 = vadd.f32 %v1469_v19, %v1121_v49  ;;  %v1038_v53 = vpop.f32.mrf.mxu1  ;;  %v7774_v9 = vpop.f32.mrf.mxu3 }
 0x100   : > { %v2472_v40 = vpop.f32.mrf.mxu0  ;;  %v1122_v46 = vadd.f32 %v1038_v53, %v7649_v62  ;;  %v908_v62 = vor.u32 %v906_v30, %v904_v47  ;;  %v912_v53 = vrot.slane %v910_v18, 1  ;;  %v7214_v30 = vld [vmem:[%s7478_s28 + $0x70] sm:$0xff] }
 0x101   : > { %v1988_v63 = vadd.f32 %v7729_v4, %v1555_v36  ;;  %v2334_v4 = vshrl.u32 %v7213_v55, 16  ;;  %v2339_v36 = vrot.slane %v2337_v2, 2 }
 0x102   : > { %6446 = vmatmul.msk.bf16.gmra.mxu1 %vm415_vm1, %v905_v26  ;;  %v7197_v26 = vld [vmem:[%s7478_s28 + $0x78] sm:$0xff] }
 0x103   : > { %6537 = vmatmul.msk.bf16.gmra.mxu2 %vm415_vm1, %v1381_v61  ;;  %v7782_v1 = vadd.f32 %v2469_v8, %v1988_v63  ;;  %6719 = vmatmul.msk.bf16.gmra.mxu0 %vm415_vm1, %v2332_v57  ;;  %v2336_v19 = vrot.slane %v2334_v4, 1  ;;  %v1382_v63 = vrot.slane %v7177_v51, 1  ;;  %v2346_v51 = vshll.u32 %v7214_v30, 16 }
 0x104   : > { %6630 = vmatmul.msk.bf16.gmra.mxu3 %vm415_vm1, %v1818_v48  ;;  %v1819_v48 = vrot.slane %v7197_v26, 1  ;;  %v7178_v26 = vld [vmem:[%s7478_s28 + $0x68] sm:$0xff] }
 0x105   : > { %v2340_v55 = vor.u32 %v2339_v36, %v2336_v19  ;;  %v1383_v4 = vsel %vm1358_vm2, %v1380_v11, %v1382_v63  ;;  %v7160_v11 = vld [vmem:[%s7478_s28 + $0x68] sm:$0xff] }
 0x106   : > { %v1472_v22 = vpop.f32.mrf.mxu2  ;;  %v918_v36 = vshll.u32 %v7160_v11, 16 }
 0x107   : > { %v1556_v39 = vadd.f32 %v1472_v22, %v1122_v46  ;;  %v1040_v59 = vpop.f32.mrf.mxu1  ;;  %v7789_v35 = vpop.f32.mrf.mxu3  ;;  %v2341_v47 = vsel %vm2225_vm4, %v2331_v38, %v2340_v55 }
 0x108   : > { %v2474_v49 = vpop.f32.mrf.mxu0  ;;  %v1123_v57 = vadd.f32 %v1040_v59, %v7666_v13  ;;  %v1820_v13 = vsel %vm1358_vm2, %v1817_v21, %v1819_v48  ;;  %v914_v21 = vshrl.u32 %v7159_v17, 16 }
 0x109   : > { %v1989_v8 = vadd.f32 %v7741_v41, %v1556_v39  ;;  %v913_v41 = vsel %vm813_vm3, %v908_v62, %v912_v53 }
 0x10b   : > { %v7793_v61 = vadd.f32 %v2472_v40, %v1989_v8 }
 0x10e   : > { %v1474_v50 = vpop.f32.mrf.mxu2 }
 0x10f   : > { %v1557_v46 = vadd.f32 %v1474_v50, %v1123_v57  ;;  %v1043_v22 = vpop.f32.mrf.mxu1  ;;  %v7798_v2 = vpop.f32.mrf.mxu3 }
 0x110   : > { %v2477_v39 = vpop.f32.mrf.mxu0  ;;  %v1124_v18 = vadd.f32 %v1043_v22, %v7677_v33  ;;  %v916_v33 = vor.u32 %v914_v21, %v912_v53  ;;  %v920_v22 = vrot.slane %v918_v36, 1  ;;  %v7215_v21 = vld [vmem:[%s7478_s28 + $0x78] sm:$0xff] }
 0x111   : > { %v1990_v40 = vadd.f32 %v7750_v24, %v1557_v46  ;;  %v2343_v24 = vshrl.u32 %v7214_v30, 16  ;;  %v2348_v46 = vrot.slane %v2346_v51, 2 }
 0x112   : > { %6447 = vmatmul.msk.bf16.gmra.mxu1 %vm415_vm1, %v913_v41  ;;  %v7198_v41 = vld [vmem:[%s7478_s28 + $0x80] sm:$0xff] }
 0x113   : > { %6538 = vmatmul.msk.bf16.gmra.mxu2 %vm415_vm1, %v1383_v4  ;;  %v7806_v59 = vadd.f32 %v2474_v49, %v1990_v40  ;;  %6720 = vmatmul.msk.bf16.gmra.mxu0 %vm415_vm1, %v2341_v47  ;;  %v2345_v50 = vrot.slane %v2343_v24, 1  ;;  %v1384_v40 = vrot.slane %v7178_v26, 1  ;;  %v2355_v26 = vshll.u32 %v7215_v21, 16 }
 0x114   : > { %6631 = vmatmul.msk.bf16.gmra.mxu3 %vm415_vm1, %v1820_v13  ;;  %v1821_v13 = vrot.slane %v7198_v41, 1  ;;  %v7179_v41 = vld [vmem:[%s7478_s28 + $0x70] sm:$0xff] }
 0x115   : > { %v2349_v30 = vor.u32 %v2348_v46, %v2345_v50  ;;  %v1385_v24 = vsel %vm1358_vm2, %v1382_v63, %v1384_v40  ;;  %v7161_v63 = vld [vmem:[%s7478_s28 + $0x70] sm:$0xff] }
 0x116   : > { %v1477_v38 = vpop.f32.mrf.mxu2  ;;  %v926_v46 = vshll.u32 %v7161_v63, 16 }
 0x117   : > { %v1558_v8 = vadd.f32 %v1477_v38, %v1124_v18  ;;  %v1045_v19 = vpop.f32.mrf.mxu1  ;;  %v7813_v62 = vpop.f32.mrf.mxu3  ;;  %v2350_v53 = vsel %vm2225_vm4, %v2340_v55, %v2349_v30 }
 0x118   : > { %v2479_v57 = vpop.f32.mrf.mxu0  ;;  %v1125_v47 = vadd.f32 %v1045_v19, %v7694_v52  ;;  %v1822_v52 = vsel %vm1358_vm2, %v1819_v48, %v1821_v13  ;;  %v922_v48 = vshrl.u32 %v7160_v11, 16 }
 0x119   : > { %v1991_v49 = vadd.f32 %v7765_v14, %v1558_v8  ;;  %v921_v14 = vsel %vm813_vm3, %v916_v33, %v920_v22 }
 0x11b   : > { %v7817_v4 = vadd.f32 %v2477_v39, %v1991_v49 }
 0x11e   : > { %v1479_v17 = vpop.f32.mrf.mxu2 }
 0x11f   : > { %v1559_v18 = vadd.f32 %v1479_v17, %v1125_v47  ;;  %v1048_v38 = vpop.f32.mrf.mxu1  ;;  %v7822_v51 = vpop.f32.mrf.mxu3 }
 0x120   : > { %v2482_v8 = vpop.f32.mrf.mxu0  ;;  %v1126_v36 = vadd.f32 %v1048_v38, %v7705_v10  ;;  %v924_v10 = vor.u32 %v922_v48, %v920_v22  ;;  %v928_v38 = vrot.slane %v926_v46, 1  ;;  %v7216_v48 = vld [vmem:[%s7478_s28 + $0x80] sm:$0xff] }
 0x121   : > { %v1992_v39 = vadd.f32 %v7774_v9, %v1559_v18  ;;  %v2352_v9 = vshrl.u32 %v7215_v21, 16  ;;  %v2357_v18 = vrot.slane %v2355_v26, 2 }
 0x122   : > { %6448 = vmatmul.msk.bf16.gmra.mxu1 %vm415_vm1, %v921_v14  ;;  %v7199_v14 = vld [vmem:[%s7478_s28 + $0x88] sm:$0xff] }
 0x123   : > { %6539 = vmatmul.msk.bf16.gmra.mxu2 %vm415_vm1, %v1385_v24  ;;  %v7830_v19 = vadd.f32 %v2479_v57, %v1992_v39  ;;  %6721 = vmatmul.msk.bf16.gmra.mxu0 %vm415_vm1, %v2350_v53  ;;  %v2354_v17 = vrot.slane %v2352_v9, 1  ;;  %v1386_v39 = vrot.slane %v7179_v41, 1  ;;  %v2364_v41 = vshll.u32 %v7216_v48, 16 }
 0x124   : > { %6632 = vmatmul.msk.bf16.gmra.mxu3 %vm415_vm1, %v1822_v52  ;;  %v1823_v52 = vrot.slane %v7199_v14, 1  ;;  %v7180_v14 = vld [vmem:[%s7478_s28 + $0x78] sm:$0xff] }
 0x125   : > { %v2358_v21 = vor.u32 %v2357_v18, %v2354_v17  ;;  %v1387_v9 = vsel %vm1358_vm2, %v1384_v40, %v1386_v39  ;;  %v7162_v40 = vld [vmem:[%s7478_s28 + $0x78] sm:$0xff] }
 0x126   : > { %v1482_v55 = vpop.f32.mrf.mxu2  ;;  %v934_v18 = vshll.u32 %v7162_v40, 16 }
 0x127   : > { %v1560_v49 = vadd.f32 %v1482_v55, %v1126_v36  ;;  %v1050_v50 = vpop.f32.mrf.mxu1  ;;  %v7837_v33 = vpop.f32.mrf.mxu3  ;;  %v2359_v22 = vsel %vm2225_vm4, %v2349_v30, %v2358_v21 }
 0x128   : > { %v2484_v47 = vpop.f32.mrf.mxu0  ;;  %v1127_v53 = vadd.f32 %v1050_v50, %v7722_v37  ;;  %v1824_v37 = vsel %vm1358_vm2, %v1821_v13, %v1823_v52  ;;  %v930_v13 = vshrl.u32 %v7161_v63, 16 }
 0x129   : > { %v1993_v57 = vadd.f32 %v7789_v35, %v1560_v49  ;;  %v929_v35 = vsel %vm813_vm3, %v924_v10, %v928_v38 }
 0x12b   : > { %v7841_v24 = vadd.f32 %v2482_v8, %v1993_v57 }
 0x12e   : > { %v1484_v11 = vpop.f32.mrf.mxu2 }
 0x12f   : > { %v1561_v36 = vadd.f32 %v1484_v11, %v1127_v53  ;;  %v1053_v55 = vpop.f32.mrf.mxu1  ;;  %v7846_v26 = vpop.f32.mrf.mxu3 }
 0x130   : > { %v2487_v49 = vpop.f32.mrf.mxu0  ;;  %v1128_v46 = vadd.f32 %v1053_v55, %v7589_v5  ;;  %v932_v5 = vor.u32 %v930_v13, %v928_v38  ;;  %v936_v55 = vrot.slane %v934_v18, 1  ;;  %v7217_v13 = vld [vmem:[%s7478_s28 + $0x88] sm:$0xff] }
 0x131   : > { %v1994_v8 = vadd.f32 %v7798_v2, %v1561_v36  ;;  %v2361_v2 = vshrl.u32 %v7216_v48, 16  ;;  %v2366_v36 = vrot.slane %v2364_v41, 2 }
 0x132   : > { %6449 = vmatmul.msk.bf16.gmra.mxu1 %vm415_vm1, %v929_v35  ;;  %v7200_v35 = vld [vmem:[%s7478_s28 + $0x90] sm:$0xff] }
 0x133   : > { %6540 = vmatmul.msk.bf16.gmra.mxu2 %vm415_vm1, %v1387_v9  ;;  %v7854_v50 = vadd.f32 %v2484_v47, %v1994_v8  ;;  %6722 = vmatmul.msk.bf16.gmra.mxu0 %vm415_vm1, %v2359_v22  ;;  %v2363_v11 = vrot.slane %v2361_v2, 1  ;;  %v1388_v8 = vrot.slane %v7180_v14, 1  ;;  %v2373_v14 = vshll.u32 %v7217_v13, 16 }
 0x134   : > { %6633 = vmatmul.msk.bf16.gmra.mxu3 %vm415_vm1, %v1824_v37  ;;  %v1825_v37 = vrot.slane %v7200_v35, 1  ;;  %v938_v35 = vshrl.u32 %v7162_v40, 16 }
 0x135   : > { %9365 = vst [vmem:[#allocation7_spill] sm:$0xff] %v7854_v50  ;;  %v2367_v48 = vor.u32 %v2366_v36, %v2363_v11  ;;  %v1389_v2 = vsel %vm1358_vm2, %v1386_v39, %v1388_v8  ;;  %v7882_v39 = vld [vmem:[%s7478_s28 + $0x80] sm:$0xff] }
 0x136   : > { %v1487_v30 = vpop.f32.mrf.mxu2 }
 0x137   : > { %v1562_v57 = vadd.f32 %v1487_v30, %v1128_v46  ;;  %v1055_v17 = vpop.f32.mrf.mxu1  ;;  %v7861_v10 = vpop.f32.mrf.mxu3 }
 0x138   : > { %v2489_v53 = vpop.f32.mrf.mxu0  ;;  %v1129_v22 = vadd.f32 %v1055_v17, %v7605_v16  ;;  %v1826_v16 = vsel %vm1358_vm2, %v1823_v52, %v1825_v37 }
 0x139   : > { %v1995_v47 = vadd.f32 %v7813_v62, %v1562_v57  ;;  %v937_v62 = vsel %vm813_vm3, %v932_v5, %v936_v55  ;;  %v2368_v57 = vsel %vm2225_vm4, %v2358_v21, %v2367_v48  ;;  %v1696_v21 = vld [vmem:[%s7478_s28 + $0x98] sm:$0x1]  ;;  %v942_v5 = vshll.u32 %v7882_v39, 16 }
 0x13a   : > { %v1772_v52 = vunpack.c.l.b16 %v1696_v21 }
 0x13b   : > { %v7865_v9 = vadd.f32 %v2487_v49, %v1995_v47 }
 0x13d   : > { %9366 = vst [vmem:[#allocation8_spill] sm:$0xff] %v7865_v9  ;;  %v717_v9 = vld [vmem:[%s7478_s28 + $0x90] sm:$0x1] }
 0x13e   : > { %v1489_v63 = vpop.f32.mrf.mxu2 }
 0x13f   : > { %v1563_v46 = vadd.f32 %v1489_v63, %v1129_v22  ;;  %v1058_v30 = vpop.f32.mrf.mxu1  ;;  %v7870_v41 = vpop.f32.mrf.mxu3 }
 0x140   : > { %v2492_v38 = vpop.f32.mrf.mxu0  ;;  %v1130_v18 = vadd.f32 %v1058_v30, %v7615_v31  ;;  %v2375_v30 = vrot.slane %v2373_v14, 2 }
 0x141   : > { %v1996_v49 = vadd.f32 %v7822_v51, %v1563_v46  ;;  %v2370_v51 = vshrl.u32 %v7217_v13, 16 }
 0x142   : > { %6450 = vmatmul.msk.bf16.gmra.mxu1 %vm415_vm1, %v937_v62  ;;  %v1791_v62 = vpack.c.b16 %v1772_v52, %v1772_v52 }
 0x143   : > { %6541 = vmatmul.msk.bf16.gmra.mxu2 %vm415_vm1, %v1389_v2  ;;  %v7878_v17 = vadd.f32 %v2489_v53, %v1996_v49  ;;  %6723 = vmatmul.msk.bf16.gmra.mxu0 %vm415_vm1, %v2368_v57  ;;  %v7889_v53 = vld [vmem:[%s7478_s28 + $0x80] sm:$0xff]  ;;  %v2372_v31 = vrot.slane %v2370_v51, 1  ;;  %v940_v49 = vor.u32 %v938_v35, %v936_v55  ;;  %v944_v57 = vrot.slane %v942_v5, 1  ;;  %v6912_v35 = vld [vmem:[%s7478_s28 + $0x10] sm:$0xc] }
 0x144   : > { %6634 = vmatmul.msk.bf16.gmra.mxu3 %vm415_vm1, %v1826_v16  ;;  %v9348_v13 = vrot.slane %v7889_v53, 1  ;;  %v1827_v21 = vrot.slane %v1791_v62, 1  ;;  %v7255_v5 = vld [vmem:[%s7478_s28 + $0x10] sm:$0xf0] }
 0x145   : > { %9367 = vst [vmem:[#allocation9_spill] sm:$0xff] %v7878_v17  ;;  %v7898_v16 = vor.u32 %v2375_v30, %v2372_v31  ;;  %v6913_v31 = vor.u32 %v7255_v5, %v6912_v35  ;;  %v2129_v35 = vld [vmem:[%s7478_s28 + $0x98] sm:$0x3] }
 0x146   : > { %v1492_v47 = vpop.f32.mrf.mxu2  ;;  %v1391_v55 = vsel %vm1358_vm2, %v1388_v8, %v9348_v13  ;;  %v7919_v8 = vld [vmem:[%s7478_s28 + $0x88] sm:$0xff] }
 0x147   : > { %v1564_v11 = vadd.f32 %v1492_v47, %v1130_v18  ;;  %v1060_v36 = vpop.f32.mrf.mxu1  ;;  %v7891_v22 = vpop.f32.mrf.mxu3  ;;  %v2377_v52 = vsel %vm2225_vm4, %v2367_v48, %v7898_v16 }
 0x148   : > { %v2494_v46 = vpop.f32.mrf.mxu0  ;;  %v1131_v40 = vadd.f32 %v1060_v36, %v7633_v43  ;;  %v1828_v36 = vsel %vm1358_vm2, %v1825_v37, %v1827_v21 }
 0x149   : > { %v1997_v63 = vadd.f32 %v7837_v33, %v1564_v11  ;;  %v7218_v11 = vld [vmem:[%s7478_s28 + $0x90] sm:$0xff] }
 0x14a   : > { %v2379_v30 = vshrl.u32 %v7218_v11, 16  ;;  %v2382_v62 = vshll.u32 %v7218_v11, 16 }
 0x14b   : > { %v7894_v2 = vadd.f32 %v2492_v38, %v1997_v63  ;;  %v945_v38 = vsel %vm813_vm3, %v940_v49, %v944_v57  ;;  %v3661_v49 = vshrl.u32 %v6913_v31, 16 }
 0x14c   : > { %v2381_v11 = vrot.slane %v2379_v30, 1 }
 0x14d   : > { %9368 = vst [vmem:[#allocation10_spill] sm:$0xff] %v7894_v2  ;;  %v3663_v5 = vrot.slane %v3661_v49, 2 }
 0x14e   : > { %v1494_v18 = vpop.f32.mrf.mxu2 }
 0x14f   : > { %v1565_v33 = vadd.f32 %v1494_v18, %v1131_v40  ;;  %v1063_v51 = vpop.f32.mrf.mxu1  ;;  %v7904_v14 = vpop.f32.mrf.mxu3  ;;  %v3664_v40 = vshll.u32 %v6913_v31, 16 }
 0x150   : > { %v2497_v47 = vpop.f32.mrf.mxu0  ;;  %v1132_v48 = vadd.f32 %v1063_v51, %v7643_v58 }
 0x151   : > { %v1998_v43 = vadd.f32 %v7846_v26, %v1565_v33  ;;  %v7256_v26 = vld [vmem:[%s7478_s28 + $0x18] sm:$0xff]  ;;  %v3666_v31 = vrot.slane %v3664_v40, 3 }
 0x152   : > { %6451 = vmatmul.msk.bf16.gmra.mxu1 %vm415_vm1, %v945_v38  ;;  %v3669_v18 = vshrl.u32 %v7256_v26, 16  ;;  %v946_v38 = vshrl.u32 %v7882_v39, 16 }
 0x153   : > { %6542 = vmatmul.msk.bf16.gmra.mxu2 %vm415_vm1, %v1391_v55  ;;  %v7915_v63 = vadd.f32 %v2494_v46, %v1998_v43  ;;  %6724 = vmatmul.msk.bf16.gmra.mxu0 %vm415_vm1, %v2377_v52  ;;  %v3672_v46 = vshll.u32 %v7256_v26, 16  ;;  %v950_v55 = vshll.u32 %v7919_v8, 16  ;;  %v7927_v43 = vld [vmem:[%s7478_s28 + $0x88] sm:$0xff]  ;;  %v3667_v30 = vor.u32 %v3666_v31, %v3663_v5 }
 0x154   : > { %6635 = vmatmul.msk.bf16.gmra.mxu3 %vm415_vm1, %v1828_v36  ;;  %v2384_v36 = vrot.slane %v2382_v62, 2  ;;  %v3671_v26 = vrot.slane %v3669_v18, 2  ;;  %v948_v39 = vor.u32 %v946_v38, %v944_v57  ;;  %v793_v18 = vunpack.c.l.b16 %v717_v9 }
 0x155   : > { %9369 = vst [vmem:[#allocation11_spill] sm:$0xff] %v7915_v63  ;;  %v952_v13 = vrot.slane %v950_v55, 1  ;;  %v1392_v63 = vrot.slane %v7927_v43, 1  ;;  %v1262_v55 = vld [vmem:[%s7478_s28 + $0x90] sm:$0x1] }
 0x156   : > { %v1497_v37 = vpop.f32.mrf.mxu2  ;;  %v2385_v17 = vor.u32 %v2384_v36, %v2381_v11  ;;  %v812_v9 = vpack.c.b16 %v793_v18, %v793_v18  ;;  %v7257_v11 = vld [vmem:[%s7478_s28 + $0x20] sm:$0xff] }
 0x157   : > { %v1566_v21 = vadd.f32 %v1497_v37, %v1132_v48  ;;  %v1065_v33 = vpop.f32.mrf.mxu1  ;;  %v7929_v52 = vpop.f32.mrf.mxu3  ;;  %v3674_v48 = vrot.slane %v3672_v46, 3  ;;  %v953_v40 = vsel %vm813_vm3, %v948_v39, %v952_v13  ;;  %v3681_v5 = vshll.u32 %v7257_v11, 16 }
 0x158   : > { %v2499_v51 = vpop.f32.mrf.mxu0  ;;  %v1133_v2 = vadd.f32 %v1065_v33, %v7661_v7  ;;  %v2386_v38 = vsel %vm2225_vm4, %v7898_v16, %v2385_v17 }
 0x159   : > { %v1999_v58 = vadd.f32 %v7861_v10, %v1566_v21  ;;  %v2205_v10 = vunpack.c.l.b16 %v2129_v35  ;;  %v3675_v62 = vor.u32 %v3674_v48, %v3671_v26  ;;  %v3678_v35 = vshrl.u32 %v7257_v11, 16 }
 0x15a   : > { %v954_v48 = vshrl.u32 %v7919_v8, 16 }
 0x15b   : > { %v7933_v37 = vadd.f32 %v2497_v47, %v1999_v58  ;;  %v9370_v47 = vrot.slane %v7889_v53, 1  ;;  %v3676_v43 = vsel %vm3659_vm5, %v3667_v30, %v3675_v62  ;;  %v1338_v58 = vunpack.c.l.b16 %v1262_v55 }
 0x15c   : > { %v956_v18 = vor.u32 %v954_v48, %v952_v13 }
 0x15d   : > { %v1393_v57 = vsel %vm1358_vm2, %v9370_v47, %v1392_v63  ;;  %v1357_v39 = vpack.c.b16 %v1338_v58, %v1338_v58  ;;  %v3683_v47 = vrot.slane %v3681_v5, 3  ;;  %v6821_v5 = vld [vmem:[%s7478_s28 + $0x10] sm:$0xc] }
 0x15e   : > { %v1499_v21 = vpop.f32.mrf.mxu2 }
 0x15f   : > { %v1567_v50 = vadd.f32 %v1499_v21, %v1133_v2  ;;  %v1068_v49 = vpop.f32.mrf.mxu1  ;;  %v7942_v46 = vpop.f32.mrf.mxu3  ;;  %v2224_v2 = vpack.c.b16 %v2205_v10, %v2205_v10 }
 0x160   : > { %v2502_v33 = vpop.f32.mrf.mxu0 }
 0x161   : > { %v2000_v7 = vadd.f32 %v7870_v41, %v1567_v50  ;;  %v1134_v50 = vadd.f32 %v1068_v49, %v7671_v27  ;;  %v2388_v41 = vshrl.u32 %v2224_v2, 16  ;;  %v2391_v36 = vshll.u32 %v2224_v2, 16 }
 0x162   : > { %6452 = vmatmul.msk.bf16.gmra.mxu1 %vm415_vm1, %v953_v40  ;;  %v3680_v49 = vrot.slane %v3678_v35, 2  ;;  %v7219_v35 = vld [vmem:[%s7478_s28 + $0x8] sm:$0xf0] }
 0x163   : > { %6543 = vmatmul.msk.bf16.gmra.mxu2 %vm415_vm1, %v1393_v57  ;;  %v7951_v53 = vadd.f32 %v2499_v51, %v2000_v7  ;;  %6725 = vmatmul.msk.bf16.gmra.mxu0 %vm415_vm1, %v2386_v38  ;;  %v958_v51 = vshll.u32 %v812_v9, 16  ;;  %v2390_v40 = vrot.slane %v2388_v41, 1  ;;  %v2393_v27 = vrot.slane %v2391_v36, 2 }
 0x164   : > { %6982 = vmatmul.msk.bf16.vlgmr.msra.gmra.mxu3 %vm415_vm1, %v3676_v43  ;;  %v1394_v38 = vrot.slane %v1357_v39, 1  ;;  %v3684_v43 = vor.u32 %v3683_v47, %v3680_v49 }
 0x165   : > { %v960_v7 = vrot.slane %v958_v51, 1  ;;  %v2394_v2 = vor.u32 %v2393_v27, %v2390_v40  ;;  %v7238_v27 = vld [vmem:[%s7478_s28 + $0x18] sm:$0xff] }
 0x166   : > { %v1502_v16 = vpop.f32.mrf.mxu2  ;;  %v3685_v41 = vsel %vm3659_vm5, %v3675_v62, %v3684_v43  ;;  %v7003_v62 = vld [vmem:[%s7478_s28 + $0x10] sm:$0x8] }
 0x167   : > { %v1568_v31 = vadd.f32 %v1502_v16, %v1134_v50  ;;  %v1070_v26 = vpop.f32.mrf.mxu1  ;;  %v7958_v10 = vpop.f32.mrf.mxu3  ;;  %v961_v58 = vsel %vm813_vm3, %v956_v18, %v960_v7  ;;  %v2395_v50 = vsel %vm2225_vm4, %v2385_v17, %v2394_v2  ;;  %v7258_v16 = vld [vmem:[%s7478_s28 + $0x28] sm:$0xff]  ;;  %v7274_v7 = vld [vmem:[%s7478_s28 + $0x18] sm:$0xff] }
 0x168   : > { %v2504_v30 = vpop.f32.mrf.mxu0  ;;  %v1135_v55 = vadd.f32 %v1070_v26, %v7689_v45  ;;  %v7273_v26 = vld [vmem:[%s7478_s28 + $0x10] sm:$0xf0]  ;;  %v3687_v48 = vshrl.u32 %v7258_v16, 16  ;;  %v3690_v51 = vshll.u32 %v7258_v16, 16 }
 0x169   : > { %v2001_v21 = vadd.f32 %v7891_v22, %v1568_v31  ;;  %v7237_v31 = vld [vmem:[%s7478_s28 + $0x10] sm:$0xf0] }
 0x16a   : > { %v6822_v49 = vor.u32 %v7237_v31, %v6821_v5  ;;  %v3692_v2 = vrot.slane %v3690_v51, 3 }
 0x16b   : > { %v7961_v57 = vadd.f32 %v2502_v33, %v2001_v21  ;;  %v1395_v33 = vsel %vm1358_vm2, %v1392_v63, %v1394_v38  ;;  %v6730_v63 = vld [vmem:[%s7478_s28 + $0x8] sm:$0xc]  ;;  %v7004_v38 = vor.u32 %v7273_v26, %v7003_v62  ;;  %v7259_v26 = vld [vmem:[%s7478_s28 + $0x30] sm:$0xff] }
 0x16c   : > { %v6731_v40 = vor.u32 %v7219_v35, %v6730_v63  ;;  %v3696_v51 = vshrl.u32 %v7259_v26, 16 }
 0x16e   : > { %v1504_v8 = vpop.f32.mrf.mxu2 }
 0x16f   : > { %v1569_v9 = vadd.f32 %v1504_v8, %v1135_v55  ;;  %v1073_v22 = vpop.f32.mrf.mxu1  ;;  %v7966_v11 = vpop.f32.mrf.mxu3  ;;  %v3689_v55 = vrot.slane %v3687_v48, 2 }
 0x170   : > { %v2507_v45 = vpop.f32.mrf.mxu0 }
 0x171   : > { %v2002_v13 = vadd.f32 %v7904_v14, %v1569_v9  ;;  %v1136_v14 = vadd.f32 %v1073_v22, %v7699_v3  ;;  %v2793_v9 = vrot.slane %v6731_v40, 2 }
 0x172   : > { %6453 = vmatmul.msk.bf16.gmra.mxu1 %vm415_vm1, %v961_v58  ;;  %v3226_v58 = vrot.slane %v6822_v49, 2 }
 0x173   : > { %6544 = vmatmul.msk.bf16.gmra.mxu2 %vm415_vm1, %v1395_v33  ;;  %v7973_v36 = vadd.f32 %v2504_v30, %v2002_v13  ;;  %6726 = vmatmul.msk.bf16.gmra.mxu0 %vm415_vm1, %v2395_v50  ;;  %v7986_v30 = vld [vmem:[%s7478_s28 + $0x10] sm:$0xff]  ;;  %v3227_v33 = vrot.slane %v7238_v27, 2  ;;  %v4227_v50 = vrot.slane %v7004_v38, 3  ;;  %v7239_v27 = vld [vmem:[%s7478_s28 + $0x20] sm:$0xff] }
 0x174   : > { %6983 = vmatmul.msk.bf16.gmra.mxu3 %vm415_vm1, %v3685_v41  ;;  %v2794_v22 = vrot.slane %v7986_v30, 2  ;;  %v4228_v41 = vrot.slane %v7274_v7, 3  ;;  %v7275_v38 = vld [vmem:[%s7478_s28 + $0x20] sm:$0xff] }
 0x176   : > { %v1507_v17 = vpop.f32.mrf.mxu2  ;;  %v2795_v35 = vsel %vm2792_vm6, %v2793_v9, %v2794_v22  ;;  %v3229_v9 = vrot.slane %v7239_v27, 2 }
 0x177   : > { %v1570_v39 = vadd.f32 %v1507_v17, %v1136_v14  ;;  %v1075_v21 = vpop.f32.mrf.mxu1  ;;  %v7989_v47 = vpop.f32.mrf.mxu3 }
 0x178   : > { %v2509_v18 = vpop.f32.mrf.mxu0  ;;  %v1137_v13 = vadd.f32 %v1075_v21, %v7717_v28  ;;  %v4229_v28 = vsel %vm4226_vm7, %v4227_v50, %v4228_v41 }
 0x179   : > { %v2003_v3 = vadd.f32 %v7929_v52, %v1570_v39  ;;  %v3693_v52 = vor.u32 %v3692_v2, %v3689_v55  ;;  %v3699_v39 = vshll.u32 %v7259_v26, 16  ;;  %v3698_v55 = vrot.slane %v3696_v51, 2  ;;  %v7240_v51 = vld [vmem:[%s7478_s28 + $0x28] sm:$0xff] }
 0x17b   : > { %v7993_v8 = vadd.f32 %v2507_v45, %v2003_v3  ;;  %v3228_v45 = vsel %vm2792_vm6, %v3226_v58, %v3227_v33  ;;  %v3694_v62 = vsel %vm3659_vm5, %v3684_v43, %v3693_v52  ;;  %v7221_v43 = vld [vmem:[%s7478_s28 + $0x18] sm:$0xff]  ;;  %v3701_v2 = vrot.slane %v3699_v39, 3 }
 0x17d   : > { %v3702_v50 = vor.u32 %v3701_v2, %v3698_v55 }
 0x17e   : > { %v1509_v63 = vpop.f32.mrf.mxu2 }
 0x17f   : > { %v1571_v16 = vadd.f32 %v1509_v63, %v1137_v13  ;;  %v1078_v14 = vpop.f32.mrf.mxu1  ;;  %v7999_v5 = vpop.f32.mrf.mxu3  ;;  %v4230_v13 = vrot.slane %v7275_v38, 3  ;;  %v3231_v38 = vrot.slane %v7240_v51, 2 }
 0x180   : > { %v2512_v17 = vpop.f32.mrf.mxu0  ;;  %v1138_v48 = vadd.f32 %v1078_v14, %v7603_v15  ;;  %v2796_v15 = vrot.slane %v7221_v43, 2  ;;  %v7276_v43 = vld [vmem:[%s7478_s28 + $0x28] sm:$0xff] }
 0x181   : > { %v2004_v31 = vadd.f32 %v7942_v46, %v1571_v16  ;;  %v4232_v2 = vrot.slane %v7276_v43, 3 }
 0x182   : > { %6800 = vmatmul.msk.bf16.vlgmr.msra.gmra.mxu1 %vm415_vm1, %v2795_v35  ;;  %v2797_v35 = vsel %vm2792_vm6, %v2794_v22, %v2796_v15  ;;  %v7260_v22 = vld [vmem:[%s7478_s28 + $0x38] sm:$0xff] }
 0x183   : > { %6891 = vmatmul.msk.bf16.vlgmr.msra.gmra.mxu2 %vm415_vm1, %v3228_v45  ;;  %7073 = vmatmul.msk.bf16.vlgmr.msra.gmra.mxu0 %vm415_vm1, %v4229_v28  ;;  %v8010_v21 = vadd.f32 %v2509_v18, %v2004_v31  ;;  %v3708_v26 = vshll.u32 %v7260_v22, 16 }
 0x184   : > { %6984 = vmatmul.msk.bf16.gmra.mxu3 %vm415_vm1, %v3694_v62  ;;  %v3703_v62 = vsel %vm3659_vm5, %v3693_v52, %v3702_v50  ;;  %v7222_v52 = vld [vmem:[%s7478_s28 + $0x20] sm:$0xff] }
 0x185   : > { %9371 = vst [vmem:[#allocation12_spill] sm:$0xff] %v8010_v21 }
 0x186   : > { %v1512_v46 = vpop.f32.mrf.mxu2 }
 0x187   : > { %v1572_v30 = vadd.f32 %v1512_v46, %v1138_v48  ;;  %v1080_v40 = vpop.f32.mrf.mxu1  ;;  %v8014_v49 = vpop.f32.mrf.mxu3 }
 0x188   : > { %v2514_v7 = vpop.f32.mrf.mxu0  ;;  %v1139_v58 = vadd.f32 %v1080_v40, %v7613_v29  ;;  %v4231_v29 = vsel %vm4226_vm7, %v4228_v41, %v4230_v13 }
 0x189   : > { %v2005_v3 = vadd.f32 %v7958_v10, %v1572_v30  ;;  %v3230_v10 = vsel %vm2792_vm6, %v3227_v33, %v3229_v9 }
 0x18b   : > { %v8019_v16 = vadd.f32 %v2512_v17, %v2005_v3  ;;  %v3705_v17 = vshrl.u32 %v7260_v22, 16  ;;  %v3710_v3 = vrot.slane %v3708_v26, 3 }
 0x18d   : > { %9372 = vst [vmem:[#allocation13_spill] sm:$0xff] %v8019_v16  ;;  %v3707_v27 = vrot.slane %v3705_v17, 2  ;;  %v7241_v17 = vld [vmem:[%s7478_s28 + $0x30] sm:$0xff] }
 0x18e   : > { %v1514_v18 = vpop.f32.mrf.mxu2  ;;  %v3233_v43 = vrot.slane %v7241_v17, 2 }
 0x18f   : > { %v1573_v63 = vadd.f32 %v1514_v18, %v1139_v58  ;;  %v1083_v14 = vpop.f32.mrf.mxu1  ;;  %v8023_v45 = vpop.f32.mrf.mxu3 }
 0x190   : > { %v2517_v28 = vpop.f32.mrf.mxu0  ;;  %v1140_v33 = vadd.f32 %v1083_v14, %v7631_v42  ;;  %v2798_v42 = vrot.slane %v7222_v52, 2 }
 0x191   : > { %v2006_v31 = vadd.f32 %v7966_v11, %v1573_v63 }
 0x192   : > { %6801 = vmatmul.msk.bf16.gmra.mxu1 %vm415_vm1, %v2797_v35  ;;  %v2799_v14 = vsel %vm2792_vm6, %v2796_v15, %v2798_v42  ;;  %v3232_v35 = vsel %vm2792_vm6, %v3229_v9, %v3231_v38  ;;  %v7261_v15 = vld [vmem:[%s7478_s28 + $0x40] sm:$0xff] }
 0x193   : > { %6892 = vmatmul.msk.bf16.gmra.mxu2 %vm415_vm1, %v3230_v10  ;;  %7074 = vmatmul.msk.bf16.gmra.mxu0 %vm415_vm1, %v4231_v29  ;;  %v8034_v46 = vadd.f32 %v2514_v7, %v2006_v31  ;;  %v3711_v7 = vor.u32 %v3710_v3, %v3707_v27  ;;  %v3717_v22 = vshll.u32 %v7261_v15, 16 }
 0x194   : > { %6985 = vmatmul.msk.bf16.gmra.mxu3 %vm415_vm1, %v3703_v62 }
 0x195   : > { %9373 = vst [vmem:[#allocation14_spill] sm:$0xff] %v8034_v46  ;;  %v3712_v62 = vsel %vm3659_vm5, %v3702_v50, %v3711_v7  ;;  %v3719_v51 = vrot.slane %v3717_v22, 3 }
 0x196   : > { %v1517_v11 = vpop.f32.mrf.mxu2 }
 0x197   : > { %v1574_v48 = vadd.f32 %v1517_v11, %v1140_v33  ;;  %v1085_v41 = vpop.f32.mrf.mxu1  ;;  %v8038_v39 = vpop.f32.mrf.mxu3 }
 0x198   : > { %v2519_v40 = vpop.f32.mrf.mxu0  ;;  %v1141_v55 = vadd.f32 %v1085_v41, %v7641_v56  ;;  %v4233_v56 = vsel %vm4226_vm7, %v4230_v13, %v4232_v2  ;;  %v7223_v13 = vld [vmem:[%s7478_s28 + $0x28] sm:$0xff]  ;;  %v7277_v41 = vld [vmem:[%s7478_s28 + $0x30] sm:$0xff] }
 0x199   : > { %v2007_v30 = vadd.f32 %v7989_v47, %v1574_v48  ;;  %v4234_v3 = vrot.slane %v7277_v41, 3 }
 0x19b   : > { %v8047_v47 = vadd.f32 %v2517_v28, %v2007_v30 }
 0x19d   : > { %9374 = vst [vmem:[#allocation15_spill] sm:$0xff] %v8047_v47 }
 0x19e   : > { %v1519_v58 = vpop.f32.mrf.mxu2 }
 0x19f   : > { %v1575_v18 = vadd.f32 %v1519_v58, %v1141_v55  ;;  %v1088_v63 = vpop.f32.mrf.mxu1  ;;  %v8045_v10 = vpop.f32.mrf.mxu3 }
 0x1a0   : > { %v2522_v29 = vpop.f32.mrf.mxu0  ;;  %v1142_v9 = vadd.f32 %v1088_v63, %v7659_v6  ;;  %v2800_v6 = vrot.slane %v7223_v13, 2  ;;  %v7278_v13 = vld [vmem:[%s7478_s28 + $0x38] sm:$0xff] }
 0x1a1   : > { %v2008_v31 = vadd.f32 %v7999_v5, %v1575_v18  ;;  %v3714_v5 = vshrl.u32 %v7261_v15, 16 }
 0x1a2   : > { %6802 = vmatmul.msk.bf16.gmra.mxu1 %vm415_vm1, %v2799_v14  ;;  %v2801_v14 = vsel %vm2792_vm6, %v2798_v42, %v2800_v6  ;;  %v7262_v42 = vld [vmem:[%s7478_s28 + $0x48] sm:$0xff] }
 0x1a3   : > { %6893 = vmatmul.msk.bf16.gmra.mxu2 %vm415_vm1, %v3232_v35  ;;  %7075 = vmatmul.msk.bf16.gmra.mxu0 %vm415_vm1, %v4233_v56  ;;  %v3716_v52 = vrot.slane %v3714_v5, 2  ;;  %v8064_v30 = vadd.f32 %v2519_v40, %v2008_v31  ;;  %v4235_v31 = vsel %vm4226_vm7, %v4232_v2, %v4234_v3  ;;  %v3723_v15 = vshrl.u32 %v7262_v42, 16  ;;  %v7242_v5 = vld [vmem:[%s7478_s28 + $0x38] sm:$0xff] }
 0x1a4   : > { %6986 = vmatmul.msk.bf16.gmra.mxu3 %vm415_vm1, %v3712_v62  ;;  %v3235_v41 = vrot.slane %v7242_v5, 2 }
 0x1a5   : > { %9375 = vst [vmem:[#allocation16_spill] sm:$0xff] %v8064_v30  ;;  %v3720_v58 = vor.u32 %v3719_v51, %v3716_v52  ;;  %v3725_v17 = vrot.slane %v3723_v15, 2  ;;  %v4236_v52 = vrot.slane %v7278_v13, 3  ;;  %v9393_v30 = vld [vmem:[#allocation5_spill] sm:$0xff] }
 0x1a6   : > { %v1522_v28 = vpop.f32.mrf.mxu2 }
 0x1a7   : > { %v1576_v33 = vadd.f32 %v1522_v28, %v1142_v9  ;;  %v1090_v11 = vpop.f32.mrf.mxu1  ;;  %v8060_v50 = vpop.f32.mrf.mxu3  ;;  %v3726_v9 = vshll.u32 %v7262_v42, 16 }
 0x1a8   : > { %v2524_v48 = vpop.f32.mrf.mxu0  ;;  %v1143_v27 = vadd.f32 %v1090_v11, %v7669_v25  ;;  %v3721_v25 = vsel %vm3659_vm5, %v3711_v7, %v3720_v58  ;;  %v7224_v7 = vld [vmem:[%s7478_s28 + $0x30] sm:$0xff] }
 0x1a9   : > { %v2009_v26 = vadd.f32 %v8014_v49, %v1576_v33  ;;  %v3234_v49 = vsel %vm2792_vm6, %v3231_v38, %v3233_v43 }
 0x1ab   : > { %v8078_v38 = vadd.f32 %v2522_v29, %v2009_v26  ;;  %v3728_v29 = vrot.slane %v3726_v9, 3  ;;  %v2802_v26 = vrot.slane %v7224_v7, 2 }
 0x1ad   : > { %9376 = vst [vmem:[#allocation17_spill] sm:$0xff] %v8078_v38 }
 0x1ae   : > { %v1524_v55 = vpop.f32.mrf.mxu2 }
 0x1af   : > { %v1577_v18 = vadd.f32 %v1524_v55, %v1143_v27  ;;  %v1093_v63 = vpop.f32.mrf.mxu1  ;;  %v8069_v35 = vpop.f32.mrf.mxu3  ;;  %v3729_v27 = vor.u32 %v3728_v29, %v3725_v17 }
 0x1b0   : > { %v2527_v40 = vpop.f32.mrf.mxu0  ;;  %v1144_v62 = vadd.f32 %v1093_v63, %v7687_v44 }
 0x1b1   : > { %v2010_v56 = vadd.f32 %v8023_v45, %v1577_v18  ;;  %v3730_v42 = vsel %vm3659_vm5, %v3720_v58, %v3729_v27  ;;  %v7243_v58 = vld [vmem:[%s7478_s28 + $0x40] sm:$0xff] }
 0x1b2   : > { %6803 = vmatmul.msk.bf16.gmra.mxu1 %vm415_vm1, %v2801_v14  ;;  %v2803_v14 = vsel %vm2792_vm6, %v2800_v6, %v2802_v26  ;;  %v3237_v17 = vrot.slane %v7243_v58, 2 }
 0x1b3   : > { %6894 = vmatmul.msk.bf16.gmra.mxu2 %vm415_vm1, %v3234_v49  ;;  %7076 = vmatmul.msk.bf16.gmra.mxu0 %vm415_vm1, %v4235_v31  ;;  %v8089_v18 = vadd.f32 %v2524_v48, %v2010_v56  ;;  %v7263_v48 = vld [vmem:[%s7478_s28 + $0x50] sm:$0xff] }
 0x1b4   : > { %6987 = vmatmul.msk.bf16.gmra.mxu3 %vm415_vm1, %v3721_v25  ;;  %v3735_v56 = vshll.u32 %v7263_v48, 16 }
 0x1b5   : > { %9377 = vst [vmem:[#allocation18_spill] sm:$0xff] %v8089_v18 }
 0x1b6   : > { %v1527_v45 = vpop.f32.mrf.mxu2  ;;  %v3737_v5 = vrot.slane %v3735_v56, 3 }
 0x1b7   : > { %v1578_v2 = vadd.f32 %v1527_v45, %v1144_v62  ;;  %v1095_v28 = vpop.f32.mrf.mxu1  ;;  %v8084_v22 = vpop.f32.mrf.mxu3  ;;  %v7225_v45 = vld [vmem:[%s7478_s28 + $0x38] sm:$0xff] }
 0x1b8   : > { %v2529_v11 = vpop.f32.mrf.mxu0  ;;  %v1145_v44 = vadd.f32 %v1095_v28, %v7697_v0  ;;  %v4237_v0 = vsel %vm4226_vm7, %v4234_v3, %v4236_v52  ;;  %v2804_v13 = vrot.slane %v7225_v45, 2  ;;  %v8161_v45 = vld [vmem:[%s7478_s28 + $0x48] sm:$0xff] }
 0x1b9   : > { %v2011_v33 = vadd.f32 %v8038_v39, %v1578_v2  ;;  %v3236_v39 = vsel %vm2792_vm6, %v3233_v43, %v3235_v41  ;;  %v3732_v43 = vshrl.u32 %v7263_v48, 16 }
 0x1bb   : > { %v8110_v9 = vadd.f32 %v2527_v40, %v2011_v33  ;;  %v3734_v7 = vrot.slane %v3732_v43, 2  ;;  %v4600_v33 = vlaneseq }
 0x1bd   : > { %9378 = vst [vmem:[#allocation19_spill] sm:$0xff] %v8110_v9  ;;  %v8125_v40 = vor.u32 %v3737_v5, %v3734_v7  ;;  %v9387_v9 = vld [vmem:[#allocation3_spill] sm:$0xff] }
 0x1be   : > { %v1529_v51 = vpop.f32.mrf.mxu2 }
 0x1bf   : > { %v1579_v55 = vadd.f32 %v1529_v51, %v1145_v44  ;;  %v1098_v63 = vpop.f32.mrf.mxu1  ;;  %v8093_v49 = vpop.f32.mrf.mxu3  ;;  %v8123_v51 = vld [vmem:[%s7478_s28 + $0x40] sm:$0xff] }
 0x1c0   : > { %v8096_v25 = vpop.f32.mrf.mxu0  ;;  %v1146_v6 = vadd.f32 %v1098_v63, %v7715_v23  ;;  %v8118_v23 = vld [vmem:[%s7478_s28 + $0x40] sm:$0xff]  ;;  %v8128_v63 = vld [vmem:[%s7478_s28 + $0x48] sm:$0xff]  ;;  %v2806_v56 = vrot.slane %v8123_v51, 2 }
 0x1c1   : > { %v2012_v31 = vadd.f32 %v8045_v10, %v1579_v55  ;;  %v4238_v44 = vrot.slane %v8118_v23, 3  ;;  %v8164_v23 = vld [vmem:[%s7478_s28 + $0x50] sm:$0xff] }
 0x1c2   : > { %6804 = vmatmul.msk.bf16.gmra.mxu1 %vm415_vm1, %v2803_v14 }
 0x1c3   : > { %6895 = vmatmul.msk.bf16.gmra.mxu2 %vm415_vm1, %v3236_v39  ;;  %7077 = vmatmul.msk.bf16.gmra.mxu0 %vm415_vm1, %v4237_v0  ;;  %v2805_v39 = vsel %vm2792_vm6, %v2802_v26, %v2804_v13  ;;  %v3238_v0 = vsel %vm2792_vm6, %v3235_v41, %v3237_v17  ;;  %v8136_v48 = vadd.f32 %v2529_v11, %v2012_v31  ;;  %v7280_v11 = vld [vmem:[%s7478_s28 + $0x48] sm:$0xff]  ;;  %v7264_v31 = vld [vmem:[%s7478_s28 + $0x58] sm:$0xff] }
 0x1c4   : > { %6988 = vmatmul.msk.bf16.gmra.mxu3 %vm415_vm1, %v3730_v42  ;;  %v4239_v43 = vsel %vm4226_vm7, %v4236_v52, %v4238_v44  ;;  %v3739_v26 = vsel %vm3659_vm5, %v3729_v27, %v8125_v40  ;;  %v8157_v27 = vsel %vm2792_vm6, %v2804_v13, %v2806_v56  ;;  %v3741_v7 = vshrl.u32 %v7264_v31, 16 }
 0x1c5   : > { %9379 = vst [vmem:[#allocation20_spill] sm:$0xff] %v8136_v48  ;;  %v3744_v5 = vshll.u32 %v7264_v31, 16 }
 0x1c6   : > { %v1532_v10 = vpop.f32.mrf.mxu2 }
 0x1c7   : > { %v1580_v62 = vadd.f32 %v1532_v10, %v1146_v6  ;;  %v1100_v3 = vpop.f32.mrf.mxu1  ;;  %v8108_v15 = vpop.f32.mrf.mxu3 }
 0x1c8   : > { %v8115_v28 = vpop.f32.mrf.mxu0  ;;  %v1147_v29 = vadd.f32 %v1100_v3, %v7725_v54  ;;  %v8134_v54 = vshrl.u32 %v4600_v33, 7 }
 0x1c9   : > { %v8113_v2 = vadd.f32 %v8060_v50, %v1580_v62 }
 0x1ca   : > { %v4640_v41 = vand.u32 65535, %v8134_v54  ;;  %v4641_v52 = vshrl.u32 %v8134_v54, 16 }
 0x1cc   : > { %v4644_v62 = vmul.u32 58254, %v4640_v41  ;;  %v4645_v51 = vmul.u32 14564, %v4641_v52 }
 0x1ce   : > { %v1534_v55 = vpop.f32.mrf.mxu2 }
 0x1cf   : > { %v1581_v50 = vadd.f32 %v1534_v55, %v1147_v29  ;;  %v1103_v14 = vpop.f32.mrf.mxu1  ;;  %v8132_v42 = vpop.f32.mrf.mxu3  ;;  %v4643_v29 = vmul.u32 14564, %v4640_v41  ;;  %v2808_v41 = vrot.slane %v8161_v45, 2  ;;  %v8187_v45 = vadd.f32 %v8096_v25, %v8113_v2  ;;  %v8202_v2 = vld [vmem:[%s7478_s28 + $0x50] sm:$0xff] }
 0x1d0   : > { %v8141_v10 = vpop.f32.mrf.mxu0  ;;  %v1148_v3 = vadd.f32 %v1103_v14, %v7608_v20  ;;  %v4647_v20 = vshll.u32 %v4644_v62, 16 }
 0x1d1   : > { %v8139_v6 = vadd.f32 %v8069_v35, %v1581_v50  ;;  %9380 = vst [vmem:[#allocation21_spill] sm:$0xff] %v8141_v10  ;;  %v3239_v35 = vrot.slane %v8128_v63, 2  ;;  %v4240_v50 = vrot.slane %v7280_v11, 3  ;;  %v8168_v63 = vld [vmem:[%s7478_s28 + $0x50] sm:$0xff]  ;;  %v9349_v11 = vmov 0  }
 0x1d2   : > { %6805 = vmatmul.msk.bf16.gmra.mxu1 %vm415_vm1, %v2805_v39  ;;  %v3743_v39 = vrot.slane %v3741_v7, 2  ;;  %vm4651_vm8 = vc.u32 %v4643_v29, %v4647_v20  ;;  %v8181_v7 = vadd.s32 8, %v8134_v54  ;;  %9383 = vst [vmem:[#allocation24_spill] sm:$0xff] %v8187_v45  ;;  %v9351_v45 = vrot.slane %v8202_v2, 2 }
 0x1d3   : > { %6896 = vmatmul.msk.bf16.gmra.mxu2 %vm415_vm1, %v3238_v0  ;;  %7078 = vmatmul.msk.bf16.gmra.mxu0 %vm415_vm1, %v4239_v43  ;;  %v3240_v33 = vsel %vm2792_vm6, %v3237_v17, %v3239_v35  ;;  %v3746_v0 = vrot.slane %v3744_v5, 3  ;;  %v4646_v43 = vmul.u32 58254, %v4641_v52  ;;  %v3241_v17 = vrot.slane %v8164_v23, 2 }
 0x1d4   : > { %6989 = vmatmul.msk.bf16.gmra.mxu3 %vm415_vm1, %v3739_v26  ;;  %v4649_v26 = vshll.u32 %v4645_v51, 16  ;;  %v4241_v52 = vsel %vm4226_vm7, %v4238_v44, %v4240_v50  ;;  %v4648_v23 = vshrl.u32 %v4644_v62, 16  ;;  %v8205_v62 = vld [vmem:[%s7478_s28 + $0x58] sm:$0xff] }
 0x1d5   : > { %v8199_v25 = vsel %vm2792_vm6, %v3239_v35, %v3241_v17 }
 0x1d6   : > { %v1537_v58 = vpop.f32.mrf.mxu2 }
 0x1d7   : > { %v1582_v55 = vadd.f32 %v1537_v58, %v1148_v3  ;;  %v1105_v13 = vpop.f32.mrf.mxu1  ;;  %v8170_v14 = vpop.f32.mrf.mxu3  ;;  %v4652_v3 = vsel %vm4651_vm8, 1, %v9349_v11  ;;  %v4653_v58 = vadd.s32 %v4647_v20, %v4643_v29  ;;  %v4669_v29 = vand.u32 65535, %v8181_v7 }
 0x1d8   : > { %v8175_v31 = vpop.f32.mrf.mxu0  ;;  %v4654_v5 = vadd.s32 %v4652_v3, %v4646_v43  ;;  %v1149_v20 = vadd.f32 %v1105_v13, %v7619_v34  ;;  %v8194_v11 = vsel %vm2792_vm6, %v2806_v56, %v2808_v41 }
 0x1d9   : > { %v8173_v10 = vadd.f32 %v8084_v22, %v1582_v55  ;;  %9382 = vst [vmem:[#allocation23_spill] sm:$0xff] %v8175_v31  ;;  %v4242_v22 = vrot.slane %v8168_v63, 3  ;;  %v8189_v55 = vor.u32 %v3746_v0, %v3743_v39  ;;  %vm4655_vm9 = vc.u32 %v4653_v58, %v4649_v26 }
 0x1da   : > { %v9384_v31 = vmov 0   ;;  %v4670_v63 = vshrl.u32 %v8181_v7, 16  ;;  %v4650_v39 = vshrl.u32 %v4645_v51, 16  ;;  %v8207_v26 = vmul.u32 58254, %v4669_v29 }
 0x1db   : > { %9381 = vst [vmem:[#allocation22_spill] sm:$0xff] %v8173_v10  ;;  %v4656_v44 = vsel %vm4655_vm9, 1, %v9384_v31  ;;  %v8210_v56 = vsel %vm4226_vm7, %v4240_v50, %v4242_v22  ;;  %v4672_v13 = vmul.u32 14564, %v4669_v29  ;;  %v3748_v35 = vsel %vm3659_vm5, %v8125_v40, %v8189_v55 }
 0x1dc   : > { %v4658_v0 = vadd.s32 %v4656_v44, %v4654_v5  ;;  %v8212_v3 = vmul.u32 14564, %v4670_v63  ;;  %v8222_v5 = vld [vmem:[%s7478_s28 + $0x58] sm:$0xff]  ;;  %v4675_v44 = vmul.u32 58254, %v4670_v63  ;;  %v8235_v51 = vsel %vm2792_vm6, %v2808_v41, %v9351_v45 }
 0x1de   : > { %v1539_v43 = vpop.f32.mrf.mxu2  ;;  %v4678_v48 = vshll.u32 %v8212_v3, 16 }
 0x1df   : > { %v1583_v34 = vadd.f32 %v1539_v43, %v1149_v20  ;;  %v1108_v58 = vpop.f32.mrf.mxu1  ;;  %v8214_v10 = vpop.f32.mrf.mxu3  ;;  %v4659_v20 = vadd.s32 %v4658_v0, %v4648_v23  ;;  %v4676_v43 = vshll.u32 %v8207_v26, 16  ;;  %v9352_v23 = vrot.slane %v8222_v5, 3 }
 0x1e0   : > { %v8227_v29 = vpop.f32.mrf.mxu0  ;;  %v1150_v40 = vadd.f32 %v1108_v58, %v9387_v9 }
 0x1e1   : > { %v8225_v50 = vadd.f32 %v8093_v49, %v1583_v34  ;;  %9386 = vst [vmem:[#allocation26_spill] sm:$0xff] %v8227_v29  ;;  %v4660_v0 = vadd.s32 %v4659_v20, %v4650_v39  ;;  %v9388_v49 = vrot.slane %v8205_v62, 2  ;;  %vm4680_vm10 = vc.u32 %v4672_v13, %v4676_v43  ;;  %v7265_v39 = vld [vmem:[%s7478_s28 + $0x60] sm:$0xff] }
 0x1e2   : > { %6806 = vmatmul.msk.bf16.gmra.mxu1 %vm415_vm1, %v8157_v27  ;;  %v4682_v9 = vadd.s32 %v4676_v43, %v4672_v13  ;;  %v8247_v34 = vadd.s32 16, %v8134_v54  ;;  %v8253_v41 = vsel %vm4226_vm7, %v4242_v22, %v9352_v23  ;;  %v4681_v58 = vsel %vm4680_vm10, 1, %v9384_v31 }
 0x1e3   : > { %9385 = vst [vmem:[#allocation25_spill] sm:$0xff] %v8225_v50  ;;  %6897 = vmatmul.msk.bf16.gmra.mxu2 %vm415_vm1, %v3240_v33  ;;  %v8244_v63 = vsel %vm2792_vm6, %v3241_v17, %v9388_v49  ;;  %7079 = vmatmul.msk.bf16.gmra.mxu0 %vm415_vm1, %v4241_v52  ;;  %v4661_v27 = vshrl.u32 %v4660_v0, 4  ;;  %v4677_v33 = vshrl.u32 %v8207_v26, 16  ;;  %v4683_v17 = vadd.s32 %v4681_v58, %v4675_v44 }
 0x1e4   : > { %6990 = vmatmul.msk.bf16.gmra.mxu3 %vm415_vm1, %v3748_v35  ;;  %vm4684_vm11 = vc.u32 %v4682_v9, %v4678_v48  ;;  %v4698_v13 = vand.u32 65535, %v8247_v34  ;;  %v4699_v20 = vshrl.u32 %v8247_v34, 16  ;;  %v3750_v49 = vshrl.u32 %v7265_v39, 16 }
 0x1e5   : > { %v4662_v43 = vmul.u32 18, %v4661_v27  ;;  %v3753_v45 = vshll.u32 %v7265_v39, 16  ;;  %v4679_v22 = vshrl.u32 %v8212_v3, 16  ;;  %v4685_v23 = vsel %vm4684_vm11, 1, %v9384_v31  ;;  %v9390_v27 = vld [vmem:[#allocation4_spill] sm:$0xff] }
 0x1e6   : > { %v1542_v52 = vpop.f32.mrf.mxu2  ;;  %v4701_v26 = vmul.u32 14564, %v4698_v13  ;;  %v4702_v29 = vmul.u32 58254, %v4698_v13  ;;  %v3752_v35 = vrot.slane %v3750_v49, 2  ;;  %v4687_v9 = vadd.s32 %v4685_v23, %v4683_v17 }
 0x1e7   : > { %v1584_v0 = vadd.f32 %v1542_v52, %v1150_v40  ;;  %v1110_v50 = vpop.f32.mrf.mxu1  ;;  %v8263_v18 = vpop.f32.mrf.mxu3  ;;  %v4663_v48 = vsub.s32 %v8134_v54, %v4662_v43  ;;  %v3755_v44 = vrot.slane %v3753_v45, 3  ;;  %v8272_v3 = vmul.u32 14564, %v4699_v20 }
 0x1e8   : > { %v1151_v39 = vadd.f32 %v1110_v50, %v9390_v27  ;;  %v8270_v38 = vpop.f32.mrf.mxu0  ;;  %v4704_v40 = vmul.u32 58254, %v4699_v20  ;;  %v4688_v45 = vadd.s32 %v4687_v9, %v4677_v33  ;;  %v4705_v23 = vshll.u32 %v4702_v29, 16  ;;  %v8287_v9 = vld [vmem:[%s7478_s28 + $0x58] sm:$0xff] }
 0x1e9   : > { %v8267_v58 = vadd.f32 %v8108_v15, %v1584_v0  ;;  %9391 = vst [vmem:[#allocation4_spill] sm:$0xff] %v8270_v38  ;;  %vm5681_vm12 = vcmp.ne.s32.totalorder %v4663_v48, 0  ;;  %vm5717_vm13 = vcmp.lt.s32.totalorder %v4663_v48, 0  ;;  %v5789_v13 = vadd.s32 18, %v4663_v48 }
 0x1ea   : > { %v8274_v52 = vor.u32 %v3755_v44, %v3752_v35  ;;  %vm5753_vm14 = vmand %vm5717_vm13, %vm5681_vm12  ;;  %v4707_v15 = vshll.u32 %v8272_v3, 16  ;;  %v4706_v43 = vshrl.u32 %v4702_v29, 16  ;;  %v8281_v20 = vadd.s32 24, %v8134_v54 }
 0x1eb   : > { %9389 = vst [vmem:[#allocation3_spill] sm:$0xff] %v8267_v58  ;;  %v5825_v17 = vsel %vm5753_vm14, %v5789_v13, %v4663_v48  ;;  %v4689_v49 = vadd.s32 %v4688_v45, %v4679_v22  ;;  %vm4709_vm0 = vc.u32 %v4701_v26, %v4705_v23  ;;  %v4711_v0 = vadd.s32 %v4705_v23, %v4701_v26  ;;  %v8290_v48 = vld [vmem:[%s7478_s28 + $0x60] sm:$0xff] }
 0x1ec   : > { %v3757_v50 = vsel %vm3659_vm5, %v8189_v55, %v8274_v52  ;;  %vm5861_vm15 = vcmp.lt.s32.totalorder %v5825_v17, 16  ;;  %v9353_v44 = vmov 0.0   ;;  %v4708_v55 = vshrl.u32 %v8272_v3, 16 }
 0x1ed   : > { %v8284_v33 = vsel %vm5861_vm15, 1.0, %v9353_v44  ;;  %v4710_v29 = vsel %vm4709_vm0, 1, %v9384_v31  ;;  %v4727_v27 = vand.u32 65535, %v8281_v20  ;;  %v4690_v22 = vshrl.u32 %v4689_v49, 4  ;;  %v8298_v44 = vld [vmem:[%s7478_s28 + $0x60] sm:$0xff] }
 0x1ee   : > { %v1544_v35 = vpop.f32.mrf.mxu2  ;;  %v4712_v45 = vadd.s32 %v4710_v29, %v4704_v40  ;;  %vm4713_vm2 = vc.u32 %v4711_v0, %v4707_v15  ;;  %v9357_v23 = vrot.slane %v8287_v9, 2  ;;  %v9356_v17 = vrot.slane %v8290_v48, 2 }
 0x1ef   : > { %v1585_v13 = vadd.f32 %v1544_v35, %v1151_v39  ;;  %v1113_v26 = vpop.f32.mrf.mxu1  ;;  %v4714_v38 = vsel %vm4713_vm2, 1, %v9384_v31  ;;  %v4728_v58 = vshrl.u32 %v8281_v20, 16  ;;  %v8308_v40 = vpop.f32.mrf.mxu3  ;;  %v4691_v15 = vmul.u32 18, %v4690_v22 }
 0x1f0   : > { %v1152_v47 = vadd.f32 %v1113_v26, %v9393_v30  ;;  %v8306_v39 = vpop.f32.mrf.mxu0  ;;  %v4716_v49 = vadd.s32 %v4714_v38, %v4712_v45  ;;  %v9395_v0 = vrot.slane %v8202_v2, 2  ;;  %v9355_v29 = vrot.slane %v8298_v44, 3 }
 0x1f1   : > { %v8303_v3 = vadd.f32 %v8132_v42, %v1585_v13  ;;  %9394 = vst [vmem:[#allocation5_spill] sm:$0xff] %v8306_v39  ;;  %v9396_v42 = vrot.slane %v8205_v62, 2  ;;  %v4730_v13 = vmul.u32 14564, %v4727_v27  ;;  %v4692_v38 = vsub.s32 %v8181_v7, %v4691_v15 }
 0x1f2   : > { %v8315_v35 = vsel %vm2792_vm6, %v9395_v0, %v9357_v23  ;;  %6807 = vmatmul.msk.bf16.gmra.mxu1 %vm415_vm1, %v8194_v11  ;;  %v4717_v2 = vadd.s32 %v4716_v49, %v4706_v43  ;;  %v8330_v22 = vmul.u32 58254, %v4727_v27  ;;  %v8332_v45 = vmul.u32 14564, %v4728_v58  ;;  %v7266_v11 = vld [vmem:[%s7478_s28 + $0x68] sm:$0xff] }
 0x1f3   : > { %9392 = vst [vmem:[#allocation27_spill] sm:$0xff] %v8303_v3  ;;  %v8322_v30 = vsel %vm2792_vm6, %v9396_v42, %v9356_v17  ;;  %6898 = vmatmul.msk.bf16.gmra.mxu2 %vm415_vm1, %v8199_v25  ;;  %7080 = vmatmul.msk.bf16.gmra.mxu0 %vm415_vm1, %v8210_v56  ;;  %v9397_v62 = vrot.slane %v8222_v5, 3  ;;  %v4733_v0 = vmul.u32 58254, %v4728_v58  ;;  %v8345_v25 = vadd.s32 32, %v8134_v54 }
 0x1f4   : > { %v8349_v7 = vadd.f32 %v8115_v28, %v8139_v6  ;;  %6991 = vmatmul.msk.bf16.gmra.mxu3 %vm415_vm1, %v3757_v50  ;;  %vm5682_vm3 = vcmp.ne.s32.totalorder %v4692_v38, 0  ;;  %vm5718_vm4 = vcmp.lt.s32.totalorder %v4692_v38, 0  ;;  %v5790_v56 = vadd.s32 18, %v4692_v38 }
 0x1f5   : > { %v8341_v26 = vsel %vm4226_vm7, %v9397_v62, %v9355_v29  ;;  %v4718_v43 = vadd.s32 %v4717_v2, %v4708_v55  ;;  %vm5754_vm8 = vmand %vm5718_vm4, %vm5682_vm3  ;;  %v3759_v5 = vshrl.u32 %v7266_v11, 16  ;;  %v3762_v15 = vshll.u32 %v7266_v11, 16  ;;  %v9400_v2 = vld [vmem:[#allocation6_spill] sm:$0xff] }
 0x1f6   : > { %9398 = vst [vmem:[#allocation28_spill] sm:$0xff] %v8349_v7  ;;  %v1547_v27 = vpop.f32.mrf.mxu2  ;;  %v4734_v49 = vshll.u32 %v8330_v22, 16  ;;  %v4735_v58 = vshrl.u32 %v8330_v22, 16  ;;  %v5826_v62 = vsel %vm5754_vm8, %v5790_v56, %v4692_v38  ;;  %v4736_v28 = vshll.u32 %v8332_v45, 16  ;;  %v8395_v7 = vld [vmem:[%s7478_s28 + $0x68] sm:$0xff] }
 0x1f7   : > { %v1586_v42 = vadd.f32 %v1547_v27, %v1152_v47  ;;  %v4719_v29 = vshrl.u32 %v4718_v43, 4  ;;  %v1115_v6 = vpop.f32.mrf.mxu1  ;;  %vm5862_vm9 = vcmp.lt.s32.totalorder %v5826_v62, 16  ;;  %v3761_v50 = vrot.slane %v3759_v5, 2  ;;  %v8368_v27 = vpop.f32.mrf.mxu3 }
 0x1f8   : > { %v3764_v17 = vrot.slane %v3762_v15, 3  ;;  %v4737_v23 = vshrl.u32 %v8332_v45, 16  ;;  %v1153_v11 = vadd.f32 %v1115_v6, %v9400_v2  ;;  %v8360_v39 = vpop.f32.mrf.mxu0  ;;  %v9402_v3 = vmov 0.0   ;;  %v8381_v6 = vld [vmem:[%s7478_s28 + $0x60] sm:$0xff] }
 0x1f9   : > { %v8357_v55 = vadd.f32 %v8170_v14, %v1586_v42  ;;  %9401 = vst [vmem:[#allocation6_spill] sm:$0xff] %v8360_v39  ;;  %v8363_v22 = vsel %vm5862_vm9, 1.0, %v9402_v3  ;;  %v4720_v47 = vmul.u32 18, %v4719_v29  ;;  %vm4738_vm10 = vc.u32 %v4730_v13, %v4734_v49 }
 0x1fa   : > { %v8365_v38 = vor.u32 %v3764_v17, %v3761_v50  ;;  %v4740_v56 = vadd.s32 %v4734_v49, %v4730_v13  ;;  %v4756_v43 = vand.u32 65535, %v8345_v25  ;;  %v4739_v45 = vsel %vm4738_vm10, 1, %v9384_v31  ;;  %v8384_v50 = vld [vmem:[%s7478_s28 + $0x68] sm:$0xff] }
 0x1fb   : > { %9399 = vst [vmem:[#allocation29_spill] sm:$0xff] %v8357_v55  ;;  %v4721_v14 = vsub.s32 %v8247_v34, %v4720_v47  ;;  %v4757_v5 = vshrl.u32 %v8345_v25, 16  ;;  %v8374_v15 = vadd.s32 40, %v8134_v54  ;;  %v4741_v29 = vadd.s32 %v4739_v45, %v4733_v0 }
 0x1fc   : > { %v3766_v17 = vsel %vm3659_vm5, %v8274_v52, %v8365_v38  ;;  %vm4742_vm11 = vc.u32 %v4740_v56, %v4736_v28  ;;  %v4759_v13 = vmul.u32 14564, %v4756_v43  ;;  %v8386_v2 = vmul.u32 58254, %v4756_v43 }
 0x1fd   : > { %vm5683_vm12 = vcmp.ne.s32.totalorder %v4721_v14, 0  ;;  %vm5719_vm13 = vcmp.lt.s32.totalorder %v4721_v14, 0  ;;  %v5791_v49 = vadd.s32 18, %v4721_v14  ;;  %v4743_v34 = vsel %vm4742_vm11, 1, %v9384_v31 }
 0x1fe   : > { %v1549_v42 = vpop.f32.mrf.mxu2  ;;  %vm5755_vm14 = vmand %vm5719_vm13, %vm5683_vm12  ;;  %v4745_v62 = vadd.s32 %v4743_v34, %v4741_v29  ;;  %v8388_v47 = vmul.u32 14564, %v4757_v5  ;;  %v4762_v52 = vmul.u32 58254, %v4757_v5  ;;  %v4785_v56 = vand.u32 65535, %v8374_v15 }
 0x1ff   : > { %v1587_v0 = vadd.f32 %v1549_v42, %v1153_v11  ;;  %v5827_v28 = vsel %vm5755_vm14, %v5791_v49, %v4721_v14  ;;  %v4786_v45 = vshrl.u32 %v8374_v15, 16  ;;  %v2896_v39 = vpop.f32.mrf.mxu1  ;;  %v9359_v29 = vrot.slane %v8381_v6, 2 }
 0x200   : > { %vm5863_vm15 = vcmp.lt.s32.totalorder %v5827_v28, 16  ;;  %v4746_v55 = vadd.s32 %v4745_v62, %v4735_v58  ;;  %v9358_v34 = vrot.slane %v8384_v50, 2  ;;  %v2986_v5 = vadd.f32 %v2896_v39, %v7745_v12  ;;  %v4330_v11 = vpop.f32.mrf.mxu0 }
 0x201   : > { %v8398_v43 = vadd.f32 %v8214_v10, %v1587_v0  ;;  %v8402_v14 = vsel %vm5863_vm15, 1.0, %v9402_v3  ;;  %v4763_v49 = vshll.u32 %v8386_v2, 16  ;;  %v9404_v58 = vrot.slane %v8287_v9, 2 }
 0x202   : > { %v4747_v42 = vadd.s32 %v4746_v55, %v4737_v23  ;;  %v9405_v10 = vrot.slane %v8290_v48, 2  ;;  %v9360_v39 = vrot.slane %v8395_v7, 3  ;;  %6808 = vmatmul.msk.bf16.gmra.mxu1 %vm415_vm1, %v8235_v51  ;;  %v4764_v9 = vshrl.u32 %v8386_v2, 16  ;;  %v7267_v2 = vld [vmem:[%s7478_s28 + $0x70] sm:$0xff] }
 0x203   : > { %9403 = vst [vmem:[#allocation30_spill] sm:$0xff] %v8398_v43  ;;  %v8410_v62 = vsel %vm2792_vm6, %v9404_v58, %v9359_v29  ;;  %6899 = vmatmul.msk.bf16.gmra.mxu2 %vm415_vm1, %v8244_v63  ;;  %v4765_v23 = vshll.u32 %v8388_v47, 16  ;;  %v4766_v55 = vshrl.u32 %v8388_v47, 16  ;;  %vm4767_vm0 = vc.u32 %v4759_v13, %v4763_v49  ;;  %7081 = vmatmul.msk.bf16.gmra.mxu0 %vm415_vm1, %v8253_v41  ;;  %v8438_v58 = vpop.f32.mrf.mxu3 }
 0x204   : > { %v8417_v12 = vsel %vm2792_vm6, %v9405_v10, %v9358_v34  ;;  %v4748_v48 = vshrl.u32 %v4747_v42, 4  ;;  %v9406_v0 = vrot.slane %v8298_v44, 3  ;;  %v4768_v63 = vsel %vm4767_vm0, 1, %v9384_v31  ;;  %6992 = vmatmul.msk.bf16.gmra.mxu3 %vm415_vm1, %v3766_v17 }
 0x205   : > { %v4769_v28 = vadd.s32 %v4763_v49, %v4759_v13  ;;  %v4770_v47 = vadd.s32 %v4768_v63, %v4762_v52  ;;  %v4788_v10 = vmul.u32 14564, %v4785_v56  ;;  %v8441_v34 = vmul.u32 58254, %v4785_v56 }
 0x206   : > { %v8434_v51 = vsel %vm4226_vm7, %v9406_v0, %v9360_v39  ;;  %v8443_v41 = vmul.u32 14564, %v4786_v45  ;;  %v3329_v42 = vpop.f32.mrf.mxu2  ;;  %v4749_v29 = vmul.u32 18, %v4748_v48  ;;  %v3768_v44 = vshrl.u32 %v7267_v2, 16 }
 0x207   : > { %vm4771_vm2 = vc.u32 %v4769_v28, %v4765_v23  ;;  %v3771_v0 = vshll.u32 %v7267_v2, 16  ;;  %v3419_v39 = vadd.f32 %v3329_v42, %v2986_v5  ;;  %v4791_v13 = vmul.u32 58254, %v4786_v45  ;;  %v2898_v46 = vpop.f32.mrf.mxu1 }
 0x208   : > { %v4772_v43 = vsel %vm4771_vm2, 1, %v9384_v31  ;;  %v4792_v49 = vshll.u32 %v8441_v34, 16  ;;  %v4750_v17 = vsub.s32 %v8281_v20, %v4749_v29  ;;  %v3770_v63 = vrot.slane %v3768_v44, 2  ;;  %v4332_v48 = vpop.f32.mrf.mxu0 }
 0x209   : > { %v4774_v52 = vadd.s32 %v4772_v43, %v4770_v47  ;;  %v3773_v56 = vrot.slane %v3771_v0, 3  ;;  %v3986_v16 = vadd.f32 %v8263_v18, %v3419_v39  ;;  %v2987_v21 = vadd.f32 %v2898_v46, %v7758_v32 }
 0x20a   : > { %v4793_v23 = vshrl.u32 %v8441_v34, 16  ;;  %v4794_v5 = vshll.u32 %v8443_v41, 16  ;;  %vm5684_vm3 = vcmp.ne.s32.totalorder %v4750_v17, 0  ;;  %vm5720_vm4 = vcmp.lt.s32.totalorder %v4750_v17, 0 }
 0x20b   : > { %v5792_v45 = vadd.s32 18, %v4750_v17  ;;  %v4775_v28 = vadd.s32 %v4774_v52, %v4764_v9  ;;  %v8452_v2 = vadd.f32 %v4330_v11, %v3986_v16  ;;  %vm5756_vm8 = vmand %vm5720_vm4, %vm5684_vm3  ;;  %v8454_v20 = vor.u32 %v3773_v56, %v3770_v63  ;;  %v8475_v0 = vpop.f32.mrf.mxu3 }
 0x20c   : > { %v4795_v29 = vshrl.u32 %v8443_v41, 16  ;;  %vm4796_vm9 = vc.u32 %v4788_v10, %v4792_v49  ;;  %v4798_v34 = vadd.s32 %v4792_v49, %v4788_v10  ;;  %v8469_v10 = vld [vmem:[%s7478_s28 + $0x68] sm:$0xff]  ;;  %v8472_v41 = vld [vmem:[%s7478_s28 + $0x70] sm:$0xff] }
 0x20d   : > { %v5828_v32 = vsel %vm5756_vm8, %v5792_v45, %v4750_v17  ;;  %v4776_v46 = vadd.s32 %v4775_v28, %v4766_v55  ;;  %v4797_v18 = vsel %vm4796_vm9, 1, %v9384_v31  ;;  %v5969_v43 = vmul.f32 %v8284_v33, %v8452_v2 }
 0x20e   : > { %v6047_v16 = vmul.f32 %v8452_v2, %v8452_v2  ;;  %vm5864_vm10 = vcmp.lt.s32.totalorder %v5828_v32, 16  ;;  %v3775_v11 = vsel %vm3659_vm5, %v8365_v38, %v8454_v20  ;;  %v3331_v39 = vpop.f32.mrf.mxu2  ;;  %v4799_v47 = vadd.s32 %v4797_v18, %v4791_v13 }
 0x20f   : > { %v8466_v9 = vsel %vm5864_vm10, 1.0, %v9402_v3  ;;  %v4777_v55 = vshrl.u32 %v4776_v46, 4  ;;  %vm4800_vm11 = vc.u32 %v4798_v34, %v4794_v5  ;;  %v3420_v44 = vadd.f32 %v3331_v39, %v2987_v21  ;;  %v2901_v17 = vpop.f32.mrf.mxu1  ;;  %v8485_v5 = vld [vmem:[%s7478_s28 + $0x70] sm:$0xff] }
 0x210   : > { %v6083_v42 = vmul.f32 %v8284_v33, %v6047_v16  ;;  %v4801_v49 = vsel %vm4800_vm11, 1, %v9384_v31  ;;  %v8479_v38 = vadd.s32 48, %v8134_v54  ;;  %v2816_v13 = vrot.slane %v8469_v10, 2  ;;  %v4335_v45 = vpop.f32.mrf.mxu0 }
 0x211   : > { %v4778_v52 = vmul.u32 18, %v4777_v55  ;;  %v4803_v63 = vadd.s32 %v4801_v49, %v4799_v47  ;;  %v3249_v56 = vrot.slane %v8472_v41, 2  ;;  %v3987_v33 = vadd.f32 %v8308_v40, %v3420_v44 }
 0x212   : > { %v2988_v21 = vadd.f32 %v2901_v17, %v7769_v60  ;;  %v4814_v28 = vand.u32 65535, %v8479_v38  ;;  %v4815_v32 = vshrl.u32 %v8479_v38, 16  ;;  %v9407_v34 = vrot.slane %v8381_v6, 2  ;;  %6809 = vmatmul.msk.bf16.gmra.mxu1 %vm415_vm1, %v8315_v35 }
 0x213   : > { %v4779_v46 = vsub.s32 %v8345_v25, %v4778_v52  ;;  %v4804_v18 = vadd.s32 %v4803_v63, %v4793_v23  ;;  %v9408_v40 = vrot.slane %v8384_v50, 2  ;;  %v4421_v39 = vadd.f32 %v4332_v48, %v3987_v33  ;;  %6900 = vmatmul.msk.bf16.gmra.mxu2 %vm415_vm1, %v8322_v30  ;;  %7082 = vmatmul.msk.bf16.gmra.mxu0 %vm415_vm1, %v8341_v26 }
 0x214   : > { %v8497_v16 = vsel %vm2792_vm6, %v9407_v34, %v2816_v13  ;;  %v4250_v25 = vrot.slane %v8485_v5, 3  ;;  %v4817_v6 = vmul.u32 14564, %v4814_v28  ;;  %v8511_v23 = vmul.u32 58254, %v4814_v28  ;;  %6993 = vmatmul.msk.bf16.gmra.mxu3 %vm415_vm1, %v3775_v11  ;;  %v7268_v11 = vld [vmem:[%s7478_s28 + $0x78] sm:$0xff] }
 0x215   : > { %v8504_v60 = vsel %vm2792_vm6, %v9408_v40, %v3249_v56  ;;  %vm5685_vm12 = vcmp.ne.s32.totalorder %v4779_v46, 0  ;;  %vm5721_vm13 = vcmp.lt.s32.totalorder %v4779_v46, 0  ;;  %v5793_v35 = vadd.s32 18, %v4779_v46 }
 0x216   : > { %v4805_v50 = vadd.s32 %v4804_v18, %v4795_v29  ;;  %v7294_v30 = vpack.c.bf16 %v4421_v39, %v8452_v2  ;;  %v5970_v48 = vmul.f32 %v8363_v22, %v4421_v39  ;;  %v6048_v55 = vmul.f32 %v4421_v39, %v4421_v39  ;;  %vm5757_vm14 = vmand %vm5721_vm13, %vm5685_vm12  ;;  %v3334_v44 = vpop.f32.mrf.mxu2 }
 0x217   : > { %v9409_v47 = vrot.slane %v8395_v7, 3  ;;  %v5829_v49 = vsel %vm5757_vm14, %v5793_v35, %v4779_v46  ;;  %v8530_v29 = vmul.u32 14564, %v4815_v32  ;;  %v4820_v2 = vmul.u32 58254, %v4815_v32  ;;  %v2903_v28 = vpop.f32.mrf.mxu1  ;;  %v8542_v35 = vpop.f32.mrf.mxu3 }
 0x218   : > { %v4806_v17 = vshrl.u32 %v4805_v50, 4  ;;  %7295 = vst [vmem:[%s8516_s18] sm:$0xff] %v7294_v30   ;;  %v6005_v52 = vadd.f32 %v5970_v48, %v5969_v43  ;;  %v6084_v63 = vmul.f32 %v8363_v22, %v6048_v55  ;;  %v3421_v33 = vadd.f32 %v3334_v44, %v2988_v21  ;;  %v4337_v43 = vpop.f32.mrf.mxu0 }
 0x219   : > { %v8528_v26 = vsel %vm4226_vm7, %v9409_v47, %v4250_v25  ;;  %vm5865_vm15 = vcmp.lt.s32.totalorder %v5829_v49, 16  ;;  %v4821_v34 = vshll.u32 %v8511_v23, 16  ;;  %v4822_v46 = vshrl.u32 %v8511_v23, 16 }
 0x21a   : > { %v8536_v18 = vsel %vm5865_vm15, 1.0, %v9402_v3  ;;  %v4807_v7 = vmul.u32 18, %v4806_v17  ;;  %v6119_v40 = vadd.f32 %v6084_v63, %v6083_v42  ;;  %v3988_v39 = vadd.f32 %v8368_v27, %v3421_v33 }
 0x21b   : > { %v2989_v32 = vadd.f32 %v2903_v28, %v7782_v1  ;;  %v4823_v22 = vshll.u32 %v8530_v29, 16  ;;  %v4824_v50 = vshrl.u32 %v8530_v29, 16  ;;  %vm4825_vm0 = vc.u32 %v4817_v6, %v4821_v34 }
 0x21c   : > { %v4808_v21 = vsub.s32 %v8374_v15, %v4807_v7  ;;  %v4827_v30 = vadd.s32 %v4821_v34, %v4817_v6  ;;  %v4422_v48 = vadd.f32 %v4335_v45, %v3988_v39  ;;  %v4826_v55 = vsel %vm4825_vm0, 1, %v9384_v31 }
 0x21d   : > { %v3777_v23 = vshrl.u32 %v7268_v11, 16  ;;  %v3780_v42 = vshll.u32 %v7268_v11, 16  ;;  %v4828_v1 = vadd.s32 %v4826_v55, %v4820_v2  ;;  %v8551_v29 = vadd.s32 56, %v8134_v54  ;;  %v8555_v2 = vld [vmem:[%s7478_s28 + $0x70] sm:$0xff] }
 0x21e   : > { %vm5686_vm2 = vcmp.ne.s32.totalorder %v4808_v21, 0  ;;  %vm5722_vm3 = vcmp.lt.s32.totalorder %v4808_v21, 0  ;;  %v5794_v27 = vadd.s32 18, %v4808_v21  ;;  %v5971_v47 = vmul.f32 %v8402_v14, %v4422_v48  ;;  %v3336_v49 = vpop.f32.mrf.mxu2 }
 0x21f   : > { %v6049_v44 = vmul.f32 %v4422_v48, %v4422_v48  ;;  %vm5758_vm4 = vmand %vm5722_vm3, %vm5686_vm2  ;;  %vm4829_vm8 = vc.u32 %v4827_v30, %v4823_v22  ;;  %v3779_v15 = vrot.slane %v3777_v23, 2  ;;  %v3782_v6 = vrot.slane %v3780_v42, 3  ;;  %v2906_v28 = vpop.f32.mrf.mxu1 }
 0x220   : > { %v5830_v17 = vsel %vm5758_vm4, %v5794_v27, %v4808_v21  ;;  %v4830_v45 = vsel %vm4829_vm8, 1, %v9384_v31  ;;  %v6006_v63 = vadd.f32 %v6005_v52, %v5971_v47  ;;  %v3422_v11 = vadd.f32 %v3336_v49, %v2989_v32  ;;  %v8564_v21 = vld [vmem:[%s7478_s28 + $0x78] sm:$0xff]  ;;  %v4340_v32 = vpop.f32.mrf.mxu0 }
 0x221   : > { %v6085_v33 = vmul.f32 %v8402_v14, %v6049_v44  ;;  %vm5866_vm9 = vcmp.lt.s32.totalorder %v5830_v17, 16  ;;  %v4832_v34 = vadd.s32 %v4830_v45, %v4828_v1  ;;  %v8560_v39 = vor.u32 %v3782_v6, %v3779_v15 }
 0x222   : > { %v8558_v7 = vsel %vm5866_vm9, 1.0, %v9402_v3  ;;  %v4843_v22 = vand.u32 65535, %v8551_v29  ;;  %v3989_v52 = vadd.f32 %v8438_v58, %v3422_v11  ;;  %v2990_v14 = vadd.f32 %v2906_v28, %v7793_v61  ;;  %6810 = vmatmul.msk.bf16.gmra.mxu1 %vm415_vm1, %v8410_v62  ;;  %v8576_v58 = vpop.f32.mrf.mxu3 }
 0x223   : > { %v6120_v30 = vadd.f32 %v6119_v40, %v6085_v33  ;;  %v4844_v55 = vshrl.u32 %v8551_v29, 16  ;;  %v4833_v23 = vadd.s32 %v4832_v34, %v4822_v46  ;;  %v3784_v42 = vsel %vm3659_vm5, %v8454_v20, %v8560_v39  ;;  %6901 = vmatmul.msk.bf16.gmra.mxu2 %vm415_vm1, %v8417_v12  ;;  %7083 = vmatmul.msk.bf16.gmra.mxu0 %vm415_vm1, %v8434_v51  ;;  %v8585_v51 = vld [vmem:[%s7478_s28 + $0x78] sm:$0xff] }
 0x224   : > { %v4846_v27 = vmul.u32 14564, %v4843_v22  ;;  %v4847_v1 = vmul.u32 58254, %v4843_v22  ;;  %v4423_v47 = vadd.f32 %v4337_v43, %v3989_v52  ;;  %v2818_v44 = vrot.slane %v8555_v2, 2  ;;  %6994 = vmatmul.msk.bf16.gmra.mxu3 %vm415_vm1, %v3784_v42  ;;  %v7269_v22 = vld [vmem:[%s7478_s28 + $0x80] sm:$0xff] }
 0x225   : > { %v4848_v61 = vmul.u32 14564, %v4844_v55  ;;  %v4849_v40 = vmul.u32 58254, %v4844_v55  ;;  %v4834_v20 = vadd.s32 %v4833_v23, %v4824_v50  ;;  %v3251_v15 = vrot.slane %v8564_v21, 2 }
 0x226   : > { %v4850_v46 = vshll.u32 %v4847_v1, 16  ;;  %v4851_v43 = vshrl.u32 %v4847_v1, 16  ;;  %v7299_v62 = vpack.c.bf16 %v4423_v47, %v4422_v48  ;;  %v5972_v12 = vmul.f32 %v8466_v9, %v4423_v47  ;;  %v3339_v45 = vpop.f32.mrf.mxu2 }
 0x227   : > { %v6050_v49 = vmul.f32 %v4423_v47, %v4423_v47  ;;  %v4852_v17 = vshll.u32 %v4848_v61, 16  ;;  %v4835_v6 = vshrl.u32 %v4834_v20, 4  ;;  %v4853_v33 = vshrl.u32 %v4848_v61, 16  ;;  %v2908_v52 = vpop.f32.mrf.mxu1 }
 0x228   : > { %vm4854_vm10 = vc.u32 %v4846_v27, %v4850_v46  ;;  %v4856_v11 = vadd.s32 %v4850_v46, %v4846_v27  ;;  %7381 = vst [vmem:[%s8516_s18 + $0x8] sm:$0xff] %v7299_v62   ;;  %v6007_v50 = vadd.f32 %v6006_v63, %v5972_v12  ;;  %v3423_v34 = vadd.f32 %v3339_v45, %v2990_v14  ;;  %v4342_v14 = vpop.f32.mrf.mxu0 }
 0x229   : > { %v6086_v28 = vmul.f32 %v8466_v9, %v6050_v49  ;;  %v4855_v48 = vsel %vm4854_vm10, 1, %v9384_v31  ;;  %v4836_v55 = vmul.u32 18, %v4835_v6  ;;  %v8596_v42 = vsel %vm2792_vm6, %v2816_v13, %v2818_v44 }
 0x22a   : > { %v4857_v23 = vadd.s32 %v4855_v48, %v4849_v40  ;;  %vm4858_vm11 = vc.u32 %v4856_v11, %v4852_v17  ;;  %v3990_v63 = vadd.f32 %v8475_v0, %v3423_v34  ;;  %v2991_v9 = vadd.f32 %v2908_v52, %v7806_v59  ;;  %v8614_v41 = vpop.f32.mrf.mxu3 }
 0x22b   : > { %v6121_v27 = vadd.f32 %v6120_v30, %v6086_v28  ;;  %v4859_v1 = vsel %vm4858_vm11, 1, %v9384_v31  ;;  %v4837_v47 = vsub.s32 %v8479_v38, %v4836_v55  ;;  %v8607_v10 = vsel %vm2792_vm6, %v3249_v56, %v3251_v15 }
 0x22c   : > { %v4861_v61 = vadd.s32 %v4859_v1, %v4857_v23  ;;  %v4252_v13 = vrot.slane %v8585_v51, 3  ;;  %v4424_v30 = vadd.f32 %v4340_v32, %v3990_v63  ;;  %v8611_v0 = vadd.s32 64, %v8134_v54 }
 0x22d   : > { %v3786_v59 = vshrl.u32 %v7269_v22, 16  ;;  %v3789_v40 = vshll.u32 %v7269_v22, 16  ;;  %vm5687_vm12 = vcmp.ne.s32.totalorder %v4837_v47, 0  ;;  %vm5723_vm13 = vcmp.lt.s32.totalorder %v4837_v47, 0 }
 0x22e   : > { %v5795_v20 = vadd.s32 18, %v4837_v47  ;;  %v4862_v38 = vadd.s32 %v4861_v61, %v4851_v43  ;;  %v5973_v46 = vmul.f32 %v8536_v18, %v4424_v30  ;;  %v6051_v62 = vmul.f32 %v4424_v30, %v4424_v30  ;;  %vm5759_vm14 = vmand %vm5723_vm13, %vm5687_vm12  ;;  %v3341_v12 = vpop.f32.mrf.mxu2 }
 0x22f   : > { %v8621_v56 = vsel %vm4226_vm7, %v4250_v25, %v4252_v13  ;;  %v4872_v32 = vand.u32 65535, %v8611_v0  ;;  %v4873_v43 = vshrl.u32 %v8611_v0, 16  ;;  %v3788_v45 = vrot.slane %v3786_v59, 2  ;;  %v2911_v34 = vpop.f32.mrf.mxu1 }
 0x230   : > { %v5831_v49 = vsel %vm5759_vm14, %v5795_v20, %v4837_v47  ;;  %v4863_v17 = vadd.s32 %v4862_v38, %v4853_v33  ;;  %v6008_v6 = vadd.f32 %v6007_v50, %v5973_v46  ;;  %v6087_v11 = vmul.f32 %v8536_v18, %v6051_v62  ;;  %v4345_v23 = vpop.f32.mrf.mxu0 }
 0x231   : > { %v3424_v28 = vadd.f32 %v3341_v12, %v2991_v9  ;;  %vm5867_vm15 = vcmp.lt.s32.totalorder %v5831_v49, 16  ;;  %v4875_v25 = vmul.u32 14564, %v4872_v32  ;;  %v4876_v22 = vmul.u32 58254, %v4872_v32 }
 0x232   : > { %v8627_v48 = vsel %vm5867_vm15, 1.0, %v9402_v3  ;;  %v4864_v5 = vshrl.u32 %v4863_v17, 4  ;;  %v6122_v52 = vadd.f32 %v6121_v27, %v6087_v11  ;;  %v2992_v33 = vadd.f32 %v2911_v34, %v7817_v4  ;;  %6811 = vmatmul.msk.bf16.gmra.mxu1 %vm415_vm1, %v8497_v16  ;;  %v8649_v12 = vpop.f32.mrf.mxu3  ;;  %v8659_v34 = vld [vmem:[%s7478_s28 + $0x80] sm:$0xff] }
 0x233   : > { %v3991_v55 = vadd.f32 %v8542_v35, %v3424_v28  ;;  %v8631_v63 = vmul.u32 14564, %v4873_v43  ;;  %v4878_v1 = vmul.u32 58254, %v4873_v43  ;;  %v4879_v18 = vshll.u32 %v4876_v22, 16  ;;  %6902 = vmatmul.msk.bf16.gmra.mxu2 %vm415_vm1, %v8504_v60  ;;  %7084 = vmatmul.msk.bf16.gmra.mxu0 %vm415_vm1, %v8528_v26 }
 0x234   : > { %v4865_v50 = vmul.u32 18, %v4864_v5  ;;  %v4880_v9 = vshrl.u32 %v4876_v22, 16  ;;  %v3791_v4 = vrot.slane %v3789_v40, 3 }
 0x235   : > { %v4425_v47 = vadd.f32 %v4342_v14, %v3991_v55  ;;  %v4881_v27 = vshll.u32 %v8631_v63, 16  ;;  %v4882_v35 = vshrl.u32 %v8631_v63, 16  ;;  %vm4883_vm0 = vc.u32 %v4875_v25, %v4879_v18 }
 0x236   : > { %v4866_v61 = vsub.s32 %v8551_v29, %v4865_v50  ;;  %v4885_v59 = vadd.s32 %v4879_v18, %v4875_v25  ;;  %v8643_v14 = vadd.s32 72, %v8134_v54  ;;  %v4884_v38 = vsel %vm4883_vm0, 1, %v9384_v31  ;;  %v3344_v46 = vpop.f32.mrf.mxu2 }
 0x237   : > { %v7304_v16 = vpack.c.bf16 %v4425_v47, %v4424_v30  ;;  %v5974_v60 = vmul.f32 %v8558_v7, %v4425_v47  ;;  %v6052_v20 = vmul.f32 %v4425_v47, %v4425_v47  ;;  %v4886_v26 = vadd.s32 %v4884_v38, %v4878_v1  ;;  %v8652_v30 = vld [vmem:[%s7478_s28 + $0x78] sm:$0xff]  ;;  %v2913_v49 = vpop.f32.mrf.mxu1 }
 0x238   : > { %vm5688_vm2 = vcmp.ne.s32.totalorder %v4866_v61, 0  ;;  %vm5724_vm3 = vcmp.lt.s32.totalorder %v4866_v61, 0  ;;  %v5796_v40 = vadd.s32 18, %v4866_v61  ;;  %v3425_v32 = vadd.f32 %v3344_v46, %v2992_v33  ;;  %v4347_v25 = vpop.f32.mrf.mxu0 }
 0x239   : > { %7382 = vst [vmem:[%s8516_s18 + $0x10] sm:$0xff] %v7304_v16   ;;  %v6009_v29 = vadd.f32 %v6008_v6, %v5974_v60  ;;  %v6088_v62 = vmul.f32 %v8558_v7, %v6052_v20  ;;  %vm5760_vm4 = vmand %vm5724_vm3, %vm5688_vm2  ;;  %vm4887_vm8 = vc.u32 %v4885_v59, %v4881_v27  ;;  %v8655_v11 = vor.u32 %v3791_v4, %v3788_v45  ;;  %v8682_v20 = vld [vmem:[%s7478_s28 + $0x80] sm:$0xff] }
 0x23a   : > { %v5832_v17 = vsel %vm5760_vm4, %v5796_v40, %v4866_v61  ;;  %v4888_v43 = vsel %vm4887_vm8, 1, %v9384_v31  ;;  %v4901_v28 = vand.u32 65535, %v8643_v14  ;;  %v3992_v7 = vadd.f32 %v8576_v58, %v3425_v32 }
 0x23b   : > { %v6123_v6 = vadd.f32 %v6122_v52, %v6088_v62  ;;  %v2993_v5 = vadd.f32 %v2913_v49, %v7830_v19  ;;  %vm5868_vm9 = vcmp.lt.s32.totalorder %v5832_v17, 16  ;;  %v4890_v55 = vadd.s32 %v4888_v43, %v4886_v26  ;;  %v8686_v26 = vld [vmem:[%s7478_s28 + $0x88] sm:$0xff]  ;;  %v8698_v43 = vpop.f32.mrf.mxu3 }
 0x23c   : > { %v8664_v22 = vsel %vm5868_vm9, 1.0, %v9402_v3  ;;  %v3793_v45 = vsel %vm3659_vm5, %v8560_v39, %v8655_v11  ;;  %v4902_v33 = vshrl.u32 %v8643_v14, 16  ;;  %v4426_v63 = vadd.f32 %v4345_v23, %v3992_v7 }
 0x23d   : > { %6995 = vmatmul.msk.bf16.gmra.mxu3 %vm415_vm1, %v3793_v45  ;;  %v4904_v52 = vmul.u32 14564, %v4901_v28  ;;  %v4905_v58 = vmul.u32 58254, %v4901_v28  ;;  %v2820_v19 = vrot.slane %v8652_v30, 2  ;;  %v4891_v50 = vadd.s32 %v4890_v55, %v4880_v9 }
 0x23e   : > { %v4906_v1 = vmul.u32 14564, %v4902_v33  ;;  %v4907_v18 = vmul.u32 58254, %v4902_v33  ;;  %v3253_v47 = vrot.slane %v8659_v34, 2  ;;  %v5975_v27 = vmul.f32 %v8627_v48, %v4426_v63  ;;  %v3346_v59 = vpop.f32.mrf.mxu2 }
 0x23f   : > { %v6053_v4 = vmul.f32 %v4426_v63, %v4426_v63  ;;  %v4908_v39 = vshll.u32 %v4905_v58, 16  ;;  %v4909_v61 = vshrl.u32 %v4905_v58, 16  ;;  %v4892_v23 = vadd.s32 %v4891_v50, %v4882_v35  ;;  %v2916_v62 = vpop.f32.mrf.mxu1 }
 0x240   : > { %v4910_v16 = vshll.u32 %v4906_v1, 16  ;;  %v4911_v60 = vshrl.u32 %v4906_v1, 16  ;;  %v8679_v9 = vsel %vm2792_vm6, %v2818_v44, %v2820_v19  ;;  %v6010_v38 = vadd.f32 %v6009_v29, %v5975_v27  ;;  %v4350_v17 = vpop.f32.mrf.mxu0 }
 0x241   : > { %v6089_v46 = vmul.f32 %v8627_v48, %v6053_v4  ;;  %v3426_v40 = vadd.f32 %v3346_v59, %v2993_v5  ;;  %vm4912_vm10 = vc.u32 %v4904_v52, %v4908_v39  ;;  %v4893_v35 = vshrl.u32 %v4892_v23, 4 }
 0x242   : > { %v4913_v32 = vsel %vm4912_vm10, 1, %v9384_v31  ;;  %v4914_v49 = vadd.s32 %v4908_v39, %v4904_v52  ;;  %v8694_v2 = vsel %vm2792_vm6, %v3251_v15, %v3253_v47  ;;  %v2994_v48 = vadd.f32 %v2916_v62, %v7841_v24  ;;  %6812 = vmatmul.msk.bf16.gmra.mxu1 %vm415_vm1, %v8596_v42 }
 0x243   : > { %v6124_v44 = vadd.f32 %v6123_v6, %v6089_v46  ;;  %v3993_v29 = vadd.f32 %v8614_v41, %v3426_v40  ;;  %v4915_v28 = vadd.s32 %v4913_v32, %v4907_v18  ;;  %v4894_v7 = vmul.u32 18, %v4893_v35  ;;  %6903 = vmatmul.msk.bf16.gmra.mxu2 %vm415_vm1, %v8607_v10  ;;  %7085 = vmatmul.msk.bf16.gmra.mxu0 %vm415_vm1, %v8621_v56  ;;  %v9410_v46 = vld [vmem:[#allocation7_spill] sm:$0xff]  ;;  %v8729_v32 = vpop.f32.mrf.mxu3 }
 0x244   : > { %vm4916_vm11 = vc.u32 %v4914_v49, %v4910_v16  ;;  %v4254_v5 = vrot.slane %v8682_v20, 3  ;;  %v8702_v55 = vadd.s32 80, %v8134_v54  ;;  %v3795_v15 = vshrl.u32 %v8686_v26, 16 }
 0x245   : > { %v4427_v21 = vadd.f32 %v4347_v25, %v3993_v29  ;;  %v4917_v24 = vsel %vm4916_vm11, 1, %v9384_v31  ;;  %v3798_v41 = vshll.u32 %v8686_v26, 16  ;;  %v4895_v6 = vsub.s32 %v8611_v0, %v4894_v7 }
 0x246   : > { %v4919_v45 = vadd.s32 %v4917_v24, %v4915_v28  ;;  %v8719_v42 = vsel %vm4226_vm7, %v4252_v13, %v4254_v5  ;;  %v4930_v10 = vand.u32 65535, %v8702_v55  ;;  %v4931_v58 = vshrl.u32 %v8702_v55, 16  ;;  %v3349_v50 = vpop.f32.mrf.mxu2 }
 0x247   : > { %v7309_v25 = vpack.c.bf16 %v4427_v21, %v4426_v63  ;;  %v5976_v33 = vmul.f32 %v8664_v22, %v4427_v21  ;;  %v6054_v52 = vmul.f32 %v4427_v21, %v4427_v21  ;;  %vm5689_vm12 = vcmp.ne.s32.totalorder %v4895_v6, 0  ;;  %v2918_v4 = vpop.f32.mrf.mxu1 }
 0x248   : > { %vm5725_vm13 = vcmp.lt.s32.totalorder %v4895_v6, 0  ;;  %v5797_v0 = vadd.s32 18, %v4895_v6  ;;  %v4920_v56 = vadd.s32 %v4919_v45, %v4909_v61  ;;  %v3427_v18 = vadd.f32 %v3349_v50, %v2994_v48  ;;  %v4352_v26 = vpop.f32.mrf.mxu0  ;;  %v8738_v50 = vld [vmem:[%s7478_s28 + $0x80] sm:$0xff] }
 0x249   : > { %7383 = vst [vmem:[%s8516_s18 + $0x18] sm:$0xff] %v7309_v25   ;;  %v6011_v1 = vadd.f32 %v6010_v38, %v5976_v33  ;;  %v6090_v51 = vmul.f32 %v8664_v22, %v6054_v52  ;;  %vm5761_vm14 = vmand %vm5725_vm13, %vm5689_vm12  ;;  %v4933_v13 = vmul.u32 14564, %v4930_v10  ;;  %v4934_v39 = vmul.u32 58254, %v4930_v10 }
 0x24a   : > { %v5833_v27 = vsel %vm5761_vm14, %v5797_v0, %v4895_v6  ;;  %v4921_v63 = vadd.s32 %v4920_v56, %v4911_v60  ;;  %v4935_v59 = vmul.u32 14564, %v4931_v58  ;;  %v3994_v16 = vadd.f32 %v8649_v12, %v3427_v18 }
 0x24b   : > { %v6125_v23 = vadd.f32 %v6124_v44, %v6090_v51  ;;  %vm5869_vm15 = vcmp.lt.s32.totalorder %v5833_v27, 16  ;;  %v2995_v40 = vadd.f32 %v2918_v4, %v9410_v46  ;;  %v4936_v62 = vmul.u32 58254, %v4931_v58  ;;  %v9411_v51 = vld [vmem:[#allocation8_spill] sm:$0xff] }
 0x24c   : > { %v7099_v61 = vsel %vm5869_vm15, 1.0, %v9402_v3  ;;  %v4922_v38 = vshrl.u32 %v4921_v63, 4  ;;  %v4937_v22 = vshll.u32 %v4934_v39, 16  ;;  %v4428_v35 = vadd.f32 %v4350_v17, %v3994_v16 }
 0x24d   : > { %v4938_v49 = vshrl.u32 %v4934_v39, 16  ;;  %v4939_v29 = vshll.u32 %v4935_v59, 16  ;;  %v4940_v60 = vshrl.u32 %v4935_v59, 16  ;;  %v3797_v12 = vrot.slane %v3795_v15, 2 }
 0x24e   : > { %v4923_v48 = vmul.u32 18, %v4922_v38  ;;  %vm4941_vm0 = vc.u32 %v4933_v13, %v4937_v22  ;;  %v4943_v44 = vadd.s32 %v4937_v22, %v4933_v13  ;;  %v5977_v28 = vmul.f32 %v7099_v61, %v4428_v35  ;;  %v3351_v6 = vpop.f32.mrf.mxu2  ;;  %v3923_v38 = vpop.f32.mrf.mxu3 }
 0x24f   : > { %v6055_v7 = vmul.f32 %v4428_v35, %v4428_v35  ;;  %v4942_v21 = vsel %vm4941_vm0, 1, %v9384_v31  ;;  %v3800_v24 = vrot.slane %v3798_v41, 3  ;;  %v8734_v17 = vadd.s32 88, %v8134_v54  ;;  %v2921_v0 = vpop.f32.mrf.mxu1 }
 0x250   : > { %v4924_v45 = vsub.s32 %v8643_v14, %v4923_v48  ;;  %v4944_v10 = vadd.s32 %v4942_v21, %v4936_v62  ;;  %vm4945_vm2 = vc.u32 %v4943_v44, %v4939_v29  ;;  %v6012_v25 = vadd.f32 %v6011_v1, %v5977_v28  ;;  %v4355_v13 = vpop.f32.mrf.mxu0  ;;  %v8760_v28 = vld [vmem:[%s7478_s28 + $0x88] sm:$0xff] }
 0x251   : > { %v6091_v33 = vmul.f32 %v7099_v61, %v6055_v7  ;;  %v3428_v52 = vadd.f32 %v3351_v6, %v2995_v40  ;;  %v4946_v58 = vsel %vm4945_vm2, 1, %v9384_v31  ;;  %v2996_v18 = vadd.f32 %v2921_v0, %v9411_v51  ;;  %v8763_v7 = vld [vmem:[%s7478_s28 + $0x88] sm:$0xff] }
 0x252   : > { %vm5690_vm3 = vcmp.ne.s32.totalorder %v4924_v45, 0  ;;  %vm5726_vm4 = vcmp.lt.s32.totalorder %v4924_v45, 0  ;;  %v5798_v15 = vadd.s32 18, %v4924_v45  ;;  %v4948_v41 = vadd.s32 %v4946_v58, %v4944_v10  ;;  %6813 = vmatmul.msk.bf16.gmra.mxu1 %vm415_vm1, %v8679_v9 }
 0x253   : > { %v6126_v56 = vadd.f32 %v6125_v23, %v6091_v33  ;;  %v3995_v14 = vadd.f32 %v8698_v43, %v3428_v52  ;;  %vm5762_vm8 = vmand %vm5726_vm4, %vm5690_vm3  ;;  %v8742_v27 = vor.u32 %v3800_v24, %v3797_v12  ;;  %v4959_v63 = vand.u32 65535, %v8734_v17  ;;  %6904 = vmatmul.msk.bf16.gmra.mxu2 %vm415_vm1, %v8694_v2  ;;  %7086 = vmatmul.msk.bf16.gmra.mxu0 %vm415_vm1, %v8719_v42  ;;  %v9412_v33 = vld [vmem:[#allocation9_spill] sm:$0xff] }
 0x254   : > { %v5834_v1 = vsel %vm5762_vm8, %v5798_v15, %v4924_v45  ;;  %v4949_v4 = vadd.s32 %v4948_v41, %v4938_v49  ;;  %v4960_v39 = vshrl.u32 %v8734_v17, 16  ;;  %v2822_v23 = vrot.slane %v8738_v50, 2 }
 0x255   : > { %v4429_v59 = vadd.f32 %v4352_v26, %v3995_v14  ;;  %vm5870_vm9 = vcmp.lt.s32.totalorder %v5834_v1, 16  ;;  %v3802_v43 = vsel %vm3659_vm5, %v8655_v11, %v8742_v27  ;;  %v4962_v40 = vmul.u32 14564, %v4959_v63  ;;  %v7271_v14 = vld [vmem:[%s7478_s28 + $0x90] sm:$0xff] }
 0x256   : > { %v7100_v16 = vsel %vm5870_vm9, 1.0, %v9402_v3  ;;  %v4950_v46 = vadd.s32 %v4949_v4, %v4940_v60  ;;  %6996 = vmatmul.msk.bf16.gmra.mxu3 %vm415_vm1, %v3802_v43  ;;  %v4963_v9 = vmul.u32 58254, %v4959_v63  ;;  %v4964_v11 = vmul.u32 14564, %v4960_v39  ;;  %v3354_v62 = vpop.f32.mrf.mxu2 }
 0x257   : > { %v7314_v26 = vpack.c.bf16 %v4429_v59, %v4428_v35  ;;  %v5978_v2 = vmul.f32 %v7100_v16, %v4429_v59  ;;  %v6056_v61 = vmul.f32 %v4429_v59, %v4429_v59  ;;  %v4965_v49 = vmul.u32 58254, %v4960_v39  ;;  %v2923_v21 = vpop.f32.mrf.mxu1 }
 0x258   : > { %v4951_v22 = vshrl.u32 %v4950_v46, 4  ;;  %v4966_v29 = vshll.u32 %v4963_v9, 16  ;;  %v4967_v48 = vshrl.u32 %v4963_v9, 16  ;;  %v3429_v60 = vadd.f32 %v3354_v62, %v2996_v18  ;;  %v4357_v58 = vpop.f32.mrf.mxu0 }
 0x259   : > { %7384 = vst [vmem:[%s8516_s18 + $0x20] sm:$0xff] %v7314_v26   ;;  %v6013_v44 = vadd.f32 %v6012_v25, %v5978_v2  ;;  %v6092_v42 = vmul.f32 %v7100_v16, %v6056_v61  ;;  %v4968_v12 = vshll.u32 %v4964_v11, 16  ;;  %v4969_v24 = vshrl.u32 %v4964_v11, 16 }
 0x25a   : > { %v4952_v35 = vmul.u32 18, %v4951_v22  ;;  %vm4970_vm10 = vc.u32 %v4962_v40, %v4966_v29  ;;  %v4972_v6 = vadd.s32 %v4966_v29, %v4962_v40  ;;  %v3996_v10 = vadd.f32 %v8729_v32, %v3429_v60  ;;  %v3926_v40 = vpop.f32.mrf.mxu3  ;;  %v9413_v22 = vld [vmem:[#allocation10_spill] sm:$0xff] }
 0x25b   : > { %v6127_v45 = vadd.f32 %v6126_v56, %v6092_v42  ;;  %v2997_v52 = vadd.f32 %v2923_v21, %v9412_v33  ;;  %v4971_v25 = vsel %vm4970_vm10, 1, %v9384_v31  ;;  %v2823_v41 = vsel %vm2792_vm6, %v2820_v19, %v2822_v23 }
 0x25c   : > { %v4953_v15 = vsub.s32 %v8702_v55, %v4952_v35  ;;  %v4973_v0 = vadd.s32 %v4971_v25, %v4965_v49  ;;  %vm4974_vm11 = vc.u32 %v4972_v6, %v4968_v12  ;;  %v4430_v51 = vadd.f32 %v4355_v13, %v3996_v10 }
 0x25d   : > { %v4975_v56 = vsel %vm4974_vm11, 1, %v9384_v31  ;;  %v3255_v32 = vrot.slane %v8760_v28, 2  ;;  %v4256_v18 = vrot.slane %v8763_v7, 3  ;;  %v8789_v13 = vadd.s32 96, %v8134_v54 }
 0x25e   : > { %vm5691_vm12 = vcmp.ne.s32.totalorder %v4953_v15, 0  ;;  %vm5727_vm13 = vcmp.lt.s32.totalorder %v4953_v15, 0  ;;  %v5799_v1 = vadd.s32 18, %v4953_v15  ;;  %v4977_v55 = vadd.s32 %v4975_v56, %v4973_v0  ;;  %v3356_v39 = vpop.f32.mrf.mxu2 }
 0x25f   : > { %vm5763_vm14 = vmand %vm5727_vm13, %vm5691_vm12  ;;  %v6057_v4 = vmul.f32 %v4430_v51, %v4430_v51  ;;  %v3256_v30 = vsel %vm2792_vm6, %v3253_v47, %v3255_v32  ;;  %v4257_v19 = vsel %vm4226_vm7, %v4254_v5, %v4256_v18  ;;  %v3804_v43 = vshrl.u32 %v7271_v14, 16  ;;  %v2926_v26 = vpop.f32.mrf.mxu1 }
 0x260   : > { %v5835_v63 = vsel %vm5763_vm14, %v5799_v1, %v4953_v15  ;;  %v4978_v59 = vadd.s32 %v4977_v55, %v4967_v48  ;;  %v3807_v16 = vshll.u32 %v7271_v14, 16  ;;  %v3430_v46 = vadd.f32 %v3356_v39, %v2997_v52  ;;  %v4360_v29 = vpop.f32.mrf.mxu0 }
 0x261   : > { %vm5871_vm15 = vcmp.lt.s32.totalorder %v5835_v63, 16  ;;  %v4988_v34 = vand.u32 65535, %v8789_v13  ;;  %v4989_v47 = vshrl.u32 %v8789_v13, 16  ;;  %v3806_v5 = vrot.slane %v3804_v43, 2 }
 0x262   : > { %v7101_v9 = vsel %vm5871_vm15, 1.0, %v9402_v3  ;;  %v4979_v20 = vadd.s32 %v4978_v59, %v4969_v24  ;;  %v3809_v2 = vrot.slane %v3807_v16, 3  ;;  %v3997_v62 = vadd.f32 %v3923_v38, %v3430_v46  ;;  %6814 = vmatmul.msk.bf16.gmra.mxu1 %vm415_vm1, %v2823_v41  ;;  %v8800_v24 = vld [vmem:[%s7478_s28 + $0x88] sm:$0xff]  ;;  %v3928_v39 = vpop.f32.mrf.mxu3  ;;  %v9414_v16 = vld [vmem:[#allocation11_spill] sm:$0xff] }
 0x263   : > { %v5979_v61 = vmul.f32 %v7101_v9, %v4430_v51  ;;  %v6093_v11 = vmul.f32 %v7101_v9, %v6057_v4  ;;  %v2998_v49 = vadd.f32 %v2926_v26, %v9413_v22  ;;  %v4991_v42 = vmul.u32 14564, %v4988_v34  ;;  %6905 = vmatmul.msk.bf16.gmra.mxu2 %vm415_vm1, %v3256_v30  ;;  %7087 = vmatmul.msk.bf16.gmra.mxu0 %vm415_vm1, %v4257_v19 }
 0x264   : > { %v4980_v48 = vshrl.u32 %v4979_v20, 4  ;;  %v4992_v60 = vmul.u32 58254, %v4988_v34  ;;  %v8795_v12 = vmul.u32 14564, %v4989_v47  ;;  %v4431_v6 = vadd.f32 %v4357_v58, %v3997_v62  ;;  %v8834_v62 = vld [vmem:[%s7478_s28 + $0x90] sm:$0xff] }
 0x265   : > { %v6014_v35 = vadd.f32 %v6013_v44, %v5979_v61  ;;  %v6128_v21 = vadd.f32 %v6127_v45, %v6093_v11  ;;  %v4994_v38 = vmul.u32 58254, %v4989_v47  ;;  %v8804_v44 = vor.u32 %v3809_v2, %v3806_v5  ;;  %v8831_v11 = vld [vmem:[%s7478_s28 + $0x90] sm:$0xff] }
 0x266   : > { %v4981_v10 = vmul.u32 18, %v4980_v48  ;;  %v4995_v33 = vshll.u32 %v4992_v60, 16  ;;  %v4996_v52 = vshrl.u32 %v4992_v60, 16  ;;  %v7319_v25 = vpack.c.bf16 %v4431_v6, %v4430_v51  ;;  %v3359_v58 = vpop.f32.mrf.mxu2 }
 0x267   : > { %v6058_v15 = vmul.f32 %v4431_v6, %v4431_v6  ;;  %v4997_v0 = vshll.u32 %v8795_v12, 16  ;;  %v8808_v14 = vadd.s32 104, %v8134_v54  ;;  %v3431_v56 = vadd.f32 %v3359_v58, %v2998_v49  ;;  %v2928_v30 = vpop.f32.mrf.mxu1 }
 0x268   : > { %v4982_v45 = vsub.s32 %v8734_v17, %v4981_v10  ;;  %vm4999_vm0 = vc.u32 %v4991_v42, %v4995_v33  ;;  %v5001_v41 = vadd.s32 %v4995_v33, %v4991_v42  ;;  %7385 = vst [vmem:[%s8516_s18 + $0x28] sm:$0xff] %v7319_v25   ;;  %v3811_v51 = vsel %vm3659_vm5, %v8742_v27, %v8804_v44 }
 0x269   : > { %v5000_v1 = vsel %vm4999_vm0, 1, %v9384_v31  ;;  %v2824_v55 = vrot.slane %v8800_v24, 2  ;;  %6997 = vmatmul.msk.bf16.gmra.mxu3 %vm415_vm1, %v3811_v51  ;;  %v3998_v19 = vadd.f32 %v3926_v40, %v3431_v56  ;;  %v4998_v63 = vshrl.u32 %v8795_v12, 16  ;;  %v4362_v40 = vpop.f32.mrf.mxu0 }
 0x26a   : > { %vm5692_vm2 = vcmp.ne.s32.totalorder %v4982_v45, 0  ;;  %vm5728_vm3 = vcmp.lt.s32.totalorder %v4982_v45, 0  ;;  %v5800_v4 = vadd.s32 18, %v4982_v45  ;;  %v5002_v17 = vadd.s32 %v5000_v1, %v4994_v38 }
 0x26b   : > { %vm5764_vm4 = vmand %vm5728_vm3, %vm5692_vm2  ;;  %vm5003_vm8 = vc.u32 %v5001_v41, %v4997_v0  ;;  %v5017_v59 = vand.u32 65535, %v8808_v14  ;;  %v2999_v46 = vadd.f32 %v2928_v30, %v9414_v16  ;;  %v5018_v34 = vshrl.u32 %v8808_v14, 16 }
 0x26c   : > { %v5836_v27 = vsel %vm5764_vm4, %v5800_v4, %v4982_v45  ;;  %v5004_v43 = vsel %vm5003_vm8, 1, %v9384_v31  ;;  %v8822_v47 = vadd.f32 %v4360_v29, %v3998_v19  ;;  %v2825_v20 = vsel %vm2792_vm6, %v2822_v23, %v2824_v55  ;;  %v7272_v45 = vld [vmem:[%s7478_s28 + $0x98] sm:$0xff]  ;;  %v3931_v19 = vpop.f32.mrf.mxu3 }
 0x26d   : > { %vm5872_vm9 = vcmp.lt.s32.totalorder %v5836_v27, 16  ;;  %v5006_v9 = vadd.s32 %v5004_v43, %v5002_v17  ;;  %v5020_v5 = vmul.u32 14564, %v5017_v59  ;;  %v5021_v2 = vmul.u32 58254, %v5017_v59 }
 0x26e   : > { %v7102_v26 = vsel %vm5872_vm9, 1.0, %v9402_v3  ;;  %v5022_v61 = vmul.u32 14564, %v5018_v34  ;;  %v5023_v48 = vmul.u32 58254, %v5018_v34  ;;  %v8838_v42 = vmul.f32 %v8822_v47, %v8822_v47  ;;  %v3361_v50 = vpop.f32.mrf.mxu2 }
 0x26f   : > { %v5980_v22 = vmul.f32 %v7102_v26, %v4431_v6  ;;  %v6094_v49 = vmul.f32 %v7102_v26, %v6058_v15  ;;  %v5007_v29 = vadd.s32 %v5006_v9, %v4996_v52  ;;  %v5024_v23 = vshll.u32 %v5021_v2, 16  ;;  %v2931_v15 = vpop.f32.mrf.mxu1 }
 0x270   : > { %v5025_v60 = vshrl.u32 %v5021_v2, 16  ;;  %v5026_v12 = vshll.u32 %v5022_v61, 16  ;;  %v3432_v25 = vadd.f32 %v3361_v50, %v2999_v46  ;;  %v3257_v52 = vrot.slane %v8831_v11, 2 }
 0x271   : > { %v8840_v10 = vadd.f32 %v6014_v35, %v5980_v22  ;;  %v8842_v38 = vadd.f32 %v6128_v21, %v6094_v49  ;;  %v5008_v33 = vadd.s32 %v5007_v29, %v4998_v63  ;;  %vm5028_vm10 = vc.u32 %v5020_v5, %v5024_v23  ;;  %v4365_v27 = vpop.f32.mrf.mxu0 }
 0x272   : > { %v5030_v6 = vadd.s32 %v5024_v23, %v5020_v5  ;;  %v4258_v0 = vrot.slane %v8834_v62, 3  ;;  %v3999_v41 = vadd.f32 %v3928_v39, %v3432_v25  ;;  %v5027_v56 = vshrl.u32 %v5022_v61, 16  ;;  %6815 = vmatmul.msk.bf16.gmra.mxu1 %vm415_vm1, %v2825_v20 }
 0x273   : > { %v5009_v58 = vshrl.u32 %v5008_v33, 4  ;;  %v5029_v1 = vsel %vm5028_vm10, 1, %v9384_v31  ;;  %v3258_v35 = vsel %vm2792_vm6, %v3255_v32, %v3257_v52  ;;  %v8864_v28 = vadd.s32 112, %v8134_v54 }
 0x274   : > { %v5031_v51 = vadd.s32 %v5029_v1, %v5023_v48  ;;  %vm5032_vm11 = vc.u32 %v5030_v6, %v5026_v12  ;;  %v4259_v21 = vsel %vm4226_vm7, %v4256_v18, %v4258_v0  ;;  %v8858_v17 = vadd.f32 %v4362_v40, %v3999_v41  ;;  %6906 = vmatmul.msk.bf16.gmra.mxu2 %vm415_vm1, %v3258_v35  ;;  %v3933_v35 = vpop.f32.mrf.mxu3 }
 0x275   : > { %v5010_v4 = vmul.u32 18, %v5009_v58  ;;  %v5033_v30 = vsel %vm5032_vm11, 1, %v9384_v31  ;;  %v3000_v63 = vadd.f32 %v2931_v15, %v7933_v37  ;;  %7088 = vmatmul.msk.bf16.gmra.mxu0 %vm415_vm1, %v4259_v21  ;;  %v3813_v7 = vshrl.u32 %v7272_v45, 16 }
 0x276   : > { %v5035_v32 = vadd.s32 %v5033_v30, %v5031_v51  ;;  %v3816_v18 = vshll.u32 %v7272_v45, 16  ;;  %v7324_v59 = vpack.c.bf16 %v8858_v17, %v8822_v47  ;;  %v5046_v43 = vand.u32 65535, %v8864_v28  ;;  %v3364_v34 = vpop.f32.mrf.mxu2 }
 0x277   : > { %v5011_v39 = vsub.s32 %v8789_v13, %v5010_v4  ;;  %v8873_v16 = vadd.s32 120, %v8134_v54  ;;  %v8877_v37 = vmul.f32 %v8858_v17, %v8858_v17  ;;  %v5047_v9 = vshrl.u32 %v8864_v28, 16  ;;  %v2933_v22 = vpop.f32.mrf.mxu1 }
 0x278   : > { %v5036_v46 = vadd.s32 %v5035_v32, %v5025_v60  ;;  %v3815_v40 = vrot.slane %v3813_v7, 2  ;;  %7386 = vst [vmem:[%s8516_s18 + $0x30] sm:$0xff] %v7324_v59   ;;  %v3433_v20 = vadd.f32 %v3364_v34, %v3000_v63  ;;  %v5049_v5 = vmul.u32 14564, %v5046_v43 }
 0x279   : > { %vm5693_vm12 = vcmp.ne.s32.totalorder %v5011_v39, 0  ;;  %vm5729_vm13 = vcmp.lt.s32.totalorder %v5011_v39, 0  ;;  %v5801_v13 = vadd.s32 18, %v5011_v39  ;;  %v5050_v2 = vmul.u32 58254, %v5046_v43 }
 0x27a   : > { %vm5765_vm14 = vmand %vm5729_vm13, %vm5693_vm12  ;;  %v5037_v26 = vadd.s32 %v5036_v46, %v5027_v56  ;;  %v5051_v61 = vmul.u32 14564, %v5047_v9  ;;  %v4000_v29 = vadd.f32 %v3931_v19, %v3433_v20  ;;  %v5052_v48 = vmul.u32 58254, %v5047_v9 }
 0x27b   : > { %v5837_v49 = vsel %vm5765_vm14, %v5801_v13, %v5011_v39  ;;  %v3818_v50 = vrot.slane %v3816_v18, 3  ;;  %v5053_v60 = vshll.u32 %v5050_v2, 16  ;;  %v3001_v12 = vadd.f32 %v2933_v22, %v7951_v53 }
 0x27c   : > { %vm5873_vm15 = vcmp.lt.s32.totalorder %v5837_v49, 16  ;;  %v5038_v23 = vshrl.u32 %v5037_v26, 4  ;;  %v8883_v25 = vadd.f32 %v4365_v27, %v4000_v29  ;;  %v5054_v6 = vshrl.u32 %v5050_v2, 16 }
 0x27d   : > { %v7103_v33 = vsel %vm5873_vm15, 1.0, %v9402_v3  ;;  %v5055_v15 = vshll.u32 %v5051_v61, 16  ;;  %vm5057_vm0 = vc.u32 %v5049_v5, %v5053_v60  ;;  %v5056_v56 = vshrl.u32 %v5051_v61, 16 }
 0x27e   : > { %v5981_v45 = vmul.f32 %v7103_v33, %v8822_v47  ;;  %v6095_v58 = vmul.f32 %v7103_v33, %v8838_v42  ;;  %v5039_v41 = vmul.u32 18, %v5038_v23  ;;  %v5058_v1 = vsel %vm5057_vm0, 1, %v9384_v31  ;;  %v3366_v47 = vpop.f32.mrf.mxu2  ;;  %v4367_v42 = vpop.f32.mrf.mxu0 }
 0x27f   : > { %v5059_v51 = vadd.s32 %v5053_v60, %v5049_v5  ;;  %v8888_v21 = vor.u32 %v3818_v50, %v3815_v40  ;;  %v5060_v19 = vadd.s32 %v5058_v1, %v5052_v48  ;;  %v3434_v63 = vadd.f32 %v3366_v47, %v3001_v12  ;;  %v8917_v48 = vld [vmem:[%s7478_s28 + $0x98] sm:$0xff] }
 0x280   : > { %v6016_v53 = vadd.f32 %v8840_v10, %v5981_v45  ;;  %v6130_v4 = vadd.f32 %v8842_v38, %v6095_v58  ;;  %v5040_v30 = vsub.s32 %v8808_v14, %v5039_v41  ;;  %v5075_v7 = vand.u32 65535, %v8873_v16  ;;  %v2936_v38 = vpop.f32.mrf.mxu1  ;;  %v8900_v14 = vld [vmem:[%s7478_s28 + $0x90] sm:$0xff]  ;;  %v8920_v50 = vld [vmem:[%s7478_s28 + $0x98] sm:$0xff]  ;;  %v3936_v45 = vpop.f32.mrf.mxu3 }
 0x281   : > { %vm5061_vm2 = vc.u32 %v5059_v51, %v5055_v15  ;;  %v3820_v32 = vsel %vm3659_vm5, %v8804_v44, %v8888_v21  ;;  %v8904_v59 = vmul.f32 %v8883_v25, %v8883_v25  ;;  %v4001_v44 = vadd.f32 %v3933_v35, %v3434_v63  ;;  %v3563_v51 = vld [vmem:[%s7478_s28 + $0xa0] sm:$0x7] }
 0x282   : > { %vm5694_vm3 = vcmp.ne.s32.totalorder %v5040_v30, 0  ;;  %vm5730_vm4 = vcmp.lt.s32.totalorder %v5040_v30, 0  ;;  %v5802_v18 = vadd.s32 18, %v5040_v30  ;;  %v5062_v10 = vsel %vm5061_vm2, 1, %v9384_v31  ;;  %6998 = vmatmul.msk.bf16.gmra.mxu3 %vm415_vm1, %v3820_v32 }
 0x283   : > { %vm5766_vm8 = vmand %vm5730_vm4, %vm5694_vm3  ;;  %v5064_v39 = vadd.s32 %v5062_v10, %v5060_v19  ;;  %v5076_v27 = vshrl.u32 %v8873_v16, 16  ;;  %v5078_v46 = vmul.u32 14564, %v5075_v7  ;;  %v5079_v34 = vmul.u32 58254, %v5075_v7 }
 0x284   : > { %v5838_v43 = vsel %vm5766_vm8, %v5802_v18, %v5040_v30  ;;  %v3002_v9 = vadd.f32 %v2936_v38, %v7961_v57  ;;  %v8908_v13 = vadd.f32 %v4367_v42, %v4001_v44  ;;  %v2826_v61 = vrot.slane %v8900_v14, 2 }
 0x285   : > { %vm5874_vm9 = vcmp.lt.s32.totalorder %v5838_v43, 16  ;;  %v5065_v40 = vadd.s32 %v5064_v39, %v5054_v6  ;;  %v5080_v20 = vmul.u32 14564, %v5076_v27  ;;  %v5081_v5 = vmul.u32 58254, %v5076_v27 }
 0x286   : > { %v7104_v26 = vsel %vm5874_vm9, 1.0, %v9402_v3  ;;  %v5082_v2 = vshll.u32 %v5079_v34, 16  ;;  %v7329_v57 = vpack.c.bf16 %v8908_v13, %v8883_v25  ;;  %v5083_v23 = vshrl.u32 %v5079_v34, 16  ;;  %v3369_v33 = vpop.f32.mrf.mxu2 }
 0x287   : > { %v5982_v22 = vmul.f32 %v7104_v26, %v8858_v17  ;;  %v6096_v49 = vmul.f32 %v7104_v26, %v8877_v37  ;;  %v5066_v29 = vadd.s32 %v5065_v40, %v5056_v56  ;;  %v5084_v60 = vshll.u32 %v5080_v20, 16 }
 0x288   : > { %vm5086_vm10 = vc.u32 %v5078_v46, %v5082_v2  ;;  %v5088_v12 = vadd.s32 %v5082_v2, %v5078_v46  ;;  %7387 = vst [vmem:[%s8516_s18 + $0x38] sm:$0xff] %v7329_v57   ;;  %v5085_v58 = vshrl.u32 %v5080_v20, 16  ;;  %v2827_v56 = vsel %vm2792_vm6, %v2824_v55, %v2826_v61  ;;  %v2938_v1 = vpop.f32.mrf.mxu1  ;;  %v3938_v57 = vpop.f32.mrf.mxu3 }
 0x289   : > { %v8922_v6 = vadd.f32 %v6016_v53, %v5982_v22  ;;  %v8924_v15 = vadd.f32 %v6130_v4, %v6096_v49  ;;  %v5067_v17 = vshrl.u32 %v5066_v29, 4  ;;  %v5087_v37 = vsel %vm5086_vm10, 1, %v9384_v31  ;;  %v4370_v4 = vpop.f32.mrf.mxu0  ;;  %6816 = vmatmul.msk.bf16.gmra.mxu1 %vm415_vm1, %v2827_v56 }
 0x28a   : > { %v5089_v41 = vadd.s32 %v5087_v37, %v5081_v5  ;;  %vm5090_vm11 = vc.u32 %v5088_v12, %v5084_v60  ;;  %v3259_v30 = vrot.slane %v8917_v48, 2  ;;  %v4260_v19 = vrot.slane %v8920_v50, 3 }
 0x28b   : > { %v5068_v35 = vmul.u32 18, %v5067_v17  ;;  %v5091_v53 = vsel %vm5090_vm11, 1, %v9384_v31  ;;  %v8940_v42 = vmul.f32 %v8908_v13, %v8908_v13  ;;  %v3435_v24 = vadd.f32 %v3369_v33, %v3002_v9 }
 0x28c   : > { %v5093_v47 = vadd.s32 %v5091_v53, %v5089_v41  ;;  %v8943_v55 = vadd.s32 128, %v8134_v54  ;;  %v3260_v63 = vsel %vm2792_vm6, %v3257_v52, %v3259_v30  ;;  %v4261_v7 = vsel %vm4226_vm7, %v4258_v0, %v4260_v19  ;;  %v2696_v53 = vld [vmem:[%s7478_s28 + $0x98] sm:$0x3] }
 0x28d   : > { %v5069_v32 = vsub.s32 %v8864_v28, %v5068_v35  ;;  %v3639_v18 = vunpack.c.l.b16 %v3563_v51  ;;  %6907 = vmatmul.msk.bf16.gmra.mxu2 %vm415_vm1, %v3260_v63  ;;  %7089 = vmatmul.msk.bf16.gmra.mxu0 %vm415_vm1, %v4261_v7  ;;  %v4002_v38 = vadd.f32 %v3936_v45, %v3435_v24  ;;  %v3003_v0 = vadd.f32 %v2938_v1, %v7973_v36 }
 0x28e   : > { %v5094_v10 = vadd.s32 %v5093_v47, %v5083_v23  ;;  %v5104_v28 = vand.u32 65535, %v8943_v55  ;;  %v5105_v39 = vshrl.u32 %v8943_v55, 16  ;;  %v3371_v43 = vpop.f32.mrf.mxu2  ;;  %v8971_v35 = vadd.s32 136, %v8134_v54 }
 0x28f   : > { %vm5695_vm12 = vcmp.ne.s32.totalorder %v5069_v32, 0  ;;  %vm5731_vm13 = vcmp.lt.s32.totalorder %v5069_v32, 0  ;;  %v5803_v11 = vadd.s32 18, %v5069_v32  ;;  %v3658_v52 = vpack.c.b16 %v3639_v18, %v3639_v18 }
 0x290   : > { %vm5767_vm14 = vmand %vm5731_vm13, %vm5695_vm12  ;;  %v5095_v44 = vadd.s32 %v5094_v10, %v5085_v58  ;;  %v5107_v62 = vmul.u32 14564, %v5104_v28  ;;  %v5108_v27 = vmul.u32 58254, %v5104_v28  ;;  %v8961_v34 = vadd.f32 %v4370_v4, %v4002_v38  ;;  %v2941_v12 = vpop.f32.mrf.mxu1 }
 0x291   : > { %v5839_v46 = vsel %vm5767_vm14, %v5803_v11, %v5069_v32  ;;  %v5109_v9 = vmul.u32 14564, %v5105_v39  ;;  %v3822_v40 = vshrl.u32 %v3658_v52, 16  ;;  %v5110_v26 = vmul.u32 58254, %v5105_v39  ;;  %v4372_v37 = vpop.f32.mrf.mxu0 }
 0x292   : > { %vm5875_vm15 = vcmp.lt.s32.totalorder %v5839_v46, 16  ;;  %v5096_v20 = vshrl.u32 %v5095_v44, 4  ;;  %v5111_v5 = vshll.u32 %v5108_v27, 16  ;;  %v5112_v22 = vshrl.u32 %v5108_v27, 16 }
 0x293   : > { %v7105_v2 = vsel %vm5875_vm15, 1.0, %v9402_v3  ;;  %v5113_v49 = vshll.u32 %v5109_v9, 16  ;;  %v5114_v29 = vshrl.u32 %v5109_v9, 16  ;;  %v3824_v45 = vrot.slane %v3822_v40, 2  ;;  %v3130_v9 = vld [vmem:[%s7478_s28 + $0xa0] sm:$0x3] }
 0x294   : > { %v5983_v23 = vmul.f32 %v7105_v2, %v8883_v25  ;;  %v6097_v36 = vmul.f32 %v7105_v2, %v8904_v59  ;;  %v5097_v60 = vmul.u32 18, %v5096_v20  ;;  %vm5115_vm0 = vc.u32 %v5107_v62, %v5111_v5  ;;  %v4130_v2 = vld [vmem:[%s7478_s28 + $0xa0] sm:$0x7] }
 0x295   : > { %v5116_v33 = vsel %vm5115_vm0, 1, %v9384_v31  ;;  %v5117_v17 = vadd.s32 %v5111_v5, %v5107_v62  ;;  %v3825_v58 = vshll.u32 %v3658_v52, 16  ;;  %v3436_v59 = vadd.f32 %v3371_v43, %v3003_v0 }
 0x296   : > { %v6018_v41 = vadd.f32 %v8922_v6, %v5983_v23  ;;  %v6132_v56 = vadd.f32 %v8924_v15, %v6097_v36  ;;  %v5098_v1 = vsub.s32 %v8873_v16, %v5097_v60  ;;  %v5118_v51 = vadd.s32 %v5116_v33, %v5110_v26  ;;  %v3374_v16 = vpop.f32.mrf.mxu2 }
 0x297   : > { %vm5119_vm2 = vc.u32 %v5117_v17, %v5113_v49  ;;  %v3827_v25 = vrot.slane %v3825_v58, 3  ;;  %v4003_v32 = vadd.f32 %v3938_v57, %v3436_v59  ;;  %v5133_v15 = vand.u32 65535, %v8971_v35 }
 0x298   : > { %vm5696_vm3 = vcmp.ne.s32.totalorder %v5098_v1, 0  ;;  %vm5732_vm4 = vcmp.lt.s32.totalorder %v5098_v1, 0  ;;  %v5804_v4 = vadd.s32 18, %v5098_v1  ;;  %v5120_v47 = vsel %vm5119_vm2, 1, %v9384_v31 }
 0x299   : > { %vm5768_vm8 = vmand %vm5732_vm4, %vm5696_vm3  ;;  %v5122_v24 = vadd.s32 %v5120_v47, %v5118_v51  ;;  %v3828_v6 = vor.u32 %v3827_v25, %v3824_v45  ;;  %v8978_v7 = vmul.f32 %v8961_v34, %v8961_v34  ;;  %v5134_v18 = vshrl.u32 %v8971_v35, 16  ;;  %v4375_v36 = vpop.f32.mrf.mxu0 }
 0x29a   : > { %v5840_v63 = vsel %vm5768_vm8, %v5804_v4, %v5098_v1  ;;  %v2772_v10 = vunpack.c.l.b16 %v2696_v53  ;;  %v8983_v39 = vadd.f32 %v4372_v37, %v4003_v32  ;;  %v5136_v52 = vmul.u32 14564, %v5133_v15 }
 0x29b   : > { %vm5876_vm9 = vcmp.lt.s32.totalorder %v5840_v63, 16  ;;  %v5123_v38 = vadd.s32 %v5122_v24, %v5112_v22  ;;  %v3829_v28 = vsel %vm3659_vm5, %v8888_v21, %v3828_v6  ;;  %v5137_v44 = vmul.u32 58254, %v5133_v15  ;;  %v3941_v21 = vpop.f32.mrf.mxu3  ;;  %v2943_v22 = vpop.f32.mrf.mxu1 }
 0x29c   : > { %v7106_v11 = vsel %vm5876_vm9, 1.0, %v9402_v3  ;;  %6999 = vmatmul.msk.bf16.gmra.mxu3 %vm415_vm1, %v3829_v28  ;;  %v5138_v62 = vmul.u32 14564, %v5134_v18  ;;  %v7334_v46 = vpack.c.bf16 %v8983_v39, %v8961_v34  ;;  %v5139_v40 = vmul.u32 58254, %v5134_v18 }
 0x29d   : > { %v5984_v27 = vmul.f32 %v7106_v11, %v8908_v13  ;;  %v6098_v0 = vmul.f32 %v7106_v11, %v8940_v42  ;;  %v5124_v43 = vadd.s32 %v5123_v38, %v5114_v29  ;;  %v5140_v20 = vshll.u32 %v5137_v44, 16  ;;  %v9415_v11 = vld [vmem:[#allocation12_spill] sm:$0xff] }
 0x29e   : > { %v5142_v26 = vshll.u32 %v5138_v62, 16  ;;  %v3004_v5 = vadd.f32 %v2941_v12, %v7993_v8  ;;  %7388 = vst [vmem:[%s8516_s18 + $0x40] sm:$0xff] %v7334_v46   ;;  %v5141_v13 = vshrl.u32 %v5137_v44, 16  ;;  %v5143_v42 = vshrl.u32 %v5138_v62, 16  ;;  %v3376_v25 = vpop.f32.mrf.mxu2 }
 0x29f   : > { %v6019_v49 = vadd.f32 %v6018_v41, %v5984_v27  ;;  %v6133_v57 = vadd.f32 %v6132_v56, %v6098_v0  ;;  %v5125_v23 = vshrl.u32 %v5124_v43, 4  ;;  %vm5144_vm5 = vc.u32 %v5136_v52, %v5140_v20 }
 0x2a0   : > { %v5146_v29 = vadd.s32 %v5140_v20, %v5136_v52  ;;  %v2791_v60 = vpack.c.b16 %v2772_v10, %v2772_v10  ;;  %v5145_v17 = vsel %vm5144_vm5, 1, %v9384_v31  ;;  %v3206_v37 = vunpack.c.l.b16 %v3130_v9 }
 0x2a1   : > { %v5126_v33 = vmul.u32 18, %v5125_v23  ;;  %v4206_v45 = vunpack.c.l.b16 %v4130_v2  ;;  %v5147_v58 = vadd.s32 %v5145_v17, %v5139_v40  ;;  %v3437_v12 = vadd.f32 %v3374_v16, %v3004_v5  ;;  %v4377_v0 = vpop.f32.mrf.mxu0 }
 0x2a2   : > { %vm5148_vm10 = vc.u32 %v5146_v29, %v5142_v26  ;;  %v2828_v8 = vrot.slane %v2791_v60, 2  ;;  %v3225_v1 = vpack.c.b16 %v3206_v37, %v3206_v37  ;;  %v9002_v47 = vadd.s32 144, %v8134_v54  ;;  %v9416_v60 = vld [vmem:[#allocation13_spill] sm:$0xff] }
 0x2a3   : > { %v5127_v41 = vsub.s32 %v8943_v55, %v5126_v33  ;;  %v5149_v56 = vsel %vm5148_vm10, 1, %v9384_v31  ;;  %v4225_v51 = vpack.c.b16 %v4206_v45, %v4206_v45  ;;  %v4004_v4 = vadd.f32 %v3941_v21, %v3437_v12  ;;  %v3943_v10 = vpop.f32.mrf.mxu3  ;;  %v2946_v44 = vpop.f32.mrf.mxu1 }
 0x2a4   : > { %v5151_v59 = vadd.s32 %v5149_v56, %v5147_v58  ;;  %v2829_v53 = vsel %vm2792_vm6, %v2826_v61, %v2828_v8  ;;  %v3261_v55 = vrot.slane %v3225_v1, 2  ;;  %v9007_v32 = vmul.f32 %v8983_v39, %v8983_v39 }
 0x2a5   : > { %vm5697_vm11 = vcmp.ne.s32.totalorder %v5127_v41, 0  ;;  %vm5733_vm12 = vcmp.lt.s32.totalorder %v5127_v41, 0  ;;  %v5805_v24 = vadd.s32 18, %v5127_v41  ;;  %6817 = vmatmul.msk.bf16.gmra.mxu1 %vm415_vm1, %v2829_v53  ;;  %v4262_v15 = vrot.slane %v4225_v51, 3 }
 0x2a6   : > { %vm5769_vm13 = vmand %vm5733_vm12, %vm5697_vm11  ;;  %v5152_v6 = vadd.s32 %v5151_v59, %v5141_v13  ;;  %v5162_v14 = vand.u32 65535, %v9002_v47  ;;  %v3262_v16 = vsel %vm2792_vm6, %v3259_v30, %v3261_v55  ;;  %v9013_v63 = vadd.f32 %v4375_v36, %v4004_v4  ;;  %v3379_v23 = vpop.f32.mrf.mxu2 }
 0x2a7   : > { %v5841_v61 = vsel %vm5769_vm13, %v5805_v24, %v5127_v41  ;;  %v5163_v18 = vshrl.u32 %v9002_v47, 16  ;;  %6908 = vmatmul.msk.bf16.gmra.mxu2 %vm415_vm1, %v3262_v16  ;;  %v4263_v28 = vsel %vm4226_vm7, %v4260_v19, %v4262_v15  ;;  %v3005_v52 = vadd.f32 %v2943_v22, %v9415_v11 }
 0x2a8   : > { %vm5877_vm14 = vcmp.lt.s32.totalorder %v5841_v61, 16  ;;  %v5153_v38 = vadd.s32 %v5152_v6, %v5143_v42  ;;  %7090 = vmatmul.msk.bf16.gmra.mxu0 %vm415_vm1, %v4263_v28  ;;  %v5165_v30 = vmul.u32 14564, %v5162_v14  ;;  %v5166_v62 = vmul.u32 58254, %v5162_v14 }
 0x2a9   : > { %v7107_v48 = vsel %vm5877_vm14, 1.0, %v9402_v3  ;;  %v5167_v27 = vmul.u32 14564, %v5163_v18  ;;  %v5168_v9 = vmul.u32 58254, %v5163_v18  ;;  %v9027_v20 = vmul.f32 %v9013_v63, %v9013_v63  ;;  %v4380_v55 = vpop.f32.mrf.mxu0 }
 0x2aa   : > { %v5985_v43 = vmul.f32 %v7107_v48, %v8961_v34  ;;  %v6099_v46 = vmul.f32 %v7107_v48, %v8978_v7  ;;  %v5154_v21 = vshrl.u32 %v5153_v38, 4  ;;  %v5169_v50 = vshll.u32 %v5166_v62, 16 }
 0x2ab   : > { %v5170_v40 = vshrl.u32 %v5166_v62, 16  ;;  %v5171_v19 = vshll.u32 %v5167_v27, 16  ;;  %v3438_v22 = vadd.f32 %v3376_v25, %v3005_v52  ;;  %v5172_v13 = vshrl.u32 %v5167_v27, 16  ;;  %v3946_v41 = vpop.f32.mrf.mxu3  ;;  %v2948_v59 = vpop.f32.mrf.mxu1 }
 0x2ac   : > { %v6020_v26 = vadd.f32 %v6019_v49, %v5985_v43  ;;  %v6134_v5 = vadd.f32 %v6133_v57, %v6099_v46  ;;  %v5155_v2 = vmul.u32 18, %v5154_v21  ;;  %vm5173_vm1 = vc.u32 %v5165_v30, %v5169_v50 }
 0x2ad   : > { %v5175_v36 = vadd.s32 %v5169_v50, %v5165_v30  ;;  %v9030_v34 = vadd.s32 152, %v8134_v54  ;;  %v5174_v42 = vsel %vm5173_vm1, 1, %v9384_v31  ;;  %v4005_v29 = vadd.f32 %v3943_v10, %v3438_v22 }
 0x2ae   : > { %v5156_v7 = vsub.s32 %v8971_v35, %v5155_v2  ;;  %v3006_v33 = vadd.f32 %v2946_v44, %v9416_v60  ;;  %v5176_v17 = vadd.s32 %v5174_v42, %v5168_v9  ;;  %v9044_v61 = vadd.s32 160, %v8134_v54  ;;  %v3381_v38 = vpop.f32.mrf.mxu2  ;;  %v9417_v9 = vld [vmem:[#allocation14_spill] sm:$0xff] }
 0x2af   : > { %vm5177_vm6 = vc.u32 %v5175_v36, %v5171_v19  ;;  %v5191_v49 = vand.u32 65535, %v9030_v34  ;;  %v5192_v57 = vshrl.u32 %v9030_v34, 16  ;;  %v9038_v8 = vadd.f32 %v4377_v0, %v4005_v29 }
 0x2b0   : > { %vm5698_vm7 = vcmp.ne.s32.totalorder %v5156_v7, 0  ;;  %vm5734_vm15 = vcmp.lt.s32.totalorder %v5156_v7, 0  ;;  %v5806_v37 = vadd.s32 18, %v5156_v7  ;;  %v5178_v45 = vsel %vm5177_vm6, 1, %v9384_v31 }
 0x2b1   : > { %vm5770_vm0 = vmand %vm5734_vm15, %vm5698_vm7  ;;  %v5180_v58 = vadd.s32 %v5178_v45, %v5176_v17  ;;  %v5194_v35 = vmul.u32 14564, %v5191_v49  ;;  %v5195_v12 = vmul.u32 58254, %v5191_v49  ;;  %v5196_v1 = vmul.u32 14564, %v5192_v57 }
 0x2b2   : > { %v5842_v56 = vsel %vm5770_vm0, %v5806_v37, %v5156_v7  ;;  %v5197_v51 = vmul.u32 58254, %v5192_v57  ;;  %v3439_v25 = vadd.f32 %v3379_v23, %v3006_v33  ;;  %v7339_v4 = vpack.c.bf16 %v9038_v8, %v9013_v63  ;;  %v4382_v57 = vpop.f32.mrf.mxu0 }
 0x2b3   : > { %vm5878_vm2 = vcmp.lt.s32.totalorder %v5842_v56, 16  ;;  %v5181_v53 = vadd.s32 %v5180_v58, %v5170_v40  ;;  %v5198_v24 = vshll.u32 %v5195_v12, 16  ;;  %v5199_v15 = vshrl.u32 %v5195_v12, 16  ;;  %v3948_v23 = vpop.f32.mrf.mxu3  ;;  %v2951_v33 = vpop.f32.mrf.mxu1 }
 0x2b4   : > { %v7108_v6 = vsel %vm5878_vm2, 1.0, %v9402_v3  ;;  %v5200_v14 = vshll.u32 %v5196_v1, 16  ;;  %7389 = vst [vmem:[%s8516_s18 + $0x48] sm:$0xff] %v7339_v4   ;;  %v5201_v28 = vshrl.u32 %v5196_v1, 16  ;;  %v4006_v44 = vadd.f32 %v3946_v41, %v3439_v25 }
 0x2b5   : > { %v5986_v16 = vmul.f32 %v7108_v6, %v8983_v39  ;;  %v6100_v18 = vmul.f32 %v7108_v6, %v9007_v32  ;;  %v5182_v10 = vadd.s32 %v5181_v53, %v5172_v13  ;;  %vm5202_vm3 = vc.u32 %v5194_v35, %v5198_v24 }
 0x2b6   : > { %v5203_v11 = vsel %vm5202_vm3, 1, %v9384_v31  ;;  %v5204_v52 = vadd.s32 %v5198_v24, %v5194_v35  ;;  %v9050_v0 = vadd.f32 %v4380_v55, %v4006_v44  ;;  %v5220_v39 = vand.u32 65535, %v9044_v61  ;;  %v3384_v56 = vpop.f32.mrf.mxu2 }
 0x2b7   : > { %v6021_v48 = vadd.f32 %v6020_v26, %v5986_v16  ;;  %v6135_v30 = vadd.f32 %v6134_v5, %v6100_v18  ;;  %v5183_v62 = vshrl.u32 %v5182_v10, 4  ;;  %v5205_v27 = vadd.s32 %v5203_v11, %v5197_v51 }
 0x2b8   : > { %vm5206_vm4 = vc.u32 %v5204_v52, %v5200_v14  ;;  %v5221_v32 = vshrl.u32 %v9044_v61, 16  ;;  %v9057_v21 = vmul.f32 %v9038_v8, %v9038_v8  ;;  %v3007_v50 = vadd.f32 %v2948_v59, %v9417_v9 }
 0x2b9   : > { %v5184_v43 = vmul.u32 18, %v5183_v62  ;;  %v5207_v46 = vsel %vm5206_vm4, 1, %v9384_v31  ;;  %v5223_v19 = vmul.u32 14564, %v5220_v39  ;;  %v5224_v26 = vmul.u32 58254, %v5220_v39 }
 0x2ba   : > { %v5209_v40 = vadd.s32 %v5207_v46, %v5205_v27  ;;  %v5225_v5 = vmul.u32 14564, %v5221_v32  ;;  %v5226_v22 = vmul.u32 58254, %v5221_v32  ;;  %v3440_v13 = vadd.f32 %v3381_v38, %v3007_v50  ;;  %v4385_v50 = vpop.f32.mrf.mxu0 }
 0x2bb   : > { %v5185_v2 = vsub.s32 %v9002_v47, %v5184_v43  ;;  %v9062_v36 = vadd.s32 168, %v8134_v54  ;;  %v5227_v42 = vshll.u32 %v5224_v26, 16  ;;  %v9066_v60 = vmul.f32 %v9050_v0, %v9050_v0  ;;  %v3951_v39 = vpop.f32.mrf.mxu3  ;;  %v2953_v43 = vpop.f32.mrf.mxu1 }
 0x2bc   : > { %v5210_v7 = vadd.s32 %v5209_v40, %v5199_v15  ;;  %v5229_v29 = vshll.u32 %v5225_v5, 16  ;;  %v5228_v49 = vshrl.u32 %v5224_v26, 16  ;;  %v4007_v45 = vadd.f32 %v3948_v23, %v3440_v13 }
 0x2bd   : > { %vm5699_vm8 = vcmp.ne.s32.totalorder %v5185_v2, 0  ;;  %vm5735_vm9 = vcmp.lt.s32.totalorder %v5185_v2, 0  ;;  %v5807_v17 = vadd.s32 18, %v5185_v2  ;;  %vm5231_vm10 = vc.u32 %v5223_v19, %v5227_v42 }
 0x2be   : > { %vm5771_vm5 = vmand %vm5735_vm9, %vm5699_vm8  ;;  %v5211_v47 = vadd.s32 %v5210_v7, %v5201_v28  ;;  %v5233_v37 = vadd.s32 %v5227_v42, %v5223_v19  ;;  %v5232_v35 = vsel %vm5231_vm10, 1, %v9384_v31  ;;  %v5249_v12 = vand.u32 65535, %v9062_v36 }
 0x2bf   : > { %v5843_v58 = vsel %vm5771_vm5, %v5807_v17, %v5185_v2  ;;  %v5250_v41 = vshrl.u32 %v9062_v36, 16  ;;  %v5234_v51 = vadd.s32 %v5232_v35, %v5226_v22  ;;  %v5230_v59 = vshrl.u32 %v5225_v5, 16  ;;  %v3386_v22 = vpop.f32.mrf.mxu2 }
 0x2c0   : > { %vm5879_vm11 = vcmp.lt.s32.totalorder %v5843_v58, 16  ;;  %v5212_v1 = vshrl.u32 %v5211_v47, 4  ;;  %vm5235_vm12 = vc.u32 %v5233_v37, %v5229_v29  ;;  %v9073_v4 = vadd.f32 %v4382_v57, %v4007_v45 }
 0x2c1   : > { %v7109_v25 = vsel %vm5879_vm11, 1.0, %v9402_v3  ;;  %v5236_v53 = vsel %vm5235_vm12, 1, %v9384_v31  ;;  %v5252_v16 = vmul.u32 14564, %v5249_v12  ;;  %v5253_v18 = vmul.u32 58254, %v5249_v12 }
 0x2c2   : > { %v5987_v24 = vmul.f32 %v7109_v25, %v9013_v63  ;;  %v6101_v55 = vmul.f32 %v7109_v25, %v9027_v20  ;;  %v5213_v6 = vmul.u32 18, %v5212_v1  ;;  %v5238_v15 = vadd.s32 %v5236_v53, %v5234_v51 }
 0x2c3   : > { %v7344_v14 = vpack.c.bf16 %v9073_v4, %v9050_v0  ;;  %v5254_v10 = vmul.u32 14564, %v5250_v41  ;;  %v5255_v44 = vmul.u32 58254, %v5250_v41  ;;  %v5256_v62 = vshll.u32 %v5253_v18, 16  ;;  %v3953_v25 = vpop.f32.mrf.mxu3 }
 0x2c4   : > { %v6022_v38 = vadd.f32 %v6021_v48, %v5987_v24  ;;  %v6136_v28 = vadd.f32 %v6135_v30, %v6101_v55  ;;  %v5214_v11 = vsub.s32 %v9030_v34, %v5213_v6  ;;  %v5239_v52 = vadd.s32 %v5238_v15, %v5228_v49  ;;  %v9418_v48 = vld [vmem:[#allocation15_spill] sm:$0xff]  ;;  %v2956_v6 = vpop.f32.mrf.mxu1 }
 0x2c5   : > { %7390 = vst [vmem:[%s8516_s18 + $0x50] sm:$0xff] %v7344_v14   ;;  %v5257_v27 = vshrl.u32 %v5253_v18, 16  ;;  %v5258_v63 = vshll.u32 %v5254_v10, 16  ;;  %v5259_v46 = vshrl.u32 %v5254_v10, 16  ;;  %vm5260_vm6 = vc.u32 %v5252_v16, %v5256_v62 }
 0x2c6   : > { %vm5700_vm13 = vcmp.ne.s32.totalorder %v5214_v11, 0  ;;  %vm5736_vm14 = vcmp.lt.s32.totalorder %v5214_v11, 0  ;;  %v5808_v20 = vadd.s32 18, %v5214_v11  ;;  %v5240_v32 = vadd.s32 %v5239_v52, %v5230_v59 }
 0x2c7   : > { %vm5772_vm1 = vmand %vm5736_vm14, %vm5700_vm13  ;;  %v5262_v9 = vadd.s32 %v5256_v62, %v5252_v16  ;;  %v3008_v30 = vadd.f32 %v2951_v33, %v9418_v48  ;;  %v5261_v19 = vsel %vm5260_vm6, 1, %v9384_v31  ;;  %v9084_v26 = vadd.s32 176, %v8134_v54  ;;  %v4387_v16 = vpop.f32.mrf.mxu0 }
 0x2c8   : > { %v5844_v34 = vsel %vm5772_vm1, %v5808_v20, %v5214_v11  ;;  %v5241_v40 = vshrl.u32 %v5240_v32, 4  ;;  %v5263_v5 = vadd.s32 %v5261_v19, %v5255_v44  ;;  %v9094_v47 = vmul.f32 %v9073_v4, %v9073_v4 }
 0x2c9   : > { %vm5880_vm7 = vcmp.lt.s32.totalorder %v5844_v34, 16  ;;  %vm5264_vm15 = vc.u32 %v5262_v9, %v5258_v63  ;;  %v3441_v2 = vadd.f32 %v3384_v56, %v3008_v30  ;;  %v5278_v42 = vand.u32 65535, %v9084_v26  ;;  %v3389_v63 = vpop.f32.mrf.mxu2 }
 0x2ca   : > { %v7110_v23 = vsel %vm5880_vm7, 1.0, %v9402_v3  ;;  %v5242_v13 = vmul.u32 18, %v5241_v40  ;;  %v5265_v7 = vsel %vm5264_vm15, 1, %v9384_v31  ;;  %v5279_v37 = vshrl.u32 %v9084_v26, 16 }
 0x2cb   : > { %v5988_v29 = vmul.f32 %v7110_v23, %v9038_v8  ;;  %v6102_v33 = vmul.f32 %v7110_v23, %v9057_v21  ;;  %v5267_v17 = vadd.s32 %v5265_v7, %v5263_v5  ;;  %v4008_v49 = vadd.f32 %v3951_v39, %v3441_v2  ;;  %v3956_v7 = vpop.f32.mrf.mxu3 }
 0x2cc   : > { %v5243_v57 = vsub.s32 %v9044_v61, %v5242_v13  ;;  %v5282_v45 = vmul.u32 58254, %v5278_v42  ;;  %v5281_v41 = vmul.u32 14564, %v5278_v42  ;;  %v5283_v56 = vmul.u32 14564, %v5279_v37 }
 0x2cd   : > { %v6023_v58 = vadd.f32 %v6022_v38, %v5988_v29  ;;  %v6137_v35 = vadd.f32 %v6136_v28, %v6102_v33  ;;  %v5268_v12 = vadd.s32 %v5267_v17, %v5257_v27  ;;  %v9097_v1 = vadd.f32 %v4385_v50, %v4008_v49  ;;  %v9419_v38 = vld [vmem:[#allocation16_spill] sm:$0xff]  ;;  %v2958_v33 = vpop.f32.mrf.mxu1 }
 0x2ce   : > { %vm5701_vm0 = vcmp.ne.s32.totalorder %v5243_v57, 0  ;;  %vm5737_vm2 = vcmp.lt.s32.totalorder %v5243_v57, 0  ;;  %v5809_v8 = vadd.s32 18, %v5243_v57  ;;  %v5284_v61 = vmul.u32 58254, %v5279_v37 }
 0x2cf   : > { %vm5773_vm3 = vmand %vm5737_vm2, %vm5701_vm0  ;;  %v5269_v21 = vadd.s32 %v5268_v12, %v5259_v46  ;;  %v5285_v51 = vshll.u32 %v5282_v45, 16  ;;  %v5286_v53 = vshrl.u32 %v5282_v45, 16  ;;  %v5287_v24 = vshll.u32 %v5283_v56, 16  ;;  %v4390_v45 = vpop.f32.mrf.mxu0 }
 0x2d0   : > { %v5845_v59 = vsel %vm5773_vm3, %v5809_v8, %v5243_v57  ;;  %v5288_v55 = vshrl.u32 %v5283_v56, 16  ;;  %v3009_v28 = vadd.f32 %v2953_v43, %v9419_v38  ;;  %v9103_v11 = vadd.s32 184, %v8134_v54  ;;  %v9420_v8 = vld [vmem:[#allocation17_spill] sm:$0xff] }
 0x2d1   : > { %vm5881_vm4 = vcmp.lt.s32.totalorder %v5845_v59, 16  ;;  %v5270_v15 = vshrl.u32 %v5269_v21, 4  ;;  %vm5289_vm8 = vc.u32 %v5281_v41, %v5285_v51  ;;  %v5291_v14 = vadd.s32 %v5285_v51, %v5281_v41 }
 0x2d2   : > { %v7111_v18 = vsel %vm5881_vm4, 1.0, %v9402_v3  ;;  %v5290_v10 = vsel %vm5289_vm8, 1, %v9384_v31  ;;  %v3442_v39 = vadd.f32 %v3386_v22, %v3009_v28  ;;  %v5307_v20 = vand.u32 65535, %v9103_v11 }
 0x2d3   : > { %v5989_v52 = vmul.f32 %v7111_v18, %v9050_v0  ;;  %v6103_v44 = vmul.f32 %v7111_v18, %v9066_v60  ;;  %v5271_v62 = vmul.u32 18, %v5270_v15  ;;  %v5292_v27 = vadd.s32 %v5290_v10, %v5284_v61  ;;  %v9421_v61 = vld [vmem:[#allocation18_spill] sm:$0xff] }
 0x2d4   : > { %vm5293_vm9 = vc.u32 %v5291_v14, %v5287_v24  ;;  %v5308_v32 = vshrl.u32 %v9103_v11, 16  ;;  %v4009_v50 = vadd.f32 %v3953_v25, %v3442_v39  ;;  %v5310_v0 = vmul.u32 14564, %v5307_v20  ;;  %v3391_v25 = vpop.f32.mrf.mxu2 }
 0x2d5   : > { %v6024_v46 = vadd.f32 %v6023_v58, %v5989_v52  ;;  %v6138_v9 = vadd.f32 %v6137_v35, %v6103_v44  ;;  %v5272_v43 = vsub.s32 %v9062_v36, %v5271_v62  ;;  %v5294_v48 = vsel %vm5293_vm9, 1, %v9384_v31 }
 0x2d6   : > { %v5296_v30 = vadd.s32 %v5294_v48, %v5292_v27  ;;  %v5311_v34 = vmul.u32 58254, %v5307_v20  ;;  %v5312_v40 = vmul.u32 14564, %v5308_v32  ;;  %v9111_v5 = vadd.f32 %v4387_v16, %v4009_v50  ;;  %v3958_v20 = vpop.f32.mrf.mxu3 }
 0x2d7   : > { %vm5702_vm5 = vcmp.ne.s32.totalorder %v5272_v43, 0  ;;  %vm5738_vm10 = vcmp.lt.s32.totalorder %v5272_v43, 0  ;;  %v5810_v60 = vadd.s32 18, %v5272_v43  ;;  %v5313_v2 = vmul.u32 58254, %v5308_v32 }
 0x2d8   : > { %vm5774_vm11 = vmand %vm5738_vm10, %vm5702_vm5  ;;  %v5297_v19 = vadd.s32 %v5296_v30, %v5286_v53  ;;  %v5314_v22 = vshll.u32 %v5311_v34, 16  ;;  %v5315_v13 = vshrl.u32 %v5311_v34, 16  ;;  %v5316_v36 = vshll.u32 %v5312_v40, 16  ;;  %v2961_v34 = vpop.f32.mrf.mxu1 }
 0x2d9   : > { %v5846_v23 = vsel %vm5774_vm11, %v5810_v60, %v5272_v43  ;;  %v7349_v29 = vpack.c.bf16 %v9111_v5, %v9097_v1  ;;  %v5317_v49 = vshrl.u32 %v5312_v40, 16  ;;  %v3010_v56 = vadd.f32 %v2956_v6, %v9420_v8 }
 0x2da   : > { %vm5882_vm12 = vcmp.lt.s32.totalorder %v5846_v23, 16  ;;  %v5298_v42 = vadd.s32 %v5297_v19, %v5288_v55  ;;  %vm5318_vm13 = vc.u32 %v5310_v0, %v5314_v22  ;;  %v5320_v37 = vadd.s32 %v5314_v22, %v5310_v0  ;;  %v4392_v0 = vpop.f32.mrf.mxu0 }
 0x2db   : > { %v7112_v17 = vsel %vm5882_vm12, 1.0, %v9402_v3  ;;  %v5319_v57 = vsel %vm5318_vm13, 1, %v9384_v31  ;;  %7391 = vst [vmem:[%s8516_s18 + $0x58] sm:$0xff] %v7349_v29   ;;  %v9122_v21 = vadd.s32 192, %v8134_v54  ;;  %v3011_v51 = vadd.f32 %v2958_v33, %v9421_v61 }
 0x2dc   : > { %v5990_v58 = vmul.f32 %v7112_v17, %v9073_v4  ;;  %v6104_v35 = vmul.f32 %v7112_v17, %v9094_v47  ;;  %v5299_v12 = vshrl.u32 %v5298_v42, 4  ;;  %v5321_v41 = vadd.s32 %v5319_v57, %v5313_v2  ;;  %v3394_v33 = vpop.f32.mrf.mxu2 }
 0x2dd   : > { %vm5322_vm14 = vc.u32 %v5320_v37, %v5316_v36  ;;  %v3443_v15 = vadd.f32 %v3389_v63, %v3010_v56  ;;  %v5336_v47 = vand.u32 65535, %v9122_v21  ;;  %v5337_v14 = vshrl.u32 %v9122_v21, 16 }
 0x2de   : > { %v6025_v59 = vadd.f32 %v6024_v46, %v5990_v58  ;;  %v6139_v53 = vadd.f32 %v6138_v9, %v6104_v35  ;;  %v5300_v24 = vmul.u32 18, %v5299_v12  ;;  %v5323_v55 = vsel %vm5322_vm14, 1, %v9384_v31 }
 0x2df   : > { %v5325_v4 = vadd.s32 %v5323_v55, %v5321_v41  ;;  %v6069_v6 = vmul.f32 %v9097_v1, %v9097_v1  ;;  %v9133_v18 = vmul.f32 %v9111_v5, %v9111_v5  ;;  %v3444_v10 = vadd.f32 %v3391_v25, %v3011_v51  ;;  %v9422_v51 = vld [vmem:[#allocation19_spill] sm:$0xff]  ;;  %v3961_v55 = vpop.f32.mrf.mxu3 }
 0x2e0   : > { %v5301_v16 = vsub.s32 %v9084_v26, %v5300_v24  ;;  %v4010_v28 = vadd.f32 %v3956_v7, %v3443_v15  ;;  %v5339_v52 = vmul.u32 14564, %v5336_v47  ;;  %v5340_v44 = vmul.u32 58254, %v5336_v47 }
 0x2e1   : > { %v5326_v38 = vadd.s32 %v5325_v4, %v5315_v13  ;;  %v5341_v27 = vmul.u32 14564, %v5337_v14  ;;  %v5342_v39 = vmul.u32 58254, %v5337_v14  ;;  %v9136_v32 = vadd.s32 200, %v8134_v54 }
 0x2e2   : > { %vm5703_vm1 = vcmp.ne.s32.totalorder %v5301_v16, 0  ;;  %vm5739_vm6 = vcmp.lt.s32.totalorder %v5301_v16, 0  ;;  %v5811_v62 = vadd.s32 18, %v5301_v16  ;;  %v5343_v26 = vshll.u32 %v5340_v44, 16 }
 0x2e3   : > { %vm5775_vm7 = vmand %vm5739_vm6, %vm5703_vm1  ;;  %v5327_v63 = vadd.s32 %v5326_v38, %v5317_v49  ;;  %v9138_v9 = vadd.f32 %v4390_v45, %v4010_v28  ;;  %v5344_v43 = vshrl.u32 %v5340_v44, 16  ;;  %v5345_v48 = vshll.u32 %v5341_v27, 16  ;;  %v2963_v38 = vpop.f32.mrf.mxu1 }
 0x2e4   : > { %v5847_v46 = vsel %vm5775_vm7, %v5811_v62, %v5301_v16  ;;  %vm5347_vm0 = vc.u32 %v5339_v52, %v5343_v26  ;;  %v5349_v50 = vadd.s32 %v5343_v26, %v5339_v52  ;;  %v5346_v40 = vshrl.u32 %v5341_v27, 16  ;;  %v4395_v16 = vpop.f32.mrf.mxu0 }
 0x2e5   : > { %vm5883_vm15 = vcmp.lt.s32.totalorder %v5847_v46, 16  ;;  %v5328_v30 = vshrl.u32 %v5327_v63, 4  ;;  %v5348_v19 = vsel %vm5347_vm0, 1, %v9384_v31  ;;  %v4011_v2 = vadd.f32 %v3958_v20, %v3444_v10 }
 0x2e6   : > { %v7113_v60 = vsel %vm5883_vm15, 1.0, %v9402_v3  ;;  %v5350_v36 = vadd.s32 %v5348_v19, %v5342_v39  ;;  %vm5351_vm2 = vc.u32 %v5349_v50, %v5345_v48  ;;  %v5365_v42 = vand.u32 65535, %v9136_v32  ;;  %v3396_v48 = vpop.f32.mrf.mxu2 }
 0x2e7   : > { %v5991_v22 = vmul.f32 %v7113_v60, %v9097_v1  ;;  %v6105_v23 = vmul.f32 %v7113_v60, %v6069_v6  ;;  %v5329_v13 = vmul.u32 18, %v5328_v30  ;;  %v9143_v7 = vadd.f32 %v4392_v0, %v4011_v2 }
 0x2e8   : > { %v5366_v29 = vshrl.u32 %v9136_v32, 16  ;;  %v5352_v37 = vsel %vm5351_vm2, 1, %v9384_v31  ;;  %v5368_v58 = vmul.u32 14564, %v5365_v42  ;;  %v5369_v35 = vmul.u32 58254, %v5365_v42 }
 0x2e9   : > { %v6026_v17 = vadd.f32 %v6025_v59, %v5991_v22  ;;  %v6140_v49 = vadd.f32 %v6139_v53, %v6105_v23  ;;  %v5330_v57 = vsub.s32 %v9103_v11, %v5329_v13  ;;  %v5354_v45 = vadd.s32 %v5352_v37, %v5350_v36  ;;  %v9423_v23 = vld [vmem:[#allocation20_spill] sm:$0xff] }
 0x2ea   : > { %v7354_v1 = vpack.c.bf16 %v9143_v7, %v9138_v9  ;;  %v5370_v41 = vmul.u32 14564, %v5366_v29  ;;  %v5371_v56 = vmul.u32 58254, %v5366_v29  ;;  %v5372_v61 = vshll.u32 %v5369_v35, 16 }
 0x2eb   : > { %vm5704_vm3 = vcmp.ne.s32.totalorder %v5330_v57, 0  ;;  %vm5740_vm4 = vcmp.lt.s32.totalorder %v5330_v57, 0  ;;  %v5812_v12 = vadd.s32 18, %v5330_v57  ;;  %v5355_v8 = vadd.s32 %v5354_v45, %v5344_v43 }
 0x2ec   : > { %vm5776_vm8 = vmand %vm5740_vm4, %vm5704_vm3  ;;  %7392 = vst [vmem:[%s8516_s18 + $0x60] sm:$0xff] %v7354_v1   ;;  %v3012_v25 = vadd.f32 %v2961_v34, %v9422_v51  ;;  %v9155_v59 = vmul.f32 %v9138_v9, %v9138_v9  ;;  %v5373_v53 = vshrl.u32 %v5369_v35, 16  ;;  %v5374_v24 = vshll.u32 %v5370_v41, 16  ;;  %v4397_v35 = vpop.f32.mrf.mxu0 }
 0x2ed   : > { %v5848_v11 = vsel %vm5776_vm8, %v5812_v12, %v5330_v57  ;;  %v5356_v4 = vadd.s32 %v5355_v8, %v5346_v40  ;;  %vm5376_vm5 = vc.u32 %v5368_v58, %v5372_v61  ;;  %v5378_v15 = vadd.s32 %v5372_v61, %v5368_v58  ;;  %v2966_v12 = vpop.f32.mrf.mxu1 }
 0x2ee   : > { %vm5884_vm9 = vcmp.lt.s32.totalorder %v5848_v11, 16  ;;  %v5377_v14 = vsel %vm5376_vm5, 1, %v9384_v31  ;;  %v3445_v6 = vadd.f32 %v3394_v33, %v3012_v25  ;;  %v9160_v10 = vadd.s32 208, %v8134_v54 }
 0x2ef   : > { %v7114_v47 = vsel %vm5884_vm9, 1.0, %v9402_v3  ;;  %v5357_v44 = vshrl.u32 %v5356_v4, 4  ;;  %v5379_v62 = vadd.s32 %v5377_v14, %v5371_v56  ;;  %vm5380_vm10 = vc.u32 %v5378_v15, %v5374_v24 }
 0x2f0   : > { %v5992_v28 = vmul.f32 %v7114_v47, %v9111_v5  ;;  %v6106_v52 = vmul.f32 %v7114_v47, %v9133_v18  ;;  %v4012_v27 = vadd.f32 %v3961_v55, %v3445_v6  ;;  %v5394_v63 = vand.u32 65535, %v9160_v10  ;;  %v3399_v47 = vpop.f32.mrf.mxu2 }
 0x2f1   : > { %v5395_v39 = vshrl.u32 %v9160_v10, 16  ;;  %v5358_v46 = vmul.u32 18, %v5357_v44  ;;  %v5381_v43 = vsel %vm5380_vm10, 1, %v9384_v31  ;;  %v5375_v30 = vshrl.u32 %v5370_v41, 16 }
 0x2f2   : > { %v6027_v26 = vadd.f32 %v6026_v17, %v5992_v28  ;;  %v6141_v20 = vadd.f32 %v6140_v49, %v6106_v52  ;;  %v5383_v50 = vadd.s32 %v5381_v43, %v5379_v62  ;;  %v5397_v0 = vmul.u32 14564, %v5394_v63  ;;  %v3963_v49 = vpop.f32.mrf.mxu3 }
 0x2f3   : > { %v5398_v5 = vmul.u32 58254, %v5394_v63  ;;  %v5359_v18 = vsub.s32 %v9122_v21, %v5358_v46  ;;  %v9168_v34 = vadd.f32 %v4395_v16, %v4012_v27  ;;  %v5399_v60 = vmul.u32 14564, %v5395_v39 }
 0x2f4   : > { %v5400_v40 = vmul.u32 58254, %v5395_v39  ;;  %v5384_v19 = vadd.s32 %v5383_v50, %v5373_v53  ;;  %v3013_v13 = vadd.f32 %v2963_v38, %v9423_v23  ;;  %v9173_v45 = vadd.s32 216, %v8134_v54  ;;  %v9424_v50 = vld [vmem:[#allocation24_spill] sm:$0xff] }
 0x2f5   : > { %v5401_v2 = vshll.u32 %v5398_v5, 16  ;;  %v5402_v22 = vshrl.u32 %v5398_v5, 16  ;;  %vm5705_vm11 = vcmp.ne.s32.totalorder %v5359_v18, 0  ;;  %vm5741_vm12 = vcmp.lt.s32.totalorder %v5359_v18, 0 }
 0x2f6   : > { %v5813_v36 = vadd.s32 18, %v5359_v18  ;;  %v5403_v42 = vshll.u32 %v5399_v60, 16  ;;  %vm5777_vm13 = vmand %vm5741_vm12, %vm5705_vm11  ;;  %v5385_v29 = vadd.s32 %v5384_v19, %v5375_v30  ;;  %v5404_v33 = vshrl.u32 %v5399_v60, 16  ;;  %v4400_v60 = vpop.f32.mrf.mxu0  ;;  %v2968_v19 = vpop.f32.mrf.mxu1 }
 0x2f7   : > { %vm5405_vm14 = vc.u32 %v5397_v0, %v5401_v2  ;;  %v5407_v17 = vadd.s32 %v5401_v2, %v5397_v0  ;;  %v3446_v37 = vadd.f32 %v3396_v48, %v3013_v13  ;;  %v5423_v61 = vand.u32 65535, %v9173_v45 }
 0x2f8   : > { %v5849_v21 = vsel %vm5777_vm13, %v5813_v36, %v5359_v18  ;;  %v5406_v57 = vsel %vm5405_vm14, 1, %v9384_v31  ;;  %v5386_v1 = vshrl.u32 %v5385_v29, 4  ;;  %v5424_v55 = vshrl.u32 %v9173_v45, 16 }
 0x2f9   : > { %vm5885_vm1 = vcmp.lt.s32.totalorder %v5849_v21, 16  ;;  %v5408_v58 = vadd.s32 %v5406_v57, %v5400_v40  ;;  %vm5409_vm6 = vc.u32 %v5407_v17, %v5403_v42  ;;  %v4013_v56 = vadd.f32 %v3963_v49, %v3446_v37  ;;  %v9425_v57 = vld [vmem:[#allocation28_spill] sm:$0xff] }
 0x2fa   : > { %v7115_v41 = vsel %vm5885_vm1, 1.0, %v9402_v3  ;;  %v5410_v8 = vsel %vm5409_vm6, 1, %v9384_v31  ;;  %v5387_v11 = vmul.u32 18, %v5386_v1  ;;  %v5426_v4 = vmul.u32 14564, %v5423_v61  ;;  %v3966_v43 = vpop.f32.mrf.mxu3  ;;  %v3401_v1 = vpop.f32.mrf.mxu2 }
 0x2fb   : > { %v5993_v51 = vmul.f32 %v7115_v41, %v9138_v9  ;;  %v6107_v25 = vmul.f32 %v7115_v41, %v9155_v59  ;;  %v5412_v53 = vadd.s32 %v5410_v8, %v5408_v58  ;;  %v9180_v24 = vadd.f32 %v4397_v35, %v4013_v56 }
 0x2fc   : > { %v5427_v15 = vmul.u32 58254, %v5423_v61  ;;  %v5388_v6 = vsub.s32 %v9136_v32, %v5387_v11  ;;  %v5428_v28 = vmul.u32 14564, %v5424_v55  ;;  %v5429_v59 = vmul.u32 58254, %v5424_v55 }
 0x2fd   : > { %v6028_v14 = vadd.f32 %v6027_v26, %v5993_v51  ;;  %v6142_v16 = vadd.f32 %v6141_v20, %v6107_v25  ;;  %v5413_v38 = vadd.s32 %v5412_v53, %v5402_v22  ;;  %v7359_v9 = vpack.c.bf16 %v9180_v24, %v9168_v34 }
 0x2fe   : > { %v5430_v52 = vshll.u32 %v5427_v15, 16  ;;  %vm5706_vm7 = vcmp.ne.s32.totalorder %v5388_v6, 0  ;;  %vm5742_vm15 = vcmp.lt.s32.totalorder %v5388_v6, 0  ;;  %v5814_v44 = vadd.s32 18, %v5388_v6 }
 0x2ff   : > { %v5414_v62 = vadd.s32 %v5413_v38, %v5404_v33  ;;  %vm5778_vm0 = vmand %vm5742_vm15, %vm5706_vm7  ;;  %v6072_v27 = vmul.f32 %v9143_v7, %v9143_v7  ;;  %7393 = vst [vmem:[%s8516_s18 + $0x68] sm:$0xff] %v7359_v9   ;;  %v5431_v63 = vshrl.u32 %v5427_v15, 16  ;;  %v5432_v39 = vshll.u32 %v5428_v28, 16 }
 0x300   : > { %vm5434_vm2 = vc.u32 %v5426_v4, %v5430_v52  ;;  %v5850_v32 = vsel %vm5778_vm0, %v5814_v44, %v5388_v6  ;;  %v5436_v46 = vadd.s32 %v5430_v52, %v5426_v4  ;;  %v5433_v48 = vshrl.u32 %v5428_v28, 16 }
 0x301   : > { %v5415_v26 = vshrl.u32 %v5414_v62, 4  ;;  %v5435_v20 = vsel %vm5434_vm2, 1, %v9384_v31  ;;  %vm5886_vm3 = vcmp.lt.s32.totalorder %v5850_v32, 16  ;;  %v3014_v0 = vadd.f32 %v2966_v12, %v9424_v50  ;;  %v9427_v50 = vld [vmem:[#allocation21_spill] sm:$0xff] }
 0x302   : > { %v5437_v30 = vadd.s32 %v5435_v20, %v5429_v59  ;;  %v7116_v5 = vsel %vm5886_vm3, 1.0, %v9402_v3  ;;  %vm5438_vm4 = vc.u32 %v5436_v46, %v5432_v39  ;;  %v9193_v40 = vadd.s32 224, %v8134_v54  ;;  %v4402_v59 = vpop.f32.mrf.mxu0  ;;  %v2971_v20 = vpop.f32.mrf.mxu1 }
 0x303   : > { %v5416_v18 = vmul.u32 18, %v5415_v26  ;;  %v5994_v2 = vmul.f32 %v7116_v5, %v9143_v7  ;;  %v6108_v22 = vmul.f32 %v7116_v5, %v6072_v27  ;;  %v5439_v23 = vsel %vm5438_vm4, 1, %v9384_v31 }
 0x304   : > { %v3447_v13 = vadd.f32 %v3399_v47, %v3014_v0  ;;  %v5441_v42 = vadd.s32 %v5439_v23, %v5437_v30  ;;  %v5452_v29 = vand.u32 65535, %v9193_v40  ;;  %v5453_v33 = vshrl.u32 %v9193_v40, 16  ;;  %v9426_v30 = vld [vmem:[#allocation22_spill] sm:$0xff] }
 0x305   : > { %v5417_v36 = vsub.s32 %v9160_v10, %v5416_v18  ;;  %v6029_v17 = vadd.f32 %v6028_v14, %v5994_v2  ;;  %v6143_v49 = vadd.f32 %v6142_v16, %v6108_v22  ;;  %v3015_v37 = vadd.f32 %v2968_v19, %v9425_v57  ;;  %v3968_v14 = vpop.f32.mrf.mxu3  ;;  %v3404_v18 = vpop.f32.mrf.mxu2 }
 0x306   : > { %v4014_v21 = vadd.f32 %v3966_v43, %v3447_v13  ;;  %v5442_v58 = vadd.s32 %v5441_v42, %v5431_v63  ;;  %v6073_v35 = vmul.f32 %v9168_v34, %v9168_v34  ;;  %v5455_v10 = vmul.u32 14564, %v5452_v29 }
 0x307   : > { %vm5707_vm8 = vcmp.ne.s32.totalorder %v5417_v36, 0  ;;  %vm5743_vm9 = vcmp.lt.s32.totalorder %v5417_v36, 0  ;;  %v5815_v7 = vadd.s32 18, %v5417_v36  ;;  %v5456_v12 = vmul.u32 58254, %v5452_v29 }
 0x308   : > { %vm5779_vm5 = vmand %vm5743_vm9, %vm5707_vm8  ;;  %v5457_v41 = vmul.u32 14564, %v5453_v33  ;;  %v5443_v56 = vadd.s32 %v5442_v58, %v5433_v48  ;;  %v6074_v61 = vmul.f32 %v9180_v24, %v9180_v24  ;;  %v3448_v51 = vadd.f32 %v3401_v1, %v3015_v37 }
 0x309   : > { %v5851_v8 = vsel %vm5779_vm5, %v5815_v7, %v5417_v36  ;;  %v5458_v25 = vmul.u32 58254, %v5453_v33  ;;  %v5459_v11 = vshll.u32 %v5456_v12, 16  ;;  %v9206_v15 = vadd.f32 %v4400_v60, %v4014_v21 }
 0x30a   : > { %vm5887_vm10 = vcmp.lt.s32.totalorder %v5851_v8, 16  ;;  %v5461_v53 = vshll.u32 %v5457_v41, 16  ;;  %v5444_v4 = vshrl.u32 %v5443_v56, 4  ;;  %v5460_v47 = vshrl.u32 %v5456_v12, 16 }
 0x30b   : > { %v7117_v55 = vsel %vm5887_vm10, 1.0, %v9402_v3  ;;  %vm5463_vm11 = vc.u32 %v5455_v10, %v5459_v11  ;;  %v5465_v38 = vadd.s32 %v5459_v11, %v5455_v10  ;;  %v4015_v52 = vadd.f32 %v3968_v14, %v3448_v51 }
 0x30c   : > { %v5995_v16 = vmul.f32 %v7117_v55, %v9168_v34  ;;  %v6109_v6 = vmul.f32 %v7117_v55, %v6073_v35  ;;  %v5445_v9 = vmul.u32 18, %v5444_v4  ;;  %v5464_v28 = vsel %vm5463_vm11, 1, %v9384_v31 }
 0x30d   : > { %v9211_v44 = vadd.s32 232, %v8134_v54  ;;  %v5466_v63 = vadd.s32 %v5464_v28, %v5458_v25  ;;  %vm5467_vm12 = vc.u32 %v5465_v38, %v5461_v53  ;;  %v9215_v34 = vadd.f32 %v4402_v59, %v4015_v52  ;;  %v3971_v37 = vpop.f32.mrf.mxu3  ;;  %v9428_v59 = vld [vmem:[#allocation25_spill] sm:$0xff]  ;;  %v9429_v52 = vld [vmem:[#allocation23_spill] sm:$0xff] }
 0x30e   : > { %v6030_v62 = vadd.f32 %v6029_v17, %v5995_v16  ;;  %v6144_v27 = vadd.f32 %v6143_v49, %v6109_v6  ;;  %v5446_v39 = vsub.s32 %v9173_v45, %v5445_v9  ;;  %v5468_v32 = vsel %vm5467_vm12, 1, %v9384_v31 }
 0x30f   : > { %v5481_v26 = vand.u32 65535, %v9211_v44  ;;  %v5462_v46 = vshrl.u32 %v5457_v41, 16  ;;  %v5470_v43 = vadd.s32 %v5468_v32, %v5466_v63  ;;  %v5482_v48 = vshrl.u32 %v9211_v44, 16  ;;  %v4405_v41 = vpop.f32.mrf.mxu0 }
 0x310   : > { %v2582_v0 = vadd.f32 %v9427_v50, %v9426_v30  ;;  %vm5708_vm13 = vcmp.ne.s32.totalorder %v5446_v39, 0  ;;  %vm5744_vm14 = vcmp.lt.s32.totalorder %v5446_v39, 0  ;;  %v5816_v5 = vadd.s32 18, %v5446_v39 }
 0x311   : > { %v7364_v45 = vpack.c.bf16 %v9215_v34, %v9206_v15  ;;  %vm5780_vm1 = vmand %vm5744_vm14, %vm5708_vm13  ;;  %v5471_v60 = vadd.s32 %v5470_v43, %v5460_v47  ;;  %v5484_v19 = vmul.u32 14564, %v5481_v26  ;;  %v5485_v2 = vmul.u32 58254, %v5481_v26 }
 0x312   : > { %v5486_v22 = vmul.u32 14564, %v5482_v48  ;;  %v5852_v23 = vsel %vm5780_vm1, %v5816_v5, %v5446_v39  ;;  %v9225_v13 = vmul.f32 %v9206_v15, %v9206_v15  ;;  %v3016_v36 = vadd.f32 %v2971_v20, %v2582_v0 }
 0x313   : > { %7394 = vst [vmem:[%s8516_s18 + $0x70] sm:$0xff] %v7364_v45   ;;  %v9229_v42 = vadd.s32 240, %v8134_v54  ;;  %vm5888_vm6 = vcmp.lt.s32.totalorder %v5852_v23, 16  ;;  %v5472_v29 = vadd.s32 %v5471_v60, %v5462_v46  ;;  %v5487_v33 = vmul.u32 58254, %v5482_v48 }
 0x314   : > { %v5488_v17 = vshll.u32 %v5485_v2, 16  ;;  %v7118_v49 = vsel %vm5888_vm6, 1.0, %v9402_v3  ;;  %v5489_v21 = vshrl.u32 %v5485_v2, 16  ;;  %v5490_v57 = vshll.u32 %v5486_v22, 16 }
 0x315   : > { %v3449_v1 = vadd.f32 %v3404_v18, %v3016_v36  ;;  %v5996_v7 = vmul.f32 %v7118_v49, %v9180_v24  ;;  %v6110_v58 = vmul.f32 %v7118_v49, %v6074_v61  ;;  %v5473_v35 = vshrl.u32 %v5472_v29, 4  ;;  %v2973_v61 = vpop.f32.mrf.mxu1  ;;  %v3973_v0 = vpop.f32.mrf.mxu3 }
 0x316   : > { %vm5492_vm7 = vc.u32 %v5484_v19, %v5488_v17  ;;  %v5494_v12 = vadd.s32 %v5488_v17, %v5484_v19  ;;  %v5510_v56 = vand.u32 65535, %v9229_v42  ;;  %v5491_v55 = vshrl.u32 %v5486_v22, 16 }
 0x317   : > { %v5493_v10 = vsel %vm5492_vm7, 1, %v9384_v31  ;;  %v4016_v8 = vadd.f32 %v3971_v37, %v3449_v1  ;;  %v6031_v51 = vadd.f32 %v6030_v62, %v5996_v7  ;;  %v6145_v25 = vadd.f32 %v6144_v27, %v6110_v58  ;;  %v3406_v27 = vpop.f32.mrf.mxu2  ;;  %v4407_v36 = vpop.f32.mrf.mxu0  ;;  %v9430_v1 = vld [vmem:[#allocation3_spill] sm:$0xff]  ;;  %v9431_v7 = vld [vmem:[#allocation26_spill] sm:$0xff] }
 0x318   : > { %v5474_v11 = vmul.u32 18, %v5473_v35  ;;  %v5495_v53 = vadd.s32 %v5493_v10, %v5487_v33  ;;  %vm5496_vm15 = vc.u32 %v5494_v12, %v5490_v57  ;;  %v5511_v24 = vshrl.u32 %v9229_v42, 16 }
 0x319   : > { %v9235_v4 = vadd.f32 %v4405_v41, %v4016_v8  ;;  %v5497_v14 = vsel %vm5496_vm15, 1, %v9384_v31  ;;  %v5513_v16 = vmul.u32 14564, %v5510_v56  ;;  %v5514_v6 = vmul.u32 58254, %v5510_v56 }
 0x31a   : > { %v5475_v47 = vsub.s32 %v9193_v40, %v5474_v11  ;;  %v5499_v38 = vadd.s32 %v5497_v14, %v5495_v53  ;;  %v5515_v9 = vmul.u32 14564, %v5511_v24  ;;  %v5516_v28 = vmul.u32 58254, %v5511_v24 }
 0x31b   : > { %v2583_v62 = vadd.f32 %v9429_v52, %v9428_v59  ;;  %v5517_v39 = vshll.u32 %v5514_v6, 16  ;;  %v5518_v26 = vshrl.u32 %v5514_v6, 16  ;;  %v9244_v5 = vadd.s32 248, %v8134_v54 }
 0x31c   : > { %vm5709_vm0 = vcmp.ne.s32.totalorder %v5475_v47, 0  ;;  %vm5745_vm2 = vcmp.lt.s32.totalorder %v5475_v47, 0  ;;  %v5817_v63 = vadd.s32 18, %v5475_v47  ;;  %v5500_v32 = vadd.s32 %v5499_v38, %v5489_v21 }
 0x31d   : > { %vm5781_vm3 = vmand %vm5745_vm2, %vm5709_vm0  ;;  %v5519_v20 = vshll.u32 %v5515_v9, 16  ;;  %v5520_v40 = vshrl.u32 %v5515_v9, 16  ;;  %vm5521_vm4 = vc.u32 %v5513_v16, %v5517_v39  ;;  %v5523_v43 = vadd.s32 %v5517_v39, %v5513_v16  ;;  %v2976_v35 = vpop.f32.mrf.mxu1 }
 0x31e   : > { %v5853_v46 = vsel %vm5781_vm3, %v5817_v63, %v5475_v47  ;;  %v3017_v48 = vadd.f32 %v2973_v61, %v2583_v62  ;;  %v5501_v30 = vadd.s32 %v5500_v32, %v5491_v55  ;;  %v5522_v50 = vsel %vm5521_vm4, 1, %v9384_v31 }
 0x31f   : > { %vm5889_vm8 = vcmp.lt.s32.totalorder %v5853_v46, 16  ;;  %v5524_v18 = vadd.s32 %v5522_v50, %v5516_v28  ;;  %vm5525_vm9 = vc.u32 %v5523_v43, %v5519_v20  ;;  %v5539_v17 = vand.u32 65535, %v9244_v5  ;;  %v3976_v28 = vpop.f32.mrf.mxu3  ;;  %v4410_v39 = vpop.f32.mrf.mxu0 }
 0x320   : > { %v7119_v45 = vsel %vm5889_vm8, 1.0, %v9402_v3  ;;  %v3450_v60 = vadd.f32 %v3406_v27, %v3017_v48  ;;  %v5502_v22 = vshrl.u32 %v5501_v30, 4  ;;  %v5526_v23 = vsel %vm5525_vm9, 1, %v9384_v31 }
 0x321   : > { %v5997_v19 = vmul.f32 %v7119_v45, %v9206_v15  ;;  %v6111_v2 = vmul.f32 %v7119_v45, %v9225_v13  ;;  %v5528_v29 = vadd.s32 %v5526_v23, %v5524_v18  ;;  %v5540_v49 = vshrl.u32 %v9244_v5, 16  ;;  %v9433_v45 = vld [vmem:[#allocation4_spill] sm:$0xff] }
 0x322   : > { %v4017_v33 = vadd.f32 %v3973_v0, %v3450_v60  ;;  %v5503_v37 = vmul.u32 18, %v5502_v22  ;;  %v2584_v58 = vadd.f32 %v9431_v7, %v9430_v1  ;;  %v5542_v13 = vmul.u32 14564, %v5539_v17  ;;  %v9432_v0 = vld [vmem:[#allocation27_spill] sm:$0xff] }
 0x323   : > { %v6032_v21 = vadd.f32 %v6031_v51, %v5997_v19  ;;  %v6146_v57 = vadd.f32 %v6145_v25, %v6111_v2  ;;  %v5529_v15 = vadd.s32 %v5528_v29, %v5518_v26  ;;  %v5543_v12 = vmul.u32 58254, %v5539_v17  ;;  %v3409_v51 = vpop.f32.mrf.mxu2 }
 0x324   : > { %v9254_v10 = vadd.f32 %v4407_v36, %v4017_v33  ;;  %v5504_v41 = vsub.s32 %v9211_v44, %v5503_v37  ;;  %v6076_v8 = vmul.f32 %v9215_v34, %v9215_v34  ;;  %v5544_v56 = vmul.u32 14564, %v5540_v49 }
 0x325   : > { %v5545_v11 = vmul.u32 58254, %v5540_v49  ;;  %v5530_v25 = vadd.s32 %v5529_v15, %v5520_v40  ;;  %v5546_v55 = vshll.u32 %v5543_v12, 16  ;;  %v3018_v24 = vadd.f32 %v2976_v35, %v2584_v58  ;;  %v2978_v60 = vpop.f32.mrf.mxu1 }
 0x326   : > { %v7369_v53 = vpack.c.bf16 %v9254_v10, %v9235_v4  ;;  %vm5710_vm5 = vcmp.ne.s32.totalorder %v5504_v41, 0  ;;  %vm5746_vm10 = vcmp.lt.s32.totalorder %v5504_v41, 0  ;;  %v5818_v61 = vadd.s32 18, %v5504_v41 }
 0x327   : > { %v5548_v47 = vshll.u32 %v5544_v56, 16  ;;  %vm5782_vm11 = vmand %vm5746_vm10, %vm5710_vm5  ;;  %v5531_v14 = vshrl.u32 %v5530_v25, 4  ;;  %v6077_v44 = vmul.f32 %v9235_v4, %v9235_v4  ;;  %vm5550_vm12 = vc.u32 %v5542_v13, %v5546_v55 }
 0x328   : > { %7395 = vst [vmem:[%s8516_s18 + $0x78] sm:$0xff] %v7369_v53   ;;  %v5552_v16 = vadd.s32 %v5546_v55, %v5542_v13  ;;  %v5854_v6 = vsel %vm5782_vm11, %v5818_v61, %v5504_v41  ;;  %v5547_v38 = vshrl.u32 %v5543_v12, 16  ;;  %v5551_v9 = vsel %vm5550_vm12, 1, %v9384_v31  ;;  %v3978_v41 = vpop.f32.mrf.mxu3  ;;  %v4412_v55 = vpop.f32.mrf.mxu0 }
 0x329   : > { %v3451_v59 = vadd.f32 %v3409_v51, %v3018_v24  ;;  %vm5890_vm13 = vcmp.lt.s32.totalorder %v5854_v6, 16  ;;  %v5532_v52 = vmul.u32 18, %v5531_v14  ;;  %v5553_v62 = vadd.s32 %v5551_v9, %v5545_v11 }
 0x32a   : > { %vm5554_vm14 = vc.u32 %v5552_v16, %v5548_v47  ;;  %v7120_v27 = vsel %vm5890_vm13, 1.0, %v9402_v3  ;;  %v9268_v26 = vadd.s32 256, %v8134_v54  ;;  %v5549_v48 = vshrl.u32 %v5544_v56, 16 }
 0x32b   : > { %v5555_v63 = vsel %vm5554_vm14, 1, %v9384_v31  ;;  %v4018_v32 = vadd.f32 %v3976_v28, %v3451_v59  ;;  %v5998_v20 = vmul.f32 %v7120_v27, %v9215_v34  ;;  %v6112_v40 = vmul.f32 %v7120_v27, %v6076_v8  ;;  %v9434_v28 = vld [vmem:[#allocation29_spill] sm:$0xff] }
 0x32c   : > { %v5533_v46 = vsub.s32 %v9229_v42, %v5532_v52  ;;  %v5557_v43 = vadd.s32 %v5555_v63, %v5553_v62  ;;  %v5568_v30 = vand.u32 65535, %v9268_v26  ;;  %v5569_v50 = vshrl.u32 %v9268_v26, 16  ;;  %v3411_v42 = vpop.f32.mrf.mxu2  ;;  %v9435_v59 = vld [vmem:[#allocation5_spill] sm:$0xff] }
 0x32d   : > { %v2585_v18 = vadd.f32 %v9433_v45, %v9432_v0  ;;  %v6033_v19 = vadd.f32 %v6032_v21, %v5998_v20  ;;  %v6147_v2 = vadd.f32 %v6146_v57, %v6112_v40  ;;  %v9276_v29 = vadd.f32 %v4410_v39, %v4018_v32  ;;  %v2981_v62 = vpop.f32.mrf.mxu1 }
 0x32e   : > { %vm5711_vm1 = vcmp.ne.s32.totalorder %v5533_v46, 0  ;;  %vm5747_vm6 = vcmp.lt.s32.totalorder %v5533_v46, 0  ;;  %v5819_v22 = vadd.s32 18, %v5533_v46  ;;  %v5558_v34 = vadd.s32 %v5557_v43, %v5547_v38 }
 0x32f   : > { %vm5783_vm7 = vmand %vm5747_vm6, %vm5711_vm1  ;;  %v5571_v23 = vmul.u32 14564, %v5568_v30  ;;  %v5572_v36 = vmul.u32 58254, %v5568_v30  ;;  %v5573_v33 = vmul.u32 14564, %v5569_v50  ;;  %v5574_v17 = vmul.u32 58254, %v5569_v50 }
 0x330   : > { %v3019_v49 = vadd.f32 %v2978_v60, %v2585_v18  ;;  %v5855_v37 = vsel %vm5783_vm7, %v5819_v22, %v5533_v46  ;;  %v5559_v1 = vadd.s32 %v5558_v34, %v5549_v48  ;;  %v9282_v24 = vadd.s32 264, %v8134_v54 }
 0x331   : > { %v5575_v7 = vshll.u32 %v5572_v36, 16  ;;  %v5576_v58 = vshrl.u32 %v5572_v36, 16  ;;  %vm5891_vm15 = vcmp.lt.s32.totalorder %v5855_v37, 16  ;;  %v5577_v21 = vshll.u32 %v5573_v33, 16 }
 0x332   : > { %v5578_v57 = vshrl.u32 %v5573_v33, 16  ;;  %v3452_v35 = vadd.f32 %v3411_v42, %v3019_v49  ;;  %v7121_v15 = vsel %vm5891_vm15, 1.0, %v9402_v3  ;;  %v5560_v13 = vshrl.u32 %v5559_v1, 4 }
 0x333   : > { %vm5579_vm0 = vc.u32 %v5571_v23, %v5575_v7  ;;  %v5581_v12 = vadd.s32 %v5575_v7, %v5571_v23  ;;  %v5999_v8 = vmul.f32 %v7121_v15, %v9235_v4  ;;  %v6113_v56 = vmul.f32 %v7121_v15, %v6077_v44 }
 0x334   : > { %v5580_v11 = vsel %vm5579_vm0, 1, %v9384_v31  ;;  %v4019_v51 = vadd.f32 %v3978_v41, %v3452_v35  ;;  %v5561_v25 = vmul.u32 18, %v5560_v13  ;;  %v5597_v6 = vand.u32 65535, %v9282_v24  ;;  %v3414_v46 = vpop.f32.mrf.mxu2  ;;  %v4415_v13 = vpop.f32.mrf.mxu0 }
 0x335   : > { %v5582_v53 = vadd.s32 %v5580_v11, %v5574_v17  ;;  %vm5583_vm2 = vc.u32 %v5581_v12, %v5577_v21  ;;  %v6034_v61 = vadd.f32 %v6033_v19, %v5999_v8  ;;  %v6148_v47 = vadd.f32 %v6147_v2, %v6113_v56 }
 0x336   : > { %v5584_v14 = vsel %vm5583_vm2, 1, %v9384_v31  ;;  %v9285_v16 = vadd.f32 %v4412_v55, %v4019_v51  ;;  %v5562_v4 = vsub.s32 %v9244_v5, %v5561_v25  ;;  %v5598_v38 = vshrl.u32 %v9282_v24, 16 }
 0x337   : > { %v5586_v44 = vadd.s32 %v5584_v14, %v5582_v53  ;;  %v2586_v52 = vadd.f32 %v9435_v59, %v9434_v28  ;;  %v9295_v27 = vadd.s32 272, %v8134_v54  ;;  %v6078_v5 = vmul.f32 %v9254_v10, %v9254_v10  ;;  %v9436_v14 = vld [vmem:[#allocation30_spill] sm:$0xff] }
 0x338   : > { %v7374_v9 = vpack.c.bf16 %v9285_v16, %v9276_v29  ;;  %vm5712_vm3 = vcmp.ne.s32.totalorder %v5562_v4, 0  ;;  %vm5748_vm4 = vcmp.lt.s32.totalorder %v5562_v4, 0  ;;  %v5820_v63 = vadd.s32 18, %v5562_v4 }
 0x339   : > { %v5587_v39 = vadd.s32 %v5586_v44, %v5576_v58  ;;  %vm5784_vm8 = vmand %vm5748_vm4, %vm5712_vm3  ;;  %v5600_v32 = vmul.u32 14564, %v5597_v6  ;;  %v5601_v20 = vmul.u32 58254, %v5597_v6  ;;  %v5602_v40 = vmul.u32 14564, %v5598_v38  ;;  %v3981_v58 = vpop.f32.mrf.mxu3 }
 0x33a   : > { %7396 = vst [vmem:[%s8516_s18 + $0x80] sm:$0xff] %v7374_v9   ;;  %v5856_v43 = vsel %vm5784_vm8, %v5820_v63, %v5562_v4  ;;  %v6079_v30 = vmul.f32 %v9276_v29, %v9276_v29  ;;  %v3020_v50 = vadd.f32 %v2981_v62, %v2586_v52  ;;  %v5603_v0 = vmul.u32 58254, %v5598_v38  ;;  %v9437_v4 = vld [vmem:[#allocation6_spill] sm:$0xff] }
 0x33b   : > { %v5588_v48 = vadd.s32 %v5587_v39, %v5578_v57  ;;  %vm5892_vm9 = vcmp.lt.s32.totalorder %v5856_v43, 16  ;;  %v5604_v45 = vshll.u32 %v5601_v20, 16  ;;  %v5606_v18 = vshll.u32 %v5602_v40, 16 }
 0x33c   : > { %v7122_v60 = vsel %vm5892_vm9, 1.0, %v9402_v3  ;;  %v3453_v2 = vadd.f32 %v3414_v46, %v3020_v50  ;;  %v5626_v22 = vand.u32 65535, %v9295_v27  ;;  %v5605_v33 = vshrl.u32 %v5601_v20, 16  ;;  %v3416_v28 = vpop.f32.mrf.mxu2 }
 0x33d   : > { %v5589_v19 = vshrl.u32 %v5588_v48, 4  ;;  %v6000_v34 = vmul.f32 %v7122_v60, %v9254_v10  ;;  %v6114_v23 = vmul.f32 %v7122_v60, %v6078_v5  ;;  %vm5608_vm5 = vc.u32 %v5600_v32, %v5604_v45 }
 0x33e   : > { %v5610_v36 = vadd.s32 %v5604_v45, %v5600_v32  ;;  %v5609_v17 = vsel %vm5608_vm5, 1, %v9384_v31  ;;  %v5627_v49 = vshrl.u32 %v9295_v27, 16  ;;  %v5607_v57 = vshrl.u32 %v5602_v40, 16 }
 0x33f   : > { %v5590_v42 = vmul.u32 18, %v5589_v19  ;;  %v6035_v37 = vadd.f32 %v6034_v61, %v6000_v34  ;;  %v6149_v1 = vadd.f32 %v6148_v47, %v6114_v23  ;;  %v5611_v7 = vadd.s32 %v5609_v17, %v5603_v0  ;;  %v2983_v61 = vpop.f32.mrf.mxu1 }
 0x340   : > { %vm5612_vm10 = vc.u32 %v5610_v36, %v5606_v18  ;;  %v4020_v10 = vadd.f32 %v3981_v58, %v3453_v2  ;;  %v5629_v12 = vmul.u32 14564, %v5626_v22  ;;  %v5630_v41 = vmul.u32 58254, %v5626_v22  ;;  %v4417_v22 = vpop.f32.mrf.mxu0 }
 0x341   : > { %v5591_v21 = vsub.s32 %v9268_v26, %v5590_v42  ;;  %v5613_v35 = vsel %vm5612_vm10, 1, %v9384_v31  ;;  %v5631_v8 = vmul.u32 14564, %v5627_v49  ;;  %v5632_v11 = vmul.u32 58254, %v5627_v49  ;;  %v3983_v45 = vpop.f32.mrf.mxu3 }
 0x342   : > { %v5615_v15 = vadd.s32 %v5613_v35, %v5611_v7  ;;  %v5633_v25 = vshll.u32 %v5630_v41, 16  ;;  %v5634_v53 = vshrl.u32 %v5630_v41, 16  ;;  %v2587_v44 = vadd.f32 %v9437_v4, %v9436_v14 }
 0x343   : > { %vm5713_vm11 = vcmp.ne.s32.totalorder %v5591_v21, 0  ;;  %vm5749_vm12 = vcmp.lt.s32.totalorder %v5591_v21, 0  ;;  %v5821_v56 = vadd.s32 18, %v5591_v21  ;;  %v5635_v55 = vshll.u32 %v5631_v8, 16 }
 0x344   : > { %vm5785_vm13 = vmand %vm5749_vm12, %vm5713_vm11  ;;  %v5616_v51 = vadd.s32 %v5615_v15, %v5605_v33  ;;  %v5636_v47 = vshrl.u32 %v5631_v8, 16  ;;  %v9312_v6 = vadd.s32 280, %v8134_v54  ;;  %vm5637_vm1 = vc.u32 %v5629_v12, %v5633_v25 }
 0x345   : > { %v5857_v26 = vsel %vm5785_vm13, %v5821_v56, %v5591_v21  ;;  %v5639_v9 = vadd.s32 %v5633_v25, %v5629_v12  ;;  %v5638_v52 = vsel %vm5637_vm1, 1, %v9384_v31  ;;  %v3021_v62 = vadd.f32 %v2983_v61, %v2587_v44 }
 0x346   : > { %vm5893_vm14 = vcmp.lt.s32.totalorder %v5857_v26, 16  ;;  %v5617_v38 = vadd.s32 %v5616_v51, %v5607_v57  ;;  %v5655_v63 = vand.u32 65535, %v9312_v6  ;;  %v5640_v20 = vadd.s32 %v5638_v52, %v5632_v11 }
 0x347   : > { %v7123_v59 = vsel %vm5893_vm14, 1.0, %v9402_v3  ;;  %vm5641_vm6 = vc.u32 %v5639_v9, %v5635_v55  ;;  %v3454_v54 = vadd.f32 %v3416_v28, %v3021_v62  ;;  %v5656_v40 = vshrl.u32 %v9312_v6, 16 }
 0x348   : > { %v6001_v39 = vmul.f32 %v7123_v59, %v9276_v29  ;;  %v6115_v5 = vmul.f32 %v7123_v59, %v6079_v30  ;;  %v5618_v32 = vshrl.u32 %v5617_v38, 4  ;;  %v5658_v46 = vmul.u32 14564, %v5655_v63 }
 0x349   : > { %v5642_v0 = vsel %vm5641_vm6, 1, %v9384_v31  ;;  %v4021_v60 = vadd.f32 %v3983_v45, %v3454_v54  ;;  %v5659_v19 = vmul.u32 58254, %v5655_v63  ;;  %v5660_v2 = vmul.u32 14564, %v5656_v40 }
 0x34a   : > { %v6036_v43 = vadd.f32 %v6035_v37, %v6001_v39  ;;  %v6150_v48 = vadd.f32 %v6149_v1, %v6115_v5  ;;  %v5619_v50 = vmul.u32 18, %v5618_v32  ;;  %v5644_v18 = vadd.s32 %v5642_v0, %v5640_v20 }
 0x34b   : > { %v4454_v30 = vadd.f32 %v4415_v13, %v4020_v10  ;;  %v4455_v23 = vadd.f32 %v4417_v22, %v4021_v60  ;;  %v5661_v36 = vmul.u32 58254, %v5656_v40  ;;  %v5662_v42 = vshll.u32 %v5659_v19, 16 }
 0x34c   : > { %v5620_v29 = vsub.s32 %v9282_v24, %v5619_v50  ;;  %v5645_v34 = vadd.s32 %v5644_v18, %v5634_v53  ;;  %v5664_v17 = vshll.u32 %v5660_v2, 16  ;;  %v6080_v49 = vmul.f32 %v9285_v16, %v9285_v16 }
 0x34d   : > { %v7379_v1 = vpack.c.bf16 %v4455_v23, %v4454_v30  ;;  %vm5666_vm2 = vc.u32 %v5658_v46, %v5662_v42  ;;  %v5668_v58 = vadd.s32 %v5662_v42, %v5658_v46  ;;  %v5663_v10 = vshrl.u32 %v5659_v19, 16 }
 0x34e   : > { %vm5714_vm7 = vcmp.ne.s32.totalorder %v5620_v29, 0  ;;  %vm5750_vm15 = vcmp.lt.s32.totalorder %v5620_v29, 0  ;;  %v5822_v33 = vadd.s32 18, %v5620_v29  ;;  %v5646_v37 = vadd.s32 %v5645_v34, %v5636_v47 }
 0x34f   : > { %vm5786_vm0 = vmand %vm5750_vm15, %vm5714_vm7  ;;  %v5667_v24 = vsel %vm5666_vm2, 1, %v9384_v31  ;;  %7397 = vst [vmem:[%s8516_s18 + $0x88] sm:$0xff] %v7379_v1   ;;  %vm5670_vm4 = vc.u32 %v5668_v58, %v5664_v17  ;;  %v5665_v8 = vshrl.u32 %v5660_v2, 16  ;;  %v6081_v61 = vmul.f32 %v4454_v30, %v4454_v30 }
 0x350   : > { %v5858_v7 = vsel %vm5786_vm0, %v5822_v33, %v5620_v29  ;;  %v5647_v21 = vshrl.u32 %v5646_v37, 4  ;;  %v5669_v57 = vadd.s32 %v5667_v24, %v5661_v36  ;;  %v5671_v41 = vsel %vm5670_vm4, 1, %v9384_v31 }
 0x351   : > { %vm5894_vm3 = vcmp.lt.s32.totalorder %v5858_v7, 16  ;;  %v6082_v59 = vmul.f32 %v4455_v23, %v4455_v23 }
 0x352   : > { %v7124_v35 = vsel %vm5894_vm3, 1.0, %v9402_v3  ;;  %v5648_v12 = vmul.u32 18, %v5647_v21  ;;  %v5673_v56 = vadd.s32 %v5671_v41, %v5669_v57 }
 0x353   : > { %v6002_v15 = vmul.f32 %v7124_v35, %v9285_v16  ;;  %v6116_v13 = vmul.f32 %v7124_v35, %v6080_v49 }
 0x354   : > { %v5649_v25 = vsub.s32 %v9295_v27, %v5648_v12  ;;  %v5674_v53 = vadd.s32 %v5673_v56, %v5663_v10 }
 0x355   : > { %v6037_v11 = vadd.f32 %v6036_v43, %v6002_v15  ;;  %v6151_v51 = vadd.f32 %v6150_v48, %v6116_v13 }
 0x356   : > { %vm5715_vm8 = vcmp.ne.s32.totalorder %v5649_v25, 0  ;;  %vm5751_vm9 = vcmp.lt.s32.totalorder %v5649_v25, 0  ;;  %v5823_v55 = vadd.s32 18, %v5649_v25  ;;  %v5675_v26 = vadd.s32 %v5674_v53, %v5665_v8 }
 0x357   : > { %vm5787_vm5 = vmand %vm5751_vm9, %vm5715_vm8 }
 0x358   : > { %v5859_v47 = vsel %vm5787_vm5, %v5823_v55, %v5649_v25  ;;  %v5676_v16 = vshrl.u32 %v5675_v26, 4 }
 0x359   : > { %vm5895_vm10 = vcmp.lt.s32.totalorder %v5859_v47, 16 }
 0x35a   : > { %v7125_v14 = vsel %vm5895_vm10, 1.0, %v9402_v3  ;;  %v5677_v44 = vmul.u32 18, %v5676_v16 }
 0x35b   : > { %v6003_v4 = vmul.f32 %v7125_v14, %v4454_v30  ;;  %v6117_v31 = vmul.f32 %v7125_v14, %v6081_v61 }
 0x35c   : > { %v5678_v28 = vsub.s32 %v9312_v6, %v5677_v44 }
 0x35d   : > { %v6038_v38 = vadd.f32 %v6037_v11, %v6003_v4  ;;  %v6152_v9 = vadd.f32 %v6151_v51, %v6117_v31 }
 0x35e   : > { %vm5716_vm11 = vcmp.ne.s32.totalorder %v5678_v28, 0  ;;  %vm5752_vm12 = vcmp.lt.s32.totalorder %v5678_v28, 0  ;;  %v5824_v27 = vadd.s32 18, %v5678_v28 }
 0x35f   : > { %vm5788_vm13 = vmand %vm5752_vm12, %vm5716_vm11 }
 0x360   : > { %v5860_v52 = vsel %vm5788_vm13, %v5824_v27, %v5678_v28 }
 0x361   : > { %vm5896_vm14 = vcmp.lt.s32.totalorder %v5860_v52, 16 }
 0x362   : > { %v7126_v62 = vsel %vm5896_vm14, 1.0, %v9402_v3 }
 0x363   : > { %v6004_v63 = vmul.f32 %v7126_v62, %v4455_v23  ;;  %v6118_v39 = vmul.f32 %v7126_v62, %v6082_v59 }
 0x365   : > { %v6039_v5 = vadd.f32 %v6038_v38, %v6004_v63  ;;  %v6153_v32 = vadd.f32 %v6152_v9, %v6118_v39 }
 0x367   : > { %v6040_v20 = vrot.slane %v6039_v5, 4  ;;  %v6154_v54 = vrot.slane %v6153_v32, 4 }
 0x369   : > { %v6041_v40 = vadd.f32 %v6040_v20, %v6039_v5  ;;  %v6155_v46 = vadd.f32 %v6154_v54, %v6153_v32 }
 0x36b   : > { %v6042_v6 = vrot.slane %v6041_v40, 2  ;;  %v6156_v43 = vrot.slane %v6155_v46, 2 }
 0x36d   : > { %v6043_v48 = vadd.f32 %v6042_v6, %v6041_v40  ;;  %v6157_v50 = vadd.f32 %v6156_v43, %v6155_v46 }
 0x36f   : > { %v6044_v0 = vrot.slane %v6043_v48, 1  ;;  %v6158_v45 = vrot.slane %v6157_v50, 1 }
 0x371   : > { %v6045_v3 = vadd.f32 %v6044_v0, %v6043_v48  ;;  %v6159_v18 = vadd.f32 %v6158_v45, %v6157_v50 }
 0x373   : > { %6046 = vst [vmem:[%s211_s21] sm:$0x1] %v6045_v3 }
 0x374   : > { %6160 = vst [vmem:[%s214_s24] sm:$0x1] %v6159_v18 }
 0x375 PF: > { %s15_s15 = sadd.s32 1, %s7419_s15  }
 0x376   : > { %p12_p4 = scmp.ge.s32.totalorder %s15_s15, 4  }
 0x378   :  { %14 = sbr.rel (!%p12_p4) target bundleno = 1 (0x1), region = 90 }

// kernel: basic_block_forward.9
= control target key start
LH: loop header
LB: loop body
LE: loop exit
PB: predicated region body
PF: predicated region fallthrough
CT: control target
= control target key end

     0   :  { %s7448_s15 = smov 0   ;;  %s9343_s0 = inlined_call_operand.vmem [shape: bf16[2,328,8], index: 0, kind: input, shape index: {}]   ;;  %s9344_s1 = inlined_call_operand.vmem [shape: bf16[9,8,128], index: 1, kind: input, shape index: {}]   ;;  %s9345_s2 = inlined_call_operand.vmem [shape: bf16[2,288,128], index: 2, kind: output, shape index: {0}]   ;;  %s9346_s3 = inlined_call_operand.vmem [shape: f32[2,1,128], index: 3, kind: output, shape index: {1}]   ;;  %s9347_s4 = inlined_call_operand.vmem [shape: f32[2,1,128], index: 4, kind: output, shape index: {2}]  }
   0x1 LB: > { %s6266_s16 = sadd.s32 4294967295, %s7419_s15   ;;  %p6270_p0 = scmp.ge.s32.totalorder %s7419_s15, 1  ;;  %s7419_s15 = sphi %s7448_s15, %s15_s15  }
   0x2   : > { %p167_p1 = scmp.lt.s32.totalorder %s7419_s15, 3 }
   0x4   : > { %p168_p2 = pnand %p6270_p0, %p167_p1 }
   0x6   : > { %171 = sbr.rel (%p168_p2) target bundleno = 885 (0x375), region = 28 }
   0xb   : > { %v324_v0 = vld [vmem:[%s9344_s1] sm:$0xf]  ;;  %vm470_vm0 = vcmask 1043456   ;;  %p199_p3 = scmp.lt.s32.totalorder %s6266_s16, 1  ;;  %v6454_v2 = vld [vmem:[%s9344_s1 + $0x8] sm:$0xf] }
   0xc   : > { %v472_v1 = vsel %vm470_vm0, %v324_v0, 0  ;;  %v6363_v3 = vld [vmem:[%s9344_s1 + $0x4] sm:$0xf]  ;;  %v1451_v4 = vsel %vm470_vm0, %v6454_v2, 0  ;;  %v6636_v6 = vld [vmem:[%s9344_s1 + $0x10] sm:$0xf] }
   0xd   : > { %7398 = vmatpush.bf16.msra.mxu1 %v472_v1  ;;  %7399 = vmatpush.bf16.msra.mxu2 %v472_v1  ;;  %s9439_s16 = smov (!%p199_p3, %s6266_s16), 1  ;;  %v1017_v5 = vsel %vm470_vm0, %v6363_v3, 0  ;;  %v2451_v7 = vsel %vm470_vm0, %v6636_v6, 0  ;;  %vm415_vm1 = vcmask 64512   ;;  %v6545_v12 = vld [vmem:[%s9344_s1 + $0xc] sm:$0xf] }
   0xe   : > { %481 = vmatpush.bf16.msra.mxu0 %v472_v1  ;;  %s7401_s25 = smul.u32 164, %s9439_s16  ;;  %7400 = vmatpush.bf16.msra.mxu3 %v472_v1  ;;  %v1884_v13 = vsel %vm470_vm0, %v6545_v12, 0  ;;  %vm1358_vm2 = vcmask 1046528   ;;  %v6818_v32 = vld [vmem:[%s9344_s1 + $0x18] sm:$0xf]  ;;  %vm2792_vm6 = vcmask 1045504   ;;  %s211_s21 = scalar_lea.vmem %s9346_s3, %s9439_s16 }
   0xf   : > { %v3318_v33 = vsel %vm470_vm0, %v6818_v32, 0  ;;  %v6909_v34 = vld [vmem:[%s9344_s1 + $0x1c] sm:$0xf]  ;;  %v6727_v35 = vld [vmem:[%s9344_s1 + $0x14] sm:$0xf]  ;;  %vm4226_vm7 = vcmask 1044480   ;;  %s214_s24 = scalar_lea.vmem %s9347_s4, %s9439_s16 }
  0x10   : > { %s7478_s28 = scalar_lea.vmem %s9343_s0, %s7401_s25  ;;  %v3885_v36 = vsel %vm470_vm0, %v6909_v34, 0  ;;  %v2885_v37 = vsel %vm470_vm0, %v6727_v35, 0  ;;  %v7000_v38 = vld [vmem:[%s9344_s1 + $0x20] sm:$0xf]  ;;  %vm813_vm3 = vsmask.f32 7424 }
  0x11   : > { %1460 = vmatpush.bf16.msrb.mxu2 %v1451_v4  ;;  %1026 = vmatpush.bf16.msrb.mxu1 %v1017_v5  ;;  %v7134_v8 = vld [vmem:[%s7478_s28 + $0x28] sm:$0xff]  ;;  %v7139_v9 = vld [vmem:[%s7478_s28 + $0x50] sm:$0xff]  ;;  %v7129_v10 = vld [vmem:[%s7478_s28] sm:$0xff]  ;;  %v4319_v39 = vsel %vm470_vm0, %v7000_v38, 0  ;;  %vm2225_vm4 = vsmask.f32 6400 }
  0x12   : > { %2460 = vmatpush.bf16.msrb.mxu0 %v2451_v7  ;;  %6350 = vmatmul.msk.bf16.vlgmr.msra.gmra.mxu1 %vm415_vm1, %v7134_v8  ;;  %v7144_v11 = vld [vmem:[%s7478_s28 + $0x78] sm:$0xff]  ;;  %v7135_v14 = vld [vmem:[%s7478_s28 + $0x30] sm:$0xff]  ;;  %v7130_v16 = vld [vmem:[%s7478_s28 + $0x8] sm:$0xff]  ;;  %vm3659_vm5 = vsmask.f32 5376  ;;  %s7402_s13 = smul.u32 144, %s9439_s16 }
  0x13   : > { %6355 = vmatmul.msk.bf16.vlgmr.msra.gmra.mxu2 %vm415_vm1, %v7139_v9  ;;  %6345 = vmatmul.msk.bf16.vlgmr.msra.gmra.mxu0 %vm415_vm1, %v7129_v10  ;;  %v7140_v15 = vld [vmem:[%s7478_s28 + $0x58] sm:$0xff]  ;;  %v7145_v17 = vld [vmem:[%s7478_s28 + $0x80] sm:$0xff]  ;;  %v7131_v20 = vld [vmem:[%s7478_s28 + $0x10] sm:$0xff] }
  0x14   : > { %6360 = vmatmul.msk.bf16.vlgmr.msra.gmra.mxu3 %vm415_vm1, %v7144_v11  ;;  %v7136_v18 = vld [vmem:[%s7478_s28 + $0x38] sm:$0xff]  ;;  %v7141_v19 = vld [vmem:[%s7478_s28 + $0x60] sm:$0xff]  ;;  %v7146_v21 = vld [vmem:[%s7478_s28 + $0x88] sm:$0xff]  ;;  %s8516_s18 = scalar_lea.vmem %s9345_s2, %s7402_s13 }
  0x15   : > { %1893 = vmatpush.bf16.msrb.mxu3 %v1884_v13  ;;  %v6548_v22 = vld [vmem:[%s7478_s28 + $0x8] sm:$0xe]  ;;  %v7183_v23 = vld [vmem:[%s7478_s28 + $0x8] sm:$0xf0]  ;;  %v7184_v24 = vld [vmem:[%s7478_s28 + $0x10] sm:$0xff]  ;;  %3327 = vmatpush.bf16.msra.mxu2 %v3318_v33 }
  0x16   : > { %v6549_v25 = vor.u32 %v7183_v23, %v6548_v22  ;;  %v1793_v27 = vrot.slane %v7184_v24, 1  ;;  %v7137_v28 = vld [vmem:[%s7478_s28 + $0x40] sm:$0xff]  ;;  %v7142_v29 = vld [vmem:[%s7478_s28 + $0x68] sm:$0xff]  ;;  %v7132_v30 = vld [vmem:[%s7478_s28 + $0x18] sm:$0xff]  ;;  %2894 = vmatpush.bf16.msra.mxu1 %v2885_v37  ;;  %4328 = vmatpush.bf16.msra.mxu0 %v4319_v39 }
  0x17   : > { %v7185_v40 = vld [vmem:[%s7478_s28 + $0x18] sm:$0xff]  ;;  %v6639_v41 = vld [vmem:[%s7478_s28 + $0x8] sm:$0xe]  ;;  %v7201_v42 = vld [vmem:[%s7478_s28 + $0x8] sm:$0xf0] }
  0x18   : > { %v1792_v26 = vrot.slane %v6549_v25, 1  ;;  %v1795_v43 = vrot.slane %v7185_v40, 1  ;;  %v7138_v44 = vld [vmem:[%s7478_s28 + $0x48] sm:$0xff]  ;;  %v7143_v45 = vld [vmem:[%s7478_s28 + $0x70] sm:$0xff]  ;;  %v7133_v46 = vld [vmem:[%s7478_s28 + $0x20] sm:$0xff]  ;;  %v6640_v49 = vor.u32 %v7201_v42, %v6639_v41 }
  0x19   : > { %3894 = vmatpush.bf16.msra.mxu3 %v3885_v36  ;;  %v7147_v47 = vld [vmem:[%s7478_s28] sm:$0xff]  ;;  %v7202_v48 = vld [vmem:[%s7478_s28 + $0x10] sm:$0xff]  ;;  %v7148_v51 = vld [vmem:[%s7478_s28 + $0x8] sm:$0xff] }
  0x1a   : > { %v1794_v31 = vsel %vm1358_vm2, %v1792_v26, %v1793_v27  ;;  %v1796_v50 = vsel %vm1358_vm2, %v1793_v27, %v1795_v43  ;;  %v817_v52 = vshll.u32 %v7147_v47, 16  ;;  %v6457_v53 = vld [vmem:[%s7478_s28] sm:$0xe]  ;;  %v7165_v54 = vld [vmem:[%s7478_s28] sm:$0xf0]  ;;  %v2227_v55 = vshrl.u32 %v6640_v49, 16 }
  0x1b   : > { %v2230_v56 = vshll.u32 %v6640_v49, 16  ;;  %v2235_v57 = vshrl.u32 %v7202_v48, 16  ;;  %v2238_v58 = vshll.u32 %v7202_v48, 16  ;;  %v815_v59 = vshrl.u32 %v7147_v47, 16  ;;  %v7166_v62 = vld [vmem:[%s7478_s28 + $0x8] sm:$0xff]  ;;  %v7186_v4 = vld [vmem:[%s7478_s28 + $0x20] sm:$0xff] }
  0x1c   : > { %v819_v60 = vrot.slane %v817_v52, 1  ;;  %v822_v61 = vshll.u32 %v7148_v51, 16  ;;  %v6458_v63 = vor.u32 %v7165_v54, %v6457_v53  ;;  %v2229_v0 = vrot.slane %v2227_v55, 1  ;;  %v7167_v22 = vld [vmem:[%s7478_s28 + $0x10] sm:$0xff]  ;;  %v7187_v25 = vld [vmem:[%s7478_s28 + $0x28] sm:$0xff]  ;;  %v7204_v34 = vld [vmem:[%s7478_s28 + $0x20] sm:$0xff] }
  0x1d   : > { %v2232_v1 = vrot.slane %v2230_v56, 2  ;;  %v2237_v2 = vrot.slane %v2235_v57, 1  ;;  %v2240_v3 = vrot.slane %v2238_v58, 2  ;;  %v1360_v8 = vrot.slane %v7166_v62, 1  ;;  %v7150_v36 = vld [vmem:[%s7478_s28 + $0x18] sm:$0xff]  ;;  %v7205_v53 = vld [vmem:[%s7478_s28 + $0x28] sm:$0xff] }
  0x1e   : > { %v820_v5 = vor.u32 %v819_v60, %v815_v59  ;;  %v824_v6 = vrot.slane %v822_v61, 1  ;;  %v1359_v7 = vrot.slane %v6458_v63, 1  ;;  %v1797_v11 = vrot.slane %v7186_v4, 1  ;;  %v7168_v41 = vld [vmem:[%s7478_s28 + $0x18] sm:$0xff]  ;;  %v7151_v55 = vld [vmem:[%s7478_s28 + $0x20] sm:$0xff] }
  0x1f   : > { %v2233_v9 = vor.u32 %v2232_v1, %v2229_v0  ;;  %v2241_v10 = vor.u32 %v2240_v3, %v2237_v2  ;;  %v2253_v37 = vshrl.u32 %v7204_v34, 16  ;;  %v2256_v38 = vshll.u32 %v7204_v34, 16  ;;  %v7169_v60 = vld [vmem:[%s7478_s28 + $0x20] sm:$0xff]  ;;  %v7189_v63 = vld [vmem:[%s7478_s28 + $0x38] sm:$0xff] }
  0x20   : > { %v825_v12 = vsel %vm813_vm3, %v820_v5, %v824_v6  ;;  %v1361_v13 = vsel %vm1358_vm2, %v1359_v7, %v1360_v8  ;;  %v838_v40 = vshll.u32 %v7150_v36, 16  ;;  %v1364_v47 = vrot.slane %v7168_v41, 1 }
  0x21   : > { %v2255_v42 = vrot.slane %v2253_v37, 1  ;;  %v2262_v56 = vshrl.u32 %v7205_v53, 16  ;;  %v2265_v57 = vshll.u32 %v7205_v53, 16  ;;  %v842_v58 = vshrl.u32 %v7150_v36, 16  ;;  %v7207_v37 = vld [vmem:[%s7478_s28 + $0x38] sm:$0xff] }
  0x22   : > { %6351 = vmatmul.msk.bf16.gmra.mxu1 %vm415_vm1, %v7135_v14  ;;  %v2242_v14 = vsel %vm2225_vm4, %v2233_v9, %v2241_v10  ;;  %v846_v59 = vshll.u32 %v7151_v55, 16  ;;  %v1366_v2 = vrot.slane %v7169_v60, 1  ;;  %v1803_v4 = vrot.slane %v7189_v63, 1 }
  0x23   : > { %6356 = vmatmul.msk.bf16.gmra.mxu2 %vm415_vm1, %v7140_v15  ;;  %6346 = vmatmul.msk.bf16.gmra.mxu0 %vm415_vm1, %v7130_v16  ;;  %v7203_v15 = vld [vmem:[%s7478_s28 + $0x18] sm:$0xff]  ;;  %v1798_v16 = vsel %vm1358_vm2, %v1795_v43, %v1797_v11  ;;  %v2258_v43 = vrot.slane %v2256_v38, 2  ;;  %v2264_v61 = vrot.slane %v2262_v56, 1  ;;  %v2267_v62 = vrot.slane %v2265_v57, 2 }
  0x24   : > { %6361 = vmatmul.msk.bf16.gmra.mxu3 %vm415_vm1, %v7145_v17  ;;  %v7149_v17 = vld [vmem:[%s7478_s28 + $0x10] sm:$0xff]  ;;  %v848_v1 = vrot.slane %v846_v59, 1  ;;  %v1367_v7 = vsel %vm1358_vm2, %v1364_v47, %v1366_v2  ;;  %v2283_v41 = vshll.u32 %v7207_v37, 16 }
  0x25   : > { %v834_v39 = vshrl.u32 %v7149_v17, 16  ;;  %v2259_v48 = vor.u32 %v2258_v43, %v2255_v42  ;;  %v2268_v3 = vor.u32 %v2267_v62, %v2264_v61 }
  0x27   : > { %v2269_v9 = vsel %vm2225_vm4, %v2259_v48, %v2268_v3 }
  0x32   : > { %6352 = vmatmul.msk.bf16.gmra.mxu1 %vm415_vm1, %v7136_v18  ;;  %v2244_v18 = vshrl.u32 %v7203_v15, 16 }
  0x33   : > { %6357 = vmatmul.msk.bf16.gmra.mxu2 %vm415_vm1, %v7141_v19  ;;  %6347 = vmatmul.msk.bf16.gmra.mxu0 %vm415_vm1, %v7131_v20  ;;  %v2247_v19 = vshll.u32 %v7203_v15, 16  ;;  %v826_v20 = vshrl.u32 %v7148_v51, 16 }
  0x34   : > { %6362 = vmatmul.msk.bf16.gmra.mxu3 %vm415_vm1, %v7146_v21  ;;  %v830_v21 = vshll.u32 %v7149_v17, 16  ;;  %v2246_v23 = vrot.slane %v2244_v18, 1  ;;  %v850_v17 = vshrl.u32 %v7151_v55, 16 }
  0x35   : > { %v2249_v24 = vrot.slane %v2247_v19, 2  ;;  %v828_v26 = vor.u32 %v826_v20, %v824_v6  ;;  %v7170_v19 = vld [vmem:[%s7478_s28 + $0x28] sm:$0xff] }
  0x36   : > { %v832_v27 = vrot.slane %v830_v21, 1 }
  0x42   : > { %6353 = vmatmul.msk.bf16.gmra.mxu1 %vm415_vm1, %v7137_v28  ;;  %v1362_v28 = vrot.slane %v7167_v22, 1 }
  0x43   : > { %6358 = vmatmul.msk.bf16.gmra.mxu2 %vm415_vm1, %v7142_v29  ;;  %6348 = vmatmul.msk.bf16.gmra.mxu0 %vm415_vm1, %v7132_v30  ;;  %v2250_v29 = vor.u32 %v2249_v24, %v2246_v23  ;;  %v1799_v30 = vrot.slane %v7187_v25, 1  ;;  %v7190_v24 = vld [vmem:[%s7478_s28 + $0x40] sm:$0xff]  ;;  %v852_v25 = vor.u32 %v850_v17, %v848_v1 }
  0x44   : > { %6618 = vmatmul.msk.bf16.vlgmr.msrb.gmra.mxu3 %vm415_vm1, %v1794_v31  ;;  %v833_v31 = vsel %vm813_vm3, %v828_v26, %v832_v27  ;;  %v1363_v32 = vsel %vm1358_vm2, %v1360_v8, %v1362_v28  ;;  %v1365_v51 = vsel %vm1358_vm2, %v1362_v28, %v1364_v47 }
  0x45   : > { %v2251_v33 = vsel %vm2225_vm4, %v2241_v10, %v2250_v29  ;;  %v1800_v35 = vsel %vm1358_vm2, %v1797_v11, %v1799_v30  ;;  %v2260_v52 = vsel %vm2225_vm4, %v2250_v29, %v2259_v48  ;;  %v7206_v10 = vld [vmem:[%s7478_s28 + $0x30] sm:$0xff] }
  0x52   : > { %6354 = vmatmul.msk.bf16.gmra.mxu1 %vm415_vm1, %v7138_v44  ;;  %v7188_v44 = vld [vmem:[%s7478_s28 + $0x30] sm:$0xff] }
  0x53   : > { %6359 = vmatmul.msk.bf16.gmra.mxu2 %vm415_vm1, %v7143_v45  ;;  %6349 = vmatmul.msk.bf16.gmra.mxu0 %vm415_vm1, %v7133_v46  ;;  %v836_v45 = vor.u32 %v834_v39, %v832_v27  ;;  %v840_v46 = vrot.slane %v838_v40, 1  ;;  %v1801_v49 = vrot.slane %v7188_v44, 1  ;;  %v1368_v27 = vrot.slane %v7170_v19, 1  ;;  %v7153_v39 = vld [vmem:[%s7478_s28 + $0x30] sm:$0xff] }
  0x54   : > { %6619 = vmatmul.msk.bf16.gmra.mxu3 %vm415_vm1, %v1796_v50  ;;  %v2280_v40 = vshrl.u32 %v7207_v37, 16  ;;  %v7209_v37 = vld [vmem:[%s7478_s28 + $0x48] sm:$0xff] }
  0x55   : > { %v841_v50 = vsel %vm813_vm3, %v836_v45, %v840_v46  ;;  %v1802_v54 = vsel %vm1358_vm2, %v1799_v30, %v1801_v49  ;;  %v844_v0 = vor.u32 %v842_v58, %v840_v46  ;;  %v1804_v11 = vsel %vm1358_vm2, %v1801_v49, %v1803_v4  ;;  %v7171_v46 = vld [vmem:[%s7478_s28 + $0x30] sm:$0xff] }
  0x56   : > { %v1805_v30 = vrot.slane %v7190_v24, 1  ;;  %v862_v45 = vshll.u32 %v7153_v39, 16  ;;  %v2282_v49 = vrot.slane %v2280_v40, 1  ;;  %v2298_v40 = vshrl.u32 %v7209_v37, 16 }
  0x57   : > { %v849_v6 = vsel %vm813_vm3, %v844_v0, %v848_v1  ;;  %v7208_v0 = vld [vmem:[%s7478_s28 + $0x40] sm:$0xff] }
  0x58   : > { %v1806_v38 = vsel %vm1358_vm2, %v1803_v4, %v1805_v30  ;;  %v864_v53 = vrot.slane %v862_v45, 1  ;;  %v2292_v4 = vshll.u32 %v7208_v0, 16 }
  0x5a   : > { %v2294_v17 = vrot.slane %v2292_v4, 2 }
  0x62   : > { %6436 = vmatmul.msk.bf16.vlgmr.msrb.gmra.mxu1 %vm415_vm1, %v825_v12  ;;  %v7152_v12 = vld [vmem:[%s7478_s28 + $0x28] sm:$0xff] }
  0x63   : > { %6527 = vmatmul.msk.bf16.vlgmr.msrb.gmra.mxu2 %vm415_vm1, %v1361_v13  ;;  %6709 = vmatmul.msk.bf16.vlgmr.msrb.gmra.mxu0 %vm415_vm1, %v2242_v14  ;;  %v2271_v13 = vshrl.u32 %v7206_v10, 16  ;;  %v2274_v14 = vshll.u32 %v7206_v10, 16  ;;  %v854_v18 = vshll.u32 %v7152_v12, 16  ;;  %v858_v44 = vshrl.u32 %v7152_v12, 16 }
  0x64   : > { %6620 = vmatmul.msk.bf16.gmra.mxu3 %vm415_vm1, %v1798_v16 }
  0x65   : > { %v2273_v22 = vrot.slane %v2271_v13, 1  ;;  %v2276_v23 = vrot.slane %v2274_v14, 2  ;;  %v856_v26 = vrot.slane %v854_v18, 1  ;;  %v7192_v18 = vld [vmem:[%s7478_s28 + $0x50] sm:$0xff] }
  0x67   : > { %v2277_v28 = vor.u32 %v2276_v23, %v2273_v22 }
  0x69   : > { %v2278_v36 = vsel %vm2225_vm4, %v2268_v3, %v2277_v28  ;;  %v2289_v3 = vshrl.u32 %v7208_v0, 16 }
  0x6b   : > { %v2291_v14 = vrot.slane %v2289_v3, 1 }
  0x6d   : > { %v2295_v24 = vor.u32 %v2294_v17, %v2291_v14  ;;  %v7210_v14 = vld [vmem:[%s7478_s28 + $0x50] sm:$0xff] }
  0x72   : > { %6437 = vmatmul.msk.bf16.gmra.mxu1 %vm415_vm1, %v833_v31 }
  0x73   : > { %6528 = vmatmul.msk.bf16.gmra.mxu2 %vm415_vm1, %v1363_v32  ;;  %6710 = vmatmul.msk.bf16.gmra.mxu0 %vm415_vm1, %v2251_v33  ;;  %v857_v32 = vsel %vm813_vm3, %v852_v25, %v856_v26  ;;  %v1369_v33 = vsel %vm1358_vm2, %v1366_v2, %v1368_v27  ;;  %v7154_v2 = vld [vmem:[%s7478_s28 + $0x38] sm:$0xff] }
  0x74   : > { %6621 = vmatmul.msk.bf16.gmra.mxu3 %vm415_vm1, %v1800_v35  ;;  %v870_v10 = vshll.u32 %v7154_v2, 16 }
  0x76   : > { %v872_v22 = vrot.slane %v870_v10, 1 }
  0x82   : > { %6438 = vmatmul.msk.bf16.gmra.mxu1 %vm415_vm1, %v841_v50  ;;  %v2285_v50 = vrot.slane %v2283_v41, 2  ;;  %v2301_v41 = vshll.u32 %v7209_v37, 16 }
  0x83   : > { %6529 = vmatmul.msk.bf16.gmra.mxu2 %vm415_vm1, %v1365_v51  ;;  %6711 = vmatmul.msk.bf16.gmra.mxu0 %vm415_vm1, %v2260_v52  ;;  %v7191_v51 = vld [vmem:[%s7478_s28 + $0x48] sm:$0xff]  ;;  %v860_v52 = vor.u32 %v858_v44, %v856_v26  ;;  %v1809_v26 = vrot.slane %v7192_v18, 1 }
  0x84   : > { %6622 = vmatmul.msk.bf16.gmra.mxu3 %vm415_vm1, %v1802_v54  ;;  %v1370_v54 = vrot.slane %v7171_v46, 1  ;;  %v2286_v55 = vor.u32 %v2285_v50, %v2282_v49  ;;  %v1807_v57 = vrot.slane %v7191_v51, 1  ;;  %v874_v46 = vshrl.u32 %v7154_v2, 16  ;;  %v7173_v50 = vld [vmem:[%s7478_s28 + $0x40] sm:$0xff]  ;;  %v7156_v18 = vld [vmem:[%s7478_s28 + $0x48] sm:$0xff] }
  0x85   : > { %v865_v59 = vsel %vm813_vm3, %v860_v52, %v864_v53 }
  0x86   : > { %v1371_v60 = vsel %vm1358_vm2, %v1368_v27, %v1370_v54  ;;  %v2287_v63 = vsel %vm2225_vm4, %v2277_v28, %v2286_v55  ;;  %v1808_v1 = vsel %vm1358_vm2, %v1805_v30, %v1807_v57 }
  0x8f   : > { %v7589_v5 = vpop.f32.mrf.mxu1 }
  0x90   : > { %v7593_v8 = vpop.f32.mrf.mxu0 }
  0x92   : > { %6439 = vmatmul.msk.bf16.gmra.mxu1 %vm415_vm1, %v849_v6 }
  0x93   : > { %6530 = vmatmul.msk.bf16.gmra.mxu2 %vm415_vm1, %v1367_v7  ;;  %6712 = vmatmul.msk.bf16.gmra.mxu0 %vm415_vm1, %v2269_v9  ;;  %v866_v9 = vshrl.u32 %v7153_v39, 16  ;;  %v7155_v39 = vld [vmem:[%s7478_s28 + $0x40] sm:$0xff] }
  0x94   : > { %6623 = vmatmul.msk.bf16.gmra.mxu3 %vm415_vm1, %v1804_v11  ;;  %v7172_v11 = vld [vmem:[%s7478_s28 + $0x38] sm:$0xff]  ;;  %v878_v49 = vshll.u32 %v7155_v39, 16 }
  0x95   : > { %v868_v19 = vor.u32 %v866_v9, %v864_v53  ;;  %v1372_v23 = vrot.slane %v7172_v11, 1  ;;  %v2300_v53 = vrot.slane %v2298_v40, 1 }
  0x96   : > { %v7603_v15 = vpop.f32.mrf.mxu2 }
  0x97   : > { %v7605_v16 = vpop.f32.mrf.mxu1  ;;  %v7608_v20 = vpop.f32.mrf.mxu3  ;;  %v873_v28 = vsel %vm813_vm3, %v868_v19, %v872_v22  ;;  %v1373_v30 = vsel %vm1358_vm2, %v1370_v54, %v1372_v23  ;;  %v2303_v54 = vrot.slane %v2301_v41, 2  ;;  %v2307_v19 = vshrl.u32 %v7210_v14, 16  ;;  %v7194_v41 = vld [vmem:[%s7478_s28 + $0x60] sm:$0xff] }
  0x98   : > { %v7610_v21 = vpop.f32.mrf.mxu0 }
  0x9e   : > { %v7613_v29 = vpop.f32.mrf.mxu2 }
  0x9f   : > { %v7615_v31 = vpop.f32.mrf.mxu1  ;;  %v7619_v34 = vpop.f32.mrf.mxu3 }
  0xa0   : > { %v7621_v35 = vpop.f32.mrf.mxu0 }
  0xa2   : > { %6440 = vmatmul.msk.bf16.gmra.mxu1 %vm415_vm1, %v857_v32 }
  0xa3   : > { %6531 = vmatmul.msk.bf16.gmra.mxu2 %vm415_vm1, %v1369_v33  ;;  %6713 = vmatmul.msk.bf16.gmra.mxu0 %vm415_vm1, %v2278_v36  ;;  %v2296_v36 = vsel %vm2225_vm4, %v2286_v55, %v2295_v24  ;;  %v7193_v55 = vld [vmem:[%s7478_s28 + $0x58] sm:$0xff] }
  0xa4   : > { %6624 = vmatmul.msk.bf16.gmra.mxu3 %vm415_vm1, %v1806_v38  ;;  %v1810_v38 = vsel %vm1358_vm2, %v1807_v57, %v1809_v26  ;;  %v876_v57 = vor.u32 %v874_v46, %v872_v22  ;;  %v2310_v22 = vshll.u32 %v7210_v14, 16 }
  0xa6   : > { %v7631_v42 = vpop.f32.mrf.mxu2  ;;  %v2312_v40 = vrot.slane %v2310_v22, 2 }
  0xa7   : > { %v7633_v43 = vpop.f32.mrf.mxu1  ;;  %v7636_v47 = vpop.f32.mrf.mxu3 }
  0xa8   : > { %9361 = vst [vmem:[#allocation3_spill] sm:$0xff] %v7636_v47  ;;  %v7638_v48 = vpop.f32.mrf.mxu0 }
  0xae   : > { %v7641_v56 = vpop.f32.mrf.mxu2 }
  0xaf   : > { %v7643_v58 = vpop.f32.mrf.mxu1  ;;  %v7647_v61 = vpop.f32.mrf.mxu3 }
  0xb0   : > { %9362 = vst [vmem:[#allocation4_spill] sm:$0xff] %v7647_v61  ;;  %v7649_v62 = vpop.f32.mrf.mxu0 }
  0xb2   : > { %6441 = vmatmul.msk.bf16.gmra.mxu1 %vm415_vm1, %v865_v59  ;;  %v880_v59 = vrot.slane %v878_v49, 1 }
  0xb3   : > { %6532 = vmatmul.msk.bf16.gmra.mxu2 %vm415_vm1, %v1371_v60  ;;  %6714 = vmatmul.msk.bf16.gmra.mxu0 %vm415_vm1, %v2287_v63  ;;  %v1374_v60 = vrot.slane %v7173_v50, 1  ;;  %v2304_v63 = vor.u32 %v2303_v54, %v2300_v53 }
  0xb4   : > { %6625 = vmatmul.msk.bf16.gmra.mxu3 %vm415_vm1, %v1808_v1  ;;  %v1811_v1 = vrot.slane %v7193_v55, 1  ;;  %v881_v2 = vsel %vm813_vm3, %v876_v57, %v880_v59  ;;  %v1813_v55 = vrot.slane %v7194_v41, 1 }
  0xb5   : > { %v1375_v4 = vsel %vm1358_vm2, %v1372_v23, %v1374_v60  ;;  %v2305_v11 = vsel %vm2225_vm4, %v2295_v24, %v2304_v63  ;;  %v882_v24 = vshrl.u32 %v7155_v39, 16 }
  0xb6   : > { %v7659_v6 = vpop.f32.mrf.mxu2  ;;  %v1812_v17 = vsel %vm1358_vm2, %v1809_v26, %v1811_v1 }
  0xb7   : > { %v7661_v7 = vpop.f32.mrf.mxu1  ;;  %v7664_v12 = vpop.f32.mrf.mxu3  ;;  %v884_v46 = vor.u32 %v882_v24, %v880_v59  ;;  %v1814_v59 = vsel %vm1358_vm2, %v1811_v1, %v1813_v55  ;;  %v7175_v1 = vld [vmem:[%s7478_s28 + $0x50] sm:$0xff] }
  0xb8   : > { %9363 = vst [vmem:[#allocation5_spill] sm:$0xff] %v7664_v12  ;;  %v7666_v13 = vpop.f32.mrf.mxu0 }
  0xbe   : > { %v7669_v25 = vpop.f32.mrf.mxu2 }
  0xbf   : > { %v7671_v27 = vpop.f32.mrf.mxu1  ;;  %v7675_v32 = vpop.f32.mrf.mxu3 }
  0xc0   : > { %9364 = vst [vmem:[#allocation6_spill] sm:$0xff] %v7675_v32  ;;  %v7677_v33 = vpop.f32.mrf.mxu0  ;;  %v7195_v32 = vld [vmem:[%s7478_s28 + $0x68] sm:$0xff] }
  0xc2   : > { %6442 = vmatmul.msk.bf16.gmra.mxu1 %vm415_vm1, %v873_v28 }
  0xc3   : > { %6533 = vmatmul.msk.bf16.gmra.mxu2 %vm415_vm1, %v1373_v30  ;;  %6715 = vmatmul.msk.bf16.gmra.mxu0 %vm415_vm1, %v2296_v36  ;;  %v886_v30 = vshll.u32 %v7156_v18, 16  ;;  %v7174_v36 = vld [vmem:[%s7478_s28 + $0x48] sm:$0xff] }
  0xc4   : > { %6626 = vmatmul.msk.bf16.gmra.mxu3 %vm415_vm1, %v1810_v38  ;;  %v2309_v38 = vrot.slane %v2307_v19, 1  ;;  %v1376_v50 = vrot.slane %v7174_v36, 1  ;;  %v7157_v19 = vld [vmem:[%s7478_s28 + $0x50] sm:$0xff] }
  0xc5   : > { %v888_v49 = vrot.slane %v886_v30, 1 }
  0xc6   : > { %v7687_v44 = vpop.f32.mrf.mxu2  ;;  %v2313_v53 = vor.u32 %v2312_v40, %v2309_v38  ;;  %v890_v38 = vshrl.u32 %v7156_v18, 16  ;;  %v894_v40 = vshll.u32 %v7157_v19, 16 }
  0xc7   : > { %v7689_v45 = vpop.f32.mrf.mxu1  ;;  %v7692_v51 = vpop.f32.mrf.mxu3  ;;  %v889_v39 = vsel %vm813_vm3, %v884_v46, %v888_v49 }
  0xc8   : > { %v7694_v52 = vpop.f32.mrf.mxu0  ;;  %v2314_v14 = vsel %vm2225_vm4, %v2304_v63, %v2313_v53 }
  0xce   : > { %v7697_v0 = vpop.f32.mrf.mxu2 }
  0xcf   : > { %v7699_v3 = vpop.f32.mrf.mxu1  ;;  %v7703_v9 = vpop.f32.mrf.mxu3 }
  0xd0   : > { %v7705_v10 = vpop.f32.mrf.mxu0 }
  0xd2   : > { %6443 = vmatmul.msk.bf16.gmra.mxu1 %vm415_vm1, %v881_v2  ;;  %v1377_v2 = vsel %vm1358_vm2, %v1374_v60, %v1376_v50 }
  0xd3   : > { %6534 = vmatmul.msk.bf16.gmra.mxu2 %vm415_vm1, %v1375_v4  ;;  %6716 = vmatmul.msk.bf16.gmra.mxu0 %vm415_vm1, %v2305_v11 }
  0xd4   : > { %6627 = vmatmul.msk.bf16.gmra.mxu3 %vm415_vm1, %v1812_v17  ;;  %v7211_v17 = vld [vmem:[%s7478_s28 + $0x58] sm:$0xff] }
  0xd5   : > { %v2316_v60 = vshrl.u32 %v7211_v17, 16  ;;  %v2319_v24 = vshll.u32 %v7211_v17, 16  ;;  %v1378_v17 = vrot.slane %v7175_v1, 1 }
  0xd6   : > { %v7715_v23 = vpop.f32.mrf.mxu2 }
  0xd7   : > { %v7717_v28 = vpop.f32.mrf.mxu1  ;;  %v7720_v26 = vpop.f32.mrf.mxu3 }
  0xd8   : > { %v7722_v37 = vpop.f32.mrf.mxu0 }
  0xde   : > { %v7725_v54 = vpop.f32.mrf.mxu2 }
  0xdf   : > { %v1028_v57 = vpop.f32.mrf.mxu1  ;;  %v7729_v4 = vpop.f32.mrf.mxu3 }
  0xe0   : > { %v2462_v11 = vpop.f32.mrf.mxu0  ;;  %v1118_v22 = vadd.f32 %v1028_v57, %v7593_v8  ;;  %v892_v8 = vor.u32 %v890_v38, %v888_v49  ;;  %v896_v57 = vrot.slane %v894_v40, 1  ;;  %v7212_v38 = vld [vmem:[%s7478_s28 + $0x60] sm:$0xff] }
  0xe2   : > { %6444 = vmatmul.msk.bf16.gmra.mxu1 %vm415_vm1, %v889_v39 }
  0xe3   : > { %6535 = vmatmul.msk.bf16.gmra.mxu2 %vm415_vm1, %v1377_v2  ;;  %6717 = vmatmul.msk.bf16.gmra.mxu0 %vm415_vm1, %v2314_v14  ;;  %v2318_v2 = vrot.slane %v2316_v60, 1  ;;  %v2321_v14 = vrot.slane %v2319_v24, 2  ;;  %v1379_v60 = vsel %vm1358_vm2, %v1376_v50, %v1378_v17  ;;  %v7158_v50 = vld [vmem:[%s7478_s28 + $0x58] sm:$0xff] }
  0xe4   : > { %6628 = vmatmul.msk.bf16.gmra.mxu3 %vm415_vm1, %v1814_v59 }
  0xe6   : > { %v1462_v30 = vpop.f32.mrf.mxu2 }
  0xe7   : > { %v1552_v63 = vadd.f32 %v1462_v30, %v1118_v22  ;;  %v1030_v36 = vpop.f32.mrf.mxu1  ;;  %v7741_v41 = vpop.f32.mrf.mxu3  ;;  %v2322_v22 = vor.u32 %v2321_v14, %v2318_v2  ;;  %v1815_v30 = vrot.slane %v7195_v32, 1  ;;  %v7176_v2 = vld [vmem:[%s7478_s28 + $0x58] sm:$0xff] }
  0xe8   : > { %v2464_v39 = vpop.f32.mrf.mxu0  ;;  %v1119_v59 = vadd.f32 %v1030_v36, %v7610_v21 }
  0xe9   : > { %v1985_v46 = vadd.f32 %v7692_v51, %v1552_v63  ;;  %v897_v51 = vsel %vm813_vm3, %v892_v8, %v896_v57  ;;  %v2323_v49 = vsel %vm2225_vm4, %v2313_v53, %v2322_v22  ;;  %v1816_v21 = vsel %vm1358_vm2, %v1813_v55, %v1815_v30 }
  0xea   : > { %v898_v55 = vshrl.u32 %v7157_v19, 16 }
  0xeb   : > { %v7745_v12 = vadd.f32 %v2462_v11, %v1985_v46  ;;  %v902_v46 = vshll.u32 %v7158_v50, 16 }
  0xee   : > { %v1464_v18 = vpop.f32.mrf.mxu2 }
  0xef   : > { %v1553_v61 = vadd.f32 %v1464_v18, %v1119_v59  ;;  %v1033_v47 = vpop.f32.mrf.mxu1  ;;  %v7750_v24 = vpop.f32.mrf.mxu3 }
  0xf0   : > { %v2467_v63 = vpop.f32.mrf.mxu0  ;;  %v1120_v36 = vadd.f32 %v1033_v47, %v7621_v35  ;;  %v900_v35 = vor.u32 %v898_v55, %v896_v57  ;;  %v904_v47 = vrot.slane %v902_v46, 1  ;;  %v7213_v55 = vld [vmem:[%s7478_s28 + $0x68] sm:$0xff] }
  0xf1   : > { %v1986_v11 = vadd.f32 %v7703_v9, %v1553_v61  ;;  %v2325_v61 = vshrl.u32 %v7212_v38, 16  ;;  %v2328_v9 = vshll.u32 %v7212_v38, 16 }
  0xf2   : > { %6445 = vmatmul.msk.bf16.gmra.mxu1 %vm415_vm1, %v897_v51  ;;  %v7196_v51 = vld [vmem:[%s7478_s28 + $0x70] sm:$0xff] }
  0xf3   : > { %6536 = vmatmul.msk.bf16.gmra.mxu2 %vm415_vm1, %v1379_v60  ;;  %v7758_v32 = vadd.f32 %v2464_v39, %v1986_v11  ;;  %6718 = vmatmul.msk.bf16.gmra.mxu0 %vm415_vm1, %v2323_v49  ;;  %v2327_v59 = vrot.slane %v2325_v61, 1  ;;  %v2330_v18 = vrot.slane %v2328_v9, 2  ;;  %v1380_v11 = vrot.slane %v7176_v2, 1 }
  0xf4   : > { %6629 = vmatmul.msk.bf16.gmra.mxu3 %vm415_vm1, %v1816_v21  ;;  %v1817_v21 = vrot.slane %v7196_v51, 1  ;;  %v2337_v2 = vshll.u32 %v7213_v55, 16  ;;  %v7177_v51 = vld [vmem:[%s7478_s28 + $0x60] sm:$0xff] }
  0xf5   : > { %v2331_v38 = vor.u32 %v2330_v18, %v2327_v59  ;;  %v1381_v61 = vsel %vm1358_vm2, %v1378_v17, %v1380_v11  ;;  %v7159_v17 = vld [vmem:[%s7478_s28 + $0x60] sm:$0xff] }
  0xf6   : > { %v1467_v53 = vpop.f32.mrf.mxu2  ;;  %v910_v18 = vshll.u32 %v7159_v17, 16 }
  0xf7   : > { %v1554_v40 = vadd.f32 %v1467_v53, %v1120_v36  ;;  %v1035_v1 = vpop.f32.mrf.mxu1  ;;  %v7765_v14 = vpop.f32.mrf.mxu3  ;;  %v2332_v57 = vsel %vm2225_vm4, %v2322_v22, %v2331_v38 }
  0xf8   : > { %v2469_v8 = vpop.f32.mrf.mxu0  ;;  %v1121_v49 = vadd.f32 %v1035_v1, %v7638_v48  ;;  %v1818_v48 = vsel %vm1358_vm2, %v1815_v30, %v1817_v21  ;;  %v906_v30 = vshrl.u32 %v7158_v50, 16 }
  0xf9   : > { %v1987_v39 = vadd.f32 %v7720_v26, %v1554_v40  ;;  %v905_v26 = vsel %vm813_vm3, %v900_v35, %v904_v47 }
  0xfb   : > { %v7769_v60 = vadd.f32 %v2467_v63, %v1987_v39 }
  0xfe   : > { %v1469_v19 = vpop.f32.mrf.mxu2 }
  0xff   : > { %v1555_v36 = vadd.f32 %v1469_v19, %v1121_v49  ;;  %v1038_v53 = vpop.f32.mrf.mxu1  ;;  %v7774_v9 = vpop.f32.mrf.mxu3 }
 0x100   : > { %v2472_v40 = vpop.f32.mrf.mxu0  ;;  %v1122_v46 = vadd.f32 %v1038_v53, %v7649_v62  ;;  %v908_v62 = vor.u32 %v906_v30, %v904_v47  ;;  %v912_v53 = vrot.slane %v910_v18, 1  ;;  %v7214_v30 = vld [vmem:[%s7478_s28 + $0x70] sm:$0xff] }
 0x101   : > { %v1988_v63 = vadd.f32 %v7729_v4, %v1555_v36  ;;  %v2334_v4 = vshrl.u32 %v7213_v55, 16  ;;  %v2339_v36 = vrot.slane %v2337_v2, 2 }
 0x102   : > { %6446 = vmatmul.msk.bf16.gmra.mxu1 %vm415_vm1, %v905_v26  ;;  %v7197_v26 = vld [vmem:[%s7478_s28 + $0x78] sm:$0xff] }
 0x103   : > { %6537 = vmatmul.msk.bf16.gmra.mxu2 %vm415_vm1, %v1381_v61  ;;  %v7782_v1 = vadd.f32 %v2469_v8, %v1988_v63  ;;  %6719 = vmatmul.msk.bf16.gmra.mxu0 %vm415_vm1, %v2332_v57  ;;  %v2336_v19 = vrot.slane %v2334_v4, 1  ;;  %v1382_v63 = vrot.slane %v7177_v51, 1  ;;  %v2346_v51 = vshll.u32 %v7214_v30, 16 }
 0x104   : > { %6630 = vmatmul.msk.bf16.gmra.mxu3 %vm415_vm1, %v1818_v48  ;;  %v1819_v48 = vrot.slane %v7197_v26, 1  ;;  %v7178_v26 = vld [vmem:[%s7478_s28 + $0x68] sm:$0xff] }
 0x105   : > { %v2340_v55 = vor.u32 %v2339_v36, %v2336_v19  ;;  %v1383_v4 = vsel %vm1358_vm2, %v1380_v11, %v1382_v63  ;;  %v7160_v11 = vld [vmem:[%s7478_s28 + $0x68] sm:$0xff] }
 0x106   : > { %v1472_v22 = vpop.f32.mrf.mxu2  ;;  %v918_v36 = vshll.u32 %v7160_v11, 16 }
 0x107   : > { %v1556_v39 = vadd.f32 %v1472_v22, %v1122_v46  ;;  %v1040_v59 = vpop.f32.mrf.mxu1  ;;  %v7789_v35 = vpop.f32.mrf.mxu3  ;;  %v2341_v47 = vsel %vm2225_vm4, %v2331_v38, %v2340_v55 }
 0x108   : > { %v2474_v49 = vpop.f32.mrf.mxu0  ;;  %v1123_v57 = vadd.f32 %v1040_v59, %v7666_v13  ;;  %v1820_v13 = vsel %vm1358_vm2, %v1817_v21, %v1819_v48  ;;  %v914_v21 = vshrl.u32 %v7159_v17, 16 }
 0x109   : > { %v1989_v8 = vadd.f32 %v7741_v41, %v1556_v39  ;;  %v913_v41 = vsel %vm813_vm3, %v908_v62, %v912_v53 }
 0x10b   : > { %v7793_v61 = vadd.f32 %v2472_v40, %v1989_v8 }
 0x10e   : > { %v1474_v50 = vpop.f32.mrf.mxu2 }
 0x10f   : > { %v1557_v46 = vadd.f32 %v1474_v50, %v1123_v57  ;;  %v1043_v22 = vpop.f32.mrf.mxu1  ;;  %v7798_v2 = vpop.f32.mrf.mxu3 }
 0x110   : > { %v2477_v39 = vpop.f32.mrf.mxu0  ;;  %v1124_v18 = vadd.f32 %v1043_v22, %v7677_v33  ;;  %v916_v33 = vor.u32 %v914_v21, %v912_v53  ;;  %v920_v22 = vrot.slane %v918_v36, 1  ;;  %v7215_v21 = vld [vmem:[%s7478_s28 + $0x78] sm:$0xff] }
 0x111   : > { %v1990_v40 = vadd.f32 %v7750_v24, %v1557_v46  ;;  %v2343_v24 = vshrl.u32 %v7214_v30, 16  ;;  %v2348_v46 = vrot.slane %v2346_v51, 2 }
 0x112   : > { %6447 = vmatmul.msk.bf16.gmra.mxu1 %vm415_vm1, %v913_v41  ;;  %v7198_v41 = vld [vmem:[%s7478_s28 + $0x80] sm:$0xff] }
 0x113   : > { %6538 = vmatmul.msk.bf16.gmra.mxu2 %vm415_vm1, %v1383_v4  ;;  %v7806_v59 = vadd.f32 %v2474_v49, %v1990_v40  ;;  %6720 = vmatmul.msk.bf16.gmra.mxu0 %vm415_vm1, %v2341_v47  ;;  %v2345_v50 = vrot.slane %v2343_v24, 1  ;;  %v1384_v40 = vrot.slane %v7178_v26, 1  ;;  %v2355_v26 = vshll.u32 %v7215_v21, 16 }
 0x114   : > { %6631 = vmatmul.msk.bf16.gmra.mxu3 %vm415_vm1, %v1820_v13  ;;  %v1821_v13 = vrot.slane %v7198_v41, 1  ;;  %v7179_v41 = vld [vmem:[%s7478_s28 + $0x70] sm:$0xff] }
 0x115   : > { %v2349_v30 = vor.u32 %v2348_v46, %v2345_v50  ;;  %v1385_v24 = vsel %vm1358_vm2, %v1382_v63, %v1384_v40  ;;  %v7161_v63 = vld [vmem:[%s7478_s28 + $0x70] sm:$0xff] }
 0x116   : > { %v1477_v38 = vpop.f32.mrf.mxu2  ;;  %v926_v46 = vshll.u32 %v7161_v63, 16 }
 0x117   : > { %v1558_v8 = vadd.f32 %v1477_v38, %v1124_v18  ;;  %v1045_v19 = vpop.f32.mrf.mxu1  ;;  %v7813_v62 = vpop.f32.mrf.mxu3  ;;  %v2350_v53 = vsel %vm2225_vm4, %v2340_v55, %v2349_v30 }
 0x118   : > { %v2479_v57 = vpop.f32.mrf.mxu0  ;;  %v1125_v47 = vadd.f32 %v1045_v19, %v7694_v52  ;;  %v1822_v52 = vsel %vm1358_vm2, %v1819_v48, %v1821_v13  ;;  %v922_v48 = vshrl.u32 %v7160_v11, 16 }
 0x119   : > { %v1991_v49 = vadd.f32 %v7765_v14, %v1558_v8  ;;  %v921_v14 = vsel %vm813_vm3, %v916_v33, %v920_v22 }
 0x11b   : > { %v7817_v4 = vadd.f32 %v2477_v39, %v1991_v49 }
 0x11e   : > { %v1479_v17 = vpop.f32.mrf.mxu2 }
 0x11f   : > { %v1559_v18 = vadd.f32 %v1479_v17, %v1125_v47  ;;  %v1048_v38 = vpop.f32.mrf.mxu1  ;;  %v7822_v51 = vpop.f32.mrf.mxu3 }
 0x120   : > { %v2482_v8 = vpop.f32.mrf.mxu0  ;;  %v1126_v36 = vadd.f32 %v1048_v38, %v7705_v10  ;;  %v924_v10 = vor.u32 %v922_v48, %v920_v22  ;;  %v928_v38 = vrot.slane %v926_v46, 1  ;;  %v7216_v48 = vld [vmem:[%s7478_s28 + $0x80] sm:$0xff] }
 0x121   : > { %v1992_v39 = vadd.f32 %v7774_v9, %v1559_v18  ;;  %v2352_v9 = vshrl.u32 %v7215_v21, 16  ;;  %v2357_v18 = vrot.slane %v2355_v26, 2 }
 0x122   : > { %6448 = vmatmul.msk.bf16.gmra.mxu1 %vm415_vm1, %v921_v14  ;;  %v7199_v14 = vld [vmem:[%s7478_s28 + $0x88] sm:$0xff] }
 0x123   : > { %6539 = vmatmul.msk.bf16.gmra.mxu2 %vm415_vm1, %v1385_v24  ;;  %v7830_v19 = vadd.f32 %v2479_v57, %v1992_v39  ;;  %6721 = vmatmul.msk.bf16.gmra.mxu0 %vm415_vm1, %v2350_v53  ;;  %v2354_v17 = vrot.slane %v2352_v9, 1  ;;  %v1386_v39 = vrot.slane %v7179_v41, 1  ;;  %v2364_v41 = vshll.u32 %v7216_v48, 16 }
 0x124   : > { %6632 = vmatmul.msk.bf16.gmra.mxu3 %vm415_vm1, %v1822_v52  ;;  %v1823_v52 = vrot.slane %v7199_v14, 1  ;;  %v7180_v14 = vld [vmem:[%s7478_s28 + $0x78] sm:$0xff] }
 0x125   : > { %v2358_v21 = vor.u32 %v2357_v18, %v2354_v17  ;;  %v1387_v9 = vsel %vm1358_vm2, %v1384_v40, %v1386_v39  ;;  %v7162_v40 = vld [vmem:[%s7478_s28 + $0x78] sm:$0xff] }
 0x126   : > { %v1482_v55 = vpop.f32.mrf.mxu2  ;;  %v934_v18 = vshll.u32 %v7162_v40, 16 }
 0x127   : > { %v1560_v49 = vadd.f32 %v1482_v55, %v1126_v36  ;;  %v1050_v50 = vpop.f32.mrf.mxu1  ;;  %v7837_v33 = vpop.f32.mrf.mxu3  ;;  %v2359_v22 = vsel %vm2225_vm4, %v2349_v30, %v2358_v21 }
 0x128   : > { %v2484_v47 = vpop.f32.mrf.mxu0  ;;  %v1127_v53 = vadd.f32 %v1050_v50, %v7722_v37  ;;  %v1824_v37 = vsel %vm1358_vm2, %v1821_v13, %v1823_v52  ;;  %v930_v13 = vshrl.u32 %v7161_v63, 16 }
 0x129   : > { %v1993_v57 = vadd.f32 %v7789_v35, %v1560_v49  ;;  %v929_v35 = vsel %vm813_vm3, %v924_v10, %v928_v38 }
 0x12b   : > { %v7841_v24 = vadd.f32 %v2482_v8, %v1993_v57 }
 0x12e   : > { %v1484_v11 = vpop.f32.mrf.mxu2 }
 0x12f   : > { %v1561_v36 = vadd.f32 %v1484_v11, %v1127_v53  ;;  %v1053_v55 = vpop.f32.mrf.mxu1  ;;  %v7846_v26 = vpop.f32.mrf.mxu3 }
 0x130   : > { %v2487_v49 = vpop.f32.mrf.mxu0  ;;  %v1128_v46 = vadd.f32 %v1053_v55, %v7589_v5  ;;  %v932_v5 = vor.u32 %v930_v13, %v928_v38  ;;  %v936_v55 = vrot.slane %v934_v18, 1  ;;  %v7217_v13 = vld [vmem:[%s7478_s28 + $0x88] sm:$0xff] }
 0x131   : > { %v1994_v8 = vadd.f32 %v7798_v2, %v1561_v36  ;;  %v2361_v2 = vshrl.u32 %v7216_v48, 16  ;;  %v2366_v36 = vrot.slane %v2364_v41, 2 }
 0x132   : > { %6449 = vmatmul.msk.bf16.gmra.mxu1 %vm415_vm1, %v929_v35  ;;  %v7200_v35 = vld [vmem:[%s7478_s28 + $0x90] sm:$0xff] }
 0x133   : > { %6540 = vmatmul.msk.bf16.gmra.mxu2 %vm415_vm1, %v1387_v9  ;;  %v7854_v50 = vadd.f32 %v2484_v47, %v1994_v8  ;;  %6722 = vmatmul.msk.bf16.gmra.mxu0 %vm415_vm1, %v2359_v22  ;;  %v2363_v11 = vrot.slane %v2361_v2, 1  ;;  %v1388_v8 = vrot.slane %v7180_v14, 1  ;;  %v2373_v14 = vshll.u32 %v7217_v13, 16 }
 0x134   : > { %6633 = vmatmul.msk.bf16.gmra.mxu3 %vm415_vm1, %v1824_v37  ;;  %v1825_v37 = vrot.slane %v7200_v35, 1  ;;  %v938_v35 = vshrl.u32 %v7162_v40, 16 }
 0x135   : > { %9365 = vst [vmem:[#allocation7_spill] sm:$0xff] %v7854_v50  ;;  %v2367_v48 = vor.u32 %v2366_v36, %v2363_v11  ;;  %v1389_v2 = vsel %vm1358_vm2, %v1386_v39, %v1388_v8  ;;  %v7882_v39 = vld [vmem:[%s7478_s28 + $0x80] sm:$0xff] }
 0x136   : > { %v1487_v30 = vpop.f32.mrf.mxu2 }
 0x137   : > { %v1562_v57 = vadd.f32 %v1487_v30, %v1128_v46  ;;  %v1055_v17 = vpop.f32.mrf.mxu1  ;;  %v7861_v10 = vpop.f32.mrf.mxu3 }
 0x138   : > { %v2489_v53 = vpop.f32.mrf.mxu0  ;;  %v1129_v22 = vadd.f32 %v1055_v17, %v7605_v16  ;;  %v1826_v16 = vsel %vm1358_vm2, %v1823_v52, %v1825_v37 }
 0x139   : > { %v1995_v47 = vadd.f32 %v7813_v62, %v1562_v57  ;;  %v937_v62 = vsel %vm813_vm3, %v932_v5, %v936_v55  ;;  %v2368_v57 = vsel %vm2225_vm4, %v2358_v21, %v2367_v48  ;;  %v1696_v21 = vld [vmem:[%s7478_s28 + $0x98] sm:$0x1]  ;;  %v942_v5 = vshll.u32 %v7882_v39, 16 }
 0x13a   : > { %v1772_v52 = vunpack.c.l.b16 %v1696_v21 }
 0x13b   : > { %v7865_v9 = vadd.f32 %v2487_v49, %v1995_v47 }
 0x13d   : > { %9366 = vst [vmem:[#allocation8_spill] sm:$0xff] %v7865_v9  ;;  %v717_v9 = vld [vmem:[%s7478_s28 + $0x90] sm:$0x1] }
 0x13e   : > { %v1489_v63 = vpop.f32.mrf.mxu2 }
 0x13f   : > { %v1563_v46 = vadd.f32 %v1489_v63, %v1129_v22  ;;  %v1058_v30 = vpop.f32.mrf.mxu1  ;;  %v7870_v41 = vpop.f32.mrf.mxu3 }
 0x140   : > { %v2492_v38 = vpop.f32.mrf.mxu0  ;;  %v1130_v18 = vadd.f32 %v1058_v30, %v7615_v31  ;;  %v2375_v30 = vrot.slane %v2373_v14, 2 }
 0x141   : > { %v1996_v49 = vadd.f32 %v7822_v51, %v1563_v46  ;;  %v2370_v51 = vshrl.u32 %v7217_v13, 16 }
 0x142   : > { %6450 = vmatmul.msk.bf16.gmra.mxu1 %vm415_vm1, %v937_v62  ;;  %v1791_v62 = vpack.c.b16 %v1772_v52, %v1772_v52 }
 0x143   : > { %6541 = vmatmul.msk.bf16.gmra.mxu2 %vm415_vm1, %v1389_v2  ;;  %v7878_v17 = vadd.f32 %v2489_v53, %v1996_v49  ;;  %6723 = vmatmul.msk.bf16.gmra.mxu0 %vm415_vm1, %v2368_v57  ;;  %v7889_v53 = vld [vmem:[%s7478_s28 + $0x80] sm:$0xff]  ;;  %v2372_v31 = vrot.slane %v2370_v51, 1  ;;  %v940_v49 = vor.u32 %v938_v35, %v936_v55  ;;  %v944_v57 = vrot.slane %v942_v5, 1  ;;  %v6912_v35 = vld [vmem:[%s7478_s28 + $0x10] sm:$0xc] }
 0x144   : > { %6634 = vmatmul.msk.bf16.gmra.mxu3 %vm415_vm1, %v1826_v16  ;;  %v9348_v13 = vrot.slane %v7889_v53, 1  ;;  %v1827_v21 = vrot.slane %v1791_v62, 1  ;;  %v7255_v5 = vld [vmem:[%s7478_s28 + $0x10] sm:$0xf0] }
 0x145   : > { %9367 = vst [vmem:[#allocation9_spill] sm:$0xff] %v7878_v17  ;;  %v7898_v16 = vor.u32 %v2375_v30, %v2372_v31  ;;  %v6913_v31 = vor.u32 %v7255_v5, %v6912_v35  ;;  %v2129_v35 = vld [vmem:[%s7478_s28 + $0x98] sm:$0x3] }
 0x146   : > { %v1492_v47 = vpop.f32.mrf.mxu2  ;;  %v1391_v55 = vsel %vm1358_vm2, %v1388_v8, %v9348_v13  ;;  %v7919_v8 = vld [vmem:[%s7478_s28 + $0x88] sm:$0xff] }
 0x147   : > { %v1564_v11 = vadd.f32 %v1492_v47, %v1130_v18  ;;  %v1060_v36 = vpop.f32.mrf.mxu1  ;;  %v7891_v22 = vpop.f32.mrf.mxu3  ;;  %v2377_v52 = vsel %vm2225_vm4, %v2367_v48, %v7898_v16 }
 0x148   : > { %v2494_v46 = vpop.f32.mrf.mxu0  ;;  %v1131_v40 = vadd.f32 %v1060_v36, %v7633_v43  ;;  %v1828_v36 = vsel %vm1358_vm2, %v1825_v37, %v1827_v21 }
 0x149   : > { %v1997_v63 = vadd.f32 %v7837_v33, %v1564_v11  ;;  %v7218_v11 = vld [vmem:[%s7478_s28 + $0x90] sm:$0xff] }
 0x14a   : > { %v2379_v30 = vshrl.u32 %v7218_v11, 16  ;;  %v2382_v62 = vshll.u32 %v7218_v11, 16 }
 0x14b   : > { %v7894_v2 = vadd.f32 %v2492_v38, %v1997_v63  ;;  %v945_v38 = vsel %vm813_vm3, %v940_v49, %v944_v57  ;;  %v3661_v49 = vshrl.u32 %v6913_v31, 16 }
 0x14c   : > { %v2381_v11 = vrot.slane %v2379_v30, 1 }
 0x14d   : > { %9368 = vst [vmem:[#allocation10_spill] sm:$0xff] %v7894_v2  ;;  %v3663_v5 = vrot.slane %v3661_v49, 2 }
 0x14e   : > { %v1494_v18 = vpop.f32.mrf.mxu2 }
 0x14f   : > { %v1565_v33 = vadd.f32 %v1494_v18, %v1131_v40  ;;  %v1063_v51 = vpop.f32.mrf.mxu1  ;;  %v7904_v14 = vpop.f32.mrf.mxu3  ;;  %v3664_v40 = vshll.u32 %v6913_v31, 16 }
 0x150   : > { %v2497_v47 = vpop.f32.mrf.mxu0  ;;  %v1132_v48 = vadd.f32 %v1063_v51, %v7643_v58 }
 0x151   : > { %v1998_v43 = vadd.f32 %v7846_v26, %v1565_v33  ;;  %v7256_v26 = vld [vmem:[%s7478_s28 + $0x18] sm:$0xff]  ;;  %v3666_v31 = vrot.slane %v3664_v40, 3 }
 0x152   : > { %6451 = vmatmul.msk.bf16.gmra.mxu1 %vm415_vm1, %v945_v38  ;;  %v3669_v18 = vshrl.u32 %v7256_v26, 16  ;;  %v946_v38 = vshrl.u32 %v7882_v39, 16 }
 0x153   : > { %6542 = vmatmul.msk.bf16.gmra.mxu2 %vm415_vm1, %v1391_v55  ;;  %v7915_v63 = vadd.f32 %v2494_v46, %v1998_v43  ;;  %6724 = vmatmul.msk.bf16.gmra.mxu0 %vm415_vm1, %v2377_v52  ;;  %v3672_v46 = vshll.u32 %v7256_v26, 16  ;;  %v950_v55 = vshll.u32 %v7919_v8, 16  ;;  %v7927_v43 = vld [vmem:[%s7478_s28 + $0x88] sm:$0xff]  ;;  %v3667_v30 = vor.u32 %v3666_v31, %v3663_v5 }
 0x154   : > { %6635 = vmatmul.msk.bf16.gmra.mxu3 %vm415_vm1, %v1828_v36  ;;  %v2384_v36 = vrot.slane %v2382_v62, 2  ;;  %v3671_v26 = vrot.slane %v3669_v18, 2  ;;  %v948_v39 = vor.u32 %v946_v38, %v944_v57  ;;  %v793_v18 = vunpack.c.l.b16 %v717_v9 }
 0x155   : > { %9369 = vst [vmem:[#allocation11_spill] sm:$0xff] %v7915_v63  ;;  %v952_v13 = vrot.slane %v950_v55, 1  ;;  %v1392_v63 = vrot.slane %v7927_v43, 1  ;;  %v1262_v55 = vld [vmem:[%s7478_s28 + $0x90] sm:$0x1] }
 0x156   : > { %v1497_v37 = vpop.f32.mrf.mxu2  ;;  %v2385_v17 = vor.u32 %v2384_v36, %v2381_v11  ;;  %v812_v9 = vpack.c.b16 %v793_v18, %v793_v18  ;;  %v7257_v11 = vld [vmem:[%s7478_s28 + $0x20] sm:$0xff] }
 0x157   : > { %v1566_v21 = vadd.f32 %v1497_v37, %v1132_v48  ;;  %v1065_v33 = vpop.f32.mrf.mxu1  ;;  %v7929_v52 = vpop.f32.mrf.mxu3  ;;  %v3674_v48 = vrot.slane %v3672_v46, 3  ;;  %v953_v40 = vsel %vm813_vm3, %v948_v39, %v952_v13  ;;  %v3681_v5 = vshll.u32 %v7257_v11, 16 }
 0x158   : > { %v2499_v51 = vpop.f32.mrf.mxu0  ;;  %v1133_v2 = vadd.f32 %v1065_v33, %v7661_v7  ;;  %v2386_v38 = vsel %vm2225_vm4, %v7898_v16, %v2385_v17 }
 0x159   : > { %v1999_v58 = vadd.f32 %v7861_v10, %v1566_v21  ;;  %v2205_v10 = vunpack.c.l.b16 %v2129_v35  ;;  %v3675_v62 = vor.u32 %v3674_v48, %v3671_v26  ;;  %v3678_v35 = vshrl.u32 %v7257_v11, 16 }
 0x15a   : > { %v954_v48 = vshrl.u32 %v7919_v8, 16 }
 0x15b   : > { %v7933_v37 = vadd.f32 %v2497_v47, %v1999_v58  ;;  %v9370_v47 = vrot.slane %v7889_v53, 1  ;;  %v3676_v43 = vsel %vm3659_vm5, %v3667_v30, %v3675_v62  ;;  %v1338_v58 = vunpack.c.l.b16 %v1262_v55 }
 0x15c   : > { %v956_v18 = vor.u32 %v954_v48, %v952_v13 }
 0x15d   : > { %v1393_v57 = vsel %vm1358_vm2, %v9370_v47, %v1392_v63  ;;  %v1357_v39 = vpack.c.b16 %v1338_v58, %v1338_v58  ;;  %v3683_v47 = vrot.slane %v3681_v5, 3  ;;  %v6821_v5 = vld [vmem:[%s7478_s28 + $0x10] sm:$0xc] }
 0x15e   : > { %v1499_v21 = vpop.f32.mrf.mxu2 }
 0x15f   : > { %v1567_v50 = vadd.f32 %v1499_v21, %v1133_v2  ;;  %v1068_v49 = vpop.f32.mrf.mxu1  ;;  %v7942_v46 = vpop.f32.mrf.mxu3  ;;  %v2224_v2 = vpack.c.b16 %v2205_v10, %v2205_v10 }
 0x160   : > { %v2502_v33 = vpop.f32.mrf.mxu0 }
 0x161   : > { %v2000_v7 = vadd.f32 %v7870_v41, %v1567_v50  ;;  %v1134_v50 = vadd.f32 %v1068_v49, %v7671_v27  ;;  %v2388_v41 = vshrl.u32 %v2224_v2, 16  ;;  %v2391_v36 = vshll.u32 %v2224_v2, 16 }
 0x162   : > { %6452 = vmatmul.msk.bf16.gmra.mxu1 %vm415_vm1, %v953_v40  ;;  %v3680_v49 = vrot.slane %v3678_v35, 2  ;;  %v7219_v35 = vld [vmem:[%s7478_s28 + $0x8] sm:$0xf0] }
 0x163   : > { %6543 = vmatmul.msk.bf16.gmra.mxu2 %vm415_vm1, %v1393_v57  ;;  %v7951_v53 = vadd.f32 %v2499_v51, %v2000_v7  ;;  %6725 = vmatmul.msk.bf16.gmra.mxu0 %vm415_vm1, %v2386_v38  ;;  %v958_v51 = vshll.u32 %v812_v9, 16  ;;  %v2390_v40 = vrot.slane %v2388_v41, 1  ;;  %v2393_v27 = vrot.slane %v2391_v36, 2 }
 0x164   : > { %6982 = vmatmul.msk.bf16.vlgmr.msra.gmra.mxu3 %vm415_vm1, %v3676_v43  ;;  %v1394_v38 = vrot.slane %v1357_v39, 1  ;;  %v3684_v43 = vor.u32 %v3683_v47, %v3680_v49 }
 0x165   : > { %v960_v7 = vrot.slane %v958_v51, 1  ;;  %v2394_v2 = vor.u32 %v2393_v27, %v2390_v40  ;;  %v7238_v27 = vld [vmem:[%s7478_s28 + $0x18] sm:$0xff] }
 0x166   : > { %v1502_v16 = vpop.f32.mrf.mxu2  ;;  %v3685_v41 = vsel %vm3659_vm5, %v3675_v62, %v3684_v43  ;;  %v7003_v62 = vld [vmem:[%s7478_s28 + $0x10] sm:$0x8] }
 0x167   : > { %v1568_v31 = vadd.f32 %v1502_v16, %v1134_v50  ;;  %v1070_v26 = vpop.f32.mrf.mxu1  ;;  %v7958_v10 = vpop.f32.mrf.mxu3  ;;  %v961_v58 = vsel %vm813_vm3, %v956_v18, %v960_v7  ;;  %v2395_v50 = vsel %vm2225_vm4, %v2385_v17, %v2394_v2  ;;  %v7258_v16 = vld [vmem:[%s7478_s28 + $0x28] sm:$0xff]  ;;  %v7274_v7 = vld [vmem:[%s7478_s28 + $0x18] sm:$0xff] }
 0x168   : > { %v2504_v30 = vpop.f32.mrf.mxu0  ;;  %v1135_v55 = vadd.f32 %v1070_v26, %v7689_v45  ;;  %v7273_v26 = vld [vmem:[%s7478_s28 + $0x10] sm:$0xf0]  ;;  %v3687_v48 = vshrl.u32 %v7258_v16, 16  ;;  %v3690_v51 = vshll.u32 %v7258_v16, 16 }
 0x169   : > { %v2001_v21 = vadd.f32 %v7891_v22, %v1568_v31  ;;  %v7237_v31 = vld [vmem:[%s7478_s28 + $0x10] sm:$0xf0] }
 0x16a   : > { %v6822_v49 = vor.u32 %v7237_v31, %v6821_v5  ;;  %v3692_v2 = vrot.slane %v3690_v51, 3 }
 0x16b   : > { %v7961_v57 = vadd.f32 %v2502_v33, %v2001_v21  ;;  %v1395_v33 = vsel %vm1358_vm2, %v1392_v63, %v1394_v38  ;;  %v6730_v63 = vld [vmem:[%s7478_s28 + $0x8] sm:$0xc]  ;;  %v7004_v38 = vor.u32 %v7273_v26, %v7003_v62  ;;  %v7259_v26 = vld [vmem:[%s7478_s28 + $0x30] sm:$0xff] }
 0x16c   : > { %v6731_v40 = vor.u32 %v7219_v35, %v6730_v63  ;;  %v3696_v51 = vshrl.u32 %v7259_v26, 16 }
 0x16e   : > { %v1504_v8 = vpop.f32.mrf.mxu2 }
 0x16f   : > { %v1569_v9 = vadd.f32 %v1504_v8, %v1135_v55  ;;  %v1073_v22 = vpop.f32.mrf.mxu1  ;;  %v7966_v11 = vpop.f32.mrf.mxu3  ;;  %v3689_v55 = vrot.slane %v3687_v48, 2 }
 0x170   : > { %v2507_v45 = vpop.f32.mrf.mxu0 }
 0x171   : > { %v2002_v13 = vadd.f32 %v7904_v14, %v1569_v9  ;;  %v1136_v14 = vadd.f32 %v1073_v22, %v7699_v3  ;;  %v2793_v9 = vrot.slane %v6731_v40, 2 }
 0x172   : > { %6453 = vmatmul.msk.bf16.gmra.mxu1 %vm415_vm1, %v961_v58  ;;  %v3226_v58 = vrot.slane %v6822_v49, 2 }
 0x173   : > { %6544 = vmatmul.msk.bf16.gmra.mxu2 %vm415_vm1, %v1395_v33  ;;  %v7973_v36 = vadd.f32 %v2504_v30, %v2002_v13  ;;  %6726 = vmatmul.msk.bf16.gmra.mxu0 %vm415_vm1, %v2395_v50  ;;  %v7986_v30 = vld [vmem:[%s7478_s28 + $0x10] sm:$0xff]  ;;  %v3227_v33 = vrot.slane %v7238_v27, 2  ;;  %v4227_v50 = vrot.slane %v7004_v38, 3  ;;  %v7239_v27 = vld [vmem:[%s7478_s28 + $0x20] sm:$0xff] }
 0x174   : > { %6983 = vmatmul.msk.bf16.gmra.mxu3 %vm415_vm1, %v3685_v41  ;;  %v2794_v22 = vrot.slane %v7986_v30, 2  ;;  %v4228_v41 = vrot.slane %v7274_v7, 3  ;;  %v7275_v38 = vld [vmem:[%s7478_s28 + $0x20] sm:$0xff] }
 0x176   : > { %v1507_v17 = vpop.f32.mrf.mxu2  ;;  %v2795_v35 = vsel %vm2792_vm6, %v2793_v9, %v2794_v22  ;;  %v3229_v9 = vrot.slane %v7239_v27, 2 }
 0x177   : > { %v1570_v39 = vadd.f32 %v1507_v17, %v1136_v14  ;;  %v1075_v21 = vpop.f32.mrf.mxu1  ;;  %v7989_v47 = vpop.f32.mrf.mxu3 }
 0x178   : > { %v2509_v18 = vpop.f32.mrf.mxu0  ;;  %v1137_v13 = vadd.f32 %v1075_v21, %v7717_v28  ;;  %v4229_v28 = vsel %vm4226_vm7, %v4227_v50, %v4228_v41 }
 0x179   : > { %v2003_v3 = vadd.f32 %v7929_v52, %v1570_v39  ;;  %v3693_v52 = vor.u32 %v3692_v2, %v3689_v55  ;;  %v3699_v39 = vshll.u32 %v7259_v26, 16  ;;  %v3698_v55 = vrot.slane %v3696_v51, 2  ;;  %v7240_v51 = vld [vmem:[%s7478_s28 + $0x28] sm:$0xff] }
 0x17b   : > { %v7993_v8 = vadd.f32 %v2507_v45, %v2003_v3  ;;  %v3228_v45 = vsel %vm2792_vm6, %v3226_v58, %v3227_v33  ;;  %v3694_v62 = vsel %vm3659_vm5, %v3684_v43, %v3693_v52  ;;  %v7221_v43 = vld [vmem:[%s7478_s28 + $0x18] sm:$0xff]  ;;  %v3701_v2 = vrot.slane %v3699_v39, 3 }
 0x17d   : > { %v3702_v50 = vor.u32 %v3701_v2, %v3698_v55 }
 0x17e   : > { %v1509_v63 = vpop.f32.mrf.mxu2 }
 0x17f   : > { %v1571_v16 = vadd.f32 %v1509_v63, %v1137_v13  ;;  %v1078_v14 = vpop.f32.mrf.mxu1  ;;  %v7999_v5 = vpop.f32.mrf.mxu3  ;;  %v4230_v13 = vrot.slane %v7275_v38, 3  ;;  %v3231_v38 = vrot.slane %v7240_v51, 2 }
 0x180   : > { %v2512_v17 = vpop.f32.mrf.mxu0  ;;  %v1138_v48 = vadd.f32 %v1078_v14, %v7603_v15  ;;  %v2796_v15 = vrot.slane %v7221_v43, 2  ;;  %v7276_v43 = vld [vmem:[%s7478_s28 + $0x28] sm:$0xff] }
 0x181   : > { %v2004_v31 = vadd.f32 %v7942_v46, %v1571_v16  ;;  %v4232_v2 = vrot.slane %v7276_v43, 3 }
 0x182   : > { %6800 = vmatmul.msk.bf16.vlgmr.msra.gmra.mxu1 %vm415_vm1, %v2795_v35  ;;  %v2797_v35 = vsel %vm2792_vm6, %v2794_v22, %v2796_v15  ;;  %v7260_v22 = vld [vmem:[%s7478_s28 + $0x38] sm:$0xff] }
 0x183   : > { %6891 = vmatmul.msk.bf16.vlgmr.msra.gmra.mxu2 %vm415_vm1, %v3228_v45  ;;  %7073 = vmatmul.msk.bf16.vlgmr.msra.gmra.mxu0 %vm415_vm1, %v4229_v28  ;;  %v8010_v21 = vadd.f32 %v2509_v18, %v2004_v31  ;;  %v3708_v26 = vshll.u32 %v7260_v22, 16 }
 0x184   : > { %6984 = vmatmul.msk.bf16.gmra.mxu3 %vm415_vm1, %v3694_v62  ;;  %v3703_v62 = vsel %vm3659_vm5, %v3693_v52, %v3702_v50  ;;  %v7222_v52 = vld [vmem:[%s7478_s28 + $0x20] sm:$0xff] }
 0x185   : > { %9371 = vst [vmem:[#allocation12_spill] sm:$0xff] %v8010_v21 }
 0x186   : > { %v1512_v46 = vpop.f32.mrf.mxu2 }
 0x187   : > { %v1572_v30 = vadd.f32 %v1512_v46, %v1138_v48  ;;  %v1080_v40 = vpop.f32.mrf.mxu1  ;;  %v8014_v49 = vpop.f32.mrf.mxu3 }
 0x188   : > { %v2514_v7 = vpop.f32.mrf.mxu0  ;;  %v1139_v58 = vadd.f32 %v1080_v40, %v7613_v29  ;;  %v4231_v29 = vsel %vm4226_vm7, %v4228_v41, %v4230_v13 }
 0x189   : > { %v2005_v3 = vadd.f32 %v7958_v10, %v1572_v30  ;;  %v3230_v10 = vsel %vm2792_vm6, %v3227_v33, %v3229_v9 }
 0x18b   : > { %v8019_v16 = vadd.f32 %v2512_v17, %v2005_v3  ;;  %v3705_v17 = vshrl.u32 %v7260_v22, 16  ;;  %v3710_v3 = vrot.slane %v3708_v26, 3 }
 0x18d   : > { %9372 = vst [vmem:[#allocation13_spill] sm:$0xff] %v8019_v16  ;;  %v3707_v27 = vrot.slane %v3705_v17, 2  ;;  %v7241_v17 = vld [vmem:[%s7478_s28 + $0x30] sm:$0xff] }
 0x18e   : > { %v1514_v18 = vpop.f32.mrf.mxu2  ;;  %v3233_v43 = vrot.slane %v7241_v17, 2 }
 0x18f   : > { %v1573_v63 = vadd.f32 %v1514_v18, %v1139_v58  ;;  %v1083_v14 = vpop.f32.mrf.mxu1  ;;  %v8023_v45 = vpop.f32.mrf.mxu3 }
 0x190   : > { %v2517_v28 = vpop.f32.mrf.mxu0  ;;  %v1140_v33 = vadd.f32 %v1083_v14, %v7631_v42  ;;  %v2798_v42 = vrot.slane %v7222_v52, 2 }
 0x191   : > { %v2006_v31 = vadd.f32 %v7966_v11, %v1573_v63 }
 0x192   : > { %6801 = vmatmul.msk.bf16.gmra.mxu1 %vm415_vm1, %v2797_v35  ;;  %v2799_v14 = vsel %vm2792_vm6, %v2796_v15, %v2798_v42  ;;  %v3232_v35 = vsel %vm2792_vm6, %v3229_v9, %v3231_v38  ;;  %v7261_v15 = vld [vmem:[%s7478_s28 + $0x40] sm:$0xff] }
 0x193   : > { %6892 = vmatmul.msk.bf16.gmra.mxu2 %vm415_vm1, %v3230_v10  ;;  %7074 = vmatmul.msk.bf16.gmra.mxu0 %vm415_vm1, %v4231_v29  ;;  %v8034_v46 = vadd.f32 %v2514_v7, %v2006_v31  ;;  %v3711_v7 = vor.u32 %v3710_v3, %v3707_v27  ;;  %v3717_v22 = vshll.u32 %v7261_v15, 16 }
 0x194   : > { %6985 = vmatmul.msk.bf16.gmra.mxu3 %vm415_vm1, %v3703_v62 }
 0x195   : > { %9373 = vst [vmem:[#allocation14_spill] sm:$0xff] %v8034_v46  ;;  %v3712_v62 = vsel %vm3659_vm5, %v3702_v50, %v3711_v7  ;;  %v3719_v51 = vrot.slane %v3717_v22, 3 }
 0x196   : > { %v1517_v11 = vpop.f32.mrf.mxu2 }
 0x197   : > { %v1574_v48 = vadd.f32 %v1517_v11, %v1140_v33  ;;  %v1085_v41 = vpop.f32.mrf.mxu1  ;;  %v8038_v39 = vpop.f32.mrf.mxu3 }
 0x198   : > { %v2519_v40 = vpop.f32.mrf.mxu0  ;;  %v1141_v55 = vadd.f32 %v1085_v41, %v7641_v56  ;;  %v4233_v56 = vsel %vm4226_vm7, %v4230_v13, %v4232_v2  ;;  %v7223_v13 = vld [vmem:[%s7478_s28 + $0x28] sm:$0xff]  ;;  %v7277_v41 = vld [vmem:[%s7478_s28 + $0x30] sm:$0xff] }
 0x199   : > { %v2007_v30 = vadd.f32 %v7989_v47, %v1574_v48  ;;  %v4234_v3 = vrot.slane %v7277_v41, 3 }
 0x19b   : > { %v8047_v47 = vadd.f32 %v2517_v28, %v2007_v30 }
 0x19d   : > { %9374 = vst [vmem:[#allocation15_spill] sm:$0xff] %v8047_v47 }
 0x19e   : > { %v1519_v58 = vpop.f32.mrf.mxu2 }
 0x19f   : > { %v1575_v18 = vadd.f32 %v1519_v58, %v1141_v55  ;;  %v1088_v63 = vpop.f32.mrf.mxu1  ;;  %v8045_v10 = vpop.f32.mrf.mxu3 }
 0x1a0   : > { %v2522_v29 = vpop.f32.mrf.mxu0  ;;  %v1142_v9 = vadd.f32 %v1088_v63, %v7659_v6  ;;  %v2800_v6 = vrot.slane %v7223_v13, 2  ;;  %v7278_v13 = vld [vmem:[%s7478_s28 + $0x38] sm:$0xff] }
 0x1a1   : > { %v2008_v31 = vadd.f32 %v7999_v5, %v1575_v18  ;;  %v3714_v5 = vshrl.u32 %v7261_v15, 16 }
 0x1a2   : > { %6802 = vmatmul.msk.bf16.gmra.mxu1 %vm415_vm1, %v2799_v14  ;;  %v2801_v14 = vsel %vm2792_vm6, %v2798_v42, %v2800_v6  ;;  %v7262_v42 = vld [vmem:[%s7478_s28 + $0x48] sm:$0xff] }
 0x1a3   : > { %6893 = vmatmul.msk.bf16.gmra.mxu2 %vm415_vm1, %v3232_v35  ;;  %7075 = vmatmul.msk.bf16.gmra.mxu0 %vm415_vm1, %v4233_v56  ;;  %v3716_v52 = vrot.slane %v3714_v5, 2  ;;  %v8064_v30 = vadd.f32 %v2519_v40, %v2008_v31  ;;  %v4235_v31 = vsel %vm4226_vm7, %v4232_v2, %v4234_v3  ;;  %v3723_v15 = vshrl.u32 %v7262_v42, 16  ;;  %v7242_v5 = vld [vmem:[%s7478_s28 + $0x38] sm:$0xff] }
 0x1a4   : > { %6986 = vmatmul.msk.bf16.gmra.mxu3 %vm415_vm1, %v3712_v62  ;;  %v3235_v41 = vrot.slane %v7242_v5, 2 }
 0x1a5   : > { %9375 = vst [vmem:[#allocation16_spill] sm:$0xff] %v8064_v30  ;;  %v3720_v58 = vor.u32 %v3719_v51, %v3716_v52  ;;  %v3725_v17 = vrot.slane %v3723_v15, 2  ;;  %v4236_v52 = vrot.slane %v7278_v13, 3  ;;  %v9393_v30 = vld [vmem:[#allocation5_spill] sm:$0xff] }
 0x1a6   : > { %v1522_v28 = vpop.f32.mrf.mxu2 }
 0x1a7   : > { %v1576_v33 = vadd.f32 %v1522_v28, %v1142_v9  ;;  %v1090_v11 = vpop.f32.mrf.mxu1  ;;  %v8060_v50 = vpop.f32.mrf.mxu3  ;;  %v3726_v9 = vshll.u32 %v7262_v42, 16 }
 0x1a8   : > { %v2524_v48 = vpop.f32.mrf.mxu0  ;;  %v1143_v27 = vadd.f32 %v1090_v11, %v7669_v25  ;;  %v3721_v25 = vsel %vm3659_vm5, %v3711_v7, %v3720_v58  ;;  %v7224_v7 = vld [vmem:[%s7478_s28 + $0x30] sm:$0xff] }
 0x1a9   : > { %v2009_v26 = vadd.f32 %v8014_v49, %v1576_v33  ;;  %v3234_v49 = vsel %vm2792_vm6, %v3231_v38, %v3233_v43 }
 0x1ab   : > { %v8078_v38 = vadd.f32 %v2522_v29, %v2009_v26  ;;  %v3728_v29 = vrot.slane %v3726_v9, 3  ;;  %v2802_v26 = vrot.slane %v7224_v7, 2 }
 0x1ad   : > { %9376 = vst [vmem:[#allocation17_spill] sm:$0xff] %v8078_v38 }
 0x1ae   : > { %v1524_v55 = vpop.f32.mrf.mxu2 }
 0x1af   : > { %v1577_v18 = vadd.f32 %v1524_v55, %v1143_v27  ;;  %v1093_v63 = vpop.f32.mrf.mxu1  ;;  %v8069_v35 = vpop.f32.mrf.mxu3  ;;  %v3729_v27 = vor.u32 %v3728_v29, %v3725_v17 }
 0x1b0   : > { %v2527_v40 = vpop.f32.mrf.mxu0  ;;  %v1144_v62 = vadd.f32 %v1093_v63, %v7687_v44 }
 0x1b1   : > { %v2010_v56 = vadd.f32 %v8023_v45, %v1577_v18  ;;  %v3730_v42 = vsel %vm3659_vm5, %v3720_v58, %v3729_v27  ;;  %v7243_v58 = vld [vmem:[%s7478_s28 + $0x40] sm:$0xff] }
 0x1b2   : > { %6803 = vmatmul.msk.bf16.gmra.mxu1 %vm415_vm1, %v2801_v14  ;;  %v2803_v14 = vsel %vm2792_vm6, %v2800_v6, %v2802_v26  ;;  %v3237_v17 = vrot.slane %v7243_v58, 2 }
 0x1b3   : > { %6894 = vmatmul.msk.bf16.gmra.mxu2 %vm415_vm1, %v3234_v49  ;;  %7076 = vmatmul.msk.bf16.gmra.mxu0 %vm415_vm1, %v4235_v31  ;;  %v8089_v18 = vadd.f32 %v2524_v48, %v2010_v56  ;;  %v7263_v48 = vld [vmem:[%s7478_s28 + $0x50] sm:$0xff] }
 0x1b4   : > { %6987 = vmatmul.msk.bf16.gmra.mxu3 %vm415_vm1, %v3721_v25  ;;  %v3735_v56 = vshll.u32 %v7263_v48, 16 }
 0x1b5   : > { %9377 = vst [vmem:[#allocation18_spill] sm:$0xff] %v8089_v18 }
 0x1b6   : > { %v1527_v45 = vpop.f32.mrf.mxu2  ;;  %v3737_v5 = vrot.slane %v3735_v56, 3 }
 0x1b7   : > { %v1578_v2 = vadd.f32 %v1527_v45, %v1144_v62  ;;  %v1095_v28 = vpop.f32.mrf.mxu1  ;;  %v8084_v22 = vpop.f32.mrf.mxu3  ;;  %v7225_v45 = vld [vmem:[%s7478_s28 + $0x38] sm:$0xff] }
 0x1b8   : > { %v2529_v11 = vpop.f32.mrf.mxu0  ;;  %v1145_v44 = vadd.f32 %v1095_v28, %v7697_v0  ;;  %v4237_v0 = vsel %vm4226_vm7, %v4234_v3, %v4236_v52  ;;  %v2804_v13 = vrot.slane %v7225_v45, 2  ;;  %v8161_v45 = vld [vmem:[%s7478_s28 + $0x48] sm:$0xff] }
 0x1b9   : > { %v2011_v33 = vadd.f32 %v8038_v39, %v1578_v2  ;;  %v3236_v39 = vsel %vm2792_vm6, %v3233_v43, %v3235_v41  ;;  %v3732_v43 = vshrl.u32 %v7263_v48, 16 }
 0x1bb   : > { %v8110_v9 = vadd.f32 %v2527_v40, %v2011_v33  ;;  %v3734_v7 = vrot.slane %v3732_v43, 2  ;;  %v4600_v33 = vlaneseq }
 0x1bd   : > { %9378 = vst [vmem:[#allocation19_spill] sm:$0xff] %v8110_v9  ;;  %v8125_v40 = vor.u32 %v3737_v5, %v3734_v7  ;;  %v9387_v9 = vld [vmem:[#allocation3_spill] sm:$0xff] }
 0x1be   : > { %v1529_v51 = vpop.f32.mrf.mxu2 }
 0x1bf   : > { %v1579_v55 = vadd.f32 %v1529_v51, %v1145_v44  ;;  %v1098_v63 = vpop.f32.mrf.mxu1  ;;  %v8093_v49 = vpop.f32.mrf.mxu3  ;;  %v8123_v51 = vld [vmem:[%s7478_s28 + $0x40] sm:$0xff] }
 0x1c0   : > { %v8096_v25 = vpop.f32.mrf.mxu0  ;;  %v1146_v6 = vadd.f32 %v1098_v63, %v7715_v23  ;;  %v8118_v23 = vld [vmem:[%s7478_s28 + $0x40] sm:$0xff]  ;;  %v8128_v63 = vld [vmem:[%s7478_s28 + $0x48] sm:$0xff]  ;;  %v2806_v56 = vrot.slane %v8123_v51, 2 }
 0x1c1   : > { %v2012_v31 = vadd.f32 %v8045_v10, %v1579_v55  ;;  %v4238_v44 = vrot.slane %v8118_v23, 3  ;;  %v8164_v23 = vld [vmem:[%s7478_s28 + $0x50] sm:$0xff] }
 0x1c2   : > { %6804 = vmatmul.msk.bf16.gmra.mxu1 %vm415_vm1, %v2803_v14 }
 0x1c3   : > { %6895 = vmatmul.msk.bf16.gmra.mxu2 %vm415_vm1, %v3236_v39  ;;  %7077 = vmatmul.msk.bf16.gmra.mxu0 %vm415_vm1, %v4237_v0  ;;  %v2805_v39 = vsel %vm2792_vm6, %v2802_v26, %v2804_v13  ;;  %v3238_v0 = vsel %vm2792_vm6, %v3235_v41, %v3237_v17  ;;  %v8136_v48 = vadd.f32 %v2529_v11, %v2012_v31  ;;  %v7280_v11 = vld [vmem:[%s7478_s28 + $0x48] sm:$0xff]  ;;  %v7264_v31 = vld [vmem:[%s7478_s28 + $0x58] sm:$0xff] }
 0x1c4   : > { %6988 = vmatmul.msk.bf16.gmra.mxu3 %vm415_vm1, %v3730_v42  ;;  %v4239_v43 = vsel %vm4226_vm7, %v4236_v52, %v4238_v44  ;;  %v3739_v26 = vsel %vm3659_vm5, %v3729_v27, %v8125_v40  ;;  %v8157_v27 = vsel %vm2792_vm6, %v2804_v13, %v2806_v56  ;;  %v3741_v7 = vshrl.u32 %v7264_v31, 16 }
 0x1c5   : > { %9379 = vst [vmem:[#allocation20_spill] sm:$0xff] %v8136_v48  ;;  %v3744_v5 = vshll.u32 %v7264_v31, 16 }
 0x1c6   : > { %v1532_v10 = vpop.f32.mrf.mxu2 }
 0x1c7   : > { %v1580_v62 = vadd.f32 %v1532_v10, %v1146_v6  ;;  %v1100_v3 = vpop.f32.mrf.mxu1  ;;  %v8108_v15 = vpop.f32.mrf.mxu3 }
 0x1c8   : > { %v8115_v28 = vpop.f32.mrf.mxu0  ;;  %v1147_v29 = vadd.f32 %v1100_v3, %v7725_v54  ;;  %v8134_v54 = vshrl.u32 %v4600_v33, 7 }
 0x1c9   : > { %v8113_v2 = vadd.f32 %v8060_v50, %v1580_v62 }
 0x1ca   : > { %v4640_v41 = vand.u32 65535, %v8134_v54  ;;  %v4641_v52 = vshrl.u32 %v8134_v54, 16 }
 0x1cc   : > { %v4644_v62 = vmul.u32 58254, %v4640_v41  ;;  %v4645_v51 = vmul.u32 14564, %v4641_v52 }
 0x1ce   : > { %v1534_v55 = vpop.f32.mrf.mxu2 }
 0x1cf   : > { %v1581_v50 = vadd.f32 %v1534_v55, %v1147_v29  ;;  %v1103_v14 = vpop.f32.mrf.mxu1  ;;  %v8132_v42 = vpop.f32.mrf.mxu3  ;;  %v4643_v29 = vmul.u32 14564, %v4640_v41  ;;  %v2808_v41 = vrot.slane %v8161_v45, 2  ;;  %v8187_v45 = vadd.f32 %v8096_v25, %v8113_v2  ;;  %v8202_v2 = vld [vmem:[%s7478_s28 + $0x50] sm:$0xff] }
 0x1d0   : > { %v8141_v10 = vpop.f32.mrf.mxu0  ;;  %v1148_v3 = vadd.f32 %v1103_v14, %v7608_v20  ;;  %v4647_v20 = vshll.u32 %v4644_v62, 16 }
 0x1d1   : > { %v8139_v6 = vadd.f32 %v8069_v35, %v1581_v50  ;;  %9380 = vst [vmem:[#allocation21_spill] sm:$0xff] %v8141_v10  ;;  %v3239_v35 = vrot.slane %v8128_v63, 2  ;;  %v4240_v50 = vrot.slane %v7280_v11, 3  ;;  %v8168_v63 = vld [vmem:[%s7478_s28 + $0x50] sm:$0xff]  ;;  %v9349_v11 = vmov 0  }
 0x1d2   : > { %6805 = vmatmul.msk.bf16.gmra.mxu1 %vm415_vm1, %v2805_v39  ;;  %v3743_v39 = vrot.slane %v3741_v7, 2  ;;  %vm4651_vm8 = vc.u32 %v4643_v29, %v4647_v20  ;;  %v8181_v7 = vadd.s32 8, %v8134_v54  ;;  %9383 = vst [vmem:[#allocation24_spill] sm:$0xff] %v8187_v45  ;;  %v9351_v45 = vrot.slane %v8202_v2, 2 }
 0x1d3   : > { %6896 = vmatmul.msk.bf16.gmra.mxu2 %vm415_vm1, %v3238_v0  ;;  %7078 = vmatmul.msk.bf16.gmra.mxu0 %vm415_vm1, %v4239_v43  ;;  %v3240_v33 = vsel %vm2792_vm6, %v3237_v17, %v3239_v35  ;;  %v3746_v0 = vrot.slane %v3744_v5, 3  ;;  %v4646_v43 = vmul.u32 58254, %v4641_v52  ;;  %v3241_v17 = vrot.slane %v8164_v23, 2 }
 0x1d4   : > { %6989 = vmatmul.msk.bf16.gmra.mxu3 %vm415_vm1, %v3739_v26  ;;  %v4649_v26 = vshll.u32 %v4645_v51, 16  ;;  %v4241_v52 = vsel %vm4226_vm7, %v4238_v44, %v4240_v50  ;;  %v4648_v23 = vshrl.u32 %v4644_v62, 16  ;;  %v8205_v62 = vld [vmem:[%s7478_s28 + $0x58] sm:$0xff] }
 0x1d5   : > { %v8199_v25 = vsel %vm2792_vm6, %v3239_v35, %v3241_v17 }
 0x1d6   : > { %v1537_v58 = vpop.f32.mrf.mxu2 }
 0x1d7   : > { %v1582_v55 = vadd.f32 %v1537_v58, %v1148_v3  ;;  %v1105_v13 = vpop.f32.mrf.mxu1  ;;  %v8170_v14 = vpop.f32.mrf.mxu3  ;;  %v4652_v3 = vsel %vm4651_vm8, 1, %v9349_v11  ;;  %v4653_v58 = vadd.s32 %v4647_v20, %v4643_v29  ;;  %v4669_v29 = vand.u32 65535, %v8181_v7 }
 0x1d8   : > { %v8175_v31 = vpop.f32.mrf.mxu0  ;;  %v4654_v5 = vadd.s32 %v4652_v3, %v4646_v43  ;;  %v1149_v20 = vadd.f32 %v1105_v13, %v7619_v34  ;;  %v8194_v11 = vsel %vm2792_vm6, %v2806_v56, %v2808_v41 }
 0x1d9   : > { %v8173_v10 = vadd.f32 %v8084_v22, %v1582_v55  ;;  %9382 = vst [vmem:[#allocation23_spill] sm:$0xff] %v8175_v31  ;;  %v4242_v22 = vrot.slane %v8168_v63, 3  ;;  %v8189_v55 = vor.u32 %v3746_v0, %v3743_v39  ;;  %vm4655_vm9 = vc.u32 %v4653_v58, %v4649_v26 }
 0x1da   : > { %v9384_v31 = vmov 0   ;;  %v4670_v63 = vshrl.u32 %v8181_v7, 16  ;;  %v4650_v39 = vshrl.u32 %v4645_v51, 16  ;;  %v8207_v26 = vmul.u32 58254, %v4669_v29 }
 0x1db   : > { %9381 = vst [vmem:[#allocation22_spill] sm:$0xff] %v8173_v10  ;;  %v4656_v44 = vsel %vm4655_vm9, 1, %v9384_v31  ;;  %v8210_v56 = vsel %vm4226_vm7, %v4240_v50, %v4242_v22  ;;  %v4672_v13 = vmul.u32 14564, %v4669_v29  ;;  %v3748_v35 = vsel %vm3659_vm5, %v8125_v40, %v8189_v55 }
 0x1dc   : > { %v4658_v0 = vadd.s32 %v4656_v44, %v4654_v5  ;;  %v8212_v3 = vmul.u32 14564, %v4670_v63  ;;  %v8222_v5 = vld [vmem:[%s7478_s28 + $0x58] sm:$0xff]  ;;  %v4675_v44 = vmul.u32 58254, %v4670_v63  ;;  %v8235_v51 = vsel %vm2792_vm6, %v2808_v41, %v9351_v45 }
 0x1de   : > { %v1539_v43 = vpop.f32.mrf.mxu2  ;;  %v4678_v48 = vshll.u32 %v8212_v3, 16 }
 0x1df   : > { %v1583_v34 = vadd.f32 %v1539_v43, %v1149_v20  ;;  %v1108_v58 = vpop.f32.mrf.mxu1  ;;  %v8214_v10 = vpop.f32.mrf.mxu3  ;;  %v4659_v20 = vadd.s32 %v4658_v0, %v4648_v23  ;;  %v4676_v43 = vshll.u32 %v8207_v26, 16  ;;  %v9352_v23 = vrot.slane %v8222_v5, 3 }
 0x1e0   : > { %v8227_v29 = vpop.f32.mrf.mxu0  ;;  %v1150_v40 = vadd.f32 %v1108_v58, %v9387_v9 }
 0x1e1   : > { %v8225_v50 = vadd.f32 %v8093_v49, %v1583_v34  ;;  %9386 = vst [vmem:[#allocation26_spill] sm:$0xff] %v8227_v29  ;;  %v4660_v0 = vadd.s32 %v4659_v20, %v4650_v39  ;;  %v9388_v49 = vrot.slane %v8205_v62, 2  ;;  %vm4680_vm10 = vc.u32 %v4672_v13, %v4676_v43  ;;  %v7265_v39 = vld [vmem:[%s7478_s28 + $0x60] sm:$0xff] }
 0x1e2   : > { %6806 = vmatmul.msk.bf16.gmra.mxu1 %vm415_vm1, %v8157_v27  ;;  %v4682_v9 = vadd.s32 %v4676_v43, %v4672_v13  ;;  %v8247_v34 = vadd.s32 16, %v8134_v54  ;;  %v8253_v41 = vsel %vm4226_vm7, %v4242_v22, %v9352_v23  ;;  %v4681_v58 = vsel %vm4680_vm10, 1, %v9384_v31 }
 0x1e3   : > { %9385 = vst [vmem:[#allocation25_spill] sm:$0xff] %v8225_v50  ;;  %6897 = vmatmul.msk.bf16.gmra.mxu2 %vm415_vm1, %v3240_v33  ;;  %v8244_v63 = vsel %vm2792_vm6, %v3241_v17, %v9388_v49  ;;  %7079 = vmatmul.msk.bf16.gmra.mxu0 %vm415_vm1, %v4241_v52  ;;  %v4661_v27 = vshrl.u32 %v4660_v0, 4  ;;  %v4677_v33 = vshrl.u32 %v8207_v26, 16  ;;  %v4683_v17 = vadd.s32 %v4681_v58, %v4675_v44 }
 0x1e4   : > { %6990 = vmatmul.msk.bf16.gmra.mxu3 %vm415_vm1, %v3748_v35  ;;  %vm4684_vm11 = vc.u32 %v4682_v9, %v4678_v48  ;;  %v4698_v13 = vand.u32 65535, %v8247_v34  ;;  %v4699_v20 = vshrl.u32 %v8247_v34, 16  ;;  %v3750_v49 = vshrl.u32 %v7265_v39, 16 }
 0x1e5   : > { %v4662_v43 = vmul.u32 18, %v4661_v27  ;;  %v3753_v45 = vshll.u32 %v7265_v39, 16  ;;  %v4679_v22 = vshrl.u32 %v8212_v3, 16  ;;  %v4685_v23 = vsel %vm4684_vm11, 1, %v9384_v31  ;;  %v9390_v27 = vld [vmem:[#allocation4_spill] sm:$0xff] }
 0x1e6   : > { %v1542_v52 = vpop.f32.mrf.mxu2  ;;  %v4701_v26 = vmul.u32 14564, %v4698_v13  ;;  %v4702_v29 = vmul.u32 58254, %v4698_v13  ;;  %v3752_v35 = vrot.slane %v3750_v49, 2  ;;  %v4687_v9 = vadd.s32 %v4685_v23, %v4683_v17 }
 0x1e7   : > { %v1584_v0 = vadd.f32 %v1542_v52, %v1150_v40  ;;  %v1110_v50 = vpop.f32.mrf.mxu1  ;;  %v8263_v18 = vpop.f32.mrf.mxu3  ;;  %v4663_v48 = vsub.s32 %v8134_v54, %v4662_v43  ;;  %v3755_v44 = vrot.slane %v3753_v45, 3  ;;  %v8272_v3 = vmul.u32 14564, %v4699_v20 }
 0x1e8   : > { %v1151_v39 = vadd.f32 %v1110_v50, %v9390_v27  ;;  %v8270_v38 = vpop.f32.mrf.mxu0  ;;  %v4704_v40 = vmul.u32 58254, %v4699_v20  ;;  %v4688_v45 = vadd.s32 %v4687_v9, %v4677_v33  ;;  %v4705_v23 = vshll.u32 %v4702_v29, 16  ;;  %v8287_v9 = vld [vmem:[%s7478_s28 + $0x58] sm:$0xff] }
 0x1e9   : > { %v8267_v58 = vadd.f32 %v8108_v15, %v1584_v0  ;;  %9391 = vst [vmem:[#allocation4_spill] sm:$0xff] %v8270_v38  ;;  %vm5681_vm12 = vcmp.ne.s32.totalorder %v4663_v48, 0  ;;  %vm5717_vm13 = vcmp.lt.s32.totalorder %v4663_v48, 0  ;;  %v5789_v13 = vadd.s32 18, %v4663_v48 }
 0x1ea   : > { %v8274_v52 = vor.u32 %v3755_v44, %v3752_v35  ;;  %vm5753_vm14 = vmand %vm5717_vm13, %vm5681_vm12  ;;  %v4707_v15 = vshll.u32 %v8272_v3, 16  ;;  %v4706_v43 = vshrl.u32 %v4702_v29, 16  ;;  %v8281_v20 = vadd.s32 24, %v8134_v54 }
 0x1eb   : > { %9389 = vst [vmem:[#allocation3_spill] sm:$0xff] %v8267_v58  ;;  %v5825_v17 = vsel %vm5753_vm14, %v5789_v13, %v4663_v48  ;;  %v4689_v49 = vadd.s32 %v4688_v45, %v4679_v22  ;;  %vm4709_vm0 = vc.u32 %v4701_v26, %v4705_v23  ;;  %v4711_v0 = vadd.s32 %v4705_v23, %v4701_v26  ;;  %v8290_v48 = vld [vmem:[%s7478_s28 + $0x60] sm:$0xff] }
 0x1ec   : > { %v3757_v50 = vsel %vm3659_vm5, %v8189_v55, %v8274_v52  ;;  %vm5861_vm15 = vcmp.lt.s32.totalorder %v5825_v17, 16  ;;  %v9353_v44 = vmov 0.0   ;;  %v4708_v55 = vshrl.u32 %v8272_v3, 16 }
 0x1ed   : > { %v8284_v33 = vsel %vm5861_vm15, 1.0, %v9353_v44  ;;  %v4710_v29 = vsel %vm4709_vm0, 1, %v9384_v31  ;;  %v4727_v27 = vand.u32 65535, %v8281_v20  ;;  %v4690_v22 = vshrl.u32 %v4689_v49, 4  ;;  %v8298_v44 = vld [vmem:[%s7478_s28 + $0x60] sm:$0xff] }
 0x1ee   : > { %v1544_v35 = vpop.f32.mrf.mxu2  ;;  %v4712_v45 = vadd.s32 %v4710_v29, %v4704_v40  ;;  %vm4713_vm2 = vc.u32 %v4711_v0, %v4707_v15  ;;  %v9357_v23 = vrot.slane %v8287_v9, 2  ;;  %v9356_v17 = vrot.slane %v8290_v48, 2 }
 0x1ef   : > { %v1585_v13 = vadd.f32 %v1544_v35, %v1151_v39  ;;  %v1113_v26 = vpop.f32.mrf.mxu1  ;;  %v4714_v38 = vsel %vm4713_vm2, 1, %v9384_v31  ;;  %v4728_v58 = vshrl.u32 %v8281_v20, 16  ;;  %v8308_v40 = vpop.f32.mrf.mxu3  ;;  %v4691_v15 = vmul.u32 18, %v4690_v22 }
 0x1f0   : > { %v1152_v47 = vadd.f32 %v1113_v26, %v9393_v30  ;;  %v8306_v39 = vpop.f32.mrf.mxu0  ;;  %v4716_v49 = vadd.s32 %v4714_v38, %v4712_v45  ;;  %v9395_v0 = vrot.slane %v8202_v2, 2  ;;  %v9355_v29 = vrot.slane %v8298_v44, 3 }
 0x1f1   : > { %v8303_v3 = vadd.f32 %v8132_v42, %v1585_v13  ;;  %9394 = vst [vmem:[#allocation5_spill] sm:$0xff] %v8306_v39  ;;  %v9396_v42 = vrot.slane %v8205_v62, 2  ;;  %v4730_v13 = vmul.u32 14564, %v4727_v27  ;;  %v4692_v38 = vsub.s32 %v8181_v7, %v4691_v15 }
 0x1f2   : > { %v8315_v35 = vsel %vm2792_vm6, %v9395_v0, %v9357_v23  ;;  %6807 = vmatmul.msk.bf16.gmra.mxu1 %vm415_vm1, %v8194_v11  ;;  %v4717_v2 = vadd.s32 %v4716_v49, %v4706_v43  ;;  %v8330_v22 = vmul.u32 58254, %v4727_v27  ;;  %v8332_v45 = vmul.u32 14564, %v4728_v58  ;;  %v7266_v11 = vld [vmem:[%s7478_s28 + $0x68] sm:$0xff] }
 0x1f3   : > { %9392 = vst [vmem:[#allocation27_spill] sm:$0xff] %v8303_v3  ;;  %v8322_v30 = vsel %vm2792_vm6, %v9396_v42, %v9356_v17  ;;  %6898 = vmatmul.msk.bf16.gmra.mxu2 %vm415_vm1, %v8199_v25  ;;  %7080 = vmatmul.msk.bf16.gmra.mxu0 %vm415_vm1, %v8210_v56  ;;  %v9397_v62 = vrot.slane %v8222_v5, 3  ;;  %v4733_v0 = vmul.u32 58254, %v4728_v58  ;;  %v8345_v25 = vadd.s32 32, %v8134_v54 }
 0x1f4   : > { %v8349_v7 = vadd.f32 %v8115_v28, %v8139_v6  ;;  %6991 = vmatmul.msk.bf16.gmra.mxu3 %vm415_vm1, %v3757_v50  ;;  %vm5682_vm3 = vcmp.ne.s32.totalorder %v4692_v38, 0  ;;  %vm5718_vm4 = vcmp.lt.s32.totalorder %v4692_v38, 0  ;;  %v5790_v56 = vadd.s32 18, %v4692_v38 }
 0x1f5   : > { %v8341_v26 = vsel %vm4226_vm7, %v9397_v62, %v9355_v29  ;;  %v4718_v43 = vadd.s32 %v4717_v2, %v4708_v55  ;;  %vm5754_vm8 = vmand %vm5718_vm4, %vm5682_vm3  ;;  %v3759_v5 = vshrl.u32 %v7266_v11, 16  ;;  %v3762_v15 = vshll.u32 %v7266_v11, 16  ;;  %v9400_v2 = vld [vmem:[#allocation6_spill] sm:$0xff] }
 0x1f6   : > { %9398 = vst [vmem:[#allocation28_spill] sm:$0xff] %v8349_v7  ;;  %v1547_v27 = vpop.f32.mrf.mxu2  ;;  %v4734_v49 = vshll.u32 %v8330_v22, 16  ;;  %v4735_v58 = vshrl.u32 %v8330_v22, 16  ;;  %v5826_v62 = vsel %vm5754_vm8, %v5790_v56, %v4692_v38  ;;  %v4736_v28 = vshll.u32 %v8332_v45, 16  ;;  %v8395_v7 = vld [vmem:[%s7478_s28 + $0x68] sm:$0xff] }
 0x1f7   : > { %v1586_v42 = vadd.f32 %v1547_v27, %v1152_v47  ;;  %v4719_v29 = vshrl.u32 %v4718_v43, 4  ;;  %v1115_v6 = vpop.f32.mrf.mxu1  ;;  %vm5862_vm9 = vcmp.lt.s32.totalorder %v5826_v62, 16  ;;  %v3761_v50 = vrot.slane %v3759_v5, 2  ;;  %v8368_v27 = vpop.f32.mrf.mxu3 }
 0x1f8   : > { %v3764_v17 = vrot.slane %v3762_v15, 3  ;;  %v4737_v23 = vshrl.u32 %v8332_v45, 16  ;;  %v1153_v11 = vadd.f32 %v1115_v6, %v9400_v2  ;;  %v8360_v39 = vpop.f32.mrf.mxu0  ;;  %v9402_v3 = vmov 0.0   ;;  %v8381_v6 = vld [vmem:[%s7478_s28 + $0x60] sm:$0xff] }
 0x1f9   : > { %v8357_v55 = vadd.f32 %v8170_v14, %v1586_v42  ;;  %9401 = vst [vmem:[#allocation6_spill] sm:$0xff] %v8360_v39  ;;  %v8363_v22 = vsel %vm5862_vm9, 1.0, %v9402_v3  ;;  %v4720_v47 = vmul.u32 18, %v4719_v29  ;;  %vm4738_vm10 = vc.u32 %v4730_v13, %v4734_v49 }
 0x1fa   : > { %v8365_v38 = vor.u32 %v3764_v17, %v3761_v50  ;;  %v4740_v56 = vadd.s32 %v4734_v49, %v4730_v13  ;;  %v4756_v43 = vand.u32 65535, %v8345_v25  ;;  %v4739_v45 = vsel %vm4738_vm10, 1, %v9384_v31  ;;  %v8384_v50 = vld [vmem:[%s7478_s28 + $0x68] sm:$0xff] }
 0x1fb   : > { %9399 = vst [vmem:[#allocation29_spill] sm:$0xff] %v8357_v55  ;;  %v4721_v14 = vsub.s32 %v8247_v34, %v4720_v47  ;;  %v4757_v5 = vshrl.u32 %v8345_v25, 16  ;;  %v8374_v15 = vadd.s32 40, %v8134_v54  ;;  %v4741_v29 = vadd.s32 %v4739_v45, %v4733_v0 }
 0x1fc   : > { %v3766_v17 = vsel %vm3659_vm5, %v8274_v52, %v8365_v38  ;;  %vm4742_vm11 = vc.u32 %v4740_v56, %v4736_v28  ;;  %v4759_v13 = vmul.u32 14564, %v4756_v43  ;;  %v8386_v2 = vmul.u32 58254, %v4756_v43 }
 0x1fd   : > { %vm5683_vm12 = vcmp.ne.s32.totalorder %v4721_v14, 0  ;;  %vm5719_vm13 = vcmp.lt.s32.totalorder %v4721_v14, 0  ;;  %v5791_v49 = vadd.s32 18, %v4721_v14  ;;  %v4743_v34 = vsel %vm4742_vm11, 1, %v9384_v31 }
 0x1fe   : > { %v1549_v42 = vpop.f32.mrf.mxu2  ;;  %vm5755_vm14 = vmand %vm5719_vm13, %vm5683_vm12  ;;  %v4745_v62 = vadd.s32 %v4743_v34, %v4741_v29  ;;  %v8388_v47 = vmul.u32 14564, %v4757_v5  ;;  %v4762_v52 = vmul.u32 58254, %v4757_v5  ;;  %v4785_v56 = vand.u32 65535, %v8374_v15 }
 0x1ff   : > { %v1587_v0 = vadd.f32 %v1549_v42, %v1153_v11  ;;  %v5827_v28 = vsel %vm5755_vm14, %v5791_v49, %v4721_v14  ;;  %v4786_v45 = vshrl.u32 %v8374_v15, 16  ;;  %v2896_v39 = vpop.f32.mrf.mxu1  ;;  %v9359_v29 = vrot.slane %v8381_v6, 2 }
 0x200   : > { %vm5863_vm15 = vcmp.lt.s32.totalorder %v5827_v28, 16  ;;  %v4746_v55 = vadd.s32 %v4745_v62, %v4735_v58  ;;  %v9358_v34 = vrot.slane %v8384_v50, 2  ;;  %v2986_v5 = vadd.f32 %v2896_v39, %v7745_v12  ;;  %v4330_v11 = vpop.f32.mrf.mxu0 }
 0x201   : > { %v8398_v43 = vadd.f32 %v8214_v10, %v1587_v0  ;;  %v8402_v14 = vsel %vm5863_vm15, 1.0, %v9402_v3  ;;  %v4763_v49 = vshll.u32 %v8386_v2, 16  ;;  %v9404_v58 = vrot.slane %v8287_v9, 2 }
 0x202   : > { %v4747_v42 = vadd.s32 %v4746_v55, %v4737_v23  ;;  %v9405_v10 = vrot.slane %v8290_v48, 2  ;;  %v9360_v39 = vrot.slane %v8395_v7, 3  ;;  %6808 = vmatmul.msk.bf16.gmra.mxu1 %vm415_vm1, %v8235_v51  ;;  %v4764_v9 = vshrl.u32 %v8386_v2, 16  ;;  %v7267_v2 = vld [vmem:[%s7478_s28 + $0x70] sm:$0xff] }
 0x203   : > { %9403 = vst [vmem:[#allocation30_spill] sm:$0xff] %v8398_v43  ;;  %v8410_v62 = vsel %vm2792_vm6, %v9404_v58, %v9359_v29  ;;  %6899 = vmatmul.msk.bf16.gmra.mxu2 %vm415_vm1, %v8244_v63  ;;  %v4765_v23 = vshll.u32 %v8388_v47, 16  ;;  %v4766_v55 = vshrl.u32 %v8388_v47, 16  ;;  %vm4767_vm0 = vc.u32 %v4759_v13, %v4763_v49  ;;  %7081 = vmatmul.msk.bf16.gmra.mxu0 %vm415_vm1, %v8253_v41  ;;  %v8438_v58 = vpop.f32.mrf.mxu3 }
 0x204   : > { %v8417_v12 = vsel %vm2792_vm6, %v9405_v10, %v9358_v34  ;;  %v4748_v48 = vshrl.u32 %v4747_v42, 4  ;;  %v9406_v0 = vrot.slane %v8298_v44, 3  ;;  %v4768_v63 = vsel %vm4767_vm0, 1, %v9384_v31  ;;  %6992 = vmatmul.msk.bf16.gmra.mxu3 %vm415_vm1, %v3766_v17 }
 0x205   : > { %v4769_v28 = vadd.s32 %v4763_v49, %v4759_v13  ;;  %v4770_v47 = vadd.s32 %v4768_v63, %v4762_v52  ;;  %v4788_v10 = vmul.u32 14564, %v4785_v56  ;;  %v8441_v34 = vmul.u32 58254, %v4785_v56 }
 0x206   : > { %v8434_v51 = vsel %vm4226_vm7, %v9406_v0, %v9360_v39  ;;  %v8443_v41 = vmul.u32 14564, %v4786_v45  ;;  %v3329_v42 = vpop.f32.mrf.mxu2  ;;  %v4749_v29 = vmul.u32 18, %v4748_v48  ;;  %v3768_v44 = vshrl.u32 %v7267_v2, 16 }
 0x207   : > { %vm4771_vm2 = vc.u32 %v4769_v28, %v4765_v23  ;;  %v3771_v0 = vshll.u32 %v7267_v2, 16  ;;  %v3419_v39 = vadd.f32 %v3329_v42, %v2986_v5  ;;  %v4791_v13 = vmul.u32 58254, %v4786_v45  ;;  %v2898_v46 = vpop.f32.mrf.mxu1 }
 0x208   : > { %v4772_v43 = vsel %vm4771_vm2, 1, %v9384_v31  ;;  %v4792_v49 = vshll.u32 %v8441_v34, 16  ;;  %v4750_v17 = vsub.s32 %v8281_v20, %v4749_v29  ;;  %v3770_v63 = vrot.slane %v3768_v44, 2  ;;  %v4332_v48 = vpop.f32.mrf.mxu0 }
 0x209   : > { %v4774_v52 = vadd.s32 %v4772_v43, %v4770_v47  ;;  %v3773_v56 = vrot.slane %v3771_v0, 3  ;;  %v3986_v16 = vadd.f32 %v8263_v18, %v3419_v39  ;;  %v2987_v21 = vadd.f32 %v2898_v46, %v7758_v32 }
 0x20a   : > { %v4793_v23 = vshrl.u32 %v8441_v34, 16  ;;  %v4794_v5 = vshll.u32 %v8443_v41, 16  ;;  %vm5684_vm3 = vcmp.ne.s32.totalorder %v4750_v17, 0  ;;  %vm5720_vm4 = vcmp.lt.s32.totalorder %v4750_v17, 0 }
 0x20b   : > { %v5792_v45 = vadd.s32 18, %v4750_v17  ;;  %v4775_v28 = vadd.s32 %v4774_v52, %v4764_v9  ;;  %v8452_v2 = vadd.f32 %v4330_v11, %v3986_v16  ;;  %vm5756_vm8 = vmand %vm5720_vm4, %vm5684_vm3  ;;  %v8454_v20 = vor.u32 %v3773_v56, %v3770_v63  ;;  %v8475_v0 = vpop.f32.mrf.mxu3 }
 0x20c   : > { %v4795_v29 = vshrl.u32 %v8443_v41, 16  ;;  %vm4796_vm9 = vc.u32 %v4788_v10, %v4792_v49  ;;  %v4798_v34 = vadd.s32 %v4792_v49, %v4788_v10  ;;  %v8469_v10 = vld [vmem:[%s7478_s28 + $0x68] sm:$0xff]  ;;  %v8472_v41 = vld [vmem:[%s7478_s28 + $0x70] sm:$0xff] }
 0x20d   : > { %v5828_v32 = vsel %vm5756_vm8, %v5792_v45, %v4750_v17  ;;  %v4776_v46 = vadd.s32 %v4775_v28, %v4766_v55  ;;  %v4797_v18 = vsel %vm4796_vm9, 1, %v9384_v31  ;;  %v5969_v43 = vmul.f32 %v8284_v33, %v8452_v2 }
 0x20e   : > { %v6047_v16 = vmul.f32 %v8452_v2, %v8452_v2  ;;  %vm5864_vm10 = vcmp.lt.s32.totalorder %v5828_v32, 16  ;;  %v3775_v11 = vsel %vm3659_vm5, %v8365_v38, %v8454_v20  ;;  %v3331_v39 = vpop.f32.mrf.mxu2  ;;  %v4799_v47 = vadd.s32 %v4797_v18, %v4791_v13 }
 0x20f   : > { %v8466_v9 = vsel %vm5864_vm10, 1.0, %v9402_v3  ;;  %v4777_v55 = vshrl.u32 %v4776_v46, 4  ;;  %vm4800_vm11 = vc.u32 %v4798_v34, %v4794_v5  ;;  %v3420_v44 = vadd.f32 %v3331_v39, %v2987_v21  ;;  %v2901_v17 = vpop.f32.mrf.mxu1  ;;  %v8485_v5 = vld [vmem:[%s7478_s28 + $0x70] sm:$0xff] }
 0x210   : > { %v6083_v42 = vmul.f32 %v8284_v33, %v6047_v16  ;;  %v4801_v49 = vsel %vm4800_vm11, 1, %v9384_v31  ;;  %v8479_v38 = vadd.s32 48, %v8134_v54  ;;  %v2816_v13 = vrot.slane %v8469_v10, 2  ;;  %v4335_v45 = vpop.f32.mrf.mxu0 }
 0x211   : > { %v4778_v52 = vmul.u32 18, %v4777_v55  ;;  %v4803_v63 = vadd.s32 %v4801_v49, %v4799_v47  ;;  %v3249_v56 = vrot.slane %v8472_v41, 2  ;;  %v3987_v33 = vadd.f32 %v8308_v40, %v3420_v44 }
 0x212   : > { %v2988_v21 = vadd.f32 %v2901_v17, %v7769_v60  ;;  %v4814_v28 = vand.u32 65535, %v8479_v38  ;;  %v4815_v32 = vshrl.u32 %v8479_v38, 16  ;;  %v9407_v34 = vrot.slane %v8381_v6, 2  ;;  %6809 = vmatmul.msk.bf16.gmra.mxu1 %vm415_vm1, %v8315_v35 }
 0x213   : > { %v4779_v46 = vsub.s32 %v8345_v25, %v4778_v52  ;;  %v4804_v18 = vadd.s32 %v4803_v63, %v4793_v23  ;;  %v9408_v40 = vrot.slane %v8384_v50, 2  ;;  %v4421_v39 = vadd.f32 %v4332_v48, %v3987_v33  ;;  %6900 = vmatmul.msk.bf16.gmra.mxu2 %vm415_vm1, %v8322_v30  ;;  %7082 = vmatmul.msk.bf16.gmra.mxu0 %vm415_vm1, %v8341_v26 }
 0x214   : > { %v8497_v16 = vsel %vm2792_vm6, %v9407_v34, %v2816_v13  ;;  %v4250_v25 = vrot.slane %v8485_v5, 3  ;;  %v4817_v6 = vmul.u32 14564, %v4814_v28  ;;  %v8511_v23 = vmul.u32 58254, %v4814_v28  ;;  %6993 = vmatmul.msk.bf16.gmra.mxu3 %vm415_vm1, %v3775_v11  ;;  %v7268_v11 = vld [vmem:[%s7478_s28 + $0x78] sm:$0xff] }
 0x215   : > { %v8504_v60 = vsel %vm2792_vm6, %v9408_v40, %v3249_v56  ;;  %vm5685_vm12 = vcmp.ne.s32.totalorder %v4779_v46, 0  ;;  %vm5721_vm13 = vcmp.lt.s32.totalorder %v4779_v46, 0  ;;  %v5793_v35 = vadd.s32 18, %v4779_v46 }
 0x216   : > { %v4805_v50 = vadd.s32 %v4804_v18, %v4795_v29  ;;  %v7294_v30 = vpack.c.bf16 %v4421_v39, %v8452_v2  ;;  %v5970_v48 = vmul.f32 %v8363_v22, %v4421_v39  ;;  %v6048_v55 = vmul.f32 %v4421_v39, %v4421_v39  ;;  %vm5757_vm14 = vmand %vm5721_vm13, %vm5685_vm12  ;;  %v3334_v44 = vpop.f32.mrf.mxu2 }
 0x217   : > { %v9409_v47 = vrot.slane %v8395_v7, 3  ;;  %v5829_v49 = vsel %vm5757_vm14, %v5793_v35, %v4779_v46  ;;  %v8530_v29 = vmul.u32 14564, %v4815_v32  ;;  %v4820_v2 = vmul.u32 58254, %v4815_v32  ;;  %v2903_v28 = vpop.f32.mrf.mxu1  ;;  %v8542_v35 = vpop.f32.mrf.mxu3 }
 0x218   : > { %v4806_v17 = vshrl.u32 %v4805_v50, 4  ;;  %7295 = vst [vmem:[%s8516_s18] sm:$0xff] %v7294_v30   ;;  %v6005_v52 = vadd.f32 %v5970_v48, %v5969_v43  ;;  %v6084_v63 = vmul.f32 %v8363_v22, %v6048_v55  ;;  %v3421_v33 = vadd.f32 %v3334_v44, %v2988_v21  ;;  %v4337_v43 = vpop.f32.mrf.mxu0 }
 0x219   : > { %v8528_v26 = vsel %vm4226_vm7, %v9409_v47, %v4250_v25  ;;  %vm5865_vm15 = vcmp.lt.s32.totalorder %v5829_v49, 16  ;;  %v4821_v34 = vshll.u32 %v8511_v23, 16  ;;  %v4822_v46 = vshrl.u32 %v8511_v23, 16 }
 0x21a   : > { %v8536_v18 = vsel %vm5865_vm15, 1.0, %v9402_v3  ;;  %v4807_v7 = vmul.u32 18, %v4806_v17  ;;  %v6119_v40 = vadd.f32 %v6084_v63, %v6083_v42  ;;  %v3988_v39 = vadd.f32 %v8368_v27, %v3421_v33 }
 0x21b   : > { %v2989_v32 = vadd.f32 %v2903_v28, %v7782_v1  ;;  %v4823_v22 = vshll.u32 %v8530_v29, 16  ;;  %v4824_v50 = vshrl.u32 %v8530_v29, 16  ;;  %vm4825_vm0 = vc.u32 %v4817_v6, %v4821_v34 }
 0x21c   : > { %v4808_v21 = vsub.s32 %v8374_v15, %v4807_v7  ;;  %v4827_v30 = vadd.s32 %v4821_v34, %v4817_v6  ;;  %v4422_v48 = vadd.f32 %v4335_v45, %v3988_v39  ;;  %v4826_v55 = vsel %vm4825_vm0, 1, %v9384_v31 }
 0x21d   : > { %v3777_v23 = vshrl.u32 %v7268_v11, 16  ;;  %v3780_v42 = vshll.u32 %v7268_v11, 16  ;;  %v4828_v1 = vadd.s32 %v4826_v55, %v4820_v2  ;;  %v8551_v29 = vadd.s32 56, %v8134_v54  ;;  %v8555_v2 = vld [vmem:[%s7478_s28 + $0x70] sm:$0xff] }
 0x21e   : > { %vm5686_vm2 = vcmp.ne.s32.totalorder %v4808_v21, 0  ;;  %vm5722_vm3 = vcmp.lt.s32.totalorder %v4808_v21, 0  ;;  %v5794_v27 = vadd.s32 18, %v4808_v21  ;;  %v5971_v47 = vmul.f32 %v8402_v14, %v4422_v48  ;;  %v3336_v49 = vpop.f32.mrf.mxu2 }
 0x21f   : > { %v6049_v44 = vmul.f32 %v4422_v48, %v4422_v48  ;;  %vm5758_vm4 = vmand %vm5722_vm3, %vm5686_vm2  ;;  %vm4829_vm8 = vc.u32 %v4827_v30, %v4823_v22  ;;  %v3779_v15 = vrot.slane %v3777_v23, 2  ;;  %v3782_v6 = vrot.slane %v3780_v42, 3  ;;  %v2906_v28 = vpop.f32.mrf.mxu1 }
 0x220   : > { %v5830_v17 = vsel %vm5758_vm4, %v5794_v27, %v4808_v21  ;;  %v4830_v45 = vsel %vm4829_vm8, 1, %v9384_v31  ;;  %v6006_v63 = vadd.f32 %v6005_v52, %v5971_v47  ;;  %v3422_v11 = vadd.f32 %v3336_v49, %v2989_v32  ;;  %v8564_v21 = vld [vmem:[%s7478_s28 + $0x78] sm:$0xff]  ;;  %v4340_v32 = vpop.f32.mrf.mxu0 }
 0x221   : > { %v6085_v33 = vmul.f32 %v8402_v14, %v6049_v44  ;;  %vm5866_vm9 = vcmp.lt.s32.totalorder %v5830_v17, 16  ;;  %v4832_v34 = vadd.s32 %v4830_v45, %v4828_v1  ;;  %v8560_v39 = vor.u32 %v3782_v6, %v3779_v15 }
 0x222   : > { %v8558_v7 = vsel %vm5866_vm9, 1.0, %v9402_v3  ;;  %v4843_v22 = vand.u32 65535, %v8551_v29  ;;  %v3989_v52 = vadd.f32 %v8438_v58, %v3422_v11  ;;  %v2990_v14 = vadd.f32 %v2906_v28, %v7793_v61  ;;  %6810 = vmatmul.msk.bf16.gmra.mxu1 %vm415_vm1, %v8410_v62  ;;  %v8576_v58 = vpop.f32.mrf.mxu3 }
 0x223   : > { %v6120_v30 = vadd.f32 %v6119_v40, %v6085_v33  ;;  %v4844_v55 = vshrl.u32 %v8551_v29, 16  ;;  %v4833_v23 = vadd.s32 %v4832_v34, %v4822_v46  ;;  %v3784_v42 = vsel %vm3659_vm5, %v8454_v20, %v8560_v39  ;;  %6901 = vmatmul.msk.bf16.gmra.mxu2 %vm415_vm1, %v8417_v12  ;;  %7083 = vmatmul.msk.bf16.gmra.mxu0 %vm415_vm1, %v8434_v51  ;;  %v8585_v51 = vld [vmem:[%s7478_s28 + $0x78] sm:$0xff] }
 0x224   : > { %v4846_v27 = vmul.u32 14564, %v4843_v22  ;;  %v4847_v1 = vmul.u32 58254, %v4843_v22  ;;  %v4423_v47 = vadd.f32 %v4337_v43, %v3989_v52  ;;  %v2818_v44 = vrot.slane %v8555_v2, 2  ;;  %6994 = vmatmul.msk.bf16.gmra.mxu3 %vm415_vm1, %v3784_v42  ;;  %v7269_v22 = vld [vmem:[%s7478_s28 + $0x80] sm:$0xff] }
 0x225   : > { %v4848_v61 = vmul.u32 14564, %v4844_v55  ;;  %v4849_v40 = vmul.u32 58254, %v4844_v55  ;;  %v4834_v20 = vadd.s32 %v4833_v23, %v4824_v50  ;;  %v3251_v15 = vrot.slane %v8564_v21, 2 }
 0x226   : > { %v4850_v46 = vshll.u32 %v4847_v1, 16  ;;  %v4851_v43 = vshrl.u32 %v4847_v1, 16  ;;  %v7299_v62 = vpack.c.bf16 %v4423_v47, %v4422_v48  ;;  %v5972_v12 = vmul.f32 %v8466_v9, %v4423_v47  ;;  %v3339_v45 = vpop.f32.mrf.mxu2 }
 0x227   : > { %v6050_v49 = vmul.f32 %v4423_v47, %v4423_v47  ;;  %v4852_v17 = vshll.u32 %v4848_v61, 16  ;;  %v4835_v6 = vshrl.u32 %v4834_v20, 4  ;;  %v4853_v33 = vshrl.u32 %v4848_v61, 16  ;;  %v2908_v52 = vpop.f32.mrf.mxu1 }
 0x228   : > { %vm4854_vm10 = vc.u32 %v4846_v27, %v4850_v46  ;;  %v4856_v11 = vadd.s32 %v4850_v46, %v4846_v27  ;;  %7381 = vst [vmem:[%s8516_s18 + $0x8] sm:$0xff] %v7299_v62   ;;  %v6007_v50 = vadd.f32 %v6006_v63, %v5972_v12  ;;  %v3423_v34 = vadd.f32 %v3339_v45, %v2990_v14  ;;  %v4342_v14 = vpop.f32.mrf.mxu0 }
 0x229   : > { %v6086_v28 = vmul.f32 %v8466_v9, %v6050_v49  ;;  %v4855_v48 = vsel %vm4854_vm10, 1, %v9384_v31  ;;  %v4836_v55 = vmul.u32 18, %v4835_v6  ;;  %v8596_v42 = vsel %vm2792_vm6, %v2816_v13, %v2818_v44 }
 0x22a   : > { %v4857_v23 = vadd.s32 %v4855_v48, %v4849_v40  ;;  %vm4858_vm11 = vc.u32 %v4856_v11, %v4852_v17  ;;  %v3990_v63 = vadd.f32 %v8475_v0, %v3423_v34  ;;  %v2991_v9 = vadd.f32 %v2908_v52, %v7806_v59  ;;  %v8614_v41 = vpop.f32.mrf.mxu3 }
 0x22b   : > { %v6121_v27 = vadd.f32 %v6120_v30, %v6086_v28  ;;  %v4859_v1 = vsel %vm4858_vm11, 1, %v9384_v31  ;;  %v4837_v47 = vsub.s32 %v8479_v38, %v4836_v55  ;;  %v8607_v10 = vsel %vm2792_vm6, %v3249_v56, %v3251_v15 }
 0x22c   : > { %v4861_v61 = vadd.s32 %v4859_v1, %v4857_v23  ;;  %v4252_v13 = vrot.slane %v8585_v51, 3  ;;  %v4424_v30 = vadd.f32 %v4340_v32, %v3990_v63  ;;  %v8611_v0 = vadd.s32 64, %v8134_v54 }
 0x22d   : > { %v3786_v59 = vshrl.u32 %v7269_v22, 16  ;;  %v3789_v40 = vshll.u32 %v7269_v22, 16  ;;  %vm5687_vm12 = vcmp.ne.s32.totalorder %v4837_v47, 0  ;;  %vm5723_vm13 = vcmp.lt.s32.totalorder %v4837_v47, 0 }
 0x22e   : > { %v5795_v20 = vadd.s32 18, %v4837_v47  ;;  %v4862_v38 = vadd.s32 %v4861_v61, %v4851_v43  ;;  %v5973_v46 = vmul.f32 %v8536_v18, %v4424_v30  ;;  %v6051_v62 = vmul.f32 %v4424_v30, %v4424_v30  ;;  %vm5759_vm14 = vmand %vm5723_vm13, %vm5687_vm12  ;;  %v3341_v12 = vpop.f32.mrf.mxu2 }
 0x22f   : > { %v8621_v56 = vsel %vm4226_vm7, %v4250_v25, %v4252_v13  ;;  %v4872_v32 = vand.u32 65535, %v8611_v0  ;;  %v4873_v43 = vshrl.u32 %v8611_v0, 16  ;;  %v3788_v45 = vrot.slane %v3786_v59, 2  ;;  %v2911_v34 = vpop.f32.mrf.mxu1 }
 0x230   : > { %v5831_v49 = vsel %vm5759_vm14, %v5795_v20, %v4837_v47  ;;  %v4863_v17 = vadd.s32 %v4862_v38, %v4853_v33  ;;  %v6008_v6 = vadd.f32 %v6007_v50, %v5973_v46  ;;  %v6087_v11 = vmul.f32 %v8536_v18, %v6051_v62  ;;  %v4345_v23 = vpop.f32.mrf.mxu0 }
 0x231   : > { %v3424_v28 = vadd.f32 %v3341_v12, %v2991_v9  ;;  %vm5867_vm15 = vcmp.lt.s32.totalorder %v5831_v49, 16  ;;  %v4875_v25 = vmul.u32 14564, %v4872_v32  ;;  %v4876_v22 = vmul.u32 58254, %v4872_v32 }
 0x232   : > { %v8627_v48 = vsel %vm5867_vm15, 1.0, %v9402_v3  ;;  %v4864_v5 = vshrl.u32 %v4863_v17, 4  ;;  %v6122_v52 = vadd.f32 %v6121_v27, %v6087_v11  ;;  %v2992_v33 = vadd.f32 %v2911_v34, %v7817_v4  ;;  %6811 = vmatmul.msk.bf16.gmra.mxu1 %vm415_vm1, %v8497_v16  ;;  %v8649_v12 = vpop.f32.mrf.mxu3  ;;  %v8659_v34 = vld [vmem:[%s7478_s28 + $0x80] sm:$0xff] }
 0x233   : > { %v3991_v55 = vadd.f32 %v8542_v35, %v3424_v28  ;;  %v8631_v63 = vmul.u32 14564, %v4873_v43  ;;  %v4878_v1 = vmul.u32 58254, %v4873_v43  ;;  %v4879_v18 = vshll.u32 %v4876_v22, 16  ;;  %6902 = vmatmul.msk.bf16.gmra.mxu2 %vm415_vm1, %v8504_v60  ;;  %7084 = vmatmul.msk.bf16.gmra.mxu0 %vm415_vm1, %v8528_v26 }
 0x234   : > { %v4865_v50 = vmul.u32 18, %v4864_v5  ;;  %v4880_v9 = vshrl.u32 %v4876_v22, 16  ;;  %v3791_v4 = vrot.slane %v3789_v40, 3 }
 0x235   : > { %v4425_v47 = vadd.f32 %v4342_v14, %v3991_v55  ;;  %v4881_v27 = vshll.u32 %v8631_v63, 16  ;;  %v4882_v35 = vshrl.u32 %v8631_v63, 16  ;;  %vm4883_vm0 = vc.u32 %v4875_v25, %v4879_v18 }
 0x236   : > { %v4866_v61 = vsub.s32 %v8551_v29, %v4865_v50  ;;  %v4885_v59 = vadd.s32 %v4879_v18, %v4875_v25  ;;  %v8643_v14 = vadd.s32 72, %v8134_v54  ;;  %v4884_v38 = vsel %vm4883_vm0, 1, %v9384_v31  ;;  %v3344_v46 = vpop.f32.mrf.mxu2 }
 0x237   : > { %v7304_v16 = vpack.c.bf16 %v4425_v47, %v4424_v30  ;;  %v5974_v60 = vmul.f32 %v8558_v7, %v4425_v47  ;;  %v6052_v20 = vmul.f32 %v4425_v47, %v4425_v47  ;;  %v4886_v26 = vadd.s32 %v4884_v38, %v4878_v1  ;;  %v8652_v30 = vld [vmem:[%s7478_s28 + $0x78] sm:$0xff]  ;;  %v2913_v49 = vpop.f32.mrf.mxu1 }
 0x238   : > { %vm5688_vm2 = vcmp.ne.s32.totalorder %v4866_v61, 0  ;;  %vm5724_vm3 = vcmp.lt.s32.totalorder %v4866_v61, 0  ;;  %v5796_v40 = vadd.s32 18, %v4866_v61  ;;  %v3425_v32 = vadd.f32 %v3344_v46, %v2992_v33  ;;  %v4347_v25 = vpop.f32.mrf.mxu0 }
 0x239   : > { %7382 = vst [vmem:[%s8516_s18 + $0x10] sm:$0xff] %v7304_v16   ;;  %v6009_v29 = vadd.f32 %v6008_v6, %v5974_v60  ;;  %v6088_v62 = vmul.f32 %v8558_v7, %v6052_v20  ;;  %vm5760_vm4 = vmand %vm5724_vm3, %vm5688_vm2  ;;  %vm4887_vm8 = vc.u32 %v4885_v59, %v4881_v27  ;;  %v8655_v11 = vor.u32 %v3791_v4, %v3788_v45  ;;  %v8682_v20 = vld [vmem:[%s7478_s28 + $0x80] sm:$0xff] }
 0x23a   : > { %v5832_v17 = vsel %vm5760_vm4, %v5796_v40, %v4866_v61  ;;  %v4888_v43 = vsel %vm4887_vm8, 1, %v9384_v31  ;;  %v4901_v28 = vand.u32 65535, %v8643_v14  ;;  %v3992_v7 = vadd.f32 %v8576_v58, %v3425_v32 }
 0x23b   : > { %v6123_v6 = vadd.f32 %v6122_v52, %v6088_v62  ;;  %v2993_v5 = vadd.f32 %v2913_v49, %v7830_v19  ;;  %vm5868_vm9 = vcmp.lt.s32.totalorder %v5832_v17, 16  ;;  %v4890_v55 = vadd.s32 %v4888_v43, %v4886_v26  ;;  %v8686_v26 = vld [vmem:[%s7478_s28 + $0x88] sm:$0xff]  ;;  %v8698_v43 = vpop.f32.mrf.mxu3 }
 0x23c   : > { %v8664_v22 = vsel %vm5868_vm9, 1.0, %v9402_v3  ;;  %v3793_v45 = vsel %vm3659_vm5, %v8560_v39, %v8655_v11  ;;  %v4902_v33 = vshrl.u32 %v8643_v14, 16  ;;  %v4426_v63 = vadd.f32 %v4345_v23, %v3992_v7 }
 0x23d   : > { %6995 = vmatmul.msk.bf16.gmra.mxu3 %vm415_vm1, %v3793_v45  ;;  %v4904_v52 = vmul.u32 14564, %v4901_v28  ;;  %v4905_v58 = vmul.u32 58254, %v4901_v28  ;;  %v2820_v19 = vrot.slane %v8652_v30, 2  ;;  %v4891_v50 = vadd.s32 %v4890_v55, %v4880_v9 }
 0x23e   : > { %v4906_v1 = vmul.u32 14564, %v4902_v33  ;;  %v4907_v18 = vmul.u32 58254, %v4902_v33  ;;  %v3253_v47 = vrot.slane %v8659_v34, 2  ;;  %v5975_v27 = vmul.f32 %v8627_v48, %v4426_v63  ;;  %v3346_v59 = vpop.f32.mrf.mxu2 }
 0x23f   : > { %v6053_v4 = vmul.f32 %v4426_v63, %v4426_v63  ;;  %v4908_v39 = vshll.u32 %v4905_v58, 16  ;;  %v4909_v61 = vshrl.u32 %v4905_v58, 16  ;;  %v4892_v23 = vadd.s32 %v4891_v50, %v4882_v35  ;;  %v2916_v62 = vpop.f32.mrf.mxu1 }
 0x240   : > { %v4910_v16 = vshll.u32 %v4906_v1, 16  ;;  %v4911_v60 = vshrl.u32 %v4906_v1, 16  ;;  %v8679_v9 = vsel %vm2792_vm6, %v2818_v44, %v2820_v19  ;;  %v6010_v38 = vadd.f32 %v6009_v29, %v5975_v27  ;;  %v4350_v17 = vpop.f32.mrf.mxu0 }
 0x241   : > { %v6089_v46 = vmul.f32 %v8627_v48, %v6053_v4  ;;  %v3426_v40 = vadd.f32 %v3346_v59, %v2993_v5  ;;  %vm4912_vm10 = vc.u32 %v4904_v52, %v4908_v39  ;;  %v4893_v35 = vshrl.u32 %v4892_v23, 4 }
 0x242   : > { %v4913_v32 = vsel %vm4912_vm10, 1, %v9384_v31  ;;  %v4914_v49 = vadd.s32 %v4908_v39, %v4904_v52  ;;  %v8694_v2 = vsel %vm2792_vm6, %v3251_v15, %v3253_v47  ;;  %v2994_v48 = vadd.f32 %v2916_v62, %v7841_v24  ;;  %6812 = vmatmul.msk.bf16.gmra.mxu1 %vm415_vm1, %v8596_v42 }
 0x243   : > { %v6124_v44 = vadd.f32 %v6123_v6, %v6089_v46  ;;  %v3993_v29 = vadd.f32 %v8614_v41, %v3426_v40  ;;  %v4915_v28 = vadd.s32 %v4913_v32, %v4907_v18  ;;  %v4894_v7 = vmul.u32 18, %v4893_v35  ;;  %6903 = vmatmul.msk.bf16.gmra.mxu2 %vm415_vm1, %v8607_v10  ;;  %7085 = vmatmul.msk.bf16.gmra.mxu0 %vm415_vm1, %v8621_v56  ;;  %v9410_v46 = vld [vmem:[#allocation7_spill] sm:$0xff]  ;;  %v8729_v32 = vpop.f32.mrf.mxu3 }
 0x244   : > { %vm4916_vm11 = vc.u32 %v4914_v49, %v4910_v16  ;;  %v4254_v5 = vrot.slane %v8682_v20, 3  ;;  %v8702_v55 = vadd.s32 80, %v8134_v54  ;;  %v3795_v15 = vshrl.u32 %v8686_v26, 16 }
 0x245   : > { %v4427_v21 = vadd.f32 %v4347_v25, %v3993_v29  ;;  %v4917_v24 = vsel %vm4916_vm11, 1, %v9384_v31  ;;  %v3798_v41 = vshll.u32 %v8686_v26, 16  ;;  %v4895_v6 = vsub.s32 %v8611_v0, %v4894_v7 }
 0x246   : > { %v4919_v45 = vadd.s32 %v4917_v24, %v4915_v28  ;;  %v8719_v42 = vsel %vm4226_vm7, %v4252_v13, %v4254_v5  ;;  %v4930_v10 = vand.u32 65535, %v8702_v55  ;;  %v4931_v58 = vshrl.u32 %v8702_v55, 16  ;;  %v3349_v50 = vpop.f32.mrf.mxu2 }
 0x247   : > { %v7309_v25 = vpack.c.bf16 %v4427_v21, %v4426_v63  ;;  %v5976_v33 = vmul.f32 %v8664_v22, %v4427_v21  ;;  %v6054_v52 = vmul.f32 %v4427_v21, %v4427_v21  ;;  %vm5689_vm12 = vcmp.ne.s32.totalorder %v4895_v6, 0  ;;  %v2918_v4 = vpop.f32.mrf.mxu1 }
 0x248   : > { %vm5725_vm13 = vcmp.lt.s32.totalorder %v4895_v6, 0  ;;  %v5797_v0 = vadd.s32 18, %v4895_v6  ;;  %v4920_v56 = vadd.s32 %v4919_v45, %v4909_v61  ;;  %v3427_v18 = vadd.f32 %v3349_v50, %v2994_v48  ;;  %v4352_v26 = vpop.f32.mrf.mxu0  ;;  %v8738_v50 = vld [vmem:[%s7478_s28 + $0x80] sm:$0xff] }
 0x249   : > { %7383 = vst [vmem:[%s8516_s18 + $0x18] sm:$0xff] %v7309_v25   ;;  %v6011_v1 = vadd.f32 %v6010_v38, %v5976_v33  ;;  %v6090_v51 = vmul.f32 %v8664_v22, %v6054_v52  ;;  %vm5761_vm14 = vmand %vm5725_vm13, %vm5689_vm12  ;;  %v4933_v13 = vmul.u32 14564, %v4930_v10  ;;  %v4934_v39 = vmul.u32 58254, %v4930_v10 }
 0x24a   : > { %v5833_v27 = vsel %vm5761_vm14, %v5797_v0, %v4895_v6  ;;  %v4921_v63 = vadd.s32 %v4920_v56, %v4911_v60  ;;  %v4935_v59 = vmul.u32 14564, %v4931_v58  ;;  %v3994_v16 = vadd.f32 %v8649_v12, %v3427_v18 }
 0x24b   : > { %v6125_v23 = vadd.f32 %v6124_v44, %v6090_v51  ;;  %vm5869_vm15 = vcmp.lt.s32.totalorder %v5833_v27, 16  ;;  %v2995_v40 = vadd.f32 %v2918_v4, %v9410_v46  ;;  %v4936_v62 = vmul.u32 58254, %v4931_v58  ;;  %v9411_v51 = vld [vmem:[#allocation8_spill] sm:$0xff] }
 0x24c   : > { %v7099_v61 = vsel %vm5869_vm15, 1.0, %v9402_v3  ;;  %v4922_v38 = vshrl.u32 %v4921_v63, 4  ;;  %v4937_v22 = vshll.u32 %v4934_v39, 16  ;;  %v4428_v35 = vadd.f32 %v4350_v17, %v3994_v16 }
 0x24d   : > { %v4938_v49 = vshrl.u32 %v4934_v39, 16  ;;  %v4939_v29 = vshll.u32 %v4935_v59, 16  ;;  %v4940_v60 = vshrl.u32 %v4935_v59, 16  ;;  %v3797_v12 = vrot.slane %v3795_v15, 2 }
 0x24e   : > { %v4923_v48 = vmul.u32 18, %v4922_v38  ;;  %vm4941_vm0 = vc.u32 %v4933_v13, %v4937_v22  ;;  %v4943_v44 = vadd.s32 %v4937_v22, %v4933_v13  ;;  %v5977_v28 = vmul.f32 %v7099_v61, %v4428_v35  ;;  %v3351_v6 = vpop.f32.mrf.mxu2  ;;  %v3923_v38 = vpop.f32.mrf.mxu3 }
 0x24f   : > { %v6055_v7 = vmul.f32 %v4428_v35, %v4428_v35  ;;  %v4942_v21 = vsel %vm4941_vm0, 1, %v9384_v31  ;;  %v3800_v24 = vrot.slane %v3798_v41, 3  ;;  %v8734_v17 = vadd.s32 88, %v8134_v54  ;;  %v2921_v0 = vpop.f32.mrf.mxu1 }
 0x250   : > { %v4924_v45 = vsub.s32 %v8643_v14, %v4923_v48  ;;  %v4944_v10 = vadd.s32 %v4942_v21, %v4936_v62  ;;  %vm4945_vm2 = vc.u32 %v4943_v44, %v4939_v29  ;;  %v6012_v25 = vadd.f32 %v6011_v1, %v5977_v28  ;;  %v4355_v13 = vpop.f32.mrf.mxu0  ;;  %v8760_v28 = vld [vmem:[%s7478_s28 + $0x88] sm:$0xff] }
 0x251   : > { %v6091_v33 = vmul.f32 %v7099_v61, %v6055_v7  ;;  %v3428_v52 = vadd.f32 %v3351_v6, %v2995_v40  ;;  %v4946_v58 = vsel %vm4945_vm2, 1, %v9384_v31  ;;  %v2996_v18 = vadd.f32 %v2921_v0, %v9411_v51  ;;  %v8763_v7 = vld [vmem:[%s7478_s28 + $0x88] sm:$0xff] }
 0x252   : > { %vm5690_vm3 = vcmp.ne.s32.totalorder %v4924_v45, 0  ;;  %vm5726_vm4 = vcmp.lt.s32.totalorder %v4924_v45, 0  ;;  %v5798_v15 = vadd.s32 18, %v4924_v45  ;;  %v4948_v41 = vadd.s32 %v4946_v58, %v4944_v10  ;;  %6813 = vmatmul.msk.bf16.gmra.mxu1 %vm415_vm1, %v8679_v9 }
 0x253   : > { %v6126_v56 = vadd.f32 %v6125_v23, %v6091_v33  ;;  %v3995_v14 = vadd.f32 %v8698_v43, %v3428_v52  ;;  %vm5762_vm8 = vmand %vm5726_vm4, %vm5690_vm3  ;;  %v8742_v27 = vor.u32 %v3800_v24, %v3797_v12  ;;  %v4959_v63 = vand.u32 65535, %v8734_v17  ;;  %6904 = vmatmul.msk.bf16.gmra.mxu2 %vm415_vm1, %v8694_v2  ;;  %7086 = vmatmul.msk.bf16.gmra.mxu0 %vm415_vm1, %v8719_v42  ;;  %v9412_v33 = vld [vmem:[#allocation9_spill] sm:$0xff] }
 0x254   : > { %v5834_v1 = vsel %vm5762_vm8, %v5798_v15, %v4924_v45  ;;  %v4949_v4 = vadd.s32 %v4948_v41, %v4938_v49  ;;  %v4960_v39 = vshrl.u32 %v8734_v17, 16  ;;  %v2822_v23 = vrot.slane %v8738_v50, 2 }
 0x255   : > { %v4429_v59 = vadd.f32 %v4352_v26, %v3995_v14  ;;  %vm5870_vm9 = vcmp.lt.s32.totalorder %v5834_v1, 16  ;;  %v3802_v43 = vsel %vm3659_vm5, %v8655_v11, %v8742_v27  ;;  %v4962_v40 = vmul.u32 14564, %v4959_v63  ;;  %v7271_v14 = vld [vmem:[%s7478_s28 + $0x90] sm:$0xff] }
 0x256   : > { %v7100_v16 = vsel %vm5870_vm9, 1.0, %v9402_v3  ;;  %v4950_v46 = vadd.s32 %v4949_v4, %v4940_v60  ;;  %6996 = vmatmul.msk.bf16.gmra.mxu3 %vm415_vm1, %v3802_v43  ;;  %v4963_v9 = vmul.u32 58254, %v4959_v63  ;;  %v4964_v11 = vmul.u32 14564, %v4960_v39  ;;  %v3354_v62 = vpop.f32.mrf.mxu2 }
 0x257   : > { %v7314_v26 = vpack.c.bf16 %v4429_v59, %v4428_v35  ;;  %v5978_v2 = vmul.f32 %v7100_v16, %v4429_v59  ;;  %v6056_v61 = vmul.f32 %v4429_v59, %v4429_v59  ;;  %v4965_v49 = vmul.u32 58254, %v4960_v39  ;;  %v2923_v21 = vpop.f32.mrf.mxu1 }
 0x258   : > { %v4951_v22 = vshrl.u32 %v4950_v46, 4  ;;  %v4966_v29 = vshll.u32 %v4963_v9, 16  ;;  %v4967_v48 = vshrl.u32 %v4963_v9, 16  ;;  %v3429_v60 = vadd.f32 %v3354_v62, %v2996_v18  ;;  %v4357_v58 = vpop.f32.mrf.mxu0 }
 0x259   : > { %7384 = vst [vmem:[%s8516_s18 + $0x20] sm:$0xff] %v7314_v26   ;;  %v6013_v44 = vadd.f32 %v6012_v25, %v5978_v2  ;;  %v6092_v42 = vmul.f32 %v7100_v16, %v6056_v61  ;;  %v4968_v12 = vshll.u32 %v4964_v11, 16  ;;  %v4969_v24 = vshrl.u32 %v4964_v11, 16 }
 0x25a   : > { %v4952_v35 = vmul.u32 18, %v4951_v22  ;;  %vm4970_vm10 = vc.u32 %v4962_v40, %v4966_v29  ;;  %v4972_v6 = vadd.s32 %v4966_v29, %v4962_v40  ;;  %v3996_v10 = vadd.f32 %v8729_v32, %v3429_v60  ;;  %v3926_v40 = vpop.f32.mrf.mxu3  ;;  %v9413_v22 = vld [vmem:[#allocation10_spill] sm:$0xff] }
 0x25b   : > { %v6127_v45 = vadd.f32 %v6126_v56, %v6092_v42  ;;  %v2997_v52 = vadd.f32 %v2923_v21, %v9412_v33  ;;  %v4971_v25 = vsel %vm4970_vm10, 1, %v9384_v31  ;;  %v2823_v41 = vsel %vm2792_vm6, %v2820_v19, %v2822_v23 }
 0x25c   : > { %v4953_v15 = vsub.s32 %v8702_v55, %v4952_v35  ;;  %v4973_v0 = vadd.s32 %v4971_v25, %v4965_v49  ;;  %vm4974_vm11 = vc.u32 %v4972_v6, %v4968_v12  ;;  %v4430_v51 = vadd.f32 %v4355_v13, %v3996_v10 }
 0x25d   : > { %v4975_v56 = vsel %vm4974_vm11, 1, %v9384_v31  ;;  %v3255_v32 = vrot.slane %v8760_v28, 2  ;;  %v4256_v18 = vrot.slane %v8763_v7, 3  ;;  %v8789_v13 = vadd.s32 96, %v8134_v54 }
 0x25e   : > { %vm5691_vm12 = vcmp.ne.s32.totalorder %v4953_v15, 0  ;;  %vm5727_vm13 = vcmp.lt.s32.totalorder %v4953_v15, 0  ;;  %v5799_v1 = vadd.s32 18, %v4953_v15  ;;  %v4977_v55 = vadd.s32 %v4975_v56, %v4973_v0  ;;  %v3356_v39 = vpop.f32.mrf.mxu2 }
 0x25f   : > { %vm5763_vm14 = vmand %vm5727_vm13, %vm5691_vm12  ;;  %v6057_v4 = vmul.f32 %v4430_v51, %v4430_v51  ;;  %v3256_v30 = vsel %vm2792_vm6, %v3253_v47, %v3255_v32  ;;  %v4257_v19 = vsel %vm4226_vm7, %v4254_v5, %v4256_v18  ;;  %v3804_v43 = vshrl.u32 %v7271_v14, 16  ;;  %v2926_v26 = vpop.f32.mrf.mxu1 }
 0x260   : > { %v5835_v63 = vsel %vm5763_vm14, %v5799_v1, %v4953_v15  ;;  %v4978_v59 = vadd.s32 %v4977_v55, %v4967_v48  ;;  %v3807_v16 = vshll.u32 %v7271_v14, 16  ;;  %v3430_v46 = vadd.f32 %v3356_v39, %v2997_v52  ;;  %v4360_v29 = vpop.f32.mrf.mxu0 }
 0x261   : > { %vm5871_vm15 = vcmp.lt.s32.totalorder %v5835_v63, 16  ;;  %v4988_v34 = vand.u32 65535, %v8789_v13  ;;  %v4989_v47 = vshrl.u32 %v8789_v13, 16  ;;  %v3806_v5 = vrot.slane %v3804_v43, 2 }
 0x262   : > { %v7101_v9 = vsel %vm5871_vm15, 1.0, %v9402_v3  ;;  %v4979_v20 = vadd.s32 %v4978_v59, %v4969_v24  ;;  %v3809_v2 = vrot.slane %v3807_v16, 3  ;;  %v3997_v62 = vadd.f32 %v3923_v38, %v3430_v46  ;;  %6814 = vmatmul.msk.bf16.gmra.mxu1 %vm415_vm1, %v2823_v41  ;;  %v8800_v24 = vld [vmem:[%s7478_s28 + $0x88] sm:$0xff]  ;;  %v3928_v39 = vpop.f32.mrf.mxu3  ;;  %v9414_v16 = vld [vmem:[#allocation11_spill] sm:$0xff] }
 0x263   : > { %v5979_v61 = vmul.f32 %v7101_v9, %v4430_v51  ;;  %v6093_v11 = vmul.f32 %v7101_v9, %v6057_v4  ;;  %v2998_v49 = vadd.f32 %v2926_v26, %v9413_v22  ;;  %v4991_v42 = vmul.u32 14564, %v4988_v34  ;;  %6905 = vmatmul.msk.bf16.gmra.mxu2 %vm415_vm1, %v3256_v30  ;;  %7087 = vmatmul.msk.bf16.gmra.mxu0 %vm415_vm1, %v4257_v19 }
 0x264   : > { %v4980_v48 = vshrl.u32 %v4979_v20, 4  ;;  %v4992_v60 = vmul.u32 58254, %v4988_v34  ;;  %v8795_v12 = vmul.u32 14564, %v4989_v47  ;;  %v4431_v6 = vadd.f32 %v4357_v58, %v3997_v62  ;;  %v8834_v62 = vld [vmem:[%s7478_s28 + $0x90] sm:$0xff] }
 0x265   : > { %v6014_v35 = vadd.f32 %v6013_v44, %v5979_v61  ;;  %v6128_v21 = vadd.f32 %v6127_v45, %v6093_v11  ;;  %v4994_v38 = vmul.u32 58254, %v4989_v47  ;;  %v8804_v44 = vor.u32 %v3809_v2, %v3806_v5  ;;  %v8831_v11 = vld [vmem:[%s7478_s28 + $0x90] sm:$0xff] }
 0x266   : > { %v4981_v10 = vmul.u32 18, %v4980_v48  ;;  %v4995_v33 = vshll.u32 %v4992_v60, 16  ;;  %v4996_v52 = vshrl.u32 %v4992_v60, 16  ;;  %v7319_v25 = vpack.c.bf16 %v4431_v6, %v4430_v51  ;;  %v3359_v58 = vpop.f32.mrf.mxu2 }
 0x267   : > { %v6058_v15 = vmul.f32 %v4431_v6, %v4431_v6  ;;  %v4997_v0 = vshll.u32 %v8795_v12, 16  ;;  %v8808_v14 = vadd.s32 104, %v8134_v54  ;;  %v3431_v56 = vadd.f32 %v3359_v58, %v2998_v49  ;;  %v2928_v30 = vpop.f32.mrf.mxu1 }
 0x268   : > { %v4982_v45 = vsub.s32 %v8734_v17, %v4981_v10  ;;  %vm4999_vm0 = vc.u32 %v4991_v42, %v4995_v33  ;;  %v5001_v41 = vadd.s32 %v4995_v33, %v4991_v42  ;;  %7385 = vst [vmem:[%s8516_s18 + $0x28] sm:$0xff] %v7319_v25   ;;  %v3811_v51 = vsel %vm3659_vm5, %v8742_v27, %v8804_v44 }
 0x269   : > { %v5000_v1 = vsel %vm4999_vm0, 1, %v9384_v31  ;;  %v2824_v55 = vrot.slane %v8800_v24, 2  ;;  %6997 = vmatmul.msk.bf16.gmra.mxu3 %vm415_vm1, %v3811_v51  ;;  %v3998_v19 = vadd.f32 %v3926_v40, %v3431_v56  ;;  %v4998_v63 = vshrl.u32 %v8795_v12, 16  ;;  %v4362_v40 = vpop.f32.mrf.mxu0 }
 0x26a   : > { %vm5692_vm2 = vcmp.ne.s32.totalorder %v4982_v45, 0  ;;  %vm5728_vm3 = vcmp.lt.s32.totalorder %v4982_v45, 0  ;;  %v5800_v4 = vadd.s32 18, %v4982_v45  ;;  %v5002_v17 = vadd.s32 %v5000_v1, %v4994_v38 }
 0x26b   : > { %vm5764_vm4 = vmand %vm5728_vm3, %vm5692_vm2  ;;  %vm5003_vm8 = vc.u32 %v5001_v41, %v4997_v0  ;;  %v5017_v59 = vand.u32 65535, %v8808_v14  ;;  %v2999_v46 = vadd.f32 %v2928_v30, %v9414_v16  ;;  %v5018_v34 = vshrl.u32 %v8808_v14, 16 }
 0x26c   : > { %v5836_v27 = vsel %vm5764_vm4, %v5800_v4, %v4982_v45  ;;  %v5004_v43 = vsel %vm5003_vm8, 1, %v9384_v31  ;;  %v8822_v47 = vadd.f32 %v4360_v29, %v3998_v19  ;;  %v2825_v20 = vsel %vm2792_vm6, %v2822_v23, %v2824_v55  ;;  %v7272_v45 = vld [vmem:[%s7478_s28 + $0x98] sm:$0xff]  ;;  %v3931_v19 = vpop.f32.mrf.mxu3 }
 0x26d   : > { %vm5872_vm9 = vcmp.lt.s32.totalorder %v5836_v27, 16  ;;  %v5006_v9 = vadd.s32 %v5004_v43, %v5002_v17  ;;  %v5020_v5 = vmul.u32 14564, %v5017_v59  ;;  %v5021_v2 = vmul.u32 58254, %v5017_v59 }
 0x26e   : > { %v7102_v26 = vsel %vm5872_vm9, 1.0, %v9402_v3  ;;  %v5022_v61 = vmul.u32 14564, %v5018_v34  ;;  %v5023_v48 = vmul.u32 58254, %v5018_v34  ;;  %v8838_v42 = vmul.f32 %v8822_v47, %v8822_v47  ;;  %v3361_v50 = vpop.f32.mrf.mxu2 }
 0x26f   : > { %v5980_v22 = vmul.f32 %v7102_v26, %v4431_v6  ;;  %v6094_v49 = vmul.f32 %v7102_v26, %v6058_v15  ;;  %v5007_v29 = vadd.s32 %v5006_v9, %v4996_v52  ;;  %v5024_v23 = vshll.u32 %v5021_v2, 16  ;;  %v2931_v15 = vpop.f32.mrf.mxu1 }
 0x270   : > { %v5025_v60 = vshrl.u32 %v5021_v2, 16  ;;  %v5026_v12 = vshll.u32 %v5022_v61, 16  ;;  %v3432_v25 = vadd.f32 %v3361_v50, %v2999_v46  ;;  %v3257_v52 = vrot.slane %v8831_v11, 2 }
 0x271   : > { %v8840_v10 = vadd.f32 %v6014_v35, %v5980_v22  ;;  %v8842_v38 = vadd.f32 %v6128_v21, %v6094_v49  ;;  %v5008_v33 = vadd.s32 %v5007_v29, %v4998_v63  ;;  %vm5028_vm10 = vc.u32 %v5020_v5, %v5024_v23  ;;  %v4365_v27 = vpop.f32.mrf.mxu0 }
 0x272   : > { %v5030_v6 = vadd.s32 %v5024_v23, %v5020_v5  ;;  %v4258_v0 = vrot.slane %v8834_v62, 3  ;;  %v3999_v41 = vadd.f32 %v3928_v39, %v3432_v25  ;;  %v5027_v56 = vshrl.u32 %v5022_v61, 16  ;;  %6815 = vmatmul.msk.bf16.gmra.mxu1 %vm415_vm1, %v2825_v20 }
 0x273   : > { %v5009_v58 = vshrl.u32 %v5008_v33, 4  ;;  %v5029_v1 = vsel %vm5028_vm10, 1, %v9384_v31  ;;  %v3258_v35 = vsel %vm2792_vm6, %v3255_v32, %v3257_v52  ;;  %v8864_v28 = vadd.s32 112, %v8134_v54 }
 0x274   : > { %v5031_v51 = vadd.s32 %v5029_v1, %v5023_v48  ;;  %vm5032_vm11 = vc.u32 %v5030_v6, %v5026_v12  ;;  %v4259_v21 = vsel %vm4226_vm7, %v4256_v18, %v4258_v0  ;;  %v8858_v17 = vadd.f32 %v4362_v40, %v3999_v41  ;;  %6906 = vmatmul.msk.bf16.gmra.mxu2 %vm415_vm1, %v3258_v35  ;;  %v3933_v35 = vpop.f32.mrf.mxu3 }
 0x275   : > { %v5010_v4 = vmul.u32 18, %v5009_v58  ;;  %v5033_v30 = vsel %vm5032_vm11, 1, %v9384_v31  ;;  %v3000_v63 = vadd.f32 %v2931_v15, %v7933_v37  ;;  %7088 = vmatmul.msk.bf16.gmra.mxu0 %vm415_vm1, %v4259_v21  ;;  %v3813_v7 = vshrl.u32 %v7272_v45, 16 }
 0x276   : > { %v5035_v32 = vadd.s32 %v5033_v30, %v5031_v51  ;;  %v3816_v18 = vshll.u32 %v7272_v45, 16  ;;  %v7324_v59 = vpack.c.bf16 %v8858_v17, %v8822_v47  ;;  %v5046_v43 = vand.u32 65535, %v8864_v28  ;;  %v3364_v34 = vpop.f32.mrf.mxu2 }
 0x277   : > { %v5011_v39 = vsub.s32 %v8789_v13, %v5010_v4  ;;  %v8873_v16 = vadd.s32 120, %v8134_v54  ;;  %v8877_v37 = vmul.f32 %v8858_v17, %v8858_v17  ;;  %v5047_v9 = vshrl.u32 %v8864_v28, 16  ;;  %v2933_v22 = vpop.f32.mrf.mxu1 }
 0x278   : > { %v5036_v46 = vadd.s32 %v5035_v32, %v5025_v60  ;;  %v3815_v40 = vrot.slane %v3813_v7, 2  ;;  %7386 = vst [vmem:[%s8516_s18 + $0x30] sm:$0xff] %v7324_v59   ;;  %v3433_v20 = vadd.f32 %v3364_v34, %v3000_v63  ;;  %v5049_v5 = vmul.u32 14564, %v5046_v43 }
 0x279   : > { %vm5693_vm12 = vcmp.ne.s32.totalorder %v5011_v39, 0  ;;  %vm5729_vm13 = vcmp.lt.s32.totalorder %v5011_v39, 0  ;;  %v5801_v13 = vadd.s32 18, %v5011_v39  ;;  %v5050_v2 = vmul.u32 58254, %v5046_v43 }
 0x27a   : > { %vm5765_vm14 = vmand %vm5729_vm13, %vm5693_vm12  ;;  %v5037_v26 = vadd.s32 %v5036_v46, %v5027_v56  ;;  %v5051_v61 = vmul.u32 14564, %v5047_v9  ;;  %v4000_v29 = vadd.f32 %v3931_v19, %v3433_v20  ;;  %v5052_v48 = vmul.u32 58254, %v5047_v9 }
 0x27b   : > { %v5837_v49 = vsel %vm5765_vm14, %v5801_v13, %v5011_v39  ;;  %v3818_v50 = vrot.slane %v3816_v18, 3  ;;  %v5053_v60 = vshll.u32 %v5050_v2, 16  ;;  %v3001_v12 = vadd.f32 %v2933_v22, %v7951_v53 }
 0x27c   : > { %vm5873_vm15 = vcmp.lt.s32.totalorder %v5837_v49, 16  ;;  %v5038_v23 = vshrl.u32 %v5037_v26, 4  ;;  %v8883_v25 = vadd.f32 %v4365_v27, %v4000_v29  ;;  %v5054_v6 = vshrl.u32 %v5050_v2, 16 }
 0x27d   : > { %v7103_v33 = vsel %vm5873_vm15, 1.0, %v9402_v3  ;;  %v5055_v15 = vshll.u32 %v5051_v61, 16  ;;  %vm5057_vm0 = vc.u32 %v5049_v5, %v5053_v60  ;;  %v5056_v56 = vshrl.u32 %v5051_v61, 16 }
 0x27e   : > { %v5981_v45 = vmul.f32 %v7103_v33, %v8822_v47  ;;  %v6095_v58 = vmul.f32 %v7103_v33, %v8838_v42  ;;  %v5039_v41 = vmul.u32 18, %v5038_v23  ;;  %v5058_v1 = vsel %vm5057_vm0, 1, %v9384_v31  ;;  %v3366_v47 = vpop.f32.mrf.mxu2  ;;  %v4367_v42 = vpop.f32.mrf.mxu0 }
 0x27f   : > { %v5059_v51 = vadd.s32 %v5053_v60, %v5049_v5  ;;  %v8888_v21 = vor.u32 %v3818_v50, %v3815_v40  ;;  %v5060_v19 = vadd.s32 %v5058_v1, %v5052_v48  ;;  %v3434_v63 = vadd.f32 %v3366_v47, %v3001_v12  ;;  %v8917_v48 = vld [vmem:[%s7478_s28 + $0x98] sm:$0xff] }
 0x280   : > { %v6016_v53 = vadd.f32 %v8840_v10, %v5981_v45  ;;  %v6130_v4 = vadd.f32 %v8842_v38, %v6095_v58  ;;  %v5040_v30 = vsub.s32 %v8808_v14, %v5039_v41  ;;  %v5075_v7 = vand.u32 65535, %v8873_v16  ;;  %v2936_v38 = vpop.f32.mrf.mxu1  ;;  %v8900_v14 = vld [vmem:[%s7478_s28 + $0x90] sm:$0xff]  ;;  %v8920_v50 = vld [vmem:[%s7478_s28 + $0x98] sm:$0xff]  ;;  %v3936_v45 = vpop.f32.mrf.mxu3 }
 0x281   : > { %vm5061_vm2 = vc.u32 %v5059_v51, %v5055_v15  ;;  %v3820_v32 = vsel %vm3659_vm5, %v8804_v44, %v8888_v21  ;;  %v8904_v59 = vmul.f32 %v8883_v25, %v8883_v25  ;;  %v4001_v44 = vadd.f32 %v3933_v35, %v3434_v63  ;;  %v3563_v51 = vld [vmem:[%s7478_s28 + $0xa0] sm:$0x7] }
 0x282   : > { %vm5694_vm3 = vcmp.ne.s32.totalorder %v5040_v30, 0  ;;  %vm5730_vm4 = vcmp.lt.s32.totalorder %v5040_v30, 0  ;;  %v5802_v18 = vadd.s32 18, %v5040_v30  ;;  %v5062_v10 = vsel %vm5061_vm2, 1, %v9384_v31  ;;  %6998 = vmatmul.msk.bf16.gmra.mxu3 %vm415_vm1, %v3820_v32 }
 0x283   : > { %vm5766_vm8 = vmand %vm5730_vm4, %vm5694_vm3  ;;  %v5064_v39 = vadd.s32 %v5062_v10, %v5060_v19  ;;  %v5076_v27 = vshrl.u32 %v8873_v16, 16  ;;  %v5078_v46 = vmul.u32 14564, %v5075_v7  ;;  %v5079_v34 = vmul.u32 58254, %v5075_v7 }
 0x284   : > { %v5838_v43 = vsel %vm5766_vm8, %v5802_v18, %v5040_v30  ;;  %v3002_v9 = vadd.f32 %v2936_v38, %v7961_v57  ;;  %v8908_v13 = vadd.f32 %v4367_v42, %v4001_v44  ;;  %v2826_v61 = vrot.slane %v8900_v14, 2 }
 0x285   : > { %vm5874_vm9 = vcmp.lt.s32.totalorder %v5838_v43, 16  ;;  %v5065_v40 = vadd.s32 %v5064_v39, %v5054_v6  ;;  %v5080_v20 = vmul.u32 14564, %v5076_v27  ;;  %v5081_v5 = vmul.u32 58254, %v5076_v27 }
 0x286   : > { %v7104_v26 = vsel %vm5874_vm9, 1.0, %v9402_v3  ;;  %v5082_v2 = vshll.u32 %v5079_v34, 16  ;;  %v7329_v57 = vpack.c.bf16 %v8908_v13, %v8883_v25  ;;  %v5083_v23 = vshrl.u32 %v5079_v34, 16  ;;  %v3369_v33 = vpop.f32.mrf.mxu2 }
 0x287   : > { %v5982_v22 = vmul.f32 %v7104_v26, %v8858_v17  ;;  %v6096_v49 = vmul.f32 %v7104_v26, %v8877_v37  ;;  %v5066_v29 = vadd.s32 %v5065_v40, %v5056_v56  ;;  %v5084_v60 = vshll.u32 %v5080_v20, 16 }
 0x288   : > { %vm5086_vm10 = vc.u32 %v5078_v46, %v5082_v2  ;;  %v5088_v12 = vadd.s32 %v5082_v2, %v5078_v46  ;;  %7387 = vst [vmem:[%s8516_s18 + $0x38] sm:$0xff] %v7329_v57   ;;  %v5085_v58 = vshrl.u32 %v5080_v20, 16  ;;  %v2827_v56 = vsel %vm2792_vm6, %v2824_v55, %v2826_v61  ;;  %v2938_v1 = vpop.f32.mrf.mxu1  ;;  %v3938_v57 = vpop.f32.mrf.mxu3 }
 0x289   : > { %v8922_v6 = vadd.f32 %v6016_v53, %v5982_v22  ;;  %v8924_v15 = vadd.f32 %v6130_v4, %v6096_v49  ;;  %v5067_v17 = vshrl.u32 %v5066_v29, 4  ;;  %v5087_v37 = vsel %vm5086_vm10, 1, %v9384_v31  ;;  %v4370_v4 = vpop.f32.mrf.mxu0  ;;  %6816 = vmatmul.msk.bf16.gmra.mxu1 %vm415_vm1, %v2827_v56 }
 0x28a   : > { %v5089_v41 = vadd.s32 %v5087_v37, %v5081_v5  ;;  %vm5090_vm11 = vc.u32 %v5088_v12, %v5084_v60  ;;  %v3259_v30 = vrot.slane %v8917_v48, 2  ;;  %v4260_v19 = vrot.slane %v8920_v50, 3 }
 0x28b   : > { %v5068_v35 = vmul.u32 18, %v5067_v17  ;;  %v5091_v53 = vsel %vm5090_vm11, 1, %v9384_v31  ;;  %v8940_v42 = vmul.f32 %v8908_v13, %v8908_v13  ;;  %v3435_v24 = vadd.f32 %v3369_v33, %v3002_v9 }
 0x28c   : > { %v5093_v47 = vadd.s32 %v5091_v53, %v5089_v41  ;;  %v8943_v55 = vadd.s32 128, %v8134_v54  ;;  %v3260_v63 = vsel %vm2792_vm6, %v3257_v52, %v3259_v30  ;;  %v4261_v7 = vsel %vm4226_vm7, %v4258_v0, %v4260_v19  ;;  %v2696_v53 = vld [vmem:[%s7478_s28 + $0x98] sm:$0x3] }
 0x28d   : > { %v5069_v32 = vsub.s32 %v8864_v28, %v5068_v35  ;;  %v3639_v18 = vunpack.c.l.b16 %v3563_v51  ;;  %6907 = vmatmul.msk.bf16.gmra.mxu2 %vm415_vm1, %v3260_v63  ;;  %7089 = vmatmul.msk.bf16.gmra.mxu0 %vm415_vm1, %v4261_v7  ;;  %v4002_v38 = vadd.f32 %v3936_v45, %v3435_v24  ;;  %v3003_v0 = vadd.f32 %v2938_v1, %v7973_v36 }
 0x28e   : > { %v5094_v10 = vadd.s32 %v5093_v47, %v5083_v23  ;;  %v5104_v28 = vand.u32 65535, %v8943_v55  ;;  %v5105_v39 = vshrl.u32 %v8943_v55, 16  ;;  %v3371_v43 = vpop.f32.mrf.mxu2  ;;  %v8971_v35 = vadd.s32 136, %v8134_v54 }
 0x28f   : > { %vm5695_vm12 = vcmp.ne.s32.totalorder %v5069_v32, 0  ;;  %vm5731_vm13 = vcmp.lt.s32.totalorder %v5069_v32, 0  ;;  %v5803_v11 = vadd.s32 18, %v5069_v32  ;;  %v3658_v52 = vpack.c.b16 %v3639_v18, %v3639_v18 }
 0x290   : > { %vm5767_vm14 = vmand %vm5731_vm13, %vm5695_vm12  ;;  %v5095_v44 = vadd.s32 %v5094_v10, %v5085_v58  ;;  %v5107_v62 = vmul.u32 14564, %v5104_v28  ;;  %v5108_v27 = vmul.u32 58254, %v5104_v28  ;;  %v8961_v34 = vadd.f32 %v4370_v4, %v4002_v38  ;;  %v2941_v12 = vpop.f32.mrf.mxu1 }
 0x291   : > { %v5839_v46 = vsel %vm5767_vm14, %v5803_v11, %v5069_v32  ;;  %v5109_v9 = vmul.u32 14564, %v5105_v39  ;;  %v3822_v40 = vshrl.u32 %v3658_v52, 16  ;;  %v5110_v26 = vmul.u32 58254, %v5105_v39  ;;  %v4372_v37 = vpop.f32.mrf.mxu0 }
 0x292   : > { %vm5875_vm15 = vcmp.lt.s32.totalorder %v5839_v46, 16  ;;  %v5096_v20 = vshrl.u32 %v5095_v44, 4  ;;  %v5111_v5 = vshll.u32 %v5108_v27, 16  ;;  %v5112_v22 = vshrl.u32 %v5108_v27, 16 }
 0x293   : > { %v7105_v2 = vsel %vm5875_vm15, 1.0, %v9402_v3  ;;  %v5113_v49 = vshll.u32 %v5109_v9, 16  ;;  %v5114_v29 = vshrl.u32 %v5109_v9, 16  ;;  %v3824_v45 = vrot.slane %v3822_v40, 2  ;;  %v3130_v9 = vld [vmem:[%s7478_s28 + $0xa0] sm:$0x3] }
 0x294   : > { %v5983_v23 = vmul.f32 %v7105_v2, %v8883_v25  ;;  %v6097_v36 = vmul.f32 %v7105_v2, %v8904_v59  ;;  %v5097_v60 = vmul.u32 18, %v5096_v20  ;;  %vm5115_vm0 = vc.u32 %v5107_v62, %v5111_v5  ;;  %v4130_v2 = vld [vmem:[%s7478_s28 + $0xa0] sm:$0x7] }
 0x295   : > { %v5116_v33 = vsel %vm5115_vm0, 1, %v9384_v31  ;;  %v5117_v17 = vadd.s32 %v5111_v5, %v5107_v62  ;;  %v3825_v58 = vshll.u32 %v3658_v52, 16  ;;  %v3436_v59 = vadd.f32 %v3371_v43, %v3003_v0 }
 0x296   : > { %v6018_v41 = vadd.f32 %v8922_v6, %v5983_v23  ;;  %v6132_v56 = vadd.f32 %v8924_v15, %v6097_v36  ;;  %v5098_v1 = vsub.s32 %v8873_v16, %v5097_v60  ;;  %v5118_v51 = vadd.s32 %v5116_v33, %v5110_v26  ;;  %v3374_v16 = vpop.f32.mrf.mxu2 }
 0x297   : > { %vm5119_vm2 = vc.u32 %v5117_v17, %v5113_v49  ;;  %v3827_v25 = vrot.slane %v3825_v58, 3  ;;  %v4003_v32 = vadd.f32 %v3938_v57, %v3436_v59  ;;  %v5133_v15 = vand.u32 65535, %v8971_v35 }
 0x298   : > { %vm5696_vm3 = vcmp.ne.s32.totalorder %v5098_v1, 0  ;;  %vm5732_vm4 = vcmp.lt.s32.totalorder %v5098_v1, 0  ;;  %v5804_v4 = vadd.s32 18, %v5098_v1  ;;  %v5120_v47 = vsel %vm5119_vm2, 1, %v9384_v31 }
 0x299   : > { %vm5768_vm8 = vmand %vm5732_vm4, %vm5696_vm3  ;;  %v5122_v24 = vadd.s32 %v5120_v47, %v5118_v51  ;;  %v3828_v6 = vor.u32 %v3827_v25, %v3824_v45  ;;  %v8978_v7 = vmul.f32 %v8961_v34, %v8961_v34  ;;  %v5134_v18 = vshrl.u32 %v8971_v35, 16  ;;  %v4375_v36 = vpop.f32.mrf.mxu0 }
 0x29a   : > { %v5840_v63 = vsel %vm5768_vm8, %v5804_v4, %v5098_v1  ;;  %v2772_v10 = vunpack.c.l.b16 %v2696_v53  ;;  %v8983_v39 = vadd.f32 %v4372_v37, %v4003_v32  ;;  %v5136_v52 = vmul.u32 14564, %v5133_v15 }
 0x29b   : > { %vm5876_vm9 = vcmp.lt.s32.totalorder %v5840_v63, 16  ;;  %v5123_v38 = vadd.s32 %v5122_v24, %v5112_v22  ;;  %v3829_v28 = vsel %vm3659_vm5, %v8888_v21, %v3828_v6  ;;  %v5137_v44 = vmul.u32 58254, %v5133_v15  ;;  %v3941_v21 = vpop.f32.mrf.mxu3  ;;  %v2943_v22 = vpop.f32.mrf.mxu1 }
 0x29c   : > { %v7106_v11 = vsel %vm5876_vm9, 1.0, %v9402_v3  ;;  %6999 = vmatmul.msk.bf16.gmra.mxu3 %vm415_vm1, %v3829_v28  ;;  %v5138_v62 = vmul.u32 14564, %v5134_v18  ;;  %v7334_v46 = vpack.c.bf16 %v8983_v39, %v8961_v34  ;;  %v5139_v40 = vmul.u32 58254, %v5134_v18 }
 0x29d   : > { %v5984_v27 = vmul.f32 %v7106_v11, %v8908_v13  ;;  %v6098_v0 = vmul.f32 %v7106_v11, %v8940_v42  ;;  %v5124_v43 = vadd.s32 %v5123_v38, %v5114_v29  ;;  %v5140_v20 = vshll.u32 %v5137_v44, 16  ;;  %v9415_v11 = vld [vmem:[#allocation12_spill] sm:$0xff] }
 0x29e   : > { %v5142_v26 = vshll.u32 %v5138_v62, 16  ;;  %v3004_v5 = vadd.f32 %v2941_v12, %v7993_v8  ;;  %7388 = vst [vmem:[%s8516_s18 + $0x40] sm:$0xff] %v7334_v46   ;;  %v5141_v13 = vshrl.u32 %v5137_v44, 16  ;;  %v5143_v42 = vshrl.u32 %v5138_v62, 16  ;;  %v3376_v25 = vpop.f32.mrf.mxu2 }
 0x29f   : > { %v6019_v49 = vadd.f32 %v6018_v41, %v5984_v27  ;;  %v6133_v57 = vadd.f32 %v6132_v56, %v6098_v0  ;;  %v5125_v23 = vshrl.u32 %v5124_v43, 4  ;;  %vm5144_vm5 = vc.u32 %v5136_v52, %v5140_v20 }
 0x2a0   : > { %v5146_v29 = vadd.s32 %v5140_v20, %v5136_v52  ;;  %v2791_v60 = vpack.c.b16 %v2772_v10, %v2772_v10  ;;  %v5145_v17 = vsel %vm5144_vm5, 1, %v9384_v31  ;;  %v3206_v37 = vunpack.c.l.b16 %v3130_v9 }
 0x2a1   : > { %v5126_v33 = vmul.u32 18, %v5125_v23  ;;  %v4206_v45 = vunpack.c.l.b16 %v4130_v2  ;;  %v5147_v58 = vadd.s32 %v5145_v17, %v5139_v40  ;;  %v3437_v12 = vadd.f32 %v3374_v16, %v3004_v5  ;;  %v4377_v0 = vpop.f32.mrf.mxu0 }
 0x2a2   : > { %vm5148_vm10 = vc.u32 %v5146_v29, %v5142_v26  ;;  %v2828_v8 = vrot.slane %v2791_v60, 2  ;;  %v3225_v1 = vpack.c.b16 %v3206_v37, %v3206_v37  ;;  %v9002_v47 = vadd.s32 144, %v8134_v54  ;;  %v9416_v60 = vld [vmem:[#allocation13_spill] sm:$0xff] }
 0x2a3   : > { %v5127_v41 = vsub.s32 %v8943_v55, %v5126_v33  ;;  %v5149_v56 = vsel %vm5148_vm10, 1, %v9384_v31  ;;  %v4225_v51 = vpack.c.b16 %v4206_v45, %v4206_v45  ;;  %v4004_v4 = vadd.f32 %v3941_v21, %v3437_v12  ;;  %v3943_v10 = vpop.f32.mrf.mxu3  ;;  %v2946_v44 = vpop.f32.mrf.mxu1 }
 0x2a4   : > { %v5151_v59 = vadd.s32 %v5149_v56, %v5147_v58  ;;  %v2829_v53 = vsel %vm2792_vm6, %v2826_v61, %v2828_v8  ;;  %v3261_v55 = vrot.slane %v3225_v1, 2  ;;  %v9007_v32 = vmul.f32 %v8983_v39, %v8983_v39 }
 0x2a5   : > { %vm5697_vm11 = vcmp.ne.s32.totalorder %v5127_v41, 0  ;;  %vm5733_vm12 = vcmp.lt.s32.totalorder %v5127_v41, 0  ;;  %v5805_v24 = vadd.s32 18, %v5127_v41  ;;  %6817 = vmatmul.msk.bf16.gmra.mxu1 %vm415_vm1, %v2829_v53  ;;  %v4262_v15 = vrot.slane %v4225_v51, 3 }
 0x2a6   : > { %vm5769_vm13 = vmand %vm5733_vm12, %vm5697_vm11  ;;  %v5152_v6 = vadd.s32 %v5151_v59, %v5141_v13  ;;  %v5162_v14 = vand.u32 65535, %v9002_v47  ;;  %v3262_v16 = vsel %vm2792_vm6, %v3259_v30, %v3261_v55  ;;  %v9013_v63 = vadd.f32 %v4375_v36, %v4004_v4  ;;  %v3379_v23 = vpop.f32.mrf.mxu2 }
 0x2a7   : > { %v5841_v61 = vsel %vm5769_vm13, %v5805_v24, %v5127_v41  ;;  %v5163_v18 = vshrl.u32 %v9002_v47, 16  ;;  %6908 = vmatmul.msk.bf16.gmra.mxu2 %vm415_vm1, %v3262_v16  ;;  %v4263_v28 = vsel %vm4226_vm7, %v4260_v19, %v4262_v15  ;;  %v3005_v52 = vadd.f32 %v2943_v22, %v9415_v11 }
 0x2a8   : > { %vm5877_vm14 = vcmp.lt.s32.totalorder %v5841_v61, 16  ;;  %v5153_v38 = vadd.s32 %v5152_v6, %v5143_v42  ;;  %7090 = vmatmul.msk.bf16.gmra.mxu0 %vm415_vm1, %v4263_v28  ;;  %v5165_v30 = vmul.u32 14564, %v5162_v14  ;;  %v5166_v62 = vmul.u32 58254, %v5162_v14 }
 0x2a9   : > { %v7107_v48 = vsel %vm5877_vm14, 1.0, %v9402_v3  ;;  %v5167_v27 = vmul.u32 14564, %v5163_v18  ;;  %v5168_v9 = vmul.u32 58254, %v5163_v18  ;;  %v9027_v20 = vmul.f32 %v9013_v63, %v9013_v63  ;;  %v4380_v55 = vpop.f32.mrf.mxu0 }
 0x2aa   : > { %v5985_v43 = vmul.f32 %v7107_v48, %v8961_v34  ;;  %v6099_v46 = vmul.f32 %v7107_v48, %v8978_v7  ;;  %v5154_v21 = vshrl.u32 %v5153_v38, 4  ;;  %v5169_v50 = vshll.u32 %v5166_v62, 16 }
 0x2ab   : > { %v5170_v40 = vshrl.u32 %v5166_v62, 16  ;;  %v5171_v19 = vshll.u32 %v5167_v27, 16  ;;  %v3438_v22 = vadd.f32 %v3376_v25, %v3005_v52  ;;  %v5172_v13 = vshrl.u32 %v5167_v27, 16  ;;  %v3946_v41 = vpop.f32.mrf.mxu3  ;;  %v2948_v59 = vpop.f32.mrf.mxu1 }
 0x2ac   : > { %v6020_v26 = vadd.f32 %v6019_v49, %v5985_v43  ;;  %v6134_v5 = vadd.f32 %v6133_v57, %v6099_v46  ;;  %v5155_v2 = vmul.u32 18, %v5154_v21  ;;  %vm5173_vm1 = vc.u32 %v5165_v30, %v5169_v50 }
 0x2ad   : > { %v5175_v36 = vadd.s32 %v5169_v50, %v5165_v30  ;;  %v9030_v34 = vadd.s32 152, %v8134_v54  ;;  %v5174_v42 = vsel %vm5173_vm1, 1, %v9384_v31  ;;  %v4005_v29 = vadd.f32 %v3943_v10, %v3438_v22 }
 0x2ae   : > { %v5156_v7 = vsub.s32 %v8971_v35, %v5155_v2  ;;  %v3006_v33 = vadd.f32 %v2946_v44, %v9416_v60  ;;  %v5176_v17 = vadd.s32 %v5174_v42, %v5168_v9  ;;  %v9044_v61 = vadd.s32 160, %v8134_v54  ;;  %v3381_v38 = vpop.f32.mrf.mxu2  ;;  %v9417_v9 = vld [vmem:[#allocation14_spill] sm:$0xff] }
 0x2af   : > { %vm5177_vm6 = vc.u32 %v5175_v36, %v5171_v19  ;;  %v5191_v49 = vand.u32 65535, %v9030_v34  ;;  %v5192_v57 = vshrl.u32 %v9030_v34, 16  ;;  %v9038_v8 = vadd.f32 %v4377_v0, %v4005_v29 }
 0x2b0   : > { %vm5698_vm7 = vcmp.ne.s32.totalorder %v5156_v7, 0  ;;  %vm5734_vm15 = vcmp.lt.s32.totalorder %v5156_v7, 0  ;;  %v5806_v37 = vadd.s32 18, %v5156_v7  ;;  %v5178_v45 = vsel %vm5177_vm6, 1, %v9384_v31 }
 0x2b1   : > { %vm5770_vm0 = vmand %vm5734_vm15, %vm5698_vm7  ;;  %v5180_v58 = vadd.s32 %v5178_v45, %v5176_v17  ;;  %v5194_v35 = vmul.u32 14564, %v5191_v49  ;;  %v5195_v12 = vmul.u32 58254, %v5191_v49  ;;  %v5196_v1 = vmul.u32 14564, %v5192_v57 }
 0x2b2   : > { %v5842_v56 = vsel %vm5770_vm0, %v5806_v37, %v5156_v7  ;;  %v5197_v51 = vmul.u32 58254, %v5192_v57  ;;  %v3439_v25 = vadd.f32 %v3379_v23, %v3006_v33  ;;  %v7339_v4 = vpack.c.bf16 %v9038_v8, %v9013_v63  ;;  %v4382_v57 = vpop.f32.mrf.mxu0 }
 0x2b3   : > { %vm5878_vm2 = vcmp.lt.s32.totalorder %v5842_v56, 16  ;;  %v5181_v53 = vadd.s32 %v5180_v58, %v5170_v40  ;;  %v5198_v24 = vshll.u32 %v5195_v12, 16  ;;  %v5199_v15 = vshrl.u32 %v5195_v12, 16  ;;  %v3948_v23 = vpop.f32.mrf.mxu3  ;;  %v2951_v33 = vpop.f32.mrf.mxu1 }
 0x2b4   : > { %v7108_v6 = vsel %vm5878_vm2, 1.0, %v9402_v3  ;;  %v5200_v14 = vshll.u32 %v5196_v1, 16  ;;  %7389 = vst [vmem:[%s8516_s18 + $0x48] sm:$0xff] %v7339_v4   ;;  %v5201_v28 = vshrl.u32 %v5196_v1, 16  ;;  %v4006_v44 = vadd.f32 %v3946_v41, %v3439_v25 }
 0x2b5   : > { %v5986_v16 = vmul.f32 %v7108_v6, %v8983_v39  ;;  %v6100_v18 = vmul.f32 %v7108_v6, %v9007_v32  ;;  %v5182_v10 = vadd.s32 %v5181_v53, %v5172_v13  ;;  %vm5202_vm3 = vc.u32 %v5194_v35, %v5198_v24 }
 0x2b6   : > { %v5203_v11 = vsel %vm5202_vm3, 1, %v9384_v31  ;;  %v5204_v52 = vadd.s32 %v5198_v24, %v5194_v35  ;;  %v9050_v0 = vadd.f32 %v4380_v55, %v4006_v44  ;;  %v5220_v39 = vand.u32 65535, %v9044_v61  ;;  %v3384_v56 = vpop.f32.mrf.mxu2 }
 0x2b7   : > { %v6021_v48 = vadd.f32 %v6020_v26, %v5986_v16  ;;  %v6135_v30 = vadd.f32 %v6134_v5, %v6100_v18  ;;  %v5183_v62 = vshrl.u32 %v5182_v10, 4  ;;  %v5205_v27 = vadd.s32 %v5203_v11, %v5197_v51 }
 0x2b8   : > { %vm5206_vm4 = vc.u32 %v5204_v52, %v5200_v14  ;;  %v5221_v32 = vshrl.u32 %v9044_v61, 16  ;;  %v9057_v21 = vmul.f32 %v9038_v8, %v9038_v8  ;;  %v3007_v50 = vadd.f32 %v2948_v59, %v9417_v9 }
 0x2b9   : > { %v5184_v43 = vmul.u32 18, %v5183_v62  ;;  %v5207_v46 = vsel %vm5206_vm4, 1, %v9384_v31  ;;  %v5223_v19 = vmul.u32 14564, %v5220_v39  ;;  %v5224_v26 = vmul.u32 58254, %v5220_v39 }
 0x2ba   : > { %v5209_v40 = vadd.s32 %v5207_v46, %v5205_v27  ;;  %v5225_v5 = vmul.u32 14564, %v5221_v32  ;;  %v5226_v22 = vmul.u32 58254, %v5221_v32  ;;  %v3440_v13 = vadd.f32 %v3381_v38, %v3007_v50  ;;  %v4385_v50 = vpop.f32.mrf.mxu0 }
 0x2bb   : > { %v5185_v2 = vsub.s32 %v9002_v47, %v5184_v43  ;;  %v9062_v36 = vadd.s32 168, %v8134_v54  ;;  %v5227_v42 = vshll.u32 %v5224_v26, 16  ;;  %v9066_v60 = vmul.f32 %v9050_v0, %v9050_v0  ;;  %v3951_v39 = vpop.f32.mrf.mxu3  ;;  %v2953_v43 = vpop.f32.mrf.mxu1 }
 0x2bc   : > { %v5210_v7 = vadd.s32 %v5209_v40, %v5199_v15  ;;  %v5229_v29 = vshll.u32 %v5225_v5, 16  ;;  %v5228_v49 = vshrl.u32 %v5224_v26, 16  ;;  %v4007_v45 = vadd.f32 %v3948_v23, %v3440_v13 }
 0x2bd   : > { %vm5699_vm8 = vcmp.ne.s32.totalorder %v5185_v2, 0  ;;  %vm5735_vm9 = vcmp.lt.s32.totalorder %v5185_v2, 0  ;;  %v5807_v17 = vadd.s32 18, %v5185_v2  ;;  %vm5231_vm10 = vc.u32 %v5223_v19, %v5227_v42 }
 0x2be   : > { %vm5771_vm5 = vmand %vm5735_vm9, %vm5699_vm8  ;;  %v5211_v47 = vadd.s32 %v5210_v7, %v5201_v28  ;;  %v5233_v37 = vadd.s32 %v5227_v42, %v5223_v19  ;;  %v5232_v35 = vsel %vm5231_vm10, 1, %v9384_v31  ;;  %v5249_v12 = vand.u32 65535, %v9062_v36 }
 0x2bf   : > { %v5843_v58 = vsel %vm5771_vm5, %v5807_v17, %v5185_v2  ;;  %v5250_v41 = vshrl.u32 %v9062_v36, 16  ;;  %v5234_v51 = vadd.s32 %v5232_v35, %v5226_v22  ;;  %v5230_v59 = vshrl.u32 %v5225_v5, 16  ;;  %v3386_v22 = vpop.f32.mrf.mxu2 }
 0x2c0   : > { %vm5879_vm11 = vcmp.lt.s32.totalorder %v5843_v58, 16  ;;  %v5212_v1 = vshrl.u32 %v5211_v47, 4  ;;  %vm5235_vm12 = vc.u32 %v5233_v37, %v5229_v29  ;;  %v9073_v4 = vadd.f32 %v4382_v57, %v4007_v45 }
 0x2c1   : > { %v7109_v25 = vsel %vm5879_vm11, 1.0, %v9402_v3  ;;  %v5236_v53 = vsel %vm5235_vm12, 1, %v9384_v31  ;;  %v5252_v16 = vmul.u32 14564, %v5249_v12  ;;  %v5253_v18 = vmul.u32 58254, %v5249_v12 }
 0x2c2   : > { %v5987_v24 = vmul.f32 %v7109_v25, %v9013_v63  ;;  %v6101_v55 = vmul.f32 %v7109_v25, %v9027_v20  ;;  %v5213_v6 = vmul.u32 18, %v5212_v1  ;;  %v5238_v15 = vadd.s32 %v5236_v53, %v5234_v51 }
 0x2c3   : > { %v7344_v14 = vpack.c.bf16 %v9073_v4, %v9050_v0  ;;  %v5254_v10 = vmul.u32 14564, %v5250_v41  ;;  %v5255_v44 = vmul.u32 58254, %v5250_v41  ;;  %v5256_v62 = vshll.u32 %v5253_v18, 16  ;;  %v3953_v25 = vpop.f32.mrf.mxu3 }
 0x2c4   : > { %v6022_v38 = vadd.f32 %v6021_v48, %v5987_v24  ;;  %v6136_v28 = vadd.f32 %v6135_v30, %v6101_v55  ;;  %v5214_v11 = vsub.s32 %v9030_v34, %v5213_v6  ;;  %v5239_v52 = vadd.s32 %v5238_v15, %v5228_v49  ;;  %v9418_v48 = vld [vmem:[#allocation15_spill] sm:$0xff]  ;;  %v2956_v6 = vpop.f32.mrf.mxu1 }
 0x2c5   : > { %7390 = vst [vmem:[%s8516_s18 + $0x50] sm:$0xff] %v7344_v14   ;;  %v5257_v27 = vshrl.u32 %v5253_v18, 16  ;;  %v5258_v63 = vshll.u32 %v5254_v10, 16  ;;  %v5259_v46 = vshrl.u32 %v5254_v10, 16  ;;  %vm5260_vm6 = vc.u32 %v5252_v16, %v5256_v62 }
 0x2c6   : > { %vm5700_vm13 = vcmp.ne.s32.totalorder %v5214_v11, 0  ;;  %vm5736_vm14 = vcmp.lt.s32.totalorder %v5214_v11, 0  ;;  %v5808_v20 = vadd.s32 18, %v5214_v11  ;;  %v5240_v32 = vadd.s32 %v5239_v52, %v5230_v59 }
 0x2c7   : > { %vm5772_vm1 = vmand %vm5736_vm14, %vm5700_vm13  ;;  %v5262_v9 = vadd.s32 %v5256_v62, %v5252_v16  ;;  %v3008_v30 = vadd.f32 %v2951_v33, %v9418_v48  ;;  %v5261_v19 = vsel %vm5260_vm6, 1, %v9384_v31  ;;  %v9084_v26 = vadd.s32 176, %v8134_v54  ;;  %v4387_v16 = vpop.f32.mrf.mxu0 }
 0x2c8   : > { %v5844_v34 = vsel %vm5772_vm1, %v5808_v20, %v5214_v11  ;;  %v5241_v40 = vshrl.u32 %v5240_v32, 4  ;;  %v5263_v5 = vadd.s32 %v5261_v19, %v5255_v44  ;;  %v9094_v47 = vmul.f32 %v9073_v4, %v9073_v4 }
 0x2c9   : > { %vm5880_vm7 = vcmp.lt.s32.totalorder %v5844_v34, 16  ;;  %vm5264_vm15 = vc.u32 %v5262_v9, %v5258_v63  ;;  %v3441_v2 = vadd.f32 %v3384_v56, %v3008_v30  ;;  %v5278_v42 = vand.u32 65535, %v9084_v26  ;;  %v3389_v63 = vpop.f32.mrf.mxu2 }
 0x2ca   : > { %v7110_v23 = vsel %vm5880_vm7, 1.0, %v9402_v3  ;;  %v5242_v13 = vmul.u32 18, %v5241_v40  ;;  %v5265_v7 = vsel %vm5264_vm15, 1, %v9384_v31  ;;  %v5279_v37 = vshrl.u32 %v9084_v26, 16 }
 0x2cb   : > { %v5988_v29 = vmul.f32 %v7110_v23, %v9038_v8  ;;  %v6102_v33 = vmul.f32 %v7110_v23, %v9057_v21  ;;  %v5267_v17 = vadd.s32 %v5265_v7, %v5263_v5  ;;  %v4008_v49 = vadd.f32 %v3951_v39, %v3441_v2  ;;  %v3956_v7 = vpop.f32.mrf.mxu3 }
 0x2cc   : > { %v5243_v57 = vsub.s32 %v9044_v61, %v5242_v13  ;;  %v5282_v45 = vmul.u32 58254, %v5278_v42  ;;  %v5281_v41 = vmul.u32 14564, %v5278_v42  ;;  %v5283_v56 = vmul.u32 14564, %v5279_v37 }
 0x2cd   : > { %v6023_v58 = vadd.f32 %v6022_v38, %v5988_v29  ;;  %v6137_v35 = vadd.f32 %v6136_v28, %v6102_v33  ;;  %v5268_v12 = vadd.s32 %v5267_v17, %v5257_v27  ;;  %v9097_v1 = vadd.f32 %v4385_v50, %v4008_v49  ;;  %v9419_v38 = vld [vmem:[#allocation16_spill] sm:$0xff]  ;;  %v2958_v33 = vpop.f32.mrf.mxu1 }
 0x2ce   : > { %vm5701_vm0 = vcmp.ne.s32.totalorder %v5243_v57, 0  ;;  %vm5737_vm2 = vcmp.lt.s32.totalorder %v5243_v57, 0  ;;  %v5809_v8 = vadd.s32 18, %v5243_v57  ;;  %v5284_v61 = vmul.u32 58254, %v5279_v37 }
 0x2cf   : > { %vm5773_vm3 = vmand %vm5737_vm2, %vm5701_vm0  ;;  %v5269_v21 = vadd.s32 %v5268_v12, %v5259_v46  ;;  %v5285_v51 = vshll.u32 %v5282_v45, 16  ;;  %v5286_v53 = vshrl.u32 %v5282_v45, 16  ;;  %v5287_v24 = vshll.u32 %v5283_v56, 16  ;;  %v4390_v45 = vpop.f32.mrf.mxu0 }
 0x2d0   : > { %v5845_v59 = vsel %vm5773_vm3, %v5809_v8, %v5243_v57  ;;  %v5288_v55 = vshrl.u32 %v5283_v56, 16  ;;  %v3009_v28 = vadd.f32 %v2953_v43, %v9419_v38  ;;  %v9103_v11 = vadd.s32 184, %v8134_v54  ;;  %v9420_v8 = vld [vmem:[#allocation17_spill] sm:$0xff] }
 0x2d1   : > { %vm5881_vm4 = vcmp.lt.s32.totalorder %v5845_v59, 16  ;;  %v5270_v15 = vshrl.u32 %v5269_v21, 4  ;;  %vm5289_vm8 = vc.u32 %v5281_v41, %v5285_v51  ;;  %v5291_v14 = vadd.s32 %v5285_v51, %v5281_v41 }
 0x2d2   : > { %v7111_v18 = vsel %vm5881_vm4, 1.0, %v9402_v3  ;;  %v5290_v10 = vsel %vm5289_vm8, 1, %v9384_v31  ;;  %v3442_v39 = vadd.f32 %v3386_v22, %v3009_v28  ;;  %v5307_v20 = vand.u32 65535, %v9103_v11 }
 0x2d3   : > { %v5989_v52 = vmul.f32 %v7111_v18, %v9050_v0  ;;  %v6103_v44 = vmul.f32 %v7111_v18, %v9066_v60  ;;  %v5271_v62 = vmul.u32 18, %v5270_v15  ;;  %v5292_v27 = vadd.s32 %v5290_v10, %v5284_v61  ;;  %v9421_v61 = vld [vmem:[#allocation18_spill] sm:$0xff] }
 0x2d4   : > { %vm5293_vm9 = vc.u32 %v5291_v14, %v5287_v24  ;;  %v5308_v32 = vshrl.u32 %v9103_v11, 16  ;;  %v4009_v50 = vadd.f32 %v3953_v25, %v3442_v39  ;;  %v5310_v0 = vmul.u32 14564, %v5307_v20  ;;  %v3391_v25 = vpop.f32.mrf.mxu2 }
 0x2d5   : > { %v6024_v46 = vadd.f32 %v6023_v58, %v5989_v52  ;;  %v6138_v9 = vadd.f32 %v6137_v35, %v6103_v44  ;;  %v5272_v43 = vsub.s32 %v9062_v36, %v5271_v62  ;;  %v5294_v48 = vsel %vm5293_vm9, 1, %v9384_v31 }
 0x2d6   : > { %v5296_v30 = vadd.s32 %v5294_v48, %v5292_v27  ;;  %v5311_v34 = vmul.u32 58254, %v5307_v20  ;;  %v5312_v40 = vmul.u32 14564, %v5308_v32  ;;  %v9111_v5 = vadd.f32 %v4387_v16, %v4009_v50  ;;  %v3958_v20 = vpop.f32.mrf.mxu3 }
 0x2d7   : > { %vm5702_vm5 = vcmp.ne.s32.totalorder %v5272_v43, 0  ;;  %vm5738_vm10 = vcmp.lt.s32.totalorder %v5272_v43, 0  ;;  %v5810_v60 = vadd.s32 18, %v5272_v43  ;;  %v5313_v2 = vmul.u32 58254, %v5308_v32 }
 0x2d8   : > { %vm5774_vm11 = vmand %vm5738_vm10, %vm5702_vm5  ;;  %v5297_v19 = vadd.s32 %v5296_v30, %v5286_v53  ;;  %v5314_v22 = vshll.u32 %v5311_v34, 16  ;;  %v5315_v13 = vshrl.u32 %v5311_v34, 16  ;;  %v5316_v36 = vshll.u32 %v5312_v40, 16  ;;  %v2961_v34 = vpop.f32.mrf.mxu1 }
 0x2d9   : > { %v5846_v23 = vsel %vm5774_vm11, %v5810_v60, %v5272_v43  ;;  %v7349_v29 = vpack.c.bf16 %v9111_v5, %v9097_v1  ;;  %v5317_v49 = vshrl.u32 %v5312_v40, 16  ;;  %v3010_v56 = vadd.f32 %v2956_v6, %v9420_v8 }
 0x2da   : > { %vm5882_vm12 = vcmp.lt.s32.totalorder %v5846_v23, 16  ;;  %v5298_v42 = vadd.s32 %v5297_v19, %v5288_v55  ;;  %vm5318_vm13 = vc.u32 %v5310_v0, %v5314_v22  ;;  %v5320_v37 = vadd.s32 %v5314_v22, %v5310_v0  ;;  %v4392_v0 = vpop.f32.mrf.mxu0 }
 0x2db   : > { %v7112_v17 = vsel %vm5882_vm12, 1.0, %v9402_v3  ;;  %v5319_v57 = vsel %vm5318_vm13, 1, %v9384_v31  ;;  %7391 = vst [vmem:[%s8516_s18 + $0x58] sm:$0xff] %v7349_v29   ;;  %v9122_v21 = vadd.s32 192, %v8134_v54  ;;  %v3011_v51 = vadd.f32 %v2958_v33, %v9421_v61 }
 0x2dc   : > { %v5990_v58 = vmul.f32 %v7112_v17, %v9073_v4  ;;  %v6104_v35 = vmul.f32 %v7112_v17, %v9094_v47  ;;  %v5299_v12 = vshrl.u32 %v5298_v42, 4  ;;  %v5321_v41 = vadd.s32 %v5319_v57, %v5313_v2  ;;  %v3394_v33 = vpop.f32.mrf.mxu2 }
 0x2dd   : > { %vm5322_vm14 = vc.u32 %v5320_v37, %v5316_v36  ;;  %v3443_v15 = vadd.f32 %v3389_v63, %v3010_v56  ;;  %v5336_v47 = vand.u32 65535, %v9122_v21  ;;  %v5337_v14 = vshrl.u32 %v9122_v21, 16 }
 0x2de   : > { %v6025_v59 = vadd.f32 %v6024_v46, %v5990_v58  ;;  %v6139_v53 = vadd.f32 %v6138_v9, %v6104_v35  ;;  %v5300_v24 = vmul.u32 18, %v5299_v12  ;;  %v5323_v55 = vsel %vm5322_vm14, 1, %v9384_v31 }
 0x2df   : > { %v5325_v4 = vadd.s32 %v5323_v55, %v5321_v41  ;;  %v6069_v6 = vmul.f32 %v9097_v1, %v9097_v1  ;;  %v9133_v18 = vmul.f32 %v9111_v5, %v9111_v5  ;;  %v3444_v10 = vadd.f32 %v3391_v25, %v3011_v51  ;;  %v9422_v51 = vld [vmem:[#allocation19_spill] sm:$0xff]  ;;  %v3961_v55 = vpop.f32.mrf.mxu3 }
 0x2e0   : > { %v5301_v16 = vsub.s32 %v9084_v26, %v5300_v24  ;;  %v4010_v28 = vadd.f32 %v3956_v7, %v3443_v15  ;;  %v5339_v52 = vmul.u32 14564, %v5336_v47  ;;  %v5340_v44 = vmul.u32 58254, %v5336_v47 }
 0x2e1   : > { %v5326_v38 = vadd.s32 %v5325_v4, %v5315_v13  ;;  %v5341_v27 = vmul.u32 14564, %v5337_v14  ;;  %v5342_v39 = vmul.u32 58254, %v5337_v14  ;;  %v9136_v32 = vadd.s32 200, %v8134_v54 }
 0x2e2   : > { %vm5703_vm1 = vcmp.ne.s32.totalorder %v5301_v16, 0  ;;  %vm5739_vm6 = vcmp.lt.s32.totalorder %v5301_v16, 0  ;;  %v5811_v62 = vadd.s32 18, %v5301_v16  ;;  %v5343_v26 = vshll.u32 %v5340_v44, 16 }
 0x2e3   : > { %vm5775_vm7 = vmand %vm5739_vm6, %vm5703_vm1  ;;  %v5327_v63 = vadd.s32 %v5326_v38, %v5317_v49  ;;  %v9138_v9 = vadd.f32 %v4390_v45, %v4010_v28  ;;  %v5344_v43 = vshrl.u32 %v5340_v44, 16  ;;  %v5345_v48 = vshll.u32 %v5341_v27, 16  ;;  %v2963_v38 = vpop.f32.mrf.mxu1 }
 0x2e4   : > { %v5847_v46 = vsel %vm5775_vm7, %v5811_v62, %v5301_v16  ;;  %vm5347_vm0 = vc.u32 %v5339_v52, %v5343_v26  ;;  %v5349_v50 = vadd.s32 %v5343_v26, %v5339_v52  ;;  %v5346_v40 = vshrl.u32 %v5341_v27, 16  ;;  %v4395_v16 = vpop.f32.mrf.mxu0 }
 0x2e5   : > { %vm5883_vm15 = vcmp.lt.s32.totalorder %v5847_v46, 16  ;;  %v5328_v30 = vshrl.u32 %v5327_v63, 4  ;;  %v5348_v19 = vsel %vm5347_vm0, 1, %v9384_v31  ;;  %v4011_v2 = vadd.f32 %v3958_v20, %v3444_v10 }
 0x2e6   : > { %v7113_v60 = vsel %vm5883_vm15, 1.0, %v9402_v3  ;;  %v5350_v36 = vadd.s32 %v5348_v19, %v5342_v39  ;;  %vm5351_vm2 = vc.u32 %v5349_v50, %v5345_v48  ;;  %v5365_v42 = vand.u32 65535, %v9136_v32  ;;  %v3396_v48 = vpop.f32.mrf.mxu2 }
 0x2e7   : > { %v5991_v22 = vmul.f32 %v7113_v60, %v9097_v1  ;;  %v6105_v23 = vmul.f32 %v7113_v60, %v6069_v6  ;;  %v5329_v13 = vmul.u32 18, %v5328_v30  ;;  %v9143_v7 = vadd.f32 %v4392_v0, %v4011_v2 }
 0x2e8   : > { %v5366_v29 = vshrl.u32 %v9136_v32, 16  ;;  %v5352_v37 = vsel %vm5351_vm2, 1, %v9384_v31  ;;  %v5368_v58 = vmul.u32 14564, %v5365_v42  ;;  %v5369_v35 = vmul.u32 58254, %v5365_v42 }
 0x2e9   : > { %v6026_v17 = vadd.f32 %v6025_v59, %v5991_v22  ;;  %v6140_v49 = vadd.f32 %v6139_v53, %v6105_v23  ;;  %v5330_v57 = vsub.s32 %v9103_v11, %v5329_v13  ;;  %v5354_v45 = vadd.s32 %v5352_v37, %v5350_v36  ;;  %v9423_v23 = vld [vmem:[#allocation20_spill] sm:$0xff] }
 0x2ea   : > { %v7354_v1 = vpack.c.bf16 %v9143_v7, %v9138_v9  ;;  %v5370_v41 = vmul.u32 14564, %v5366_v29  ;;  %v5371_v56 = vmul.u32 58254, %v5366_v29  ;;  %v5372_v61 = vshll.u32 %v5369_v35, 16 }
 0x2eb   : > { %vm5704_vm3 = vcmp.ne.s32.totalorder %v5330_v57, 0  ;;  %vm5740_vm4 = vcmp.lt.s32.totalorder %v5330_v57, 0  ;;  %v5812_v12 = vadd.s32 18, %v5330_v57  ;;  %v5355_v8 = vadd.s32 %v5354_v45, %v5344_v43 }
 0x2ec   : > { %vm5776_vm8 = vmand %vm5740_vm4, %vm5704_vm3  ;;  %7392 = vst [vmem:[%s8516_s18 + $0x60] sm:$0xff] %v7354_v1   ;;  %v3012_v25 = vadd.f32 %v2961_v34, %v9422_v51  ;;  %v9155_v59 = vmul.f32 %v9138_v9, %v9138_v9  ;;  %v5373_v53 = vshrl.u32 %v5369_v35, 16  ;;  %v5374_v24 = vshll.u32 %v5370_v41, 16  ;;  %v4397_v35 = vpop.f32.mrf.mxu0 }
 0x2ed   : > { %v5848_v11 = vsel %vm5776_vm8, %v5812_v12, %v5330_v57  ;;  %v5356_v4 = vadd.s32 %v5355_v8, %v5346_v40  ;;  %vm5376_vm5 = vc.u32 %v5368_v58, %v5372_v61  ;;  %v5378_v15 = vadd.s32 %v5372_v61, %v5368_v58  ;;  %v2966_v12 = vpop.f32.mrf.mxu1 }
 0x2ee   : > { %vm5884_vm9 = vcmp.lt.s32.totalorder %v5848_v11, 16  ;;  %v5377_v14 = vsel %vm5376_vm5, 1, %v9384_v31  ;;  %v3445_v6 = vadd.f32 %v3394_v33, %v3012_v25  ;;  %v9160_v10 = vadd.s32 208, %v8134_v54 }
 0x2ef   : > { %v7114_v47 = vsel %vm5884_vm9, 1.0, %v9402_v3  ;;  %v5357_v44 = vshrl.u32 %v5356_v4, 4  ;;  %v5379_v62 = vadd.s32 %v5377_v14, %v5371_v56  ;;  %vm5380_vm10 = vc.u32 %v5378_v15, %v5374_v24 }
 0x2f0   : > { %v5992_v28 = vmul.f32 %v7114_v47, %v9111_v5  ;;  %v6106_v52 = vmul.f32 %v7114_v47, %v9133_v18  ;;  %v4012_v27 = vadd.f32 %v3961_v55, %v3445_v6  ;;  %v5394_v63 = vand.u32 65535, %v9160_v10  ;;  %v3399_v47 = vpop.f32.mrf.mxu2 }
 0x2f1   : > { %v5395_v39 = vshrl.u32 %v9160_v10, 16  ;;  %v5358_v46 = vmul.u32 18, %v5357_v44  ;;  %v5381_v43 = vsel %vm5380_vm10, 1, %v9384_v31  ;;  %v5375_v30 = vshrl.u32 %v5370_v41, 16 }
 0x2f2   : > { %v6027_v26 = vadd.f32 %v6026_v17, %v5992_v28  ;;  %v6141_v20 = vadd.f32 %v6140_v49, %v6106_v52  ;;  %v5383_v50 = vadd.s32 %v5381_v43, %v5379_v62  ;;  %v5397_v0 = vmul.u32 14564, %v5394_v63  ;;  %v3963_v49 = vpop.f32.mrf.mxu3 }
 0x2f3   : > { %v5398_v5 = vmul.u32 58254, %v5394_v63  ;;  %v5359_v18 = vsub.s32 %v9122_v21, %v5358_v46  ;;  %v9168_v34 = vadd.f32 %v4395_v16, %v4012_v27  ;;  %v5399_v60 = vmul.u32 14564, %v5395_v39 }
 0x2f4   : > { %v5400_v40 = vmul.u32 58254, %v5395_v39  ;;  %v5384_v19 = vadd.s32 %v5383_v50, %v5373_v53  ;;  %v3013_v13 = vadd.f32 %v2963_v38, %v9423_v23  ;;  %v9173_v45 = vadd.s32 216, %v8134_v54  ;;  %v9424_v50 = vld [vmem:[#allocation24_spill] sm:$0xff] }
 0x2f5   : > { %v5401_v2 = vshll.u32 %v5398_v5, 16  ;;  %v5402_v22 = vshrl.u32 %v5398_v5, 16  ;;  %vm5705_vm11 = vcmp.ne.s32.totalorder %v5359_v18, 0  ;;  %vm5741_vm12 = vcmp.lt.s32.totalorder %v5359_v18, 0 }
 0x2f6   : > { %v5813_v36 = vadd.s32 18, %v5359_v18  ;;  %v5403_v42 = vshll.u32 %v5399_v60, 16  ;;  %vm5777_vm13 = vmand %vm5741_vm12, %vm5705_vm11  ;;  %v5385_v29 = vadd.s32 %v5384_v19, %v5375_v30  ;;  %v5404_v33 = vshrl.u32 %v5399_v60, 16  ;;  %v4400_v60 = vpop.f32.mrf.mxu0  ;;  %v2968_v19 = vpop.f32.mrf.mxu1 }
 0x2f7   : > { %vm5405_vm14 = vc.u32 %v5397_v0, %v5401_v2  ;;  %v5407_v17 = vadd.s32 %v5401_v2, %v5397_v0  ;;  %v3446_v37 = vadd.f32 %v3396_v48, %v3013_v13  ;;  %v5423_v61 = vand.u32 65535, %v9173_v45 }
 0x2f8   : > { %v5849_v21 = vsel %vm5777_vm13, %v5813_v36, %v5359_v18  ;;  %v5406_v57 = vsel %vm5405_vm14, 1, %v9384_v31  ;;  %v5386_v1 = vshrl.u32 %v5385_v29, 4  ;;  %v5424_v55 = vshrl.u32 %v9173_v45, 16 }
 0x2f9   : > { %vm5885_vm1 = vcmp.lt.s32.totalorder %v5849_v21, 16  ;;  %v5408_v58 = vadd.s32 %v5406_v57, %v5400_v40  ;;  %vm5409_vm6 = vc.u32 %v5407_v17, %v5403_v42  ;;  %v4013_v56 = vadd.f32 %v3963_v49, %v3446_v37  ;;  %v9425_v57 = vld [vmem:[#allocation28_spill] sm:$0xff] }
 0x2fa   : > { %v7115_v41 = vsel %vm5885_vm1, 1.0, %v9402_v3  ;;  %v5410_v8 = vsel %vm5409_vm6, 1, %v9384_v31  ;;  %v5387_v11 = vmul.u32 18, %v5386_v1  ;;  %v5426_v4 = vmul.u32 14564, %v5423_v61  ;;  %v3966_v43 = vpop.f32.mrf.mxu3  ;;  %v3401_v1 = vpop.f32.mrf.mxu2 }
 0x2fb   : > { %v5993_v51 = vmul.f32 %v7115_v41, %v9138_v9  ;;  %v6107_v25 = vmul.f32 %v7115_v41, %v9155_v59  ;;  %v5412_v53 = vadd.s32 %v5410_v8, %v5408_v58  ;;  %v9180_v24 = vadd.f32 %v4397_v35, %v4013_v56 }
 0x2fc   : > { %v5427_v15 = vmul.u32 58254, %v5423_v61  ;;  %v5388_v6 = vsub.s32 %v9136_v32, %v5387_v11  ;;  %v5428_v28 = vmul.u32 14564, %v5424_v55  ;;  %v5429_v59 = vmul.u32 58254, %v5424_v55 }
 0x2fd   : > { %v6028_v14 = vadd.f32 %v6027_v26, %v5993_v51  ;;  %v6142_v16 = vadd.f32 %v6141_v20, %v6107_v25  ;;  %v5413_v38 = vadd.s32 %v5412_v53, %v5402_v22  ;;  %v7359_v9 = vpack.c.bf16 %v9180_v24, %v9168_v34 }
 0x2fe   : > { %v5430_v52 = vshll.u32 %v5427_v15, 16  ;;  %vm5706_vm7 = vcmp.ne.s32.totalorder %v5388_v6, 0  ;;  %vm5742_vm15 = vcmp.lt.s32.totalorder %v5388_v6, 0  ;;  %v5814_v44 = vadd.s32 18, %v5388_v6 }
 0x2ff   : > { %v5414_v62 = vadd.s32 %v5413_v38, %v5404_v33  ;;  %vm5778_vm0 = vmand %vm5742_vm15, %vm5706_vm7  ;;  %v6072_v27 = vmul.f32 %v9143_v7, %v9143_v7  ;;  %7393 = vst [vmem:[%s8516_s18 + $0x68] sm:$0xff] %v7359_v9   ;;  %v5431_v63 = vshrl.u32 %v5427_v15, 16  ;;  %v5432_v39 = vshll.u32 %v5428_v28, 16 }
 0x300   : > { %vm5434_vm2 = vc.u32 %v5426_v4, %v5430_v52  ;;  %v5850_v32 = vsel %vm5778_vm0, %v5814_v44, %v5388_v6  ;;  %v5436_v46 = vadd.s32 %v5430_v52, %v5426_v4  ;;  %v5433_v48 = vshrl.u32 %v5428_v28, 16 }
 0x301   : > { %v5415_v26 = vshrl.u32 %v5414_v62, 4  ;;  %v5435_v20 = vsel %vm5434_vm2, 1, %v9384_v31  ;;  %vm5886_vm3 = vcmp.lt.s32.totalorder %v5850_v32, 16  ;;  %v3014_v0 = vadd.f32 %v2966_v12, %v9424_v50  ;;  %v9427_v50 = vld [vmem:[#allocation21_spill] sm:$0xff] }
 0x302   : > { %v5437_v30 = vadd.s32 %v5435_v20, %v5429_v59  ;;  %v7116_v5 = vsel %vm5886_vm3, 1.0, %v9402_v3  ;;  %vm5438_vm4 = vc.u32 %v5436_v46, %v5432_v39  ;;  %v9193_v40 = vadd.s32 224, %v8134_v54  ;;  %v4402_v59 = vpop.f32.mrf.mxu0  ;;  %v2971_v20 = vpop.f32.mrf.mxu1 }
 0x303   : > { %v5416_v18 = vmul.u32 18, %v5415_v26  ;;  %v5994_v2 = vmul.f32 %v7116_v5, %v9143_v7  ;;  %v6108_v22 = vmul.f32 %v7116_v5, %v6072_v27  ;;  %v5439_v23 = vsel %vm5438_vm4, 1, %v9384_v31 }
 0x304   : > { %v3447_v13 = vadd.f32 %v3399_v47, %v3014_v0  ;;  %v5441_v42 = vadd.s32 %v5439_v23, %v5437_v30  ;;  %v5452_v29 = vand.u32 65535, %v9193_v40  ;;  %v5453_v33 = vshrl.u32 %v9193_v40, 16  ;;  %v9426_v30 = vld [vmem:[#allocation22_spill] sm:$0xff] }
 0x305   : > { %v5417_v36 = vsub.s32 %v9160_v10, %v5416_v18  ;;  %v6029_v17 = vadd.f32 %v6028_v14, %v5994_v2  ;;  %v6143_v49 = vadd.f32 %v6142_v16, %v6108_v22  ;;  %v3015_v37 = vadd.f32 %v2968_v19, %v9425_v57  ;;  %v3968_v14 = vpop.f32.mrf.mxu3  ;;  %v3404_v18 = vpop.f32.mrf.mxu2 }
 0x306   : > { %v4014_v21 = vadd.f32 %v3966_v43, %v3447_v13  ;;  %v5442_v58 = vadd.s32 %v5441_v42, %v5431_v63  ;;  %v6073_v35 = vmul.f32 %v9168_v34, %v9168_v34  ;;  %v5455_v10 = vmul.u32 14564, %v5452_v29 }
 0x307   : > { %vm5707_vm8 = vcmp.ne.s32.totalorder %v5417_v36, 0  ;;  %vm5743_vm9 = vcmp.lt.s32.totalorder %v5417_v36, 0  ;;  %v5815_v7 = vadd.s32 18, %v5417_v36  ;;  %v5456_v12 = vmul.u32 58254, %v5452_v29 }
 0x308   : > { %vm5779_vm5 = vmand %vm5743_vm9, %vm5707_vm8  ;;  %v5457_v41 = vmul.u32 14564, %v5453_v33  ;;  %v5443_v56 = vadd.s32 %v5442_v58, %v5433_v48  ;;  %v6074_v61 = vmul.f32 %v9180_v24, %v9180_v24  ;;  %v3448_v51 = vadd.f32 %v3401_v1, %v3015_v37 }
 0x309   : > { %v5851_v8 = vsel %vm5779_vm5, %v5815_v7, %v5417_v36  ;;  %v5458_v25 = vmul.u32 58254, %v5453_v33  ;;  %v5459_v11 = vshll.u32 %v5456_v12, 16  ;;  %v9206_v15 = vadd.f32 %v4400_v60, %v4014_v21 }
 0x30a   : > { %vm5887_vm10 = vcmp.lt.s32.totalorder %v5851_v8, 16  ;;  %v5461_v53 = vshll.u32 %v5457_v41, 16  ;;  %v5444_v4 = vshrl.u32 %v5443_v56, 4  ;;  %v5460_v47 = vshrl.u32 %v5456_v12, 16 }
 0x30b   : > { %v7117_v55 = vsel %vm5887_vm10, 1.0, %v9402_v3  ;;  %vm5463_vm11 = vc.u32 %v5455_v10, %v5459_v11  ;;  %v5465_v38 = vadd.s32 %v5459_v11, %v5455_v10  ;;  %v4015_v52 = vadd.f32 %v3968_v14, %v3448_v51 }
 0x30c   : > { %v5995_v16 = vmul.f32 %v7117_v55, %v9168_v34  ;;  %v6109_v6 = vmul.f32 %v7117_v55, %v6073_v35  ;;  %v5445_v9 = vmul.u32 18, %v5444_v4  ;;  %v5464_v28 = vsel %vm5463_vm11, 1, %v9384_v31 }
 0x30d   : > { %v9211_v44 = vadd.s32 232, %v8134_v54  ;;  %v5466_v63 = vadd.s32 %v5464_v28, %v5458_v25  ;;  %vm5467_vm12 = vc.u32 %v5465_v38, %v5461_v53  ;;  %v9215_v34 = vadd.f32 %v4402_v59, %v4015_v52  ;;  %v3971_v37 = vpop.f32.mrf.mxu3  ;;  %v9428_v59 = vld [vmem:[#allocation25_spill] sm:$0xff]  ;;  %v9429_v52 = vld [vmem:[#allocation23_spill] sm:$0xff] }
 0x30e   : > { %v6030_v62 = vadd.f32 %v6029_v17, %v5995_v16  ;;  %v6144_v27 = vadd.f32 %v6143_v49, %v6109_v6  ;;  %v5446_v39 = vsub.s32 %v9173_v45, %v5445_v9  ;;  %v5468_v32 = vsel %vm5467_vm12, 1, %v9384_v31 }
 0x30f   : > { %v5481_v26 = vand.u32 65535, %v9211_v44  ;;  %v5462_v46 = vshrl.u32 %v5457_v41, 16  ;;  %v5470_v43 = vadd.s32 %v5468_v32, %v5466_v63  ;;  %v5482_v48 = vshrl.u32 %v9211_v44, 16  ;;  %v4405_v41 = vpop.f32.mrf.mxu0 }
 0x310   : > { %v2582_v0 = vadd.f32 %v9427_v50, %v9426_v30  ;;  %vm5708_vm13 = vcmp.ne.s32.totalorder %v5446_v39, 0  ;;  %vm5744_vm14 = vcmp.lt.s32.totalorder %v5446_v39, 0  ;;  %v5816_v5 = vadd.s32 18, %v5446_v39 }
 0x311   : > { %v7364_v45 = vpack.c.bf16 %v9215_v34, %v9206_v15  ;;  %vm5780_vm1 = vmand %vm5744_vm14, %vm5708_vm13  ;;  %v5471_v60 = vadd.s32 %v5470_v43, %v5460_v47  ;;  %v5484_v19 = vmul.u32 14564, %v5481_v26  ;;  %v5485_v2 = vmul.u32 58254, %v5481_v26 }
 0x312   : > { %v5486_v22 = vmul.u32 14564, %v5482_v48  ;;  %v5852_v23 = vsel %vm5780_vm1, %v5816_v5, %v5446_v39  ;;  %v9225_v13 = vmul.f32 %v9206_v15, %v9206_v15  ;;  %v3016_v36 = vadd.f32 %v2971_v20, %v2582_v0 }
 0x313   : > { %7394 = vst [vmem:[%s8516_s18 + $0x70] sm:$0xff] %v7364_v45   ;;  %v9229_v42 = vadd.s32 240, %v8134_v54  ;;  %vm5888_vm6 = vcmp.lt.s32.totalorder %v5852_v23, 16  ;;  %v5472_v29 = vadd.s32 %v5471_v60, %v5462_v46  ;;  %v5487_v33 = vmul.u32 58254, %v5482_v48 }
 0x314   : > { %v5488_v17 = vshll.u32 %v5485_v2, 16  ;;  %v7118_v49 = vsel %vm5888_vm6, 1.0, %v9402_v3  ;;  %v5489_v21 = vshrl.u32 %v5485_v2, 16  ;;  %v5490_v57 = vshll.u32 %v5486_v22, 16 }
 0x315   : > { %v3449_v1 = vadd.f32 %v3404_v18, %v3016_v36  ;;  %v5996_v7 = vmul.f32 %v7118_v49, %v9180_v24  ;;  %v6110_v58 = vmul.f32 %v7118_v49, %v6074_v61  ;;  %v5473_v35 = vshrl.u32 %v5472_v29, 4  ;;  %v2973_v61 = vpop.f32.mrf.mxu1  ;;  %v3973_v0 = vpop.f32.mrf.mxu3 }
 0x316   : > { %vm5492_vm7 = vc.u32 %v5484_v19, %v5488_v17  ;;  %v5494_v12 = vadd.s32 %v5488_v17, %v5484_v19  ;;  %v5510_v56 = vand.u32 65535, %v9229_v42  ;;  %v5491_v55 = vshrl.u32 %v5486_v22, 16 }
 0x317   : > { %v5493_v10 = vsel %vm5492_vm7, 1, %v9384_v31  ;;  %v4016_v8 = vadd.f32 %v3971_v37, %v3449_v1  ;;  %v6031_v51 = vadd.f32 %v6030_v62, %v5996_v7  ;;  %v6145_v25 = vadd.f32 %v6144_v27, %v6110_v58  ;;  %v3406_v27 = vpop.f32.mrf.mxu2  ;;  %v4407_v36 = vpop.f32.mrf.mxu0  ;;  %v9430_v1 = vld [vmem:[#allocation3_spill] sm:$0xff]  ;;  %v9431_v7 = vld [vmem:[#allocation26_spill] sm:$0xff] }
 0x318   : > { %v5474_v11 = vmul.u32 18, %v5473_v35  ;;  %v5495_v53 = vadd.s32 %v5493_v10, %v5487_v33  ;;  %vm5496_vm15 = vc.u32 %v5494_v12, %v5490_v57  ;;  %v5511_v24 = vshrl.u32 %v9229_v42, 16 }
 0x319   : > { %v9235_v4 = vadd.f32 %v4405_v41, %v4016_v8  ;;  %v5497_v14 = vsel %vm5496_vm15, 1, %v9384_v31  ;;  %v5513_v16 = vmul.u32 14564, %v5510_v56  ;;  %v5514_v6 = vmul.u32 58254, %v5510_v56 }
 0x31a   : > { %v5475_v47 = vsub.s32 %v9193_v40, %v5474_v11  ;;  %v5499_v38 = vadd.s32 %v5497_v14, %v5495_v53  ;;  %v5515_v9 = vmul.u32 14564, %v5511_v24  ;;  %v5516_v28 = vmul.u32 58254, %v5511_v24 }
 0x31b   : > { %v2583_v62 = vadd.f32 %v9429_v52, %v9428_v59  ;;  %v5517_v39 = vshll.u32 %v5514_v6, 16  ;;  %v5518_v26 = vshrl.u32 %v5514_v6, 16  ;;  %v9244_v5 = vadd.s32 248, %v8134_v54 }
 0x31c   : > { %vm5709_vm0 = vcmp.ne.s32.totalorder %v5475_v47, 0  ;;  %vm5745_vm2 = vcmp.lt.s32.totalorder %v5475_v47, 0  ;;  %v5817_v63 = vadd.s32 18, %v5475_v47  ;;  %v5500_v32 = vadd.s32 %v5499_v38, %v5489_v21 }
 0x31d   : > { %vm5781_vm3 = vmand %vm5745_vm2, %vm5709_vm0  ;;  %v5519_v20 = vshll.u32 %v5515_v9, 16  ;;  %v5520_v40 = vshrl.u32 %v5515_v9, 16  ;;  %vm5521_vm4 = vc.u32 %v5513_v16, %v5517_v39  ;;  %v5523_v43 = vadd.s32 %v5517_v39, %v5513_v16  ;;  %v2976_v35 = vpop.f32.mrf.mxu1 }
 0x31e   : > { %v5853_v46 = vsel %vm5781_vm3, %v5817_v63, %v5475_v47  ;;  %v3017_v48 = vadd.f32 %v2973_v61, %v2583_v62  ;;  %v5501_v30 = vadd.s32 %v5500_v32, %v5491_v55  ;;  %v5522_v50 = vsel %vm5521_vm4, 1, %v9384_v31 }
 0x31f   : > { %vm5889_vm8 = vcmp.lt.s32.totalorder %v5853_v46, 16  ;;  %v5524_v18 = vadd.s32 %v5522_v50, %v5516_v28  ;;  %vm5525_vm9 = vc.u32 %v5523_v43, %v5519_v20  ;;  %v5539_v17 = vand.u32 65535, %v9244_v5  ;;  %v3976_v28 = vpop.f32.mrf.mxu3  ;;  %v4410_v39 = vpop.f32.mrf.mxu0 }
 0x320   : > { %v7119_v45 = vsel %vm5889_vm8, 1.0, %v9402_v3  ;;  %v3450_v60 = vadd.f32 %v3406_v27, %v3017_v48  ;;  %v5502_v22 = vshrl.u32 %v5501_v30, 4  ;;  %v5526_v23 = vsel %vm5525_vm9, 1, %v9384_v31 }
 0x321   : > { %v5997_v19 = vmul.f32 %v7119_v45, %v9206_v15  ;;  %v6111_v2 = vmul.f32 %v7119_v45, %v9225_v13  ;;  %v5528_v29 = vadd.s32 %v5526_v23, %v5524_v18  ;;  %v5540_v49 = vshrl.u32 %v9244_v5, 16  ;;  %v9433_v45 = vld [vmem:[#allocation4_spill] sm:$0xff] }
 0x322   : > { %v4017_v33 = vadd.f32 %v3973_v0, %v3450_v60  ;;  %v5503_v37 = vmul.u32 18, %v5502_v22  ;;  %v2584_v58 = vadd.f32 %v9431_v7, %v9430_v1  ;;  %v5542_v13 = vmul.u32 14564, %v5539_v17  ;;  %v9432_v0 = vld [vmem:[#allocation27_spill] sm:$0xff] }
 0x323   : > { %v6032_v21 = vadd.f32 %v6031_v51, %v5997_v19  ;;  %v6146_v57 = vadd.f32 %v6145_v25, %v6111_v2  ;;  %v5529_v15 = vadd.s32 %v5528_v29, %v5518_v26  ;;  %v5543_v12 = vmul.u32 58254, %v5539_v17  ;;  %v3409_v51 = vpop.f32.mrf.mxu2 }
 0x324   : > { %v9254_v10 = vadd.f32 %v4407_v36, %v4017_v33  ;;  %v5504_v41 = vsub.s32 %v9211_v44, %v5503_v37  ;;  %v6076_v8 = vmul.f32 %v9215_v34, %v9215_v34  ;;  %v5544_v56 = vmul.u32 14564, %v5540_v49 }
 0x325   : > { %v5545_v11 = vmul.u32 58254, %v5540_v49  ;;  %v5530_v25 = vadd.s32 %v5529_v15, %v5520_v40  ;;  %v5546_v55 = vshll.u32 %v5543_v12, 16  ;;  %v3018_v24 = vadd.f32 %v2976_v35, %v2584_v58  ;;  %v2978_v60 = vpop.f32.mrf.mxu1 }
 0x326   : > { %v7369_v53 = vpack.c.bf16 %v9254_v10, %v9235_v4  ;;  %vm5710_vm5 = vcmp.ne.s32.totalorder %v5504_v41, 0  ;;  %vm5746_vm10 = vcmp.lt.s32.totalorder %v5504_v41, 0  ;;  %v5818_v61 = vadd.s32 18, %v5504_v41 }
 0x327   : > { %v5548_v47 = vshll.u32 %v5544_v56, 16  ;;  %vm5782_vm11 = vmand %vm5746_vm10, %vm5710_vm5  ;;  %v5531_v14 = vshrl.u32 %v5530_v25, 4  ;;  %v6077_v44 = vmul.f32 %v9235_v4, %v9235_v4  ;;  %vm5550_vm12 = vc.u32 %v5542_v13, %v5546_v55 }
 0x328   : > { %7395 = vst [vmem:[%s8516_s18 + $0x78] sm:$0xff] %v7369_v53   ;;  %v5552_v16 = vadd.s32 %v5546_v55, %v5542_v13  ;;  %v5854_v6 = vsel %vm5782_vm11, %v5818_v61, %v5504_v41  ;;  %v5547_v38 = vshrl.u32 %v5543_v12, 16  ;;  %v5551_v9 = vsel %vm5550_vm12, 1, %v9384_v31  ;;  %v3978_v41 = vpop.f32.mrf.mxu3  ;;  %v4412_v55 = vpop.f32.mrf.mxu0 }
 0x329   : > { %v3451_v59 = vadd.f32 %v3409_v51, %v3018_v24  ;;  %vm5890_vm13 = vcmp.lt.s32.totalorder %v5854_v6, 16  ;;  %v5532_v52 = vmul.u32 18, %v5531_v14  ;;  %v5553_v62 = vadd.s32 %v5551_v9, %v5545_v11 }
 0x32a   : > { %vm5554_vm14 = vc.u32 %v5552_v16, %v5548_v47  ;;  %v7120_v27 = vsel %vm5890_vm13, 1.0, %v9402_v3  ;;  %v9268_v26 = vadd.s32 256, %v8134_v54  ;;  %v5549_v48 = vshrl.u32 %v5544_v56, 16 }
 0x32b   : > { %v5555_v63 = vsel %vm5554_vm14, 1, %v9384_v31  ;;  %v4018_v32 = vadd.f32 %v3976_v28, %v3451_v59  ;;  %v5998_v20 = vmul.f32 %v7120_v27, %v9215_v34  ;;  %v6112_v40 = vmul.f32 %v7120_v27, %v6076_v8  ;;  %v9434_v28 = vld [vmem:[#allocation29_spill] sm:$0xff] }
 0x32c   : > { %v5533_v46 = vsub.s32 %v9229_v42, %v5532_v52  ;;  %v5557_v43 = vadd.s32 %v5555_v63, %v5553_v62  ;;  %v5568_v30 = vand.u32 65535, %v9268_v26  ;;  %v5569_v50 = vshrl.u32 %v9268_v26, 16  ;;  %v3411_v42 = vpop.f32.mrf.mxu2  ;;  %v9435_v59 = vld [vmem:[#allocation5_spill] sm:$0xff] }
 0x32d   : > { %v2585_v18 = vadd.f32 %v9433_v45, %v9432_v0  ;;  %v6033_v19 = vadd.f32 %v6032_v21, %v5998_v20  ;;  %v6147_v2 = vadd.f32 %v6146_v57, %v6112_v40  ;;  %v9276_v29 = vadd.f32 %v4410_v39, %v4018_v32  ;;  %v2981_v62 = vpop.f32.mrf.mxu1 }
 0x32e   : > { %vm5711_vm1 = vcmp.ne.s32.totalorder %v5533_v46, 0  ;;  %vm5747_vm6 = vcmp.lt.s32.totalorder %v5533_v46, 0  ;;  %v5819_v22 = vadd.s32 18, %v5533_v46  ;;  %v5558_v34 = vadd.s32 %v5557_v43, %v5547_v38 }
 0x32f   : > { %vm5783_vm7 = vmand %vm5747_vm6, %vm5711_vm1  ;;  %v5571_v23 = vmul.u32 14564, %v5568_v30  ;;  %v5572_v36 = vmul.u32 58254, %v5568_v30  ;;  %v5573_v33 = vmul.u32 14564, %v5569_v50  ;;  %v5574_v17 = vmul.u32 58254, %v5569_v50 }
 0x330   : > { %v3019_v49 = vadd.f32 %v2978_v60, %v2585_v18  ;;  %v5855_v37 = vsel %vm5783_vm7, %v5819_v22, %v5533_v46  ;;  %v5559_v1 = vadd.s32 %v5558_v34, %v5549_v48  ;;  %v9282_v24 = vadd.s32 264, %v8134_v54 }
 0x331   : > { %v5575_v7 = vshll.u32 %v5572_v36, 16  ;;  %v5576_v58 = vshrl.u32 %v5572_v36, 16  ;;  %vm5891_vm15 = vcmp.lt.s32.totalorder %v5855_v37, 16  ;;  %v5577_v21 = vshll.u32 %v5573_v33, 16 }
 0x332   : > { %v5578_v57 = vshrl.u32 %v5573_v33, 16  ;;  %v3452_v35 = vadd.f32 %v3411_v42, %v3019_v49  ;;  %v7121_v15 = vsel %vm5891_vm15, 1.0, %v9402_v3  ;;  %v5560_v13 = vshrl.u32 %v5559_v1, 4 }
 0x333   : > { %vm5579_vm0 = vc.u32 %v5571_v23, %v5575_v7  ;;  %v5581_v12 = vadd.s32 %v5575_v7, %v5571_v23  ;;  %v5999_v8 = vmul.f32 %v7121_v15, %v9235_v4  ;;  %v6113_v56 = vmul.f32 %v7121_v15, %v6077_v44 }
 0x334   : > { %v5580_v11 = vsel %vm5579_vm0, 1, %v9384_v31  ;;  %v4019_v51 = vadd.f32 %v3978_v41, %v3452_v35  ;;  %v5561_v25 = vmul.u32 18, %v5560_v13  ;;  %v5597_v6 = vand.u32 65535, %v9282_v24  ;;  %v3414_v46 = vpop.f32.mrf.mxu2  ;;  %v4415_v13 = vpop.f32.mrf.mxu0 }
 0x335   : > { %v5582_v53 = vadd.s32 %v5580_v11, %v5574_v17  ;;  %vm5583_vm2 = vc.u32 %v5581_v12, %v5577_v21  ;;  %v6034_v61 = vadd.f32 %v6033_v19, %v5999_v8  ;;  %v6148_v47 = vadd.f32 %v6147_v2, %v6113_v56 }
 0x336   : > { %v5584_v14 = vsel %vm5583_vm2, 1, %v9384_v31  ;;  %v9285_v16 = vadd.f32 %v4412_v55, %v4019_v51  ;;  %v5562_v4 = vsub.s32 %v9244_v5, %v5561_v25  ;;  %v5598_v38 = vshrl.u32 %v9282_v24, 16 }
 0x337   : > { %v5586_v44 = vadd.s32 %v5584_v14, %v5582_v53  ;;  %v2586_v52 = vadd.f32 %v9435_v59, %v9434_v28  ;;  %v9295_v27 = vadd.s32 272, %v8134_v54  ;;  %v6078_v5 = vmul.f32 %v9254_v10, %v9254_v10  ;;  %v9436_v14 = vld [vmem:[#allocation30_spill] sm:$0xff] }
 0x338   : > { %v7374_v9 = vpack.c.bf16 %v9285_v16, %v9276_v29  ;;  %vm5712_vm3 = vcmp.ne.s32.totalorder %v5562_v4, 0  ;;  %vm5748_vm4 = vcmp.lt.s32.totalorder %v5562_v4, 0  ;;  %v5820_v63 = vadd.s32 18, %v5562_v4 }
 0x339   : > { %v5587_v39 = vadd.s32 %v5586_v44, %v5576_v58  ;;  %vm5784_vm8 = vmand %vm5748_vm4, %vm5712_vm3  ;;  %v5600_v32 = vmul.u32 14564, %v5597_v6  ;;  %v5601_v20 = vmul.u32 58254, %v5597_v6  ;;  %v5602_v40 = vmul.u32 14564, %v5598_v38  ;;  %v3981_v58 = vpop.f32.mrf.mxu3 }
 0x33a   : > { %7396 = vst [vmem:[%s8516_s18 + $0x80] sm:$0xff] %v7374_v9   ;;  %v5856_v43 = vsel %vm5784_vm8, %v5820_v63, %v5562_v4  ;;  %v6079_v30 = vmul.f32 %v9276_v29, %v9276_v29  ;;  %v3020_v50 = vadd.f32 %v2981_v62, %v2586_v52  ;;  %v5603_v0 = vmul.u32 58254, %v5598_v38  ;;  %v9437_v4 = vld [vmem:[#allocation6_spill] sm:$0xff] }
 0x33b   : > { %v5588_v48 = vadd.s32 %v5587_v39, %v5578_v57  ;;  %vm5892_vm9 = vcmp.lt.s32.totalorder %v5856_v43, 16  ;;  %v5604_v45 = vshll.u32 %v5601_v20, 16  ;;  %v5606_v18 = vshll.u32 %v5602_v40, 16 }
 0x33c   : > { %v7122_v60 = vsel %vm5892_vm9, 1.0, %v9402_v3  ;;  %v3453_v2 = vadd.f32 %v3414_v46, %v3020_v50  ;;  %v5626_v22 = vand.u32 65535, %v9295_v27  ;;  %v5605_v33 = vshrl.u32 %v5601_v20, 16  ;;  %v3416_v28 = vpop.f32.mrf.mxu2 }
 0x33d   : > { %v5589_v19 = vshrl.u32 %v5588_v48, 4  ;;  %v6000_v34 = vmul.f32 %v7122_v60, %v9254_v10  ;;  %v6114_v23 = vmul.f32 %v7122_v60, %v6078_v5  ;;  %vm5608_vm5 = vc.u32 %v5600_v32, %v5604_v45 }
 0x33e   : > { %v5610_v36 = vadd.s32 %v5604_v45, %v5600_v32  ;;  %v5609_v17 = vsel %vm5608_vm5, 1, %v9384_v31  ;;  %v5627_v49 = vshrl.u32 %v9295_v27, 16  ;;  %v5607_v57 = vshrl.u32 %v5602_v40, 16 }
 0x33f   : > { %v5590_v42 = vmul.u32 18, %v5589_v19  ;;  %v6035_v37 = vadd.f32 %v6034_v61, %v6000_v34  ;;  %v6149_v1 = vadd.f32 %v6148_v47, %v6114_v23  ;;  %v5611_v7 = vadd.s32 %v5609_v17, %v5603_v0  ;;  %v2983_v61 = vpop.f32.mrf.mxu1 }
 0x340   : > { %vm5612_vm10 = vc.u32 %v5610_v36, %v5606_v18  ;;  %v4020_v10 = vadd.f32 %v3981_v58, %v3453_v2  ;;  %v5629_v12 = vmul.u32 14564, %v5626_v22  ;;  %v5630_v41 = vmul.u32 58254, %v5626_v22  ;;  %v4417_v22 = vpop.f32.mrf.mxu0 }
 0x341   : > { %v5591_v21 = vsub.s32 %v9268_v26, %v5590_v42  ;;  %v5613_v35 = vsel %vm5612_vm10, 1, %v9384_v31  ;;  %v5631_v8 = vmul.u32 14564, %v5627_v49  ;;  %v5632_v11 = vmul.u32 58254, %v5627_v49  ;;  %v3983_v45 = vpop.f32.mrf.mxu3 }
 0x342   : > { %v5615_v15 = vadd.s32 %v5613_v35, %v5611_v7  ;;  %v5633_v25 = vshll.u32 %v5630_v41, 16  ;;  %v5634_v53 = vshrl.u32 %v5630_v41, 16  ;;  %v2587_v44 = vadd.f32 %v9437_v4, %v9436_v14 }
 0x343   : > { %vm5713_vm11 = vcmp.ne.s32.totalorder %v5591_v21, 0  ;;  %vm5749_vm12 = vcmp.lt.s32.totalorder %v5591_v21, 0  ;;  %v5821_v56 = vadd.s32 18, %v5591_v21  ;;  %v5635_v55 = vshll.u32 %v5631_v8, 16 }
 0x344   : > { %vm5785_vm13 = vmand %vm5749_vm12, %vm5713_vm11  ;;  %v5616_v51 = vadd.s32 %v5615_v15, %v5605_v33  ;;  %v5636_v47 = vshrl.u32 %v5631_v8, 16  ;;  %v9312_v6 = vadd.s32 280, %v8134_v54  ;;  %vm5637_vm1 = vc.u32 %v5629_v12, %v5633_v25 }
 0x345   : > { %v5857_v26 = vsel %vm5785_vm13, %v5821_v56, %v5591_v21  ;;  %v5639_v9 = vadd.s32 %v5633_v25, %v5629_v12  ;;  %v5638_v52 = vsel %vm5637_vm1, 1, %v9384_v31  ;;  %v3021_v62 = vadd.f32 %v2983_v61, %v2587_v44 }
 0x346   : > { %vm5893_vm14 = vcmp.lt.s32.totalorder %v5857_v26, 16  ;;  %v5617_v38 = vadd.s32 %v5616_v51, %v5607_v57  ;;  %v5655_v63 = vand.u32 65535, %v9312_v6  ;;  %v5640_v20 = vadd.s32 %v5638_v52, %v5632_v11 }
 0x347   : > { %v7123_v59 = vsel %vm5893_vm14, 1.0, %v9402_v3  ;;  %vm5641_vm6 = vc.u32 %v5639_v9, %v5635_v55  ;;  %v3454_v54 = vadd.f32 %v3416_v28, %v3021_v62  ;;  %v5656_v40 = vshrl.u32 %v9312_v6, 16 }
 0x348   : > { %v6001_v39 = vmul.f32 %v7123_v59, %v9276_v29  ;;  %v6115_v5 = vmul.f32 %v7123_v59, %v6079_v30  ;;  %v5618_v32 = vshrl.u32 %v5617_v38, 4  ;;  %v5658_v46 = vmul.u32 14564, %v5655_v63 }
 0x349   : > { %v5642_v0 = vsel %vm5641_vm6, 1, %v9384_v31  ;;  %v4021_v60 = vadd.f32 %v3983_v45, %v3454_v54  ;;  %v5659_v19 = vmul.u32 58254, %v5655_v63  ;;  %v5660_v2 = vmul.u32 14564, %v5656_v40 }
 0x34a   : > { %v6036_v43 = vadd.f32 %v6035_v37, %v6001_v39  ;;  %v6150_v48 = vadd.f32 %v6149_v1, %v6115_v5  ;;  %v5619_v50 = vmul.u32 18, %v5618_v32  ;;  %v5644_v18 = vadd.s32 %v5642_v0, %v5640_v20 }
 0x34b   : > { %v4454_v30 = vadd.f32 %v4415_v13, %v4020_v10  ;;  %v4455_v23 = vadd.f32 %v4417_v22, %v4021_v60  ;;  %v5661_v36 = vmul.u32 58254, %v5656_v40  ;;  %v5662_v42 = vshll.u32 %v5659_v19, 16 }
 0x34c   : > { %v5620_v29 = vsub.s32 %v9282_v24, %v5619_v50  ;;  %v5645_v34 = vadd.s32 %v5644_v18, %v5634_v53  ;;  %v5664_v17 = vshll.u32 %v5660_v2, 16  ;;  %v6080_v49 = vmul.f32 %v9285_v16, %v9285_v16 }
 0x34d   : > { %v7379_v1 = vpack.c.bf16 %v4455_v23, %v4454_v30  ;;  %vm5666_vm2 = vc.u32 %v5658_v46, %v5662_v42  ;;  %v5668_v58 = vadd.s32 %v5662_v42, %v5658_v46  ;;  %v5663_v10 = vshrl.u32 %v5659_v19, 16 }
 0x34e   : > { %vm5714_vm7 = vcmp.ne.s32.totalorder %v5620_v29, 0  ;;  %vm5750_vm15 = vcmp.lt.s32.totalorder %v5620_v29, 0  ;;  %v5822_v33 = vadd.s32 18, %v5620_v29  ;;  %v5646_v37 = vadd.s32 %v5645_v34, %v5636_v47 }
 0x34f   : > { %vm5786_vm0 = vmand %vm5750_vm15, %vm5714_vm7  ;;  %v5667_v24 = vsel %vm5666_vm2, 1, %v9384_v31  ;;  %7397 = vst [vmem:[%s8516_s18 + $0x88] sm:$0xff] %v7379_v1   ;;  %vm5670_vm4 = vc.u32 %v5668_v58, %v5664_v17  ;;  %v5665_v8 = vshrl.u32 %v5660_v2, 16  ;;  %v6081_v61 = vmul.f32 %v4454_v30, %v4454_v30 }
 0x350   : > { %v5858_v7 = vsel %vm5786_vm0, %v5822_v33, %v5620_v29  ;;  %v5647_v21 = vshrl.u32 %v5646_v37, 4  ;;  %v5669_v57 = vadd.s32 %v5667_v24, %v5661_v36  ;;  %v5671_v41 = vsel %vm5670_vm4, 1, %v9384_v31 }
 0x351   : > { %vm5894_vm3 = vcmp.lt.s32.totalorder %v5858_v7, 16  ;;  %v6082_v59 = vmul.f32 %v4455_v23, %v4455_v23 }
 0x352   : > { %v7124_v35 = vsel %vm5894_vm3, 1.0, %v9402_v3  ;;  %v5648_v12 = vmul.u32 18, %v5647_v21  ;;  %v5673_v56 = vadd.s32 %v5671_v41, %v5669_v57 }
 0x353   : > { %v6002_v15 = vmul.f32 %v7124_v35, %v9285_v16  ;;  %v6116_v13 = vmul.f32 %v7124_v35, %v6080_v49 }
 0x354   : > { %v5649_v25 = vsub.s32 %v9295_v27, %v5648_v12  ;;  %v5674_v53 = vadd.s32 %v5673_v56, %v5663_v10 }
 0x355   : > { %v6037_v11 = vadd.f32 %v6036_v43, %v6002_v15  ;;  %v6151_v51 = vadd.f32 %v6150_v48, %v6116_v13 }
 0x356   : > { %vm5715_vm8 = vcmp.ne.s32.totalorder %v5649_v25, 0  ;;  %vm5751_vm9 = vcmp.lt.s32.totalorder %v5649_v25, 0  ;;  %v5823_v55 = vadd.s32 18, %v5649_v25  ;;  %v5675_v26 = vadd.s32 %v5674_v53, %v5665_v8 }
 0x357   : > { %vm5787_vm5 = vmand %vm5751_vm9, %vm5715_vm8 }
 0x358   : > { %v5859_v47 = vsel %vm5787_vm5, %v5823_v55, %v5649_v25  ;;  %v5676_v16 = vshrl.u32 %v5675_v26, 4 }
 0x359   : > { %vm5895_vm10 = vcmp.lt.s32.totalorder %v5859_v47, 16 }
 0x35a   : > { %v7125_v14 = vsel %vm5895_vm10, 1.0, %v9402_v3  ;;  %v5677_v44 = vmul.u32 18, %v5676_v16 }
 0x35b   : > { %v6003_v4 = vmul.f32 %v7125_v14, %v4454_v30  ;;  %v6117_v31 = vmul.f32 %v7125_v14, %v6081_v61 }
 0x35c   : > { %v5678_v28 = vsub.s32 %v9312_v6, %v5677_v44 }
 0x35d   : > { %v6038_v38 = vadd.f32 %v6037_v11, %v6003_v4  ;;  %v6152_v9 = vadd.f32 %v6151_v51, %v6117_v31 }
 0x35e   : > { %vm5716_vm11 = vcmp.ne.s32.totalorder %v5678_v28, 0  ;;  %vm5752_vm12 = vcmp.lt.s32.totalorder %v5678_v28, 0  ;;  %v5824_v27 = vadd.s32 18, %v5678_v28 }
 0x35f   : > { %vm5788_vm13 = vmand %vm5752_vm12, %vm5716_vm11 }
 0x360   : > { %v5860_v52 = vsel %vm5788_vm13, %v5824_v27, %v5678_v28 }
 0x361   : > { %vm5896_vm14 = vcmp.lt.s32.totalorder %v5860_v52, 16 }
 0x362   : > { %v7126_v62 = vsel %vm5896_vm14, 1.0, %v9402_v3 }
 0x363   : > { %v6004_v63 = vmul.f32 %v7126_v62, %v4455_v23  ;;  %v6118_v39 = vmul.f32 %v7126_v62, %v6082_v59 }
 0x365   : > { %v6039_v5 = vadd.f32 %v6038_v38, %v6004_v63  ;;  %v6153_v32 = vadd.f32 %v6152_v9, %v6118_v39 }
 0x367   : > { %v6040_v20 = vrot.slane %v6039_v5, 4  ;;  %v6154_v54 = vrot.slane %v6153_v32, 4 }
 0x369   : > { %v6041_v40 = vadd.f32 %v6040_v20, %v6039_v5  ;;  %v6155_v46 = vadd.f32 %v6154_v54, %v6153_v32 }
 0x36b   : > { %v6042_v6 = vrot.slane %v6041_v40, 2  ;;  %v6156_v43 = vrot.slane %v6155_v46, 2 }
 0x36d   : > { %v6043_v48 = vadd.f32 %v6042_v6, %v6041_v40  ;;  %v6157_v50 = vadd.f32 %v6156_v43, %v6155_v46 }
 0x36f   : > { %v6044_v0 = vrot.slane %v6043_v48, 1  ;;  %v6158_v45 = vrot.slane %v6157_v50, 1 }
 0x371   : > { %v6045_v3 = vadd.f32 %v6044_v0, %v6043_v48  ;;  %v6159_v18 = vadd.f32 %v6158_v45, %v6157_v50 }
 0x373   : > { %6046 = vst [vmem:[%s211_s21] sm:$0x1] %v6045_v3 }
 0x374   : > { %6160 = vst [vmem:[%s214_s24] sm:$0x1] %v6159_v18 }
 0x375 PF: > { %s15_s15 = sadd.s32 1, %s7419_s15  }
 0x376   : > { %p12_p4 = scmp.ge.s32.totalorder %s15_s15, 4  }
 0x378   :  { %14 = sbr.rel (!%p12_p4) target bundleno = 1 (0x1), region = 90 }

</bundles_post_ra>
